<compile_context>
chip_gen: v7x
topology: tpu7x:2x2x1
jax: 0.10.0
libtpu: 0.0.40
codegen_flags: <defaults>
</compile_context>

<pallas_src>
import functools

import numpy as np
import jax
import jax.numpy as jnp
from jax import lax
from jax.experimental import pallas as pl
from jax.experimental.pallas import tpu as pltpu


B_LANE = 128   # batch lanes per grid step (lane width)
KT = 16        # AR time-block / unroll factor; T is padded to a multiple of this


def _fir(u, bcoef, *, n_out, n_in, nb, nk, T, B):
    """Whole-slab FIR (numerator) of a MIMO IIR bank, batch-in-lanes layout.

    u     : (T, n_in, B) f32
    bcoef : (nb, P, 1) f32, pair-major p = i*n_out + o
    returns (T, P, B) f32 with v[t, p, b] = sum_k b[k, p] * u[t - nk - k, p // n_out, b]
    """
    f32 = jnp.float32
    P = n_in * n_out
    # replicate each input channel n_out times along the pair (sublane) axis
    u_rep = jnp.concatenate(
        [u[:, i:i + 1, :] for i in range(n_in) for _ in range(n_out)], axis=1)
    pad = nk + nb - 1
    if pad > 0:   # zero-pad once at the head of the time axis; each tap is a static slice
        u_pad = jnp.concatenate([jnp.zeros((pad, P, B), f32), u_rep], axis=0)
    else:
        u_pad = u_rep
    v = None
    for k in range(nb):
        start = pad - (k + nk)                        # always in [0, pad]
        shifted = lax.slice_in_dim(u_pad, start, start + T, axis=0)   # (T, P, B)
        term = bcoef[k] * shifted                     # (P,1) lane-broadcast
        v = term if v is None else v + term
    return v


def _iir_ar_store(v, v_ref, out_ref, acoef, *, n_out, n_in, na, T, B):
    """AR (denominator) recursion + channel sum, blocked over time, batch in lanes.

    v      : (T, P, B) FIR output (value)
    v_ref  : (T, Pmax, B) VMEM scratch used only to stage v for blocked dynamic reads
    out_ref: (T, n_out, B) destination ref
    acoef  : (na, P, 1)
    """
    f32 = jnp.float32
    P = n_in * n_out

    def chsum(y):                                     # (..., P, B) -> (..., n_out, B)
        acc = y[..., 0:n_out, :]
        for i in range(1, n_in):
            acc = acc + y[..., i * n_out:(i + 1) * n_out, :]
        return acc

    if na == 0:                                       # pure FIR: no staging, no recursion
        out_ref[...] = chsum(v).astype(out_ref.dtype)
        return

    v_ref[:, 0:P, :] = v                              # stage once (lane-dense store)
    # hoist the lane-broadcast of the AR coefficients out of the sequential loop
    a_b = [jnp.broadcast_to(acoef[j], (P, B)) for j in range(na)]

    def body(blk, prev):                              # prev[j] = y[t-1-j], each (P, B)
        t0 = pl.multiple_of(blk * KT, KT)
        vblk = v_ref[pl.ds(t0, KT), :, :][:, 0:P, :]  # (KT, P, B)
        ys = []
        for kk in range(KT):                          # unrolled AR steps (serial path)
            yt = vblk[kk]
            for j in range(na):
                yt = yt - a_b[j] * prev[j]
            prev = (yt,) + prev[:-1]
            ys.append(yt)
        yblk = jnp.stack(ys, axis=0)                  # (KT, P, B): leading-axis stack
        out_ref[pl.ds(t0, KT), :, :] = chsum(yblk).astype(out_ref.dtype)
        return prev

    prev0 = tuple(jnp.zeros((P, B), f32) for _ in range(na))
    lax.fori_loop(0, T // KT, body, prev0)


def nn_custom_kernel(x_ref, b1_ref, a1_ref, w1_ref, c1_ref, w2_ref, c2_ref,
                     b2_ref, a2_ref, y_ref, v_ref, y1_ref, *,
                     T, B, in_ch, inner, mid, out_ch,
                     nb1, na1, nk1, nb2, na2, nk2, H):
    f32 = jnp.float32

    # ---- G1: MIMO IIR (in_ch -> inner), n_k = 1; FIR hoisted out of the recursion ----
    v1 = _fir(x_ref[...].astype(f32), b1_ref[...], n_out=inner, n_in=in_ch,
              nb=nb1, nk=nk1, T=T, B=B)
    _iir_ar_store(v1, v_ref, y1_ref, a1_ref[...], n_out=inner, n_in=in_ch,
                  na=na1, T=T, B=B)

    # ---- F1: Linear(inner,H) -> tanh -> Linear(H,mid), lane-dense VPU/EUP work ----
    y1 = y1_ref[...]                                  # (T, inner, B)
    w1 = w1_ref[...]                                  # (inner, H, 1)
    w2 = w2_ref[...]                                  # (H, mid, 1)
    h = c1_ref[...]                                   # (1, H, 1)
    for c in range(inner):
        h = h + y1[:, c:c + 1, :] * w1[c]             # (T,1,B)*(H,1) -> (T,H,B)
    h = jnp.tanh(h)                                   # (T, H, B), EUP lane-dense
    z = c2_ref[...]                                   # (1, mid, 1)
    for j in range(H):
        z = z + h[:, j:j + 1, :] * w2[j]              # (T,1,B)*(mid,1) -> (T,mid,B)
    # TODO(synk): on v5e a K-starved MXU matmul for this MLP could relieve the VALU slots.

    # ---- G2: MIMO IIR (mid -> out_ch), n_k = 0; AR stores straight into the output ----
    v2 = _fir(z, b2_ref[...], n_out=out_ch, n_in=mid, nb=nb2, nk=nk2, T=T, B=B)
    _iir_ar_store(v2, v_ref, y_ref, a2_ref[...], n_out=out_ch, n_in=mid,
                  na=na2, T=T, B=B)


def nn_custom_forward(x, params, *, n_a, n_b, n_hidden):
    """x: (batch, time, in_channels) float32 — same convention as the PyTorch module."""
    f32 = jnp.float32
    B, T, in_ch = x.shape
    inner = mid = 3                                   # innlay / midlay in NN_custom
    H = int(n_hidden[0])
    nk1, nk2 = 1, 0
    nb1, nb2 = int(n_b[0]), int(n_b[1])
    na1, na2 = int(n_a[0]), int(n_a[1])
    out_ch = params["G2_b"].shape[0]
    P1, P2 = in_ch * inner, mid * out_ch
    Pmax = max(P1, P2)

    # flatten filter taps to (taps, P, 1) with pair-major columns p = i*n_out + o
    def flat(coef, n_out_, n_in_, ntaps):
        if ntaps == 0:
            return jnp.zeros((1, n_in_ * n_out_, 1), f32)   # dummy, never read
        return jnp.transpose(coef.astype(f32), (2, 1, 0)).reshape(
            ntaps, n_in_ * n_out_)[..., None]

    b1_f = flat(params["G1_b"], inner, in_ch, nb1)
    a1_f = flat(params["G1_a"], inner, in_ch, na1)
    b2_f = flat(params["G2_b"], out_ch, mid, nb2)
    a2_f = flat(params["G2_a"], out_ch, mid, na2)
    w1_t = jnp.transpose(params["F1_w1"].astype(f32))[..., None]   # (inner, H, 1)
    c1_r = params["F1_b1"].astype(f32).reshape(1, H, 1)
    w2_t = jnp.transpose(params["F1_w2"].astype(f32))[..., None]   # (H, mid, 1)
    c2_r = params["F1_b2"].astype(f32).reshape(1, mid, 1)

    # batch -> lanes (pad to 128), time padded to the AR block size (causal => safe)
    Bp = ((B + B_LANE - 1) // B_LANE) * B_LANE
    Tp = ((T + KT - 1) // KT) * KT
    x_p = jnp.pad(x.astype(f32), ((0, Bp - B), (0, Tp - T), (0, 0)))
    x_t = jnp.transpose(x_p, (1, 2, 0))               # (Tp, in_ch, Bp)

    grid = (Bp // B_LANE,)
    kernel = functools.partial(
        nn_custom_kernel, T=Tp, B=B_LANE, in_ch=in_ch, inner=inner, mid=mid,
        out_ch=out_ch, nb1=nb1, na1=na1, nk1=nk1, nb2=nb2, na2=na2, nk2=nk2, H=H)

    def full_spec(shape):
        nd = len(shape)
        return pl.BlockSpec(tuple(shape), lambda i: (0,) * nd)

    params_in = (b1_f, a1_f, w1_t, c1_r, w2_t, c2_r, b2_f, a2_f)
    in_specs = [pl.BlockSpec((Tp, in_ch, B_LANE), lambda i: (0, 0, i))]
    in_specs += [full_spec(a.shape) for a in params_in]

    # VMEM budget per grid step: double-buffered I/O blocks + scratch slabs + temporaries.
    def rup(v, m):
        return (v + m - 1) // m * m
    row = 4 * Tp * B_LANE
    est = row * (2 * rup(in_ch, 8) + 2 * rup(out_ch, 8)       # pipelined I/O blocks
                 + rup(Pmax, 8) + rup(inner, 8)               # explicit scratch slabs
                 + 4 * rup(Pmax, 8) + rup(H, 8))              # compiler-managed temps
    vmem_limit = int(min(max(2 * est, 32 << 20), 48 << 20))   # stay well under v7x 64 MiB
    # TODO(synk): for very long sequences, chunk the time axis (carrying the AR state
    # between chunks) instead of keeping whole-T slabs resident; v5e/v6e could also use a
    # higher VMEM cap (~100 MiB) than the v7x-safe 48 MiB chosen here.

    y_t = pl.pallas_call(
        kernel,
        out_shape=jax.ShapeDtypeStruct((Tp, out_ch, Bp), f32),
        grid_spec=pltpu.PrefetchScalarGridSpec(
            num_scalar_prefetch=0,
            grid=grid,
            in_specs=in_specs,
            out_specs=pl.BlockSpec((Tp, out_ch, B_LANE), lambda i: (0, 0, i)),
            scratch_shapes=[pltpu.VMEM((Tp, Pmax, B_LANE), f32),    # shared FIR slab
                            pltpu.VMEM((Tp, inner, B_LANE), f32)],  # G1 output slab
        ),
        compiler_params=pltpu.CompilerParams(
            dimension_semantics=("parallel",),
            vmem_limit_bytes=vmem_limit),
    )(x_t, *params_in)

    return jnp.transpose(y_t, (2, 0, 1))[:B, :T, :]   # back to (B, T, out_ch)


# ------------------------- pure-numpy reference (for checking) -------------------------
def _ref_lti(u, b, a, n_k):
    Bn, Tn, In = u.shape
    On, _, nb = b.shape
    na = a.shape[2]
    y = np.zeros((Bn, Tn, On), np.float32)
    for o in range(On):
        for i in range(In):
            yoi = np.zeros((Bn, Tn), np.float32)
            for t in range(Tn):
                acc = np.zeros((Bn,), np.float32)
                for k in range(nb):
                    td = t - n_k - k
                    if td >= 0:
                        acc += b[o, i, k] * u[:, td, i]
                for j in range(na):
                    if t - 1 - j >= 0:
                        acc -= a[o, i, j] * yoi[:, t - 1 - j]
                yoi[:, t] = acc
            y[:, :, o] += yoi
    return y


def _reference_forward(x, p):
    y1 = _ref_lti(x.astype(np.float32), p["G1_b"], p["G1_a"], n_k=1)
    h = np.tanh(y1 @ p["F1_w1"].T + p["F1_b1"])
    z = (h @ p["F1_w2"].T + p["F1_b2"]).astype(np.float32)
    return _ref_lti(z, p["G2_b"], p["G2_a"], n_k=0)


if __name__ == "__main__":
    B, T = 6, 19                                       # non-multiples exercise padding
    in_channels, out_channels = 3, 1
    n_a, n_b, n_hidden = [2, 2], [3, 3], [16]
    inner, mid, H = 3, 3, n_hidden[0]

    key = jax.random.PRNGKey(0)
    ks = jax.random.split(key, 9)
    params = {
        "G1_b": 0.01 * jax.random.normal(ks[0], (inner, in_channels, n_b[0]), jnp.float32),
        "G1_a": 0.01 * jax.random.normal(ks[1], (inner, in_channels, n_a[0]), jnp.float32),
        "F1_w1": jax.random.normal(ks[2], (H, inner), jnp.float32) / np.sqrt(inner),
        "F1_b1": 0.1 * jax.random.normal(ks[3], (H,), jnp.float32),
        "F1_w2": jax.random.normal(ks[4], (mid, H), jnp.float32) / np.sqrt(H),
        "F1_b2": 0.1 * jax.random.normal(ks[5], (mid,), jnp.float32),
        "G2_b": 0.01 * jax.random.normal(ks[6], (out_channels, mid, n_b[1]), jnp.float32),
        "G2_a": 0.01 * jax.random.normal(ks[7], (out_channels, mid, n_a[1]), jnp.float32),
    }
    x = jax.random.normal(ks[8], (B, T, in_channels), jnp.float32)

    y = nn_custom_forward(x, params, n_a=n_a, n_b=n_b, n_hidden=n_hidden)
    y = jax.block_until_ready(y)

    y_ref = _reference_forward(np.asarray(x), {k: np.asarray(v) for k, v in params.items()})
    np.testing.assert_allclose(np.asarray(y), y_ref, rtol=2e-3, atol=1e-4)
    print("KERNEL_OK")
</pallas_src>

<mosaic_0001>
module attributes {stable_mosaic.version = 11 : i64} {
  func.func @nn_custom_kernel(%arg0: i32, %arg1: memref<32x3x128xf32, #tpu.memory_space<vmem>>, %arg2: memref<3x9x1xf32, #tpu.memory_space<vmem>>, %arg3: memref<2x9x1xf32, #tpu.memory_space<vmem>>, %arg4: memref<3x16x1xf32, #tpu.memory_space<vmem>>, %arg5: memref<1x16x1xf32, #tpu.memory_space<vmem>>, %arg6: memref<16x3x1xf32, #tpu.memory_space<vmem>>, %arg7: memref<1x3x1xf32, #tpu.memory_space<vmem>>, %arg8: memref<3x3x1xf32, #tpu.memory_space<vmem>>, %arg9: memref<2x3x1xf32, #tpu.memory_space<vmem>>, %arg10: memref<32x1x128xf32, #tpu.memory_space<vmem>>, %arg11: memref<32x9x128xf32, #tpu.memory_space<vmem>>, %arg12: memref<32x3x128xf32, #tpu.memory_space<vmem>>) attributes {dimension_semantics = [#tpu.dimension_semantics<parallel>], iteration_bounds = array<i64: 1>, scalar_prefetch = 0 : i64, scratch_operands = 2 : i64, tpu.core_type = #tpu.core_type<tc>, window_params = [{transform_indices = @transform_0, window_bounds = array<i64: 32, 3, 128>}, {pipeline_mode = #tpu.pipeline_mode<synchronous>, transform_indices = @transform_1, window_bounds = array<i64: 3, 9, 1>}, {pipeline_mode = #tpu.pipeline_mode<synchronous>, transform_indices = @transform_2, window_bounds = array<i64: 2, 9, 1>}, {pipeline_mode = #tpu.pipeline_mode<synchronous>, transform_indices = @transform_3, window_bounds = array<i64: 3, 16, 1>}, {pipeline_mode = #tpu.pipeline_mode<synchronous>, transform_indices = @transform_4, window_bounds = array<i64: 1, 16, 1>}, {pipeline_mode = #tpu.pipeline_mode<synchronous>, transform_indices = @transform_5, window_bounds = array<i64: 16, 3, 1>}, {pipeline_mode = #tpu.pipeline_mode<synchronous>, transform_indices = @transform_6, window_bounds = array<i64: 1, 3, 1>}, {pipeline_mode = #tpu.pipeline_mode<synchronous>, transform_indices = @transform_7, window_bounds = array<i64: 3, 3, 1>}, {pipeline_mode = #tpu.pipeline_mode<synchronous>, transform_indices = @transform_8, window_bounds = array<i64: 2, 3, 1>}, {transform_indices = @transform_9, window_bounds = array<i64: 32, 1, 128>}]} {
    %c0 = arith.constant 0 : index
    %c0_0 = arith.constant 0 : index
    %c0_1 = arith.constant 0 : index
    %0 = vector.load %arg1[%c0, %c0_0, %c0_1] : memref<32x3x128xf32, #tpu.memory_space<vmem>>, vector<32x3x128xf32>
    %c0_2 = arith.constant 0 : index
    %c0_3 = arith.constant 0 : index
    %c0_4 = arith.constant 0 : index
    %1 = vector.load %arg2[%c0_2, %c0_3, %c0_4] : memref<3x9x1xf32, #tpu.memory_space<vmem>>, vector<3x9x1xf32>
    %2 = vector.extract_strided_slice %0 {offsets = [0, 0, 0], sizes = [32, 1, 128], strides = [1, 1, 1]} : vector<32x3x128xf32> to vector<32x1x128xf32>
    %3 = vector.extract_strided_slice %0 {offsets = [0, 0, 0], sizes = [32, 1, 128], strides = [1, 1, 1]} : vector<32x3x128xf32> to vector<32x1x128xf32>
    %4 = vector.extract_strided_slice %0 {offsets = [0, 0, 0], sizes = [32, 1, 128], strides = [1, 1, 1]} : vector<32x3x128xf32> to vector<32x1x128xf32>
    %5 = vector.extract_strided_slice %0 {offsets = [0, 1, 0], sizes = [32, 1, 128], strides = [1, 1, 1]} : vector<32x3x128xf32> to vector<32x1x128xf32>
    %6 = vector.extract_strided_slice %0 {offsets = [0, 1, 0], sizes = [32, 1, 128], strides = [1, 1, 1]} : vector<32x3x128xf32> to vector<32x1x128xf32>
    %7 = vector.extract_strided_slice %0 {offsets = [0, 1, 0], sizes = [32, 1, 128], strides = [1, 1, 1]} : vector<32x3x128xf32> to vector<32x1x128xf32>
    %8 = vector.extract_strided_slice %0 {offsets = [0, 2, 0], sizes = [32, 1, 128], strides = [1, 1, 1]} : vector<32x3x128xf32> to vector<32x1x128xf32>
    %9 = vector.extract_strided_slice %0 {offsets = [0, 2, 0], sizes = [32, 1, 128], strides = [1, 1, 1]} : vector<32x3x128xf32> to vector<32x1x128xf32>
    %10 = vector.extract_strided_slice %0 {offsets = [0, 2, 0], sizes = [32, 1, 128], strides = [1, 1, 1]} : vector<32x3x128xf32> to vector<32x1x128xf32>
    %11 = tpu.concatenate %2, %3, %4, %5, %6, %7, %8, %9, %10 in 1 : vector<32x1x128xf32>, vector<32x1x128xf32>, vector<32x1x128xf32>, vector<32x1x128xf32>, vector<32x1x128xf32>, vector<32x1x128xf32>, vector<32x1x128xf32>, vector<32x1x128xf32>, vector<32x1x128xf32> -> vector<32x9x128xf32>
    %cst = arith.constant 0.000000e+00 : f32
    %12 = vector.broadcast %cst : f32 to vector<3x9x128xf32>
    %13 = tpu.concatenate %12, %11 in 0 : vector<3x9x128xf32>, vector<32x9x128xf32> -> vector<35x9x128xf32>
    %14 = vector.extract_strided_slice %13 {offsets = [2, 0, 0], sizes = [32, 9, 128], strides = [1, 1, 1]} : vector<35x9x128xf32> to vector<32x9x128xf32>
    %15 = vector.extract_strided_slice %1 {offsets = [0, 0, 0], sizes = [1, 9, 1], strides = [1, 1, 1]} : vector<3x9x1xf32> to vector<1x9x1xf32>
    %16 = vector.shape_cast %15 : vector<1x9x1xf32> to vector<9x1xf32>
    %17 = vector.shape_cast %16 : vector<9x1xf32> to vector<1x9x1xf32>
    %18 = vector.broadcast %17 : vector<1x9x1xf32> to vector<32x9x128xf32>
    %19 = arith.mulf %18, %14 : vector<32x9x128xf32>
    %20 = vector.extract_strided_slice %13 {offsets = [1, 0, 0], sizes = [32, 9, 128], strides = [1, 1, 1]} : vector<35x9x128xf32> to vector<32x9x128xf32>
    %21 = vector.extract_strided_slice %1 {offsets = [1, 0, 0], sizes = [1, 9, 1], strides = [1, 1, 1]} : vector<3x9x1xf32> to vector<1x9x1xf32>
    %22 = vector.shape_cast %21 : vector<1x9x1xf32> to vector<9x1xf32>
    %23 = vector.shape_cast %22 : vector<9x1xf32> to vector<1x9x1xf32>
    %24 = vector.broadcast %23 : vector<1x9x1xf32> to vector<32x9x128xf32>
    %25 = arith.mulf %24, %20 : vector<32x9x128xf32>
    %26 = arith.addf %19, %25 : vector<32x9x128xf32>
    %27 = vector.extract_strided_slice %13 {offsets = [0, 0, 0], sizes = [32, 9, 128], strides = [1, 1, 1]} : vector<35x9x128xf32> to vector<32x9x128xf32>
    %28 = vector.extract_strided_slice %1 {offsets = [2, 0, 0], sizes = [1, 9, 1], strides = [1, 1, 1]} : vector<3x9x1xf32> to vector<1x9x1xf32>
    %29 = vector.shape_cast %28 : vector<1x9x1xf32> to vector<9x1xf32>
    %30 = vector.shape_cast %29 : vector<9x1xf32> to vector<1x9x1xf32>
    %31 = vector.broadcast %30 : vector<1x9x1xf32> to vector<32x9x128xf32>
    %32 = arith.mulf %31, %27 : vector<32x9x128xf32>
    %33 = arith.addf %26, %32 : vector<32x9x128xf32>
    %c0_5 = arith.constant 0 : index
    %c0_6 = arith.constant 0 : index
    %c0_7 = arith.constant 0 : index
    %34 = vector.load %arg3[%c0_5, %c0_6, %c0_7] : memref<2x9x1xf32, #tpu.memory_space<vmem>>, vector<2x9x1xf32>
    %c0_8 = arith.constant 0 : index
    %c0_9 = arith.constant 0 : index
    %c0_10 = arith.constant 0 : index
    %35 = vector.load %arg11[%c0_8, %c0_9, %c0_10] : memref<32x9x128xf32, #tpu.memory_space<vmem>>, vector<32x9x128xf32>
    tpu.vector_store %arg11[%c0_8, %c0_9, %c0_10], %33 {strides = array<i32>} : memref<32x9x128xf32, #tpu.memory_space<vmem>>, vector<32x9x128xf32>,
    %36 = vector.extract_strided_slice %34 {offsets = [0, 0, 0], sizes = [1, 9, 1], strides = [1, 1, 1]} : vector<2x9x1xf32> to vector<1x9x1xf32>
    %37 = vector.shape_cast %36 : vector<1x9x1xf32> to vector<9x1xf32>
    %38 = vector.shape_cast %37 : vector<9x1xf32> to vector<9x1xf32>
    %39 = vector.broadcast %38 : vector<9x1xf32> to vector<9x128xf32>
    %40 = vector.extract_strided_slice %34 {offsets = [1, 0, 0], sizes = [1, 9, 1], strides = [1, 1, 1]} : vector<2x9x1xf32> to vector<1x9x1xf32>
    %41 = vector.shape_cast %40 : vector<1x9x1xf32> to vector<9x1xf32>
    %42 = vector.shape_cast %41 : vector<9x1xf32> to vector<9x1xf32>
    %43 = vector.broadcast %42 : vector<9x1xf32> to vector<9x128xf32>
    %cst_11 = arith.constant 0.000000e+00 : f32
    %44 = vector.broadcast %cst_11 : f32 to vector<9x128xf32>
    %cst_12 = arith.constant 0.000000e+00 : f32
    %45 = vector.broadcast %cst_12 : f32 to vector<9x128xf32>
    %c0_i32 = arith.constant 0 : i32
    %c2_i32 = arith.constant 2 : i32
    %46 = arith.addi %c0_i32, %c2_i32 : i32
    %c1_i32 = arith.constant 1 : i32
    %47:2 = scf.for %arg13 = %c0_i32 to %46 step %c1_i32 iter_args(%arg14 = %44, %arg15 = %45) -> (vector<9x128xf32>, vector<9x128xf32>)  : i32 {
      %c16_i32 = arith.constant 16 : i32
      %249 = arith.muli %arg13, %c16_i32 : i32
      %250 = tpu.assume_multiple %249, 16 : i32
      %251 = arith.index_cast %250 : i32 to index
      %c0_45 = arith.constant 0 : index
      %c0_46 = arith.constant 0 : index
      %252 = vector.load %arg11[%251, %c0_45, %c0_46] : memref<32x9x128xf32, #tpu.memory_space<vmem>>, vector<16x9x128xf32>
      %253 = vector.extract_strided_slice %252 {offsets = [0, 0, 0], sizes = [1, 9, 128], strides = [1, 1, 1]} : vector<16x9x128xf32> to vector<1x9x128xf32>
      %254 = vector.shape_cast %253 : vector<1x9x128xf32> to vector<9x128xf32>
      %255 = arith.mulf %39, %arg14 : vector<9x128xf32>
      %256 = arith.subf %254, %255 : vector<9x128xf32>
      %257 = arith.mulf %43, %arg15 : vector<9x128xf32>
      %258 = arith.subf %256, %257 : vector<9x128xf32>
      %259 = vector.extract_strided_slice %252 {offsets = [1, 0, 0], sizes = [1, 9, 128], strides = [1, 1, 1]} : vector<16x9x128xf32> to vector<1x9x128xf32>
      %260 = vector.shape_cast %259 : vector<1x9x128xf32> to vector<9x128xf32>
      %261 = arith.mulf %39, %258 : vector<9x128xf32>
      %262 = arith.subf %260, %261 : vector<9x128xf32>
      %263 = arith.mulf %43, %arg14 : vector<9x128xf32>
      %264 = arith.subf %262, %263 : vector<9x128xf32>
      %265 = vector.extract_strided_slice %252 {offsets = [2, 0, 0], sizes = [1, 9, 128], strides = [1, 1, 1]} : vector<16x9x128xf32> to vector<1x9x128xf32>
      %266 = vector.shape_cast %265 : vector<1x9x128xf32> to vector<9x128xf32>
      %267 = arith.mulf %39, %264 : vector<9x128xf32>
      %268 = arith.subf %266, %267 : vector<9x128xf32>
      %269 = arith.mulf %43, %258 : vector<9x128xf32>
      %270 = arith.subf %268, %269 : vector<9x128xf32>
      %271 = vector.extract_strided_slice %252 {offsets = [3, 0, 0], sizes = [1, 9, 128], strides = [1, 1, 1]} : vector<16x9x128xf32> to vector<1x9x128xf32>
      %272 = vector.shape_cast %271 : vector<1x9x128xf32> to vector<9x128xf32>
      %273 = arith.mulf %39, %270 : vector<9x128xf32>
      %274 = arith.subf %272, %273 : vector<9x128xf32>
      %275 = arith.mulf %43, %264 : vector<9x128xf32>
      %276 = arith.subf %274, %275 : vector<9x128xf32>
      %277 = vector.extract_strided_slice %252 {offsets = [4, 0, 0], sizes = [1, 9, 128], strides = [1, 1, 1]} : vector<16x9x128xf32> to vector<1x9x128xf32>
      %278 = vector.shape_cast %277 : vector<1x9x128xf32> to vector<9x128xf32>
      %279 = arith.mulf %39, %276 : vector<9x128xf32>
      %280 = arith.subf %278, %279 : vector<9x128xf32>
      %281 = arith.mulf %43, %270 : vector<9x128xf32>
      %282 = arith.subf %280, %281 : vector<9x128xf32>
      %283 = vector.extract_strided_slice %252 {offsets = [5, 0, 0], sizes = [1, 9, 128], strides = [1, 1, 1]} : vector<16x9x128xf32> to vector<1x9x128xf32>
      %284 = vector.shape_cast %283 : vector<1x9x128xf32> to vector<9x128xf32>
      %285 = arith.mulf %39, %282 : vector<9x128xf32>
      %286 = arith.subf %284, %285 : vector<9x128xf32>
      %287 = arith.mulf %43, %276 : vector<9x128xf32>
      %288 = arith.subf %286, %287 : vector<9x128xf32>
      %289 = vector.extract_strided_slice %252 {offsets = [6, 0, 0], sizes = [1, 9, 128], strides = [1, 1, 1]} : vector<16x9x128xf32> to vector<1x9x128xf32>
      %290 = vector.shape_cast %289 : vector<1x9x128xf32> to vector<9x128xf32>
      %291 = arith.mulf %39, %288 : vector<9x128xf32>
      %292 = arith.subf %290, %291 : vector<9x128xf32>
      %293 = arith.mulf %43, %282 : vector<9x128xf32>
      %294 = arith.subf %292, %293 : vector<9x128xf32>
      %295 = vector.extract_strided_slice %252 {offsets = [7, 0, 0], sizes = [1, 9, 128], strides = [1, 1, 1]} : vector<16x9x128xf32> to vector<1x9x128xf32>
      %296 = vector.shape_cast %295 : vector<1x9x128xf32> to vector<9x128xf32>
      %297 = arith.mulf %39, %294 : vector<9x128xf32>
      %298 = arith.subf %296, %297 : vector<9x128xf32>
      %299 = arith.mulf %43, %288 : vector<9x128xf32>
      %300 = arith.subf %298, %299 : vector<9x128xf32>
      %301 = vector.extract_strided_slice %252 {offsets = [8, 0, 0], sizes = [1, 9, 128], strides = [1, 1, 1]} : vector<16x9x128xf32> to vector<1x9x128xf32>
      %302 = vector.shape_cast %301 : vector<1x9x128xf32> to vector<9x128xf32>
      %303 = arith.mulf %39, %300 : vector<9x128xf32>
      %304 = arith.subf %302, %303 : vector<9x128xf32>
      %305 = arith.mulf %43, %294 : vector<9x128xf32>
      %306 = arith.subf %304, %305 : vector<9x128xf32>
      %307 = vector.extract_strided_slice %252 {offsets = [9, 0, 0], sizes = [1, 9, 128], strides = [1, 1, 1]} : vector<16x9x128xf32> to vector<1x9x128xf32>
      %308 = vector.shape_cast %307 : vector<1x9x128xf32> to vector<9x128xf32>
      %309 = arith.mulf %39, %306 : vector<9x128xf32>
      %310 = arith.subf %308, %309 : vector<9x128xf32>
      %311 = arith.mulf %43, %300 : vector<9x128xf32>
      %312 = arith.subf %310, %311 : vector<9x128xf32>
      %313 = vector.extract_strided_slice %252 {offsets = [10, 0, 0], sizes = [1, 9, 128], strides = [1, 1, 1]} : vector<16x9x128xf32> to vector<1x9x128xf32>
      %314 = vector.shape_cast %313 : vector<1x9x128xf32> to vector<9x128xf32>
      %315 = arith.mulf %39, %312 : vector<9x128xf32>
      %316 = arith.subf %314, %315 : vector<9x128xf32>
      %317 = arith.mulf %43, %306 : vector<9x128xf32>
      %318 = arith.subf %316, %317 : vector<9x128xf32>
      %319 = vector.extract_strided_slice %252 {offsets = [11, 0, 0], sizes = [1, 9, 128], strides = [1, 1, 1]} : vector<16x9x128xf32> to vector<1x9x128xf32>
      %320 = vector.shape_cast %319 : vector<1x9x128xf32> to vector<9x128xf32>
      %321 = arith.mulf %39, %318 : vector<9x128xf32>
      %322 = arith.subf %320, %321 : vector<9x128xf32>
      %323 = arith.mulf %43, %312 : vector<9x128xf32>
      %324 = arith.subf %322, %323 : vector<9x128xf32>
      %325 = vector.extract_strided_slice %252 {offsets = [12, 0, 0], sizes = [1, 9, 128], strides = [1, 1, 1]} : vector<16x9x128xf32> to vector<1x9x128xf32>
      %326 = vector.shape_cast %325 : vector<1x9x128xf32> to vector<9x128xf32>
      %327 = arith.mulf %39, %324 : vector<9x128xf32>
      %328 = arith.subf %326, %327 : vector<9x128xf32>
      %329 = arith.mulf %43, %318 : vector<9x128xf32>
      %330 = arith.subf %328, %329 : vector<9x128xf32>
      %331 = vector.extract_strided_slice %252 {offsets = [13, 0, 0], sizes = [1, 9, 128], strides = [1, 1, 1]} : vector<16x9x128xf32> to vector<1x9x128xf32>
      %332 = vector.shape_cast %331 : vector<1x9x128xf32> to vector<9x128xf32>
      %333 = arith.mulf %39, %330 : vector<9x128xf32>
      %334 = arith.subf %332, %333 : vector<9x128xf32>
      %335 = arith.mulf %43, %324 : vector<9x128xf32>
      %336 = arith.subf %334, %335 : vector<9x128xf32>
      %337 = vector.extract_strided_slice %252 {offsets = [14, 0, 0], sizes = [1, 9, 128], strides = [1, 1, 1]} : vector<16x9x128xf32> to vector<1x9x128xf32>
      %338 = vector.shape_cast %337 : vector<1x9x128xf32> to vector<9x128xf32>
      %339 = arith.mulf %39, %336 : vector<9x128xf32>
      %340 = arith.subf %338, %339 : vector<9x128xf32>
      %341 = arith.mulf %43, %330 : vector<9x128xf32>
      %342 = arith.subf %340, %341 : vector<9x128xf32>
      %343 = vector.extract_strided_slice %252 {offsets = [15, 0, 0], sizes = [1, 9, 128], strides = [1, 1, 1]} : vector<16x9x128xf32> to vector<1x9x128xf32>
      %344 = vector.shape_cast %343 : vector<1x9x128xf32> to vector<9x128xf32>
      %345 = arith.mulf %39, %342 : vector<9x128xf32>
      %346 = arith.subf %344, %345 : vector<9x128xf32>
      %347 = arith.mulf %43, %336 : vector<9x128xf32>
      %348 = arith.subf %346, %347 : vector<9x128xf32>
      %349 = vector.shape_cast %258 : vector<9x128xf32> to vector<1x9x128xf32>
      %350 = vector.shape_cast %264 : vector<9x128xf32> to vector<1x9x128xf32>
      %351 = vector.shape_cast %270 : vector<9x128xf32> to vector<1x9x128xf32>
      %352 = vector.shape_cast %276 : vector<9x128xf32> to vector<1x9x128xf32>
      %353 = vector.shape_cast %282 : vector<9x128xf32> to vector<1x9x128xf32>
      %354 = vector.shape_cast %288 : vector<9x128xf32> to vector<1x9x128xf32>
      %355 = vector.shape_cast %294 : vector<9x128xf32> to vector<1x9x128xf32>
      %356 = vector.shape_cast %300 : vector<9x128xf32> to vector<1x9x128xf32>
      %357 = vector.shape_cast %306 : vector<9x128xf32> to vector<1x9x128xf32>
      %358 = vector.shape_cast %312 : vector<9x128xf32> to vector<1x9x128xf32>
      %359 = vector.shape_cast %318 : vector<9x128xf32> to vector<1x9x128xf32>
      %360 = vector.shape_cast %324 : vector<9x128xf32> to vector<1x9x128xf32>
      %361 = vector.shape_cast %330 : vector<9x128xf32> to vector<1x9x128xf32>
      %362 = vector.shape_cast %336 : vector<9x128xf32> to vector<1x9x128xf32>
      %363 = vector.shape_cast %342 : vector<9x128xf32> to vector<1x9x128xf32>
      %364 = vector.shape_cast %348 : vector<9x128xf32> to vector<1x9x128xf32>
      %365 = tpu.concatenate %349, %350, %351, %352, %353, %354, %355, %356, %357, %358, %359, %360, %361, %362, %363, %364 in 0 : vector<1x9x128xf32>, vector<1x9x128xf32>, vector<1x9x128xf32>, vector<1x9x128xf32>, vector<1x9x128xf32>, vector<1x9x128xf32>, vector<1x9x128xf32>, vector<1x9x128xf32>, vector<1x9x128xf32>, vector<1x9x128xf32>, vector<1x9x128xf32>, vector<1x9x128xf32>, vector<1x9x128xf32>, vector<1x9x128xf32>, vector<1x9x128xf32>, vector<1x9x128xf32> -> vector<16x9x128xf32>
      %366 = vector.extract_strided_slice %365 {offsets = [0, 0, 0], sizes = [16, 3, 128], strides = [1, 1, 1]} : vector<16x9x128xf32> to vector<16x3x128xf32>
      %367 = vector.extract_strided_slice %365 {offsets = [0, 3, 0], sizes = [16, 3, 128], strides = [1, 1, 1]} : vector<16x9x128xf32> to vector<16x3x128xf32>
      %368 = arith.addf %366, %367 : vector<16x3x128xf32>
      %369 = vector.extract_strided_slice %365 {offsets = [0, 6, 0], sizes = [16, 3, 128], strides = [1, 1, 1]} : vector<16x9x128xf32> to vector<16x3x128xf32>
      %370 = arith.addf %368, %369 : vector<16x3x128xf32>
      %371 = arith.index_cast %250 : i32 to index
      %c0_47 = arith.constant 0 : index
      %c0_48 = arith.constant 0 : index
      %372 = vector.load %arg12[%371, %c0_47, %c0_48] : memref<32x3x128xf32, #tpu.memory_space<vmem>>, vector<16x3x128xf32>
      tpu.vector_store %arg12[%371, %c0_47, %c0_48], %370 {strides = array<i32>} : memref<32x3x128xf32, #tpu.memory_space<vmem>>, vector<16x3x128xf32>,
      scf.yield %348, %342 : vector<9x128xf32>, vector<9x128xf32>
    }
    %c2_i32_13 = arith.constant 2 : i32
    %c0_14 = arith.constant 0 : index
    %c0_15 = arith.constant 0 : index
    %c0_16 = arith.constant 0 : index
    %48 = vector.load %arg12[%c0_14, %c0_15, %c0_16] : memref<32x3x128xf32, #tpu.memory_space<vmem>>, vector<32x3x128xf32>
    %c0_17 = arith.constant 0 : index
    %c0_18 = arith.constant 0 : index
    %c0_19 = arith.constant 0 : index
    %49 = vector.load %arg4[%c0_17, %c0_18, %c0_19] : memref<3x16x1xf32, #tpu.memory_space<vmem>>, vector<3x16x1xf32>
    %c0_20 = arith.constant 0 : index
    %c0_21 = arith.constant 0 : index
    %c0_22 = arith.constant 0 : index
    %50 = vector.load %arg6[%c0_20, %c0_21, %c0_22] : memref<16x3x1xf32, #tpu.memory_space<vmem>>, vector<16x3x1xf32>
    %c0_23 = arith.constant 0 : index
    %c0_24 = arith.constant 0 : index
    %c0_25 = arith.constant 0 : index
    %51 = vector.load %arg5[%c0_23, %c0_24, %c0_25] : memref<1x16x1xf32, #tpu.memory_space<vmem>>, vector<1x16x1xf32>
    %52 = vector.extract_strided_slice %48 {offsets = [0, 0, 0], sizes = [32, 1, 128], strides = [1, 1, 1]} : vector<32x3x128xf32> to vector<32x1x128xf32>
    %53 = vector.extract_strided_slice %49 {offsets = [0, 0, 0], sizes = [1, 16, 1], strides = [1, 1, 1]} : vector<3x16x1xf32> to vector<1x16x1xf32>
    %54 = vector.shape_cast %53 : vector<1x16x1xf32> to vector<16x1xf32>
    %55 = vector.shape_cast %54 : vector<16x1xf32> to vector<1x16x1xf32>
    %56 = vector.broadcast %52 : vector<32x1x128xf32> to vector<32x16x128xf32>
    %57 = vector.broadcast %55 : vector<1x16x1xf32> to vector<32x16x128xf32>
    %58 = arith.mulf %56, %57 : vector<32x16x128xf32>
    %59 = vector.broadcast %51 : vector<1x16x1xf32> to vector<32x16x128xf32>
    %60 = arith.addf %59, %58 : vector<32x16x128xf32>
    %61 = vector.extract_strided_slice %48 {offsets = [0, 1, 0], sizes = [32, 1, 128], strides = [1, 1, 1]} : vector<32x3x128xf32> to vector<32x1x128xf32>
    %62 = vector.extract_strided_slice %49 {offsets = [1, 0, 0], sizes = [1, 16, 1], strides = [1, 1, 1]} : vector<3x16x1xf32> to vector<1x16x1xf32>
    %63 = vector.shape_cast %62 : vector<1x16x1xf32> to vector<16x1xf32>
    %64 = vector.shape_cast %63 : vector<16x1xf32> to vector<1x16x1xf32>
    %65 = vector.broadcast %61 : vector<32x1x128xf32> to vector<32x16x128xf32>
    %66 = vector.broadcast %64 : vector<1x16x1xf32> to vector<32x16x128xf32>
    %67 = arith.mulf %65, %66 : vector<32x16x128xf32>
    %68 = arith.addf %60, %67 : vector<32x16x128xf32>
    %69 = vector.extract_strided_slice %48 {offsets = [0, 2, 0], sizes = [32, 1, 128], strides = [1, 1, 1]} : vector<32x3x128xf32> to vector<32x1x128xf32>
    %70 = vector.extract_strided_slice %49 {offsets = [2, 0, 0], sizes = [1, 16, 1], strides = [1, 1, 1]} : vector<3x16x1xf32> to vector<1x16x1xf32>
    %71 = vector.shape_cast %70 : vector<1x16x1xf32> to vector<16x1xf32>
    %72 = vector.shape_cast %71 : vector<16x1xf32> to vector<1x16x1xf32>
    %73 = vector.broadcast %69 : vector<32x1x128xf32> to vector<32x16x128xf32>
    %74 = vector.broadcast %72 : vector<1x16x1xf32> to vector<32x16x128xf32>
    %75 = arith.mulf %73, %74 : vector<32x16x128xf32>
    %76 = arith.addf %68, %75 : vector<32x16x128xf32>
    %77 = math.tanh %76 : vector<32x16x128xf32>
    %c0_26 = arith.constant 0 : index
    %c0_27 = arith.constant 0 : index
    %c0_28 = arith.constant 0 : index
    %78 = vector.load %arg7[%c0_26, %c0_27, %c0_28] : memref<1x3x1xf32, #tpu.memory_space<vmem>>, vector<1x3x1xf32>
    %79 = vector.extract_strided_slice %77 {offsets = [0, 0, 0], sizes = [32, 1, 128], strides = [1, 1, 1]} : vector<32x16x128xf32> to vector<32x1x128xf32>
    %80 = vector.extract_strided_slice %50 {offsets = [0, 0, 0], sizes = [1, 3, 1], strides = [1, 1, 1]} : vector<16x3x1xf32> to vector<1x3x1xf32>
    %81 = vector.shape_cast %80 : vector<1x3x1xf32> to vector<3x1xf32>
    %82 = vector.shape_cast %81 : vector<3x1xf32> to vector<1x3x1xf32>
    %83 = vector.broadcast %79 : vector<32x1x128xf32> to vector<32x3x128xf32>
    %84 = vector.broadcast %82 : vector<1x3x1xf32> to vector<32x3x128xf32>
    %85 = arith.mulf %83, %84 : vector<32x3x128xf32>
    %86 = vector.broadcast %78 : vector<1x3x1xf32> to vector<32x3x128xf32>
    %87 = arith.addf %86, %85 : vector<32x3x128xf32>
    %88 = vector.extract_strided_slice %77 {offsets = [0, 1, 0], sizes = [32, 1, 128], strides = [1, 1, 1]} : vector<32x16x128xf32> to vector<32x1x128xf32>
    %89 = vector.extract_strided_slice %50 {offsets = [1, 0, 0], sizes = [1, 3, 1], strides = [1, 1, 1]} : vector<16x3x1xf32> to vector<1x3x1xf32>
    %90 = vector.shape_cast %89 : vector<1x3x1xf32> to vector<3x1xf32>
    %91 = vector.shape_cast %90 : vector<3x1xf32> to vector<1x3x1xf32>
    %92 = vector.broadcast %88 : vector<32x1x128xf32> to vector<32x3x128xf32>
    %93 = vector.broadcast %91 : vector<1x3x1xf32> to vector<32x3x128xf32>
    %94 = arith.mulf %92, %93 : vector<32x3x128xf32>
    %95 = arith.addf %87, %94 : vector<32x3x128xf32>
    %96 = vector.extract_strided_slice %77 {offsets = [0, 2, 0], sizes = [32, 1, 128], strides = [1, 1, 1]} : vector<32x16x128xf32> to vector<32x1x128xf32>
    %97 = vector.extract_strided_slice %50 {offsets = [2, 0, 0], sizes = [1, 3, 1], strides = [1, 1, 1]} : vector<16x3x1xf32> to vector<1x3x1xf32>
    %98 = vector.shape_cast %97 : vector<1x3x1xf32> to vector<3x1xf32>
    %99 = vector.shape_cast %98 : vector<3x1xf32> to vector<1x3x1xf32>
    %100 = vector.broadcast %96 : vector<32x1x128xf32> to vector<32x3x128xf32>
    %101 = vector.broadcast %99 : vector<1x3x1xf32> to vector<32x3x128xf32>
    %102 = arith.mulf %100, %101 : vector<32x3x128xf32>
    %103 = arith.addf %95, %102 : vector<32x3x128xf32>
    %104 = vector.extract_strided_slice %77 {offsets = [0, 3, 0], sizes = [32, 1, 128], strides = [1, 1, 1]} : vector<32x16x128xf32> to vector<32x1x128xf32>
    %105 = vector.extract_strided_slice %50 {offsets = [3, 0, 0], sizes = [1, 3, 1], strides = [1, 1, 1]} : vector<16x3x1xf32> to vector<1x3x1xf32>
    %106 = vector.shape_cast %105 : vector<1x3x1xf32> to vector<3x1xf32>
    %107 = vector.shape_cast %106 : vector<3x1xf32> to vector<1x3x1xf32>
    %108 = vector.broadcast %104 : vector<32x1x128xf32> to vector<32x3x128xf32>
    %109 = vector.broadcast %107 : vector<1x3x1xf32> to vector<32x3x128xf32>
    %110 = arith.mulf %108, %109 : vector<32x3x128xf32>
    %111 = arith.addf %103, %110 : vector<32x3x128xf32>
    %112 = vector.extract_strided_slice %77 {offsets = [0, 4, 0], sizes = [32, 1, 128], strides = [1, 1, 1]} : vector<32x16x128xf32> to vector<32x1x128xf32>
    %113 = vector.extract_strided_slice %50 {offsets = [4, 0, 0], sizes = [1, 3, 1], strides = [1, 1, 1]} : vector<16x3x1xf32> to vector<1x3x1xf32>
    %114 = vector.shape_cast %113 : vector<1x3x1xf32> to vector<3x1xf32>
    %115 = vector.shape_cast %114 : vector<3x1xf32> to vector<1x3x1xf32>
    %116 = vector.broadcast %112 : vector<32x1x128xf32> to vector<32x3x128xf32>
    %117 = vector.broadcast %115 : vector<1x3x1xf32> to vector<32x3x128xf32>
    %118 = arith.mulf %116, %117 : vector<32x3x128xf32>
    %119 = arith.addf %111, %118 : vector<32x3x128xf32>
    %120 = vector.extract_strided_slice %77 {offsets = [0, 5, 0], sizes = [32, 1, 128], strides = [1, 1, 1]} : vector<32x16x128xf32> to vector<32x1x128xf32>
    %121 = vector.extract_strided_slice %50 {offsets = [5, 0, 0], sizes = [1, 3, 1], strides = [1, 1, 1]} : vector<16x3x1xf32> to vector<1x3x1xf32>
    %122 = vector.shape_cast %121 : vector<1x3x1xf32> to vector<3x1xf32>
    %123 = vector.shape_cast %122 : vector<3x1xf32> to vector<1x3x1xf32>
    %124 = vector.broadcast %120 : vector<32x1x128xf32> to vector<32x3x128xf32>
    %125 = vector.broadcast %123 : vector<1x3x1xf32> to vector<32x3x128xf32>
    %126 = arith.mulf %124, %125 : vector<32x3x128xf32>
    %127 = arith.addf %119, %126 : vector<32x3x128xf32>
    %128 = vector.extract_strided_slice %77 {offsets = [0, 6, 0], sizes = [32, 1, 128], strides = [1, 1, 1]} : vector<32x16x128xf32> to vector<32x1x128xf32>
    %129 = vector.extract_strided_slice %50 {offsets = [6, 0, 0], sizes = [1, 3, 1], strides = [1, 1, 1]} : vector<16x3x1xf32> to vector<1x3x1xf32>
    %130 = vector.shape_cast %129 : vector<1x3x1xf32> to vector<3x1xf32>
    %131 = vector.shape_cast %130 : vector<3x1xf32> to vector<1x3x1xf32>
    %132 = vector.broadcast %128 : vector<32x1x128xf32> to vector<32x3x128xf32>
    %133 = vector.broadcast %131 : vector<1x3x1xf32> to vector<32x3x128xf32>
    %134 = arith.mulf %132, %133 : vector<32x3x128xf32>
    %135 = arith.addf %127, %134 : vector<32x3x128xf32>
    %136 = vector.extract_strided_slice %77 {offsets = [0, 7, 0], sizes = [32, 1, 128], strides = [1, 1, 1]} : vector<32x16x128xf32> to vector<32x1x128xf32>
    %137 = vector.extract_strided_slice %50 {offsets = [7, 0, 0], sizes = [1, 3, 1], strides = [1, 1, 1]} : vector<16x3x1xf32> to vector<1x3x1xf32>
    %138 = vector.shape_cast %137 : vector<1x3x1xf32> to vector<3x1xf32>
    %139 = vector.shape_cast %138 : vector<3x1xf32> to vector<1x3x1xf32>
    %140 = vector.broadcast %136 : vector<32x1x128xf32> to vector<32x3x128xf32>
    %141 = vector.broadcast %139 : vector<1x3x1xf32> to vector<32x3x128xf32>
    %142 = arith.mulf %140, %141 : vector<32x3x128xf32>
    %143 = arith.addf %135, %142 : vector<32x3x128xf32>
    %144 = vector.extract_strided_slice %77 {offsets = [0, 8, 0], sizes = [32, 1, 128], strides = [1, 1, 1]} : vector<32x16x128xf32> to vector<32x1x128xf32>
    %145 = vector.extract_strided_slice %50 {offsets = [8, 0, 0], sizes = [1, 3, 1], strides = [1, 1, 1]} : vector<16x3x1xf32> to vector<1x3x1xf32>
    %146 = vector.shape_cast %145 : vector<1x3x1xf32> to vector<3x1xf32>
    %147 = vector.shape_cast %146 : vector<3x1xf32> to vector<1x3x1xf32>
    %148 = vector.broadcast %144 : vector<32x1x128xf32> to vector<32x3x128xf32>
    %149 = vector.broadcast %147 : vector<1x3x1xf32> to vector<32x3x128xf32>
    %150 = arith.mulf %148, %149 : vector<32x3x128xf32>
    %151 = arith.addf %143, %150 : vector<32x3x128xf32>
    %152 = vector.extract_strided_slice %77 {offsets = [0, 9, 0], sizes = [32, 1, 128], strides = [1, 1, 1]} : vector<32x16x128xf32> to vector<32x1x128xf32>
    %153 = vector.extract_strided_slice %50 {offsets = [9, 0, 0], sizes = [1, 3, 1], strides = [1, 1, 1]} : vector<16x3x1xf32> to vector<1x3x1xf32>
    %154 = vector.shape_cast %153 : vector<1x3x1xf32> to vector<3x1xf32>
    %155 = vector.shape_cast %154 : vector<3x1xf32> to vector<1x3x1xf32>
    %156 = vector.broadcast %152 : vector<32x1x128xf32> to vector<32x3x128xf32>
    %157 = vector.broadcast %155 : vector<1x3x1xf32> to vector<32x3x128xf32>
    %158 = arith.mulf %156, %157 : vector<32x3x128xf32>
    %159 = arith.addf %151, %158 : vector<32x3x128xf32>
    %160 = vector.extract_strided_slice %77 {offsets = [0, 10, 0], sizes = [32, 1, 128], strides = [1, 1, 1]} : vector<32x16x128xf32> to vector<32x1x128xf32>
    %161 = vector.extract_strided_slice %50 {offsets = [10, 0, 0], sizes = [1, 3, 1], strides = [1, 1, 1]} : vector<16x3x1xf32> to vector<1x3x1xf32>
    %162 = vector.shape_cast %161 : vector<1x3x1xf32> to vector<3x1xf32>
    %163 = vector.shape_cast %162 : vector<3x1xf32> to vector<1x3x1xf32>
    %164 = vector.broadcast %160 : vector<32x1x128xf32> to vector<32x3x128xf32>
    %165 = vector.broadcast %163 : vector<1x3x1xf32> to vector<32x3x128xf32>
    %166 = arith.mulf %164, %165 : vector<32x3x128xf32>
    %167 = arith.addf %159, %166 : vector<32x3x128xf32>
    %168 = vector.extract_strided_slice %77 {offsets = [0, 11, 0], sizes = [32, 1, 128], strides = [1, 1, 1]} : vector<32x16x128xf32> to vector<32x1x128xf32>
    %169 = vector.extract_strided_slice %50 {offsets = [11, 0, 0], sizes = [1, 3, 1], strides = [1, 1, 1]} : vector<16x3x1xf32> to vector<1x3x1xf32>
    %170 = vector.shape_cast %169 : vector<1x3x1xf32> to vector<3x1xf32>
    %171 = vector.shape_cast %170 : vector<3x1xf32> to vector<1x3x1xf32>
    %172 = vector.broadcast %168 : vector<32x1x128xf32> to vector<32x3x128xf32>
    %173 = vector.broadcast %171 : vector<1x3x1xf32> to vector<32x3x128xf32>
    %174 = arith.mulf %172, %173 : vector<32x3x128xf32>
    %175 = arith.addf %167, %174 : vector<32x3x128xf32>
    %176 = vector.extract_strided_slice %77 {offsets = [0, 12, 0], sizes = [32, 1, 128], strides = [1, 1, 1]} : vector<32x16x128xf32> to vector<32x1x128xf32>
    %177 = vector.extract_strided_slice %50 {offsets = [12, 0, 0], sizes = [1, 3, 1], strides = [1, 1, 1]} : vector<16x3x1xf32> to vector<1x3x1xf32>
    %178 = vector.shape_cast %177 : vector<1x3x1xf32> to vector<3x1xf32>
    %179 = vector.shape_cast %178 : vector<3x1xf32> to vector<1x3x1xf32>
    %180 = vector.broadcast %176 : vector<32x1x128xf32> to vector<32x3x128xf32>
    %181 = vector.broadcast %179 : vector<1x3x1xf32> to vector<32x3x128xf32>
    %182 = arith.mulf %180, %181 : vector<32x3x128xf32>
    %183 = arith.addf %175, %182 : vector<32x3x128xf32>
    %184 = vector.extract_strided_slice %77 {offsets = [0, 13, 0], sizes = [32, 1, 128], strides = [1, 1, 1]} : vector<32x16x128xf32> to vector<32x1x128xf32>
    %185 = vector.extract_strided_slice %50 {offsets = [13, 0, 0], sizes = [1, 3, 1], strides = [1, 1, 1]} : vector<16x3x1xf32> to vector<1x3x1xf32>
    %186 = vector.shape_cast %185 : vector<1x3x1xf32> to vector<3x1xf32>
    %187 = vector.shape_cast %186 : vector<3x1xf32> to vector<1x3x1xf32>
    %188 = vector.broadcast %184 : vector<32x1x128xf32> to vector<32x3x128xf32>
    %189 = vector.broadcast %187 : vector<1x3x1xf32> to vector<32x3x128xf32>
    %190 = arith.mulf %188, %189 : vector<32x3x128xf32>
    %191 = arith.addf %183, %190 : vector<32x3x128xf32>
    %192 = vector.extract_strided_slice %77 {offsets = [0, 14, 0], sizes = [32, 1, 128], strides = [1, 1, 1]} : vector<32x16x128xf32> to vector<32x1x128xf32>
    %193 = vector.extract_strided_slice %50 {offsets = [14, 0, 0], sizes = [1, 3, 1], strides = [1, 1, 1]} : vector<16x3x1xf32> to vector<1x3x1xf32>
    %194 = vector.shape_cast %193 : vector<1x3x1xf32> to vector<3x1xf32>
    %195 = vector.shape_cast %194 : vector<3x1xf32> to vector<1x3x1xf32>
    %196 = vector.broadcast %192 : vector<32x1x128xf32> to vector<32x3x128xf32>
    %197 = vector.broadcast %195 : vector<1x3x1xf32> to vector<32x3x128xf32>
    %198 = arith.mulf %196, %197 : vector<32x3x128xf32>
    %199 = arith.addf %191, %198 : vector<32x3x128xf32>
    %200 = vector.extract_strided_slice %77 {offsets = [0, 15, 0], sizes = [32, 1, 128], strides = [1, 1, 1]} : vector<32x16x128xf32> to vector<32x1x128xf32>
    %201 = vector.extract_strided_slice %50 {offsets = [15, 0, 0], sizes = [1, 3, 1], strides = [1, 1, 1]} : vector<16x3x1xf32> to vector<1x3x1xf32>
    %202 = vector.shape_cast %201 : vector<1x3x1xf32> to vector<3x1xf32>
    %203 = vector.shape_cast %202 : vector<3x1xf32> to vector<1x3x1xf32>
    %204 = vector.broadcast %200 : vector<32x1x128xf32> to vector<32x3x128xf32>
    %205 = vector.broadcast %203 : vector<1x3x1xf32> to vector<32x3x128xf32>
    %206 = arith.mulf %204, %205 : vector<32x3x128xf32>
    %207 = arith.addf %199, %206 : vector<32x3x128xf32>
    %c0_29 = arith.constant 0 : index
    %c0_30 = arith.constant 0 : index
    %c0_31 = arith.constant 0 : index
    %208 = vector.load %arg8[%c0_29, %c0_30, %c0_31] : memref<3x3x1xf32, #tpu.memory_space<vmem>>, vector<3x3x1xf32>
    %209 = vector.extract_strided_slice %207 {offsets = [0, 0, 0], sizes = [32, 1, 128], strides = [1, 1, 1]} : vector<32x3x128xf32> to vector<32x1x128xf32>
    %210 = vector.extract_strided_slice %207 {offsets = [0, 1, 0], sizes = [32, 1, 128], strides = [1, 1, 1]} : vector<32x3x128xf32> to vector<32x1x128xf32>
    %211 = vector.extract_strided_slice %207 {offsets = [0, 2, 0], sizes = [32, 1, 128], strides = [1, 1, 1]} : vector<32x3x128xf32> to vector<32x1x128xf32>
    %212 = tpu.concatenate %209, %210, %211 in 1 : vector<32x1x128xf32>, vector<32x1x128xf32>, vector<32x1x128xf32> -> vector<32x3x128xf32>
    %cst_32 = arith.constant 0.000000e+00 : f32
    %213 = vector.broadcast %cst_32 : f32 to vector<2x3x128xf32>
    %214 = tpu.concatenate %213, %212 in 0 : vector<2x3x128xf32>, vector<32x3x128xf32> -> vector<34x3x128xf32>
    %215 = vector.extract_strided_slice %214 {offsets = [2, 0, 0], sizes = [32, 3, 128], strides = [1, 1, 1]} : vector<34x3x128xf32> to vector<32x3x128xf32>
    %216 = vector.extract_strided_slice %208 {offsets = [0, 0, 0], sizes = [1, 3, 1], strides = [1, 1, 1]} : vector<3x3x1xf32> to vector<1x3x1xf32>
    %217 = vector.shape_cast %216 : vector<1x3x1xf32> to vector<3x1xf32>
    %218 = vector.shape_cast %217 : vector<3x1xf32> to vector<1x3x1xf32>
    %219 = vector.broadcast %218 : vector<1x3x1xf32> to vector<32x3x128xf32>
    %220 = arith.mulf %219, %215 : vector<32x3x128xf32>
    %221 = vector.extract_strided_slice %214 {offsets = [1, 0, 0], sizes = [32, 3, 128], strides = [1, 1, 1]} : vector<34x3x128xf32> to vector<32x3x128xf32>
    %222 = vector.extract_strided_slice %208 {offsets = [1, 0, 0], sizes = [1, 3, 1], strides = [1, 1, 1]} : vector<3x3x1xf32> to vector<1x3x1xf32>
    %223 = vector.shape_cast %222 : vector<1x3x1xf32> to vector<3x1xf32>
    %224 = vector.shape_cast %223 : vector<3x1xf32> to vector<1x3x1xf32>
    %225 = vector.broadcast %224 : vector<1x3x1xf32> to vector<32x3x128xf32>
    %226 = arith.mulf %225, %221 : vector<32x3x128xf32>
    %227 = arith.addf %220, %226 : vector<32x3x128xf32>
    %228 = vector.extract_strided_slice %214 {offsets = [0, 0, 0], sizes = [32, 3, 128], strides = [1, 1, 1]} : vector<34x3x128xf32> to vector<32x3x128xf32>
    %229 = vector.extract_strided_slice %208 {offsets = [2, 0, 0], sizes = [1, 3, 1], strides = [1, 1, 1]} : vector<3x3x1xf32> to vector<1x3x1xf32>
    %230 = vector.shape_cast %229 : vector<1x3x1xf32> to vector<3x1xf32>
    %231 = vector.shape_cast %230 : vector<3x1xf32> to vector<1x3x1xf32>
    %232 = vector.broadcast %231 : vector<1x3x1xf32> to vector<32x3x128xf32>
    %233 = arith.mulf %232, %228 : vector<32x3x128xf32>
    %234 = arith.addf %227, %233 : vector<32x3x128xf32>
    %c0_33 = arith.constant 0 : index
    %c0_34 = arith.constant 0 : index
    %c0_35 = arith.constant 0 : index
    %235 = vector.load %arg9[%c0_33, %c0_34, %c0_35] : memref<2x3x1xf32, #tpu.memory_space<vmem>>, vector<2x3x1xf32>
    %c0_36 = arith.constant 0 : index
    %c0_37 = arith.constant 0 : index
    %c0_38 = arith.constant 0 : index
    %236 = vector.load %arg11[%c0_36, %c0_37, %c0_38] : memref<32x9x128xf32, #tpu.memory_space<vmem>>, vector<32x3x128xf32>
    tpu.vector_store %arg11[%c0_36, %c0_37, %c0_38], %234 {strides = array<i32>} : memref<32x9x128xf32, #tpu.memory_space<vmem>>, vector<32x3x128xf32>,
    %237 = vector.extract_strided_slice %235 {offsets = [0, 0, 0], sizes = [1, 3, 1], strides = [1, 1, 1]} : vector<2x3x1xf32> to vector<1x3x1xf32>
    %238 = vector.shape_cast %237 : vector<1x3x1xf32> to vector<3x1xf32>
    %239 = vector.shape_cast %238 : vector<3x1xf32> to vector<3x1xf32>
    %240 = vector.broadcast %239 : vector<3x1xf32> to vector<3x128xf32>
    %241 = vector.extract_strided_slice %235 {offsets = [1, 0, 0], sizes = [1, 3, 1], strides = [1, 1, 1]} : vector<2x3x1xf32> to vector<1x3x1xf32>
    %242 = vector.shape_cast %241 : vector<1x3x1xf32> to vector<3x1xf32>
    %243 = vector.shape_cast %242 : vector<3x1xf32> to vector<3x1xf32>
    %244 = vector.broadcast %243 : vector<3x1xf32> to vector<3x128xf32>
    %cst_39 = arith.constant 0.000000e+00 : f32
    %245 = vector.broadcast %cst_39 : f32 to vector<3x128xf32>
    %cst_40 = arith.constant 0.000000e+00 : f32
    %246 = vector.broadcast %cst_40 : f32 to vector<3x128xf32>
    %c0_i32_41 = arith.constant 0 : i32
    %c2_i32_42 = arith.constant 2 : i32
    %247 = arith.addi %c0_i32_41, %c2_i32_42 : i32
    %c1_i32_43 = arith.constant 1 : i32
    %248:2 = scf.for %arg13 = %c0_i32_41 to %247 step %c1_i32_43 iter_args(%arg14 = %245, %arg15 = %246) -> (vector<3x128xf32>, vector<3x128xf32>)  : i32 {
      %c16_i32 = arith.constant 16 : i32
      %249 = arith.muli %arg13, %c16_i32 : i32
      %250 = tpu.assume_multiple %249, 16 : i32
      %251 = arith.index_cast %250 : i32 to index
      %c0_45 = arith.constant 0 : index
      %c0_46 = arith.constant 0 : index
      %252 = vector.load %arg11[%251, %c0_45, %c0_46] : memref<32x9x128xf32, #tpu.memory_space<vmem>>, vector<16x9x128xf32>
      %253 = vector.extract_strided_slice %252 {offsets = [0, 0, 0], sizes = [16, 3, 128], strides = [1, 1, 1]} : vector<16x9x128xf32> to vector<16x3x128xf32>
      %254 = vector.extract_strided_slice %253 {offsets = [0, 0, 0], sizes = [1, 3, 128], strides = [1, 1, 1]} : vector<16x3x128xf32> to vector<1x3x128xf32>
      %255 = vector.shape_cast %254 : vector<1x3x128xf32> to vector<3x128xf32>
      %256 = arith.mulf %240, %arg14 : vector<3x128xf32>
      %257 = arith.subf %255, %256 : vector<3x128xf32>
      %258 = arith.mulf %244, %arg15 : vector<3x128xf32>
      %259 = arith.subf %257, %258 : vector<3x128xf32>
      %260 = vector.extract_strided_slice %253 {offsets = [1, 0, 0], sizes = [1, 3, 128], strides = [1, 1, 1]} : vector<16x3x128xf32> to vector<1x3x128xf32>
      %261 = vector.shape_cast %260 : vector<1x3x128xf32> to vector<3x128xf32>
      %262 = arith.mulf %240, %259 : vector<3x128xf32>
      %263 = arith.subf %261, %262 : vector<3x128xf32>
      %264 = arith.mulf %244, %arg14 : vector<3x128xf32>
      %265 = arith.subf %263, %264 : vector<3x128xf32>
      %266 = vector.extract_strided_slice %253 {offsets = [2, 0, 0], sizes = [1, 3, 128], strides = [1, 1, 1]} : vector<16x3x128xf32> to vector<1x3x128xf32>
      %267 = vector.shape_cast %266 : vector<1x3x128xf32> to vector<3x128xf32>
      %268 = arith.mulf %240, %265 : vector<3x128xf32>
      %269 = arith.subf %267, %268 : vector<3x128xf32>
      %270 = arith.mulf %244, %259 : vector<3x128xf32>
      %271 = arith.subf %269, %270 : vector<3x128xf32>
      %272 = vector.extract_strided_slice %253 {offsets = [3, 0, 0], sizes = [1, 3, 128], strides = [1, 1, 1]} : vector<16x3x128xf32> to vector<1x3x128xf32>
      %273 = vector.shape_cast %272 : vector<1x3x128xf32> to vector<3x128xf32>
      %274 = arith.mulf %240, %271 : vector<3x128xf32>
      %275 = arith.subf %273, %274 : vector<3x128xf32>
      %276 = arith.mulf %244, %265 : vector<3x128xf32>
      %277 = arith.subf %275, %276 : vector<3x128xf32>
      %278 = vector.extract_strided_slice %253 {offsets = [4, 0, 0], sizes = [1, 3, 128], strides = [1, 1, 1]} : vector<16x3x128xf32> to vector<1x3x128xf32>
      %279 = vector.shape_cast %278 : vector<1x3x128xf32> to vector<3x128xf32>
      %280 = arith.mulf %240, %277 : vector<3x128xf32>
      %281 = arith.subf %279, %280 : vector<3x128xf32>
      %282 = arith.mulf %244, %271 : vector<3x128xf32>
      %283 = arith.subf %281, %282 : vector<3x128xf32>
      %284 = vector.extract_strided_slice %253 {offsets = [5, 0, 0], sizes = [1, 3, 128], strides = [1, 1, 1]} : vector<16x3x128xf32> to vector<1x3x128xf32>
      %285 = vector.shape_cast %284 : vector<1x3x128xf32> to vector<3x128xf32>
      %286 = arith.mulf %240, %283 : vector<3x128xf32>
      %287 = arith.subf %285, %286 : vector<3x128xf32>
      %288 = arith.mulf %244, %277 : vector<3x128xf32>
      %289 = arith.subf %287, %288 : vector<3x128xf32>
      %290 = vector.extract_strided_slice %253 {offsets = [6, 0, 0], sizes = [1, 3, 128], strides = [1, 1, 1]} : vector<16x3x128xf32> to vector<1x3x128xf32>
      %291 = vector.shape_cast %290 : vector<1x3x128xf32> to vector<3x128xf32>
      %292 = arith.mulf %240, %289 : vector<3x128xf32>
      %293 = arith.subf %291, %292 : vector<3x128xf32>
      %294 = arith.mulf %244, %283 : vector<3x128xf32>
      %295 = arith.subf %293, %294 : vector<3x128xf32>
      %296 = vector.extract_strided_slice %253 {offsets = [7, 0, 0], sizes = [1, 3, 128], strides = [1, 1, 1]} : vector<16x3x128xf32> to vector<1x3x128xf32>
      %297 = vector.shape_cast %296 : vector<1x3x128xf32> to vector<3x128xf32>
      %298 = arith.mulf %240, %295 : vector<3x128xf32>
      %299 = arith.subf %297, %298 : vector<3x128xf32>
      %300 = arith.mulf %244, %289 : vector<3x128xf32>
      %301 = arith.subf %299, %300 : vector<3x128xf32>
      %302 = vector.extract_strided_slice %253 {offsets = [8, 0, 0], sizes = [1, 3, 128], strides = [1, 1, 1]} : vector<16x3x128xf32> to vector<1x3x128xf32>
      %303 = vector.shape_cast %302 : vector<1x3x128xf32> to vector<3x128xf32>
      %304 = arith.mulf %240, %301 : vector<3x128xf32>
      %305 = arith.subf %303, %304 : vector<3x128xf32>
      %306 = arith.mulf %244, %295 : vector<3x128xf32>
      %307 = arith.subf %305, %306 : vector<3x128xf32>
      %308 = vector.extract_strided_slice %253 {offsets = [9, 0, 0], sizes = [1, 3, 128], strides = [1, 1, 1]} : vector<16x3x128xf32> to vector<1x3x128xf32>
      %309 = vector.shape_cast %308 : vector<1x3x128xf32> to vector<3x128xf32>
      %310 = arith.mulf %240, %307 : vector<3x128xf32>
      %311 = arith.subf %309, %310 : vector<3x128xf32>
      %312 = arith.mulf %244, %301 : vector<3x128xf32>
      %313 = arith.subf %311, %312 : vector<3x128xf32>
      %314 = vector.extract_strided_slice %253 {offsets = [10, 0, 0], sizes = [1, 3, 128], strides = [1, 1, 1]} : vector<16x3x128xf32> to vector<1x3x128xf32>
      %315 = vector.shape_cast %314 : vector<1x3x128xf32> to vector<3x128xf32>
      %316 = arith.mulf %240, %313 : vector<3x128xf32>
      %317 = arith.subf %315, %316 : vector<3x128xf32>
      %318 = arith.mulf %244, %307 : vector<3x128xf32>
      %319 = arith.subf %317, %318 : vector<3x128xf32>
      %320 = vector.extract_strided_slice %253 {offsets = [11, 0, 0], sizes = [1, 3, 128], strides = [1, 1, 1]} : vector<16x3x128xf32> to vector<1x3x128xf32>
      %321 = vector.shape_cast %320 : vector<1x3x128xf32> to vector<3x128xf32>
      %322 = arith.mulf %240, %319 : vector<3x128xf32>
      %323 = arith.subf %321, %322 : vector<3x128xf32>
      %324 = arith.mulf %244, %313 : vector<3x128xf32>
      %325 = arith.subf %323, %324 : vector<3x128xf32>
      %326 = vector.extract_strided_slice %253 {offsets = [12, 0, 0], sizes = [1, 3, 128], strides = [1, 1, 1]} : vector<16x3x128xf32> to vector<1x3x128xf32>
      %327 = vector.shape_cast %326 : vector<1x3x128xf32> to vector<3x128xf32>
      %328 = arith.mulf %240, %325 : vector<3x128xf32>
      %329 = arith.subf %327, %328 : vector<3x128xf32>
      %330 = arith.mulf %244, %319 : vector<3x128xf32>
      %331 = arith.subf %329, %330 : vector<3x128xf32>
      %332 = vector.extract_strided_slice %253 {offsets = [13, 0, 0], sizes = [1, 3, 128], strides = [1, 1, 1]} : vector<16x3x128xf32> to vector<1x3x128xf32>
      %333 = vector.shape_cast %332 : vector<1x3x128xf32> to vector<3x128xf32>
      %334 = arith.mulf %240, %331 : vector<3x128xf32>
      %335 = arith.subf %333, %334 : vector<3x128xf32>
      %336 = arith.mulf %244, %325 : vector<3x128xf32>
      %337 = arith.subf %335, %336 : vector<3x128xf32>
      %338 = vector.extract_strided_slice %253 {offsets = [14, 0, 0], sizes = [1, 3, 128], strides = [1, 1, 1]} : vector<16x3x128xf32> to vector<1x3x128xf32>
      %339 = vector.shape_cast %338 : vector<1x3x128xf32> to vector<3x128xf32>
      %340 = arith.mulf %240, %337 : vector<3x128xf32>
      %341 = arith.subf %339, %340 : vector<3x128xf32>
      %342 = arith.mulf %244, %331 : vector<3x128xf32>
      %343 = arith.subf %341, %342 : vector<3x128xf32>
      %344 = vector.extract_strided_slice %253 {offsets = [15, 0, 0], sizes = [1, 3, 128], strides = [1, 1, 1]} : vector<16x3x128xf32> to vector<1x3x128xf32>
      %345 = vector.shape_cast %344 : vector<1x3x128xf32> to vector<3x128xf32>
      %346 = arith.mulf %240, %343 : vector<3x128xf32>
      %347 = arith.subf %345, %346 : vector<3x128xf32>
      %348 = arith.mulf %244, %337 : vector<3x128xf32>
      %349 = arith.subf %347, %348 : vector<3x128xf32>
      %350 = vector.shape_cast %259 : vector<3x128xf32> to vector<1x3x128xf32>
      %351 = vector.shape_cast %265 : vector<3x128xf32> to vector<1x3x128xf32>
      %352 = vector.shape_cast %271 : vector<3x128xf32> to vector<1x3x128xf32>
      %353 = vector.shape_cast %277 : vector<3x128xf32> to vector<1x3x128xf32>
      %354 = vector.shape_cast %283 : vector<3x128xf32> to vector<1x3x128xf32>
      %355 = vector.shape_cast %289 : vector<3x128xf32> to vector<1x3x128xf32>
      %356 = vector.shape_cast %295 : vector<3x128xf32> to vector<1x3x128xf32>
      %357 = vector.shape_cast %301 : vector<3x128xf32> to vector<1x3x128xf32>
      %358 = vector.shape_cast %307 : vector<3x128xf32> to vector<1x3x128xf32>
      %359 = vector.shape_cast %313 : vector<3x128xf32> to vector<1x3x128xf32>
      %360 = vector.shape_cast %319 : vector<3x128xf32> to vector<1x3x128xf32>
      %361 = vector.shape_cast %325 : vector<3x128xf32> to vector<1x3x128xf32>
      %362 = vector.shape_cast %331 : vector<3x128xf32> to vector<1x3x128xf32>
      %363 = vector.shape_cast %337 : vector<3x128xf32> to vector<1x3x128xf32>
      %364 = vector.shape_cast %343 : vector<3x128xf32> to vector<1x3x128xf32>
      %365 = vector.shape_cast %349 : vector<3x128xf32> to vector<1x3x128xf32>
      %366 = tpu.concatenate %350, %351, %352, %353, %354, %355, %356, %357, %358, %359, %360, %361, %362, %363, %364, %365 in 0 : vector<1x3x128xf32>, vector<1x3x128xf32>, vector<1x3x128xf32>, vector<1x3x128xf32>, vector<1x3x128xf32>, vector<1x3x128xf32>, vector<1x3x128xf32>, vector<1x3x128xf32>, vector<1x3x128xf32>, vector<1x3x128xf32>, vector<1x3x128xf32>, vector<1x3x128xf32>, vector<1x3x128xf32>, vector<1x3x128xf32>, vector<1x3x128xf32>, vector<1x3x128xf32> -> vector<16x3x128xf32>
      %367 = vector.extract_strided_slice %366 {offsets = [0, 0, 0], sizes = [16, 1, 128], strides = [1, 1, 1]} : vector<16x3x128xf32> to vector<16x1x128xf32>
      %368 = vector.extract_strided_slice %366 {offsets = [0, 1, 0], sizes = [16, 1, 128], strides = [1, 1, 1]} : vector<16x3x128xf32> to vector<16x1x128xf32>
      %369 = arith.addf %367, %368 : vector<16x1x128xf32>
      %370 = vector.extract_strided_slice %366 {offsets = [0, 2, 0], sizes = [16, 1, 128], strides = [1, 1, 1]} : vector<16x3x128xf32> to vector<16x1x128xf32>
      %371 = arith.addf %369, %370 : vector<16x1x128xf32>
      %372 = arith.index_cast %250 : i32 to index
      %c0_47 = arith.constant 0 : index
      %c0_48 = arith.constant 0 : index
      %373 = vector.load %arg10[%372, %c0_47, %c0_48] : memref<32x1x128xf32, #tpu.memory_space<vmem>>, vector<16x1x128xf32>
      tpu.vector_store %arg10[%372, %c0_47, %c0_48], %371 {strides = array<i32>} : memref<32x1x128xf32, #tpu.memory_space<vmem>>, vector<16x1x128xf32>,
      scf.yield %349, %343 : vector<3x128xf32>, vector<3x128xf32>
    }
    %c2_i32_44 = arith.constant 2 : i32
    return
  }
  func.func @transform_0(%arg0: i32) -> (i32, i32, i32) {
    %c0_i32 = arith.constant 0 : i32
    %c0_i32_0 = arith.constant 0 : i32
    %c0_i32_1 = arith.constant 0 : i32
    return %c0_i32, %c0_i32_0, %arg0 : i32, i32, i32
  }
  func.func @transform_1(%arg0: i32) -> (i32, i32, i32) {
    %c0_i32 = arith.constant 0 : i32
    %c0_i32_0 = arith.constant 0 : i32
    %c0_i32_1 = arith.constant 0 : i32
    %c0_i32_2 = arith.constant 0 : i32
    return %c0_i32, %c0_i32_0, %c0_i32_1 : i32, i32, i32
  }
  func.func @transform_2(%arg0: i32) -> (i32, i32, i32) {
    %c0_i32 = arith.constant 0 : i32
    %c0_i32_0 = arith.constant 0 : i32
    %c0_i32_1 = arith.constant 0 : i32
    %c0_i32_2 = arith.constant 0 : i32
    return %c0_i32, %c0_i32_0, %c0_i32_1 : i32, i32, i32
  }
  func.func @transform_3(%arg0: i32) -> (i32, i32, i32) {
    %c0_i32 = arith.constant 0 : i32
    %c0_i32_0 = arith.constant 0 : i32
    %c0_i32_1 = arith.constant 0 : i32
    %c0_i32_2 = arith.constant 0 : i32
    return %c0_i32, %c0_i32_0, %c0_i32_1 : i32, i32, i32
  }
  func.func @transform_4(%arg0: i32) -> (i32, i32, i32) {
    %c0_i32 = arith.constant 0 : i32
    %c0_i32_0 = arith.constant 0 : i32
    %c0_i32_1 = arith.constant 0 : i32
    %c0_i32_2 = arith.constant 0 : i32
    return %c0_i32, %c0_i32_0, %c0_i32_1 : i32, i32, i32
  }
  func.func @transform_5(%arg0: i32) -> (i32, i32, i32) {
    %c0_i32 = arith.constant 0 : i32
    %c0_i32_0 = arith.constant 0 : i32
    %c0_i32_1 = arith.constant 0 : i32
    %c0_i32_2 = arith.constant 0 : i32
    return %c0_i32, %c0_i32_0, %c0_i32_1 : i32, i32, i32
  }
  func.func @transform_6(%arg0: i32) -> (i32, i32, i32) {
    %c0_i32 = arith.constant 0 : i32
    %c0_i32_0 = arith.constant 0 : i32
    %c0_i32_1 = arith.constant 0 : i32
    %c0_i32_2 = arith.constant 0 : i32
    return %c0_i32, %c0_i32_0, %c0_i32_1 : i32, i32, i32
  }
  func.func @transform_7(%arg0: i32) -> (i32, i32, i32) {
    %c0_i32 = arith.constant 0 : i32
    %c0_i32_0 = arith.constant 0 : i32
    %c0_i32_1 = arith.constant 0 : i32
    %c0_i32_2 = arith.constant 0 : i32
    return %c0_i32, %c0_i32_0, %c0_i32_1 : i32, i32, i32
  }
  func.func @transform_8(%arg0: i32) -> (i32, i32, i32) {
    %c0_i32 = arith.constant 0 : i32
    %c0_i32_0 = arith.constant 0 : i32
    %c0_i32_1 = arith.constant 0 : i32
    %c0_i32_2 = arith.constant 0 : i32
    return %c0_i32, %c0_i32_0, %c0_i32_1 : i32, i32, i32
  }
  func.func @transform_9(%arg0: i32) -> (i32, i32, i32) {
    %c0_i32 = arith.constant 0 : i32
    %c0_i32_0 = arith.constant 0 : i32
    %c0_i32_1 = arith.constant 0 : i32
    return %c0_i32, %c0_i32_0, %arg0 : i32, i32, i32
  }
}

</mosaic_0001>

<bundles_post_ra>
// kernel: tpu_custom_call.1
= control target key start
LH: loop header
LB: loop body
LE: loop exit
PB: predicated region body
PF: predicated region fallthrough
CT: control target
= control target key end

     0   :  { %v13439_v2 = vmov 0   ;;  %s13429_s0 = inlined_call_operand.vmem [shape: f32[32,3,128], index: 0, kind: input, shape index: {}]   ;;  %s13430_s1 = inlined_call_operand.vmem [shape: f32[3,9,1], index: 1, kind: input, shape index: {}]   ;;  %s13431_s2 = inlined_call_operand.vmem [shape: f32[2,9,1], index: 2, kind: input, shape index: {}]   ;;  %s13432_s3 = inlined_call_operand.vmem [shape: f32[3,16,1], index: 3, kind: input, shape index: {}]   ;;  %s13433_s4 = inlined_call_operand.vmem [shape: f32[1,16,1], index: 4, kind: input, shape index: {}]   ;;  %s13434_s5 = inlined_call_operand.vmem [shape: f32[16,3,1], index: 5, kind: input, shape index: {}]   ;;  %s13435_s6 = inlined_call_operand.vmem [shape: f32[1,3,1], index: 6, kind: input, shape index: {}]   ;;  %s13436_s7 = inlined_call_operand.vmem [shape: f32[3,3,1], index: 7, kind: input, shape index: {}]   ;;  %s13437_s8 = inlined_call_operand.vmem [shape: f32[2,3,1], index: 8, kind: input, shape index: {}]   ;;  %s13438_s9 = inlined_call_operand.hbm [shape: f32[32,1,128], index: 9, kind: output, shape index: {}]  }
   0x1   :  { %v66_v0 = vld [vmem:[%s13430_s1 + $0x10] sm:$0xff]  ;;  %v64_v1 = vld [vmem:[%s13430_s1] sm:$0xff]  ;;  %6136 = vset.pattern.permute.xlu1 %v13439_v2  ;;  %6135 = vset.pattern.permute.xlu0 %v13439_v2  ;;  %v67_v3 = vld [vmem:[%s13430_s1 + $0x18] sm:$0x1] }
   0x2   :  { %773 = vperm.xlu1 %6136, %v66_v0   ;;  %699 = vperm.xlu0 %6135, %v64_v1   ;;  %v65_v4 = vld [vmem:[%s13430_s1 + $0x8] sm:$0x1]  ;;  %v68_v6 = vld [vmem:[%s13430_s1 + $0x20] sm:$0xff] }
   0x3   :  { %v69_v5 = vld [vmem:[%s13430_s1 + $0x28] sm:$0x1]  ;;  %v1041_v8 = vld [vmem:[%s13431_s2] sm:$0xff] }
   0x4   :  { %v1042_v7 = vld [vmem:[%s13431_s2 + $0x8] sm:$0x1] }
   0x6   :  { %778 = vperm.xlu1 %6136, %v67_v3   ;;  %704 = vperm.xlu0 %6135, %v65_v4  }
   0xa   :  { %914 = vperm.xlu1 %6136, %v69_v5   ;;  %909 = vperm.xlu0 %6135, %v68_v6  }
   0xe   :  { %1116 = vperm.xlu1 %6136, %v1042_v7   ;;  %1111 = vperm.xlu0 %6135, %v1041_v8  }
   0xf   :  { %14 = vsyncpa [#allocation5], 0  ;;  %v1044_v9 = vld [vmem:[%s13431_s2 + $0x18] sm:$0x1]  ;;  %v1043_v10 = vld [vmem:[%s13431_s2 + $0x10] sm:$0xff]  ;;  %vm473_vm0 = vcmask 1040384  }
  0x10   :  { %v6444_v11 = vld [vmem:[%s13429_s0] sm:$0x7]  ;;  %v6449_v12 = vld [vmem:[%s13429_s0 + $0x4] sm:$0x7]  ;;  %v6454_v13 = vld [vmem:[%s13429_s0 + $0x8] sm:$0x7] }
  0x11   :  { %13882 = vst [vmem:[#allocation7_spill] sm:$0xff] %v6444_v11  ;;  %13883 = vst [vmem:[#allocation8_spill] sm:$0xff] %v6449_v12  ;;  %v6459_v14 = vld [vmem:[%s13429_s0 + $0xc] sm:$0x7]  ;;  %v6464_v15 = vld [vmem:[%s13429_s0 + $0x10] sm:$0x7] }
  0x12   :  { %1126 = vperm.xlu1 %6136, %v1044_v9   ;;  %1121 = vperm.xlu0 %6135, %v1043_v10   ;;  %13884 = vst [vmem:[#allocation9_spill] sm:$0xff] %v6454_v13  ;;  %13885 = vst [vmem:[#allocation10_spill] sm:$0xff] %v6459_v14  ;;  %v6469_v16 = vld [vmem:[%s13429_s0 + $0x14] sm:$0x7]  ;;  %v6474_v17 = vld [vmem:[%s13429_s0 + $0x18] sm:$0x7] }
  0x13   :  { %13886 = vst [vmem:[#allocation11_spill] sm:$0xff] %v6464_v15  ;;  %13887 = vst [vmem:[#allocation12_spill] sm:$0xff] %v6469_v16  ;;  %v6479_v18 = vld [vmem:[%s13429_s0 + $0x1c] sm:$0x7]  ;;  %v6484_v19 = vld [vmem:[%s13429_s0 + $0x20] sm:$0x7] }
  0x14   :  { %13888 = vst [vmem:[#allocation13_spill] sm:$0xff] %v6474_v17  ;;  %13889 = vst [vmem:[#allocation14_spill] sm:$0xff] %v6479_v18  ;;  %v6489_v20 = vld [vmem:[%s13429_s0 + $0x24] sm:$0x7]  ;;  %v6494_v21 = vld [vmem:[%s13429_s0 + $0x28] sm:$0x7] }
  0x15   :  { %13890 = vst [vmem:[#allocation15_spill] sm:$0xff] %v6484_v19  ;;  %13891 = vst [vmem:[#allocation16_spill] sm:$0xff] %v6489_v20  ;;  %v6499_v22 = vld [vmem:[%s13429_s0 + $0x2c] sm:$0x7]  ;;  %v6504_v23 = vld [vmem:[%s13429_s0 + $0x30] sm:$0x7] }
  0x16   :  { %13892 = vst [vmem:[#allocation17_spill] sm:$0xff] %v6494_v21  ;;  %13893 = vst [vmem:[#allocation18_spill] sm:$0xff] %v6499_v22  ;;  %v6509_v24 = vld [vmem:[%s13429_s0 + $0x34] sm:$0x7]  ;;  %v6514_v25 = vld [vmem:[%s13429_s0 + $0x38] sm:$0x7] }
  0x17   :  { %13894 = vst [vmem:[#allocation19_spill] sm:$0xff] %v6504_v23  ;;  %13895 = vst [vmem:[#allocation20_spill] sm:$0xff] %v6509_v24  ;;  %v6517_v26 = vrot.slane %v6444_v11, 2  ;;  %v6520_v27 = vrot.slane %v6449_v12, 2  ;;  %v6523_v28 = vrot.slane %v6454_v13, 2  ;;  %v6546_v33 = vrot.slane %v6459_v14, 2 }
  0x18   :  { %13896 = vst [vmem:[#allocation21_spill] sm:$0xff] %v6514_v25  ;;  %v6528_v29 = vld [vmem:[%s13429_s0 + $0x3c] sm:$0x7]  ;;  %v6533_v30 = vld [vmem:[%s13429_s0 + $0x40] sm:$0x7]  ;;  %v6549_v34 = vrot.slane %v6464_v15, 2 }
  0x19   :  { %13897 = vst [vmem:[#allocation22_spill] sm:$0xff] %v6517_v26  ;;  %13898 = vst [vmem:[#allocation23_spill] sm:$0xff] %v6520_v27  ;;  %v6538_v31 = vld [vmem:[%s13429_s0 + $0x44] sm:$0x7]  ;;  %v6543_v32 = vld [vmem:[%s13429_s0 + $0x48] sm:$0x7] }
  0x1a   :  { %13899 = vst [vmem:[#allocation24_spill] sm:$0xff] %v6523_v28  ;;  %13900 = vst [vmem:[#allocation25_spill] sm:$0xff] %v6528_v29  ;;  %v6552_v35 = vrot.slane %v6469_v16, 2  ;;  %v6555_v36 = vrot.slane %v6474_v17, 2  ;;  %v6560_v37 = vld [vmem:[%s13429_s0 + $0x4c] sm:$0x7] }
  0x1b   :  { %13901 = vst [vmem:[#allocation26_spill] sm:$0xff] %v6533_v30  ;;  %13902 = vst [vmem:[#allocation27_spill] sm:$0xff] %v6538_v31  ;;  %v6565_v38 = vld [vmem:[%s13429_s0 + $0x50] sm:$0x7]  ;;  %v6570_v39 = vld [vmem:[%s13429_s0 + $0x54] sm:$0x7] }
  0x1c   :  { %13903 = vst [vmem:[#allocation28_spill] sm:$0xff] %v6543_v32  ;;  %13904 = vst [vmem:[#allocation29_spill] sm:$0xff] %v6546_v33  ;;  %v6575_v40 = vld [vmem:[%s13429_s0 + $0x58] sm:$0x7]  ;;  %v6578_v41 = vrot.slane %v6479_v18, 2  ;;  %v6581_v42 = vrot.slane %v6484_v19, 2 }
  0x1d   :  { %13905 = vst [vmem:[#allocation30_spill] sm:$0xff] %v6549_v34  ;;  %13906 = vst [vmem:[#allocation31_spill] sm:$0xff] %v6552_v35  ;;  %v6584_v43 = vrot.slane %v6489_v20, 2  ;;  %v6587_v44 = vrot.slane %v6494_v21, 2  ;;  %v6592_v45 = vld [vmem:[%s13429_s0 + $0x5c] sm:$0x7] }
  0x1e   :  { %13907 = vst [vmem:[#allocation32_spill] sm:$0xff] %v6555_v36  ;;  %13908 = vst [vmem:[#allocation33_spill] sm:$0xff] %v6560_v37  ;;  %v6597_v46 = vld [vmem:[%s13429_s0 + $0x60] sm:$0x7]  ;;  %v6602_v47 = vld [vmem:[%s13429_s0 + $0x64] sm:$0x7] }
  0x1f   :  { %13909 = vst [vmem:[#allocation34_spill] sm:$0xff] %v6565_v38  ;;  %13910 = vst [vmem:[#allocation35_spill] sm:$0xff] %v6570_v39  ;;  %v6607_v48 = vld [vmem:[%s13429_s0 + $0x68] sm:$0x7]  ;;  %v6610_v49 = vrot.slane %v6499_v22, 2  ;;  %v6613_v50 = vrot.slane %v6504_v23, 2 }
  0x20   :  { %13911 = vst [vmem:[#allocation36_spill] sm:$0xff] %v6575_v40  ;;  %13912 = vst [vmem:[#allocation37_spill] sm:$0xff] %v6578_v41  ;;  %v6616_v51 = vrot.slane %v6509_v24, 2  ;;  %v6619_v52 = vrot.slane %v6514_v25, 2  ;;  %v6624_v53 = vld [vmem:[%s13429_s0 + $0x6c] sm:$0x7] }
  0x21   :  { %13913 = vst [vmem:[#allocation38_spill] sm:$0xff] %v6581_v42  ;;  %13914 = vst [vmem:[#allocation39_spill] sm:$0xff] %v6584_v43  ;;  %v6629_v54 = vld [vmem:[%s13429_s0 + $0x70] sm:$0x7]  ;;  %v6632_v55 = vrot.slane %v6528_v29, 2  ;;  %v6635_v56 = vrot.slane %v6533_v30, 2 }
  0x22   :  { %13915 = vst [vmem:[#allocation40_spill] sm:$0xff] %v6587_v44  ;;  %13916 = vst [vmem:[#allocation41_spill] sm:$0xff] %v6592_v45  ;;  %v6638_v57 = vrot.slane %v6538_v31, 2  ;;  %v6641_v58 = vrot.slane %v6543_v32, 2  ;;  %v6646_v59 = vld [vmem:[%s13429_s0 + $0x74] sm:$0x7] }
  0x23   :  { %13917 = vst [vmem:[#allocation42_spill] sm:$0xff] %v6597_v46  ;;  %13918 = vst [vmem:[#allocation43_spill] sm:$0xff] %v6602_v47  ;;  %v6649_v60 = vrot.slane %v6560_v37, 2  ;;  %v6652_v61 = vrot.slane %v6565_v38, 2  ;;  %v6655_v62 = vrot.slane %v6570_v39, 2  ;;  %v6658_v63 = vrot.slane %v6575_v40, 2 }
  0x24   :  { %13919 = vst [vmem:[#allocation44_spill] sm:$0xff] %v6607_v48  ;;  %13920 = vst [vmem:[#allocation45_spill] sm:$0xff] %v6610_v49  ;;  %v6663_v0 = vld [vmem:[%s13429_s0 + $0x78] sm:$0x7]  ;;  %v6666_v1 = vrot.slane %v6592_v45, 2  ;;  %v6669_v3 = vrot.slane %v6597_v46, 2 }
  0x25   :  { %13921 = vst [vmem:[#allocation46_spill] sm:$0xff] %v6613_v50  ;;  %13922 = vst [vmem:[#allocation47_spill] sm:$0xff] %v6616_v51  ;;  %v6672_v4 = vrot.slane %v6602_v47, 2  ;;  %v6675_v5 = vrot.slane %v6607_v48, 2  ;;  %v6678_v6 = vrot.slane %v6624_v53, 2  ;;  %v6681_v7 = vrot.slane %v6629_v54, 2 }
  0x26   :  { %13923 = vst [vmem:[#allocation48_spill] sm:$0xff] %v6619_v52  ;;  %13924 = vst [vmem:[#allocation49_spill] sm:$0xff] %v6624_v53  ;;  %vm505_vm1 = vcmask 1041408   ;;  %v13944_v10 = vrot.slane %v6454_v13, 7  ;;  %v13947_v8 = vrot.slane %v6469_v16, 7  ;;  %v13956_v52 = vrot.slane %v6514_v25, 7 }
  0x27   :  { %13925 = vst [vmem:[#allocation50_spill] sm:$0xff] %v6629_v54  ;;  %13926 = vst [vmem:[#allocation51_spill] sm:$0xff] %v6632_v55  ;;  %v13955_v55 = vrot.slane %v6509_v24, 7  ;;  %v13957_v51 = vrot.slane %v6528_v29, 7  ;;  %v13958_v50 = vrot.slane %v6533_v30, 7  ;;  %vm537_vm2 = vcmask 1042432  }
  0x28   :  { %13927 = vst [vmem:[#allocation52_spill] sm:$0xff] %v6635_v56  ;;  %13928 = vst [vmem:[#allocation53_spill] sm:$0xff] %v6638_v57  ;;  %v476_v2 = vsel %vm473_vm0, %v6454_v13, %v13944_v10  ;;  %v13953_v57 = vrot.slane %v6499_v22, 7  ;;  %v13954_v56 = vrot.slane %v6504_v23, 7  ;;  %v13959_v49 = vrot.slane %v6538_v31, 7  ;;  %s8231_s0 = smov 0  }
  0x29   :  { %13929 = vst [vmem:[#allocation54_spill] sm:$0xff] %v6641_v58  ;;  %13930 = vst [vmem:[#allocation55_spill] sm:$0xff] %v6646_v59  ;;  %v13952_v58 = vrot.slane %v6494_v21, 7  ;;  %v13960_v44 = vrot.slane %v6543_v32, 7  ;;  %v13961_v43 = vrot.slane %v6560_v37, 7  ;;  %v13962_v42 = vrot.slane %v6565_v38, 7 }
  0x2a   :  { %13931 = vst [vmem:[#allocation56_spill] sm:$0xff] %v6649_v60  ;;  %13932 = vst [vmem:[#allocation57_spill] sm:$0xff] %v6652_v61  ;;  %v13950_v61 = vrot.slane %v6484_v19, 7  ;;  %v13951_v60 = vrot.slane %v6489_v20, 7  ;;  %v13963_v41 = vrot.slane %v6570_v39, 7  ;;  %v13964_v36 = vrot.slane %v6575_v40, 7 }
  0x2b   :  { %13933 = vst [vmem:[#allocation58_spill] sm:$0xff] %v6655_v62  ;;  %13934 = vst [vmem:[#allocation59_spill] sm:$0xff] %v6658_v63  ;;  %v13948_v63 = vrot.slane %v6474_v17, 7  ;;  %v13949_v62 = vrot.slane %v6479_v18, 7  ;;  %v13965_v35 = vrot.slane %v6592_v45, 7  ;;  %v13966_v34 = vrot.slane %v6597_v46, 7 }
  0x2c   :  { %13935 = vst [vmem:[#allocation60_spill] sm:$0xff] %v6663_v0  ;;  %13936 = vst [vmem:[#allocation61_spill] sm:$0xff] %v6666_v1  ;;  %v13942_v1 = vrot.slane %v6444_v11, 7  ;;  %v13967_v33 = vrot.slane %v6602_v47, 7  ;;  %v13968_v28 = vrot.slane %v6607_v48, 7  ;;  %v13969_v27 = vrot.slane %v6624_v53, 7 }
  0x2d   :  { %13937 = vst [vmem:[#allocation62_spill] sm:$0xff] %v6669_v3  ;;  %13938 = vst [vmem:[#allocation63_spill] sm:$0xff] %v6672_v4  ;;  %v13945_v3 = vrot.slane %v6459_v14, 7  ;;  %v13946_v4 = vrot.slane %v6464_v15, 7  ;;  %v480_v10 = vsel %vm473_vm0, %v6474_v17, %v13948_v63  ;;  %v484_v63 = vsel %vm473_vm0, %v6494_v21, %v13952_v58 }
  0x2e   :  { %13939 = vst [vmem:[#allocation64_spill] sm:$0xff] %v6675_v5  ;;  %13940 = vst [vmem:[#allocation65_spill] sm:$0xff] %v6678_v6  ;;  %v474_v6 = vsel %vm473_vm0, %v6444_v11, %v13942_v1  ;;  %v488_v58 = vsel %vm473_vm0, %v6514_v25, %v13956_v52  ;;  %v492_v52 = vsel %vm473_vm0, %v6543_v32, %v13960_v44  ;;  %v13970_v26 = vrot.slane %v6629_v54, 7 }
  0x2f   :  { %13941 = vst [vmem:[#allocation66_spill] sm:$0xff] %v6681_v7  ;;  %v13943_v7 = vrot.slane %v6449_v12, 7  ;;  %v477_v5 = vsel %vm473_vm0, %v6459_v14, %v13945_v3  ;;  %v478_v1 = vsel %vm473_vm0, %v6464_v15, %v13946_v4  ;;  %v481_v3 = vsel %vm473_vm0, %v6479_v18, %v13949_v62 }
  0x30   :  { %v482_v4 = vsel %vm473_vm0, %v6484_v19, %v13950_v61  ;;  %v485_v62 = vsel %vm473_vm0, %v6499_v22, %v13953_v57  ;;  %v486_v61 = vsel %vm473_vm0, %v6504_v23, %v13954_v56  ;;  %v489_v57 = vsel %vm473_vm0, %v6528_v29, %v13957_v51 }
  0x31   :  { %v475_v9 = vsel %vm473_vm0, %v6449_v12, %v13943_v7  ;;  %v479_v7 = vsel %vm473_vm0, %v6469_v16, %v13947_v8  ;;  %v483_v8 = vsel %vm473_vm0, %v6489_v20, %v13951_v60  ;;  %v487_v60 = vsel %vm473_vm0, %v6509_v24, %v13955_v55 }
  0x32   :  { %v490_v56 = vsel %vm473_vm0, %v6533_v30, %v13958_v50  ;;  %v491_v55 = vsel %vm473_vm0, %v6538_v31, %v13959_v49  ;;  %v493_v51 = vsel %vm473_vm0, %v6560_v37, %v13961_v43  ;;  %v494_v50 = vsel %vm473_vm0, %v6565_v38, %v13962_v42 }
  0x33   :  { %v495_v49 = vsel %vm473_vm0, %v6570_v39, %v13963_v41  ;;  %v496_v44 = vsel %vm473_vm0, %v6575_v40, %v13964_v36  ;;  %v497_v43 = vsel %vm473_vm0, %v6592_v45, %v13965_v35  ;;  %v498_v42 = vsel %vm473_vm0, %v6597_v46, %v13966_v34 }
  0x34   :  { %v499_v41 = vsel %vm473_vm0, %v6602_v47, %v13967_v33  ;;  %v500_v36 = vsel %vm473_vm0, %v6607_v48, %v13968_v28  ;;  %v501_v35 = vsel %vm473_vm0, %v6624_v53, %v13969_v27  ;;  %v502_v34 = vsel %vm473_vm0, %v6629_v54, %v13970_v26 }
  0x35   :  { %v13971_v46 = vrot.slane %v6646_v59, 7  ;;  %v13972_v47 = vrot.slane %v6663_v0, 7  ;;  %v13973_v48 = vrot.slane %v6444_v11, 6  ;;  %v13974_v27 = vrot.slane %v6449_v12, 6 }
  0x36   :  { %v13975_v26 = vrot.slane %v6454_v13, 6  ;;  %v13976_v40 = vrot.slane %v6459_v14, 6  ;;  %v13978_v11 = vrot.slane %v6469_v16, 6  ;;  %vm569_vm3 = vcmask 1043456  }
  0x37   :  { %v503_v33 = vsel %vm473_vm0, %v6646_v59, %v13971_v46  ;;  %v504_v28 = vsel %vm473_vm0, %v6663_v0, %v13972_v47  ;;  %v506_v45 = vsel %vm505_vm1, %v474_v6, %v13973_v48  ;;  %v507_v53 = vsel %vm505_vm1, %v475_v9, %v13974_v27 }
  0x38   :  { %v508_v54 = vsel %vm505_vm1, %v476_v2, %v13975_v26  ;;  %v509_v46 = vsel %vm505_vm1, %v477_v5, %v13976_v40  ;;  %v13977_v59 = vrot.slane %v6464_v15, 6  ;;  %v511_v48 = vsel %vm505_vm1, %v479_v7, %v13978_v11 }
  0x39   :  { %v13979_v6 = vrot.slane %v6474_v17, 6  ;;  %v13980_v27 = vrot.slane %v6479_v18, 6  ;;  %v13981_v26 = vrot.slane %v6484_v19, 6  ;;  %v13982_v5 = vrot.slane %v6489_v20, 6 }
  0x3a   :  { %v510_v47 = vsel %vm505_vm1, %v478_v1, %v13977_v59  ;;  %v13983_v1 = vrot.slane %v6494_v21, 6  ;;  %v13984_v7 = vrot.slane %v6499_v22, 6  ;;  %vm601_vm4 = vcmask 1044480  }
  0x3b   :  { %v512_v9 = vsel %vm505_vm1, %v480_v10, %v13979_v6  ;;  %v513_v2 = vsel %vm505_vm1, %v481_v3, %v13980_v27  ;;  %v514_v40 = vsel %vm505_vm1, %v482_v4, %v13981_v26  ;;  %v515_v59 = vsel %vm505_vm1, %v483_v8, %v13982_v5 }
  0x3c   :  { %v516_v11 = vsel %vm505_vm1, %v484_v63, %v13983_v1  ;;  %v517_v10 = vsel %vm505_vm1, %v485_v62, %v13984_v7  ;;  %v13985_v6 = vrot.slane %v6504_v23, 6  ;;  %v13986_v27 = vrot.slane %v6509_v24, 6 }
  0x3d   :  { %v13987_v26 = vrot.slane %v6514_v25, 6  ;;  %v13988_v5 = vrot.slane %v6528_v29, 6  ;;  %v13989_v1 = vrot.slane %v6533_v30, 6  ;;  %v13990_v7 = vrot.slane %v6538_v31, 6 }
  0x3e   :  { %v518_v3 = vsel %vm505_vm1, %v486_v61, %v13985_v6  ;;  %v519_v4 = vsel %vm505_vm1, %v487_v60, %v13986_v27  ;;  %v13991_v6 = vrot.slane %v6543_v32, 6  ;;  %v13992_v27 = vrot.slane %v6560_v37, 6 }
  0x3f   :  { %v520_v8 = vsel %vm505_vm1, %v488_v58, %v13987_v26  ;;  %v521_v63 = vsel %vm505_vm1, %v489_v57, %v13988_v5  ;;  %v522_v62 = vsel %vm505_vm1, %v490_v56, %v13989_v1  ;;  %v523_v61 = vsel %vm505_vm1, %v491_v55, %v13990_v7  ;;  %v13995_v1 = vld [vmem:[#allocation36_spill] sm:$0xff]  ;;  %v13997_v7 = vld [vmem:[#allocation41_spill] sm:$0xff] }
  0x40   :  { %v524_v60 = vsel %vm505_vm1, %v492_v52, %v13991_v6  ;;  %v525_v58 = vsel %vm505_vm1, %v493_v51, %v13992_v27  ;;  %v13993_v26 = vrot.slane %v6565_v38, 6  ;;  %v13994_v5 = vrot.slane %v6570_v39, 6  ;;  %v13999_v6 = vld [vmem:[#allocation42_spill] sm:$0xff]  ;;  %v14001_v27 = vld [vmem:[#allocation43_spill] sm:$0xff] }
  0x41   :  { %v13996_v31 = vrot.slane %v13995_v1, 6  ;;  %v13998_v32 = vrot.slane %v13997_v7, 6  ;;  %v14000_v37 = vrot.slane %v13999_v6, 6  ;;  %v14002_v38 = vrot.slane %v14001_v27, 6 }
  0x42   :  { %v526_v57 = vsel %vm505_vm1, %v494_v50, %v13993_v26  ;;  %v527_v56 = vsel %vm505_vm1, %v495_v49, %v13994_v5  ;;  %v14003_v26 = vld [vmem:[#allocation44_spill] sm:$0xff]  ;;  %v14005_v5 = vld [vmem:[#allocation49_spill] sm:$0xff]  ;;  %vm633_vm5 = vcmask 1045504   ;;  %vm665_vm6 = vcmask 1046528  }
  0x43   :  { %v528_v55 = vsel %vm505_vm1, %v496_v44, %v13996_v31  ;;  %v529_v52 = vsel %vm505_vm1, %v497_v43, %v13998_v32  ;;  %v530_v51 = vsel %vm505_vm1, %v498_v42, %v14000_v37  ;;  %v531_v50 = vsel %vm505_vm1, %v499_v41, %v14002_v38  ;;  %v14007_v44 = vld [vmem:[#allocation50_spill] sm:$0xff]  ;;  %v14009_v43 = vld [vmem:[#allocation55_spill] sm:$0xff] }
  0x44   :  { %v14004_v39 = vrot.slane %v14003_v26, 6  ;;  %v14006_v1 = vrot.slane %v14005_v5, 6  ;;  %v14008_v7 = vrot.slane %v14007_v44, 6  ;;  %v14010_v6 = vrot.slane %v14009_v43, 6  ;;  %v14012_v41 = vld [vmem:[#allocation7_spill] sm:$0xff] }
  0x45   :  { %v14011_v42 = vrot.slane %v6663_v0, 6  ;;  %v14013_v26 = vrot.slane %v14012_v41, 6 }
  0x46   :  { %v532_v49 = vsel %vm505_vm1, %v500_v36, %v14004_v39  ;;  %v533_v31 = vsel %vm505_vm1, %v501_v35, %v14006_v1  ;;  %v534_v32 = vsel %vm505_vm1, %v502_v34, %v14008_v7  ;;  %v535_v37 = vsel %vm505_vm1, %v503_v33, %v14010_v6 }
  0x47   :  { %v536_v38 = vsel %vm505_vm1, %v504_v28, %v14011_v42  ;;  %v538_v39 = vsel %vm537_vm2, %v506_v45, %v14013_v26  ;;  %v14014_v36 = vrot.slane %v6449_v12, 6  ;;  %v14015_v1 = vrot.slane %v6454_v13, 6 }
  0x48   :  { %v14016_v7 = vrot.slane %v6459_v14, 6  ;;  %v14017_v6 = vrot.slane %v6464_v15, 6  ;;  %v14018_v42 = vrot.slane %v6469_v16, 6  ;;  %v14019_v26 = vrot.slane %v6474_v17, 6 }
  0x49   :  { %v539_v35 = vsel %vm537_vm2, %v507_v53, %v14014_v36  ;;  %v540_v34 = vsel %vm537_vm2, %v508_v54, %v14015_v1  ;;  %v14020_v36 = vrot.slane %v6479_v18, 6  ;;  %v14021_v1 = vrot.slane %v6484_v19, 6 }
  0x4a   :  { %v541_v33 = vsel %vm537_vm2, %v509_v46, %v14016_v7  ;;  %v542_v28 = vsel %vm537_vm2, %v510_v47, %v14017_v6  ;;  %v543_v45 = vsel %vm537_vm2, %v511_v48, %v14018_v42  ;;  %v544_v53 = vsel %vm537_vm2, %v512_v9, %v14019_v26 }
  0x4b   :  { %v545_v54 = vsel %vm537_vm2, %v513_v2, %v14020_v36  ;;  %v546_v46 = vsel %vm537_vm2, %v514_v40, %v14021_v1  ;;  %v14022_v7 = vrot.slane %v6489_v20, 6  ;;  %v14023_v6 = vrot.slane %v6494_v21, 6 }
  0x4c   :  { %v14024_v42 = vrot.slane %v6499_v22, 6  ;;  %v14025_v26 = vrot.slane %v6504_v23, 6  ;;  %v14026_v36 = vrot.slane %v6509_v24, 6  ;;  %v14027_v1 = vrot.slane %v6514_v25, 6 }
  0x4d   :  { %v547_v47 = vsel %vm537_vm2, %v515_v59, %v14022_v7  ;;  %v548_v48 = vsel %vm537_vm2, %v516_v11, %v14023_v6  ;;  %v14028_v7 = vrot.slane %v6528_v29, 6  ;;  %v14029_v6 = vrot.slane %v6533_v30, 6 }
  0x4e   :  { %v549_v9 = vsel %vm537_vm2, %v517_v10, %v14024_v42  ;;  %v550_v2 = vsel %vm537_vm2, %v518_v3, %v14025_v26  ;;  %v551_v40 = vsel %vm537_vm2, %v519_v4, %v14026_v36  ;;  %v552_v59 = vsel %vm537_vm2, %v520_v8, %v14027_v1  ;;  %v14030_v42 = vld [vmem:[#allocation27_spill] sm:$0xff]  ;;  %v14032_v26 = vld [vmem:[#allocation28_spill] sm:$0xff]  ;;  %v14034_v36 = vld [vmem:[#allocation33_spill] sm:$0xff] }
  0x4f   :  { %v553_v11 = vsel %vm537_vm2, %v521_v63, %v14028_v7  ;;  %v554_v10 = vsel %vm537_vm2, %v522_v62, %v14029_v6  ;;  %v14031_v23 = vrot.slane %v14030_v42, 6  ;;  %v14033_v24 = vrot.slane %v14032_v26, 6  ;;  %v14036_v1 = vld [vmem:[#allocation34_spill] sm:$0xff]  ;;  %v14038_v7 = vld [vmem:[#allocation35_spill] sm:$0xff]  ;;  %v14040_v6 = vld [vmem:[#allocation36_spill] sm:$0xff] }
  0x50   :  { %v14035_v25 = vrot.slane %v14034_v36, 6  ;;  %v14037_v29 = vrot.slane %v14036_v1, 6  ;;  %v14039_v30 = vrot.slane %v14038_v7, 6  ;;  %v14041_v42 = vrot.slane %v14040_v6, 6 }
  0x51   :  { %v555_v3 = vsel %vm537_vm2, %v523_v61, %v14031_v23  ;;  %v556_v4 = vsel %vm537_vm2, %v524_v60, %v14033_v24  ;;  %v14042_v61 = vld [vmem:[#allocation41_spill] sm:$0xff]  ;;  %v14044_v60 = vld [vmem:[#allocation42_spill] sm:$0xff] }
  0x52   :  { %v557_v8 = vsel %vm537_vm2, %v525_v58, %v14035_v25  ;;  %v558_v63 = vsel %vm537_vm2, %v526_v57, %v14037_v29  ;;  %v559_v62 = vsel %vm537_vm2, %v527_v56, %v14039_v30  ;;  %v560_v23 = vsel %vm537_vm2, %v528_v55, %v14041_v42  ;;  %v14047_v57 = vld [vmem:[#allocation44_spill] sm:$0xff] }
  0x53   :  { %v14043_v26 = vrot.slane %v14042_v61, 6  ;;  %v14045_v36 = vrot.slane %v14044_v60, 6  ;;  %v14046_v58 = vrot.slane %v14001_v27, 6  ;;  %v14048_v7 = vrot.slane %v14047_v57, 6 }
  0x54   :  { %v14049_v56 = vrot.slane %v14005_v5, 6  ;;  %v14050_v42 = vrot.slane %v14007_v44, 6 }
  0x55   :  { %v561_v24 = vsel %vm537_vm2, %v529_v52, %v14043_v26  ;;  %v562_v25 = vsel %vm537_vm2, %v530_v51, %v14045_v36  ;;  %v563_v29 = vsel %vm537_vm2, %v531_v50, %v14046_v58  ;;  %v564_v30 = vsel %vm537_vm2, %v532_v49, %v14048_v7 }
  0x56   :  { %v565_v55 = vsel %vm537_vm2, %v533_v31, %v14049_v56  ;;  %v566_v52 = vsel %vm537_vm2, %v534_v32, %v14050_v42  ;;  %v14051_v26 = vrot.slane %v14009_v43, 6  ;;  %v14052_v36 = vrot.slane %v6663_v0, 6 }
  0x57   :  { %v14053_v58 = vrot.slane %v14012_v41, 5  ;;  %v14054_v7 = vrot.slane %v6449_v12, 5  ;;  %v14055_v56 = vrot.slane %v6454_v13, 5  ;;  %v14056_v42 = vrot.slane %v6459_v14, 5 }
  0x58   :  { %v567_v51 = vsel %vm537_vm2, %v535_v37, %v14051_v26  ;;  %v568_v50 = vsel %vm537_vm2, %v536_v38, %v14052_v36  ;;  %v14057_v26 = vrot.slane %v6464_v15, 5  ;;  %v14058_v36 = vrot.slane %v6469_v16, 5 }
  0x59   :  { %v570_v49 = vsel %vm569_vm3, %v538_v39, %v14053_v58  ;;  %v571_v31 = vsel %vm569_vm3, %v539_v35, %v14054_v7  ;;  %v572_v32 = vsel %vm569_vm3, %v540_v34, %v14055_v56  ;;  %v573_v37 = vsel %vm569_vm3, %v541_v33, %v14056_v42 }
  0x5a   :  { %v574_v38 = vsel %vm569_vm3, %v542_v28, %v14057_v26  ;;  %v575_v39 = vsel %vm569_vm3, %v543_v45, %v14058_v36  ;;  %v14059_v58 = vrot.slane %v6474_v17, 5  ;;  %v14060_v7 = vrot.slane %v6479_v18, 5 }
  0x5b   :  { %v14061_v56 = vrot.slane %v6484_v19, 5  ;;  %v14062_v42 = vrot.slane %v6489_v20, 5  ;;  %v14063_v26 = vrot.slane %v6494_v21, 5  ;;  %v14064_v36 = vrot.slane %v6499_v22, 5 }
  0x5c   :  { %v576_v35 = vsel %vm569_vm3, %v544_v53, %v14059_v58  ;;  %v577_v34 = vsel %vm569_vm3, %v545_v54, %v14060_v7  ;;  %v14065_v58 = vld [vmem:[#allocation19_spill] sm:$0xff]  ;;  %v14067_v7 = vld [vmem:[#allocation20_spill] sm:$0xff] }
  0x5d   :  { %v578_v33 = vsel %vm569_vm3, %v546_v46, %v14061_v56  ;;  %v579_v28 = vsel %vm569_vm3, %v547_v47, %v14062_v42  ;;  %v580_v45 = vsel %vm569_vm3, %v548_v48, %v14063_v26  ;;  %v581_v53 = vsel %vm569_vm3, %v549_v9, %v14064_v36  ;;  %v14069_v56 = vld [vmem:[#allocation21_spill] sm:$0xff]  ;;  %v14073_v26 = vld [vmem:[#allocation26_spill] sm:$0xff]  ;;  %v14075_v36 = vld [vmem:[#allocation27_spill] sm:$0xff] }
  0x5e   :  { %v14066_v18 = vrot.slane %v14065_v58, 5  ;;  %v14068_v19 = vrot.slane %v14067_v7, 5  ;;  %v14070_v20 = vrot.slane %v14069_v56, 5  ;;  %v14071_v42 = vld [vmem:[#allocation25_spill] sm:$0xff]  ;;  %v14074_v22 = vrot.slane %v14073_v26, 5 }
  0x5f   :  { %v14072_v21 = vrot.slane %v14071_v42, 5  ;;  %v14076_v58 = vrot.slane %v14075_v36, 5 }
  0x60   :  { %v582_v54 = vsel %vm569_vm3, %v550_v2, %v14066_v18  ;;  %v583_v46 = vsel %vm569_vm3, %v551_v40, %v14068_v19  ;;  %v584_v47 = vsel %vm569_vm3, %v552_v59, %v14070_v20  ;;  %v586_v9 = vsel %vm569_vm3, %v554_v10, %v14074_v22  ;;  %v14077_v2 = vld [vmem:[#allocation28_spill] sm:$0xff]  ;;  %v14079_v40 = vld [vmem:[#allocation33_spill] sm:$0xff] }
  0x61   :  { %v585_v48 = vsel %vm569_vm3, %v553_v11, %v14072_v21  ;;  %v587_v18 = vsel %vm569_vm3, %v555_v3, %v14076_v58  ;;  %v14078_v7 = vrot.slane %v14077_v2, 5  ;;  %v14080_v56 = vrot.slane %v14079_v40, 5  ;;  %v14082_v11 = vld [vmem:[#allocation35_spill] sm:$0xff] }
  0x62   :  { %v14081_v59 = vrot.slane %v14036_v1, 5  ;;  %v14083_v26 = vrot.slane %v14082_v11, 5  ;;  %v14084_v10 = vrot.slane %v14040_v6, 5  ;;  %v14085_v58 = vrot.slane %v14042_v61, 5 }
  0x63   :  { %v588_v19 = vsel %vm569_vm3, %v556_v4, %v14078_v7  ;;  %v589_v20 = vsel %vm569_vm3, %v557_v8, %v14080_v56  ;;  %v14086_v7 = vrot.slane %v14044_v60, 5  ;;  %v14087_v56 = vrot.slane %v14001_v27, 5 }
  0x64   :  { %v590_v21 = vsel %vm569_vm3, %v558_v63, %v14081_v59  ;;  %v591_v22 = vsel %vm569_vm3, %v559_v62, %v14083_v26  ;;  %v592_v3 = vsel %vm569_vm3, %v560_v23, %v14084_v10  ;;  %v593_v4 = vsel %vm569_vm3, %v561_v24, %v14085_v58 }
  0x65   :  { %v594_v8 = vsel %vm569_vm3, %v562_v25, %v14086_v7  ;;  %v595_v63 = vsel %vm569_vm3, %v563_v29, %v14087_v56  ;;  %v14088_v59 = vrot.slane %v14047_v57, 5  ;;  %v14089_v26 = vrot.slane %v14005_v5, 5 }
  0x66   :  { %v14090_v10 = vrot.slane %v14007_v44, 5  ;;  %v14091_v58 = vrot.slane %v14009_v43, 5  ;;  %v14092_v7 = vrot.slane %v6663_v0, 5  ;;  %v14093_v56 = vrot.slane %v14012_v41, 4 }
  0x67   :  { %v596_v62 = vsel %vm569_vm3, %v564_v30, %v14088_v59  ;;  %v597_v23 = vsel %vm569_vm3, %v565_v55, %v14089_v26  ;;  %v14094_v59 = vrot.slane %v6449_v12, 4  ;;  %v14095_v26 = vrot.slane %v6454_v13, 4 }
  0x68   :  { %v598_v24 = vsel %vm569_vm3, %v566_v52, %v14090_v10  ;;  %v599_v25 = vsel %vm569_vm3, %v567_v51, %v14091_v58  ;;  %v600_v29 = vsel %vm569_vm3, %v568_v50, %v14092_v7  ;;  %v602_v30 = vsel %vm601_vm4, %v570_v49, %v14093_v56 }
  0x69   :  { %v603_v55 = vsel %vm601_vm4, %v571_v31, %v14094_v59  ;;  %v604_v52 = vsel %vm601_vm4, %v572_v32, %v14095_v26  ;;  %v14096_v10 = vrot.slane %v6459_v14, 4  ;;  %v14097_v58 = vrot.slane %v6464_v15, 4  ;;  %v14100_v59 = vld [vmem:[#allocation14_spill] sm:$0xff]  ;;  %v14102_v26 = vld [vmem:[#allocation15_spill] sm:$0xff] }
  0x6a   :  { %v14098_v7 = vrot.slane %v6469_v16, 4  ;;  %v14099_v56 = vrot.slane %v6474_v17, 4  ;;  %v14101_v13 = vrot.slane %v14100_v59, 4  ;;  %v14103_v14 = vrot.slane %v14102_v26, 4 }
  0x6b   :  { %v605_v51 = vsel %vm601_vm4, %v573_v37, %v14096_v10  ;;  %v606_v50 = vsel %vm601_vm4, %v574_v38, %v14097_v58  ;;  %v14104_v10 = vld [vmem:[#allocation16_spill] sm:$0xff]  ;;  %v14106_v58 = vld [vmem:[#allocation17_spill] sm:$0xff] }
  0x6c   :  { %v607_v49 = vsel %vm601_vm4, %v575_v39, %v14098_v7  ;;  %v608_v31 = vsel %vm601_vm4, %v576_v35, %v14099_v56  ;;  %v609_v32 = vsel %vm601_vm4, %v577_v34, %v14101_v13  ;;  %v610_v37 = vsel %vm601_vm4, %v578_v33, %v14103_v14  ;;  %v14108_v7 = vld [vmem:[#allocation18_spill] sm:$0xff]  ;;  %v14110_v56 = vld [vmem:[#allocation19_spill] sm:$0xff]  ;;  %v14112_v34 = vld [vmem:[#allocation20_spill] sm:$0xff] }
  0x6d   :  { %v14105_v15 = vrot.slane %v14104_v10, 4  ;;  %v14107_v16 = vrot.slane %v14106_v58, 4  ;;  %v14109_v17 = vrot.slane %v14108_v7, 4  ;;  %v14111_v59 = vrot.slane %v14110_v56, 4  ;;  %v14114_v33 = vld [vmem:[#allocation21_spill] sm:$0xff] }
  0x6e   :  { %v14113_v26 = vrot.slane %v14112_v34, 4  ;;  %v14115_v10 = vrot.slane %v14114_v33, 4 }
  0x6f   :  { %v611_v38 = vsel %vm601_vm4, %v579_v28, %v14105_v15  ;;  %v612_v39 = vsel %vm601_vm4, %v580_v45, %v14107_v16  ;;  %v613_v35 = vsel %vm601_vm4, %v581_v53, %v14109_v17  ;;  %v614_v13 = vsel %vm601_vm4, %v582_v54, %v14111_v59  ;;  %v14117_v45 = vld [vmem:[#allocation26_spill] sm:$0xff] }
  0x70   :  { %v615_v14 = vsel %vm601_vm4, %v583_v46, %v14113_v26  ;;  %v616_v15 = vsel %vm601_vm4, %v584_v47, %v14115_v10  ;;  %v14116_v28 = vrot.slane %v14071_v42, 4  ;;  %v14118_v7 = vrot.slane %v14117_v45, 4 }
  0x71   :  { %v14119_v53 = vrot.slane %v14075_v36, 4  ;;  %v14120_v59 = vrot.slane %v14077_v2, 4  ;;  %v14121_v26 = vrot.slane %v14079_v40, 4  ;;  %v14122_v10 = vrot.slane %v14036_v1, 4 }
  0x72   :  { %v617_v16 = vsel %vm601_vm4, %v585_v48, %v14116_v28  ;;  %v618_v17 = vsel %vm601_vm4, %v586_v9, %v14118_v7  ;;  %v14123_v28 = vrot.slane %v14082_v11, 4  ;;  %v14124_v7 = vrot.slane %v14040_v6, 4 }
  0x73   :  { %v619_v54 = vsel %vm601_vm4, %v587_v18, %v14119_v53  ;;  %v620_v46 = vsel %vm601_vm4, %v588_v19, %v14120_v59  ;;  %v621_v47 = vsel %vm601_vm4, %v589_v20, %v14121_v26  ;;  %v622_v48 = vsel %vm601_vm4, %v590_v21, %v14122_v10 }
  0x74   :  { %v623_v9 = vsel %vm601_vm4, %v591_v22, %v14123_v28  ;;  %v624_v18 = vsel %vm601_vm4, %v592_v3, %v14124_v7  ;;  %v14125_v53 = vrot.slane %v14042_v61, 4  ;;  %v14126_v59 = vrot.slane %v14044_v60, 4 }
  0x75   :  { %v14127_v26 = vrot.slane %v14001_v27, 4  ;;  %v14128_v10 = vrot.slane %v14047_v57, 4  ;;  %v14129_v28 = vrot.slane %v14005_v5, 4  ;;  %v14130_v7 = vrot.slane %v14007_v44, 4 }
  0x76   :  { %v625_v19 = vsel %vm601_vm4, %v593_v4, %v14125_v53  ;;  %v626_v20 = vsel %vm601_vm4, %v594_v8, %v14126_v59  ;;  %v14131_v53 = vrot.slane %v14009_v43, 4  ;;  %v14132_v59 = vrot.slane %v6663_v0, 4 }
  0x77   :  { %v627_v21 = vsel %vm601_vm4, %v595_v63, %v14127_v26  ;;  %v628_v22 = vsel %vm601_vm4, %v596_v62, %v14128_v10  ;;  %v629_v3 = vsel %vm601_vm4, %v597_v23, %v14129_v28  ;;  %v630_v4 = vsel %vm601_vm4, %v598_v24, %v14130_v7  ;;  %v14135_v28 = vld [vmem:[#allocation9_spill] sm:$0xff]  ;;  %v14137_v7 = vld [vmem:[#allocation10_spill] sm:$0xff] }
  0x78   :  { %v631_v8 = vsel %vm601_vm4, %v599_v25, %v14131_v53  ;;  %v632_v63 = vsel %vm601_vm4, %v600_v29, %v14132_v59  ;;  %v14133_v26 = vrot.slane %v14012_v41, 4  ;;  %v14134_v10 = vrot.slane %v6449_v12, 4  ;;  %v14139_v53 = vld [vmem:[#allocation11_spill] sm:$0xff]  ;;  %v14141_v59 = vld [vmem:[#allocation12_spill] sm:$0xff] }
  0x79   :  { %v14136_v44 = vrot.slane %v14135_v28, 4  ;;  %v14138_v43 = vrot.slane %v14137_v7, 4  ;;  %v14140_v0 = vrot.slane %v14139_v53, 4  ;;  %v14142_v41 = vrot.slane %v14141_v59, 4 }
  0x7a   :  { %v634_v62 = vsel %vm633_vm5, %v602_v30, %v14133_v26  ;;  %v635_v23 = vsel %vm633_vm5, %v603_v55, %v14134_v10  ;;  %v14143_v26 = vld [vmem:[#allocation13_spill] sm:$0xff]  ;;  %v14145_v10 = vld [vmem:[#allocation14_spill] sm:$0xff] }
  0x7b   :  { %v636_v24 = vsel %vm633_vm5, %v604_v52, %v14136_v44  ;;  %v637_v25 = vsel %vm633_vm5, %v605_v51, %v14138_v43  ;;  %v638_v29 = vsel %vm633_vm5, %v606_v50, %v14140_v0  ;;  %v639_v30 = vsel %vm633_vm5, %v607_v49, %v14142_v41  ;;  %v14147_v52 = vld [vmem:[#allocation15_spill] sm:$0xff]  ;;  %v14149_v51 = vld [vmem:[#allocation16_spill] sm:$0xff]  ;;  %v14152_v49 = vld [vmem:[#allocation18_spill] sm:$0xff] }
  0x7c   :  { %v14144_v12 = vrot.slane %v14143_v26, 4  ;;  %v14146_v28 = vrot.slane %v14145_v10, 4  ;;  %v14148_v7 = vrot.slane %v14147_v52, 4  ;;  %v14150_v53 = vrot.slane %v14149_v51, 4 }
  0x7d   :  { %v14151_v50 = vrot.slane %v14106_v58, 4  ;;  %v14153_v26 = vrot.slane %v14152_v49, 4 }
  0x7e   :  { %v640_v55 = vsel %vm633_vm5, %v608_v31, %v14144_v12  ;;  %v641_v44 = vsel %vm633_vm5, %v609_v32, %v14146_v28  ;;  %v642_v43 = vsel %vm633_vm5, %v610_v37, %v14148_v7  ;;  %v643_v0 = vsel %vm633_vm5, %v611_v38, %v14150_v53 }
  0x7f   :  { %v644_v41 = vsel %vm633_vm5, %v612_v39, %v14151_v50  ;;  %v645_v12 = vsel %vm633_vm5, %v613_v35, %v14153_v26  ;;  %v14154_v31 = vrot.slane %v14110_v56, 4  ;;  %v14155_v28 = vrot.slane %v14112_v34, 4 }
  0x80   :  { %v14156_v7 = vrot.slane %v14114_v33, 4  ;;  %v14157_v53 = vrot.slane %v14071_v42, 4  ;;  %v14158_v50 = vrot.slane %v14117_v45, 4  ;;  %v14159_v26 = vrot.slane %v14075_v36, 4 }
  0x81   :  { %v646_v32 = vsel %vm633_vm5, %v614_v13, %v14154_v31  ;;  %v647_v37 = vsel %vm633_vm5, %v615_v14, %v14155_v28  ;;  %v14160_v31 = vrot.slane %v14077_v2, 4  ;;  %v14161_v28 = vrot.slane %v14079_v40, 4 }
  0x82   :  { %v648_v38 = vsel %vm633_vm5, %v616_v15, %v14156_v7  ;;  %v649_v39 = vsel %vm633_vm5, %v617_v16, %v14157_v53  ;;  %v650_v35 = vsel %vm633_vm5, %v618_v17, %v14158_v50  ;;  %v651_v13 = vsel %vm633_vm5, %v619_v54, %v14159_v26 }
  0x83   :  { %v652_v14 = vsel %vm633_vm5, %v620_v46, %v14160_v31  ;;  %v653_v15 = vsel %vm633_vm5, %v621_v47, %v14161_v28  ;;  %v14162_v7 = vrot.slane %v14036_v1, 4  ;;  %v14163_v53 = vrot.slane %v14082_v11, 4 }
  0x84   :  { %v14164_v50 = vrot.slane %v14040_v6, 4  ;;  %v14165_v26 = vrot.slane %v14042_v61, 4  ;;  %v14166_v31 = vrot.slane %v14044_v60, 4  ;;  %v14167_v28 = vrot.slane %v14001_v27, 4 }
  0x85   :  { %v654_v16 = vsel %vm633_vm5, %v622_v48, %v14162_v7  ;;  %v655_v17 = vsel %vm633_vm5, %v623_v9, %v14163_v53  ;;  %v14168_v7 = vrot.slane %v14047_v57, 4  ;;  %v14169_v53 = vrot.slane %v14005_v5, 4 }
  0x86   :  { %v656_v54 = vsel %vm633_vm5, %v624_v18, %v14164_v50  ;;  %v657_v46 = vsel %vm633_vm5, %v625_v19, %v14165_v26  ;;  %v658_v47 = vsel %vm633_vm5, %v626_v20, %v14166_v31  ;;  %v659_v48 = vsel %vm633_vm5, %v627_v21, %v14167_v28  ;;  %v14170_v50 = vld [vmem:[#allocation50_spill] sm:$0xff]  ;;  %v14172_v26 = vld [vmem:[#allocation55_spill] sm:$0xff]  ;;  %v14174_v31 = vld [vmem:[#allocation60_spill] sm:$0xff] }
  0x87   :  { %v660_v9 = vsel %vm633_vm5, %v628_v22, %v14168_v7  ;;  %v661_v18 = vsel %vm633_vm5, %v629_v3, %v14169_v53  ;;  %v14171_v61 = vrot.slane %v14170_v50, 4  ;;  %v14173_v60 = vrot.slane %v14172_v26, 4  ;;  %v14176_v28 = vld [vmem:[#allocation7_spill] sm:$0xff]  ;;  %v14179_v7 = vld [vmem:[#allocation8_spill] sm:$0xff]  ;;  %v14182_v53 = vld [vmem:[#allocation9_spill] sm:$0xff] }
  0x88   :  { %v14175_v27 = vrot.slane %v14174_v31, 4  ;;  %v14177_v57 = vrot.slane %v14176_v28, 3  ;;  %v14180_v5 = vrot.slane %v14179_v7, 3  ;;  %v14196_v7 = vrot.slane %v14145_v10, 3 }
  0x89   :  { %v662_v19 = vsel %vm633_vm5, %v630_v4, %v14171_v61  ;;  %v663_v20 = vsel %vm633_vm5, %v631_v8, %v14173_v60  ;;  %v14183_v61 = vrot.slane %v14182_v53, 3  ;;  %v14185_v60 = vld [vmem:[#allocation10_spill] sm:$0xff]  ;;  %v14198_v53 = vrot.slane %v14147_v52, 3 }
  0x8a   :  { %v664_v21 = vsel %vm633_vm5, %v632_v63, %v14175_v27  ;;  %v7432_v22 = vsel %vm665_vm6, %v634_v62, %v14177_v57  ;;  %v7437_v3 = vsel %vm665_vm6, %v635_v23, %v14180_v5  ;;  %v14186_v8 = vrot.slane %v14185_v60, 3  ;;  %v14188_v27 = vld [vmem:[#allocation11_spill] sm:$0xff]  ;;  %v14193_v23 = vld [vmem:[#allocation13_spill] sm:$0xff] }
  0x8b   :  { %14178 = vst [vmem:[#allocation34_spill] sm:$0xff] %v7432_v22  ;;  %14181 = vst [vmem:[#allocation36_spill] sm:$0xff] %v7437_v3  ;;  %v7442_v4 = vsel %vm665_vm6, %v636_v24, %v14183_v61  ;;  %v14189_v63 = vrot.slane %v14188_v27, 3  ;;  %v14191_v62 = vrot.slane %v14141_v59, 3  ;;  %v14194_v28 = vrot.slane %v14193_v23, 3  ;;  %v14228_v60 = vld [vmem:[#allocation41_spill] sm:$0xff]  ;;  %v7566_v23 = vpop.permute.xlu0 %699 }
  0x8c   :  { %14184 = vst [vmem:[#allocation25_spill] sm:$0xff] %v7442_v4  ;;  %v7447_v31 = vsel %vm665_vm6, %v637_v25, %v14186_v8  ;;  %v7467_v25 = vsel %vm665_vm6, %v641_v44, %v14196_v7  ;;  %v14200_v59 = vrot.slane %v14149_v51, 3  ;;  %v14202_v61 = vrot.slane %v14106_v58, 3  ;;  %v14231_v8 = vld [vmem:[#allocation42_spill] sm:$0xff]  ;;  %v14234_v27 = vld [vmem:[#allocation43_spill] sm:$0xff] }
  0x8d   :  { %14187 = vst [vmem:[#allocation27_spill] sm:$0xff] %v7447_v31  ;;  %v7452_v57 = vsel %vm665_vm6, %v638_v29, %v14189_v63  ;;  %v7457_v5 = vsel %vm665_vm6, %v639_v30, %v14191_v62  ;;  %v7462_v24 = vsel %vm665_vm6, %v640_v55, %v14194_v28  ;;  %14197 = vst [vmem:[#allocation17_spill] sm:$0xff] %v7467_v25  ;;  %v14204_v10 = vrot.slane %v14152_v49, 3  ;;  %v14237_v63 = vld [vmem:[#allocation44_spill] sm:$0xff]  ;;  %v7564_v62 = vpop.permute.xlu1 %773 }
  0x8e   :  { %14190 = vst [vmem:[#allocation28_spill] sm:$0xff] %v7452_v57  ;;  %14192 = vst [vmem:[#allocation33_spill] sm:$0xff] %v7457_v5  ;;  %v7472_v29 = vsel %vm665_vm6, %v642_v43, %v14198_v53  ;;  %v7477_v30 = vsel %vm665_vm6, %v643_v0, %v14200_v59  ;;  %v7482_v55 = vsel %vm665_vm6, %v644_v41, %v14202_v61  ;;  %v14206_v52 = vrot.slane %v14110_v56, 3 }
  0x8f   :  { %14195 = vst [vmem:[#allocation35_spill] sm:$0xff] %v7462_v24  ;;  %14199 = vst [vmem:[#allocation19_spill] sm:$0xff] %v7472_v29  ;;  %v7487_v44 = vsel %vm665_vm6, %v645_v12, %v14204_v10  ;;  %v14208_v51 = vrot.slane %v14112_v34, 3  ;;  %v14210_v58 = vrot.slane %v14114_v33, 3  ;;  %v14212_v49 = vrot.slane %v14071_v42, 3 }
  0x90   :  { %14201 = vst [vmem:[#allocation20_spill] sm:$0xff] %v7477_v30  ;;  %14203 = vst [vmem:[#allocation21_spill] sm:$0xff] %v7482_v55  ;;  %v7492_v43 = vsel %vm665_vm6, %v646_v32, %v14206_v52  ;;  %v14214_v56 = vrot.slane %v14117_v45, 3  ;;  %v14216_v34 = vrot.slane %v14075_v36, 3  ;;  %v14218_v33 = vrot.slane %v14077_v2, 3 }
  0x91   :  { %14205 = vst [vmem:[#allocation26_spill] sm:$0xff] %v7487_v44  ;;  %14207 = vst [vmem:[#allocation12_spill] sm:$0xff] %v7492_v43  ;;  %v7497_v0 = vsel %vm665_vm6, %v647_v37, %v14208_v51  ;;  %v7502_v41 = vsel %vm665_vm6, %v648_v38, %v14210_v58  ;;  %v7507_v12 = vsel %vm665_vm6, %v649_v39, %v14212_v49  ;;  %v14220_v42 = vrot.slane %v14079_v40, 3 }
  0x92   :  { %14209 = vst [vmem:[#allocation14_spill] sm:$0xff] %v7497_v0  ;;  %14211 = vst [vmem:[#allocation15_spill] sm:$0xff] %v7502_v41  ;;  %v7512_v32 = vsel %vm665_vm6, %v650_v35, %v14214_v56  ;;  %v7517_v37 = vsel %vm665_vm6, %v651_v13, %v14216_v34  ;;  %v7522_v38 = vsel %vm665_vm6, %v652_v14, %v14218_v33  ;;  %v14222_v45 = vrot.slane %v14036_v1, 3  ;;  %v14303_v41 = vld [vmem:[#allocation65_spill] sm:$0xff]  ;;  %v14305_v0 = vld [vmem:[#allocation66_spill] sm:$0xff] }
  0x93   :  { %14213 = vst [vmem:[#allocation16_spill] sm:$0xff] %v7507_v12  ;;  %14215 = vst [vmem:[#allocation18_spill] sm:$0xff] %v7512_v32  ;;  %v7527_v39 = vsel %vm665_vm6, %v653_v15, %v14220_v42  ;;  %v14224_v36 = vrot.slane %v14082_v11, 3  ;;  %v14226_v2 = vrot.slane %v14040_v6, 3  ;;  %v14229_v40 = vrot.slane %v14228_v60, 3  ;;  %v7631_v42 = vpop.permute.xlu1 %778  ;;  %v14301_v32 = vld [vmem:[#allocation64_spill] sm:$0xff] }
  0x94   :  { %14217 = vst [vmem:[#allocation50_spill] sm:$0xff] %v7517_v37  ;;  %14219 = vst [vmem:[#allocation55_spill] sm:$0xff] %v7522_v38  ;;  %v7532_v35 = vsel %vm665_vm6, %v654_v16, %v14222_v45  ;;  %v14232_v1 = vrot.slane %v14231_v8, 3  ;;  %v14235_v11 = vrot.slane %v14234_v27, 3  ;;  %v14238_v6 = vrot.slane %v14237_v63, 3  ;;  %v705_v45 = vpop.permute.xlu0 %704  ;;  %v14267_v27 = vld [vmem:[#allocation22_spill] sm:$0xff] }
  0x95   :  { %14221 = vst [vmem:[#allocation7_spill] sm:$0xff] %v7527_v39  ;;  %14223 = vst [vmem:[#allocation8_spill] sm:$0xff] %v7532_v35  ;;  %v7537_v13 = vsel %vm665_vm6, %v655_v17, %v14224_v36  ;;  %v7542_v14 = vsel %vm665_vm6, %v656_v54, %v14226_v2  ;;  %v7547_v15 = vsel %vm665_vm6, %v657_v46, %v14229_v40  ;;  %v14242_v46 = vld [vmem:[#allocation49_spill] sm:$0xff]  ;;  %v707_v52 = vmul.f32 0.0, %v7566_v23  ;;  %v14268_v63 = vld [vmem:[#allocation23_spill] sm:$0xff] }
  0x96   :  { %14225 = vst [vmem:[#allocation9_spill] sm:$0xff] %v7537_v13  ;;  %14227 = vst [vmem:[#allocation10_spill] sm:$0xff] %v7542_v14  ;;  %v7552_v16 = vsel %vm665_vm6, %v658_v47, %v14232_v1  ;;  %v7557_v17 = vsel %vm665_vm6, %v659_v48, %v14235_v11  ;;  %v7562_v54 = vsel %vm665_vm6, %v660_v9, %v14238_v6  ;;  %v14243_v28 = vrot.slane %v14242_v46, 3  ;;  %v14249_v9 = vld [vmem:[#allocation60_spill] sm:$0xff]  ;;  %v14295_v14 = vld [vmem:[#allocation61_spill] sm:$0xff] }
  0x97   :  { %14230 = vst [vmem:[#allocation11_spill] sm:$0xff] %v7547_v15  ;;  %14233 = vst [vmem:[#allocation13_spill] sm:$0xff] %v7552_v16  ;;  %v14245_v47 = vrot.slane %v14170_v50, 3  ;;  %v14247_v48 = vrot.slane %v14172_v26, 3  ;;  %v14250_v61 = vrot.slane %v14249_v9, 3  ;;  %v7594_v50 = vmul.f32 %v7566_v23, %v7432_v22  ;;  %v14269_v46 = vld [vmem:[#allocation24_spill] sm:$0xff] }
  0x98   :  { %14236 = vst [vmem:[#allocation41_spill] sm:$0xff] %v7557_v17  ;;  %14239 = vst [vmem:[#allocation42_spill] sm:$0xff] %v7562_v54  ;;  %v7571_v7 = vsel %vm665_vm6, %v661_v18, %v14243_v28  ;;  %v7590_v18 = vmul.f32 0.0, %v7564_v62  ;;  %v7610_v51 = vmul.f32 %v7566_v23, %v7452_v57  ;;  %v7614_v58 = vmul.f32 %v7566_v23, %v7457_v5  ;;  %v14284_v5 = vld [vmem:[#allocation51_spill] sm:$0xff]  ;;  %v14287_v22 = vld [vmem:[#allocation54_spill] sm:$0xff] }
  0x99   :  { %14240 = vst [vmem:[#allocation43_spill] sm:$0xff] %v7564_v62  ;;  %14241 = vst [vmem:[#allocation44_spill] sm:$0xff] %v7566_v23  ;;  %v7576_v53 = vsel %vm665_vm6, %v662_v19, %v14245_v47  ;;  %v7581_v59 = vsel %vm665_vm6, %v663_v20, %v14247_v48  ;;  %v7586_v10 = vsel %vm665_vm6, %v664_v21, %v14250_v61  ;;  %v7650_v8 = vmul.f32 0.0, %v7631_v42  ;;  %v14270_v47 = vld [vmem:[#allocation29_spill] sm:$0xff]  ;;  %v14271_v61 = vld [vmem:[#allocation30_spill] sm:$0xff] }
  0x9a   :  { %14244 = vst [vmem:[#allocation49_spill] sm:$0xff] %v7571_v7  ;;  %14246 = vst [vmem:[#allocation67_spill] sm:$0xff] %v7576_v53  ;;  %v7598_v19 = vmul.f32 %v7566_v23, %v7437_v3  ;;  %v7602_v20 = vmul.f32 %v7566_v23, %v7442_v4  ;;  %v7606_v21 = vmul.f32 %v7566_v23, %v7447_v31  ;;  %v7652_v1 = vmul.f32 0.0, %v705_v45  ;;  %v14285_v31 = vld [vmem:[#allocation52_spill] sm:$0xff]  ;;  %v14286_v3 = vld [vmem:[#allocation53_spill] sm:$0xff] }
  0x9b   :  { %14248 = vst [vmem:[#allocation68_spill] sm:$0xff] %v7581_v59  ;;  %14251 = vst [vmem:[#allocation60_spill] sm:$0xff] %v7586_v10  ;;  %v7617_v49 = vadd.f32 %v7590_v18, %v707_v52  ;;  %v7621_v56 = vmul.f32 %v7566_v23, %v7462_v24  ;;  %v7625_v34 = vmul.f32 %v7566_v23, %v7467_v25  ;;  %v14283_v25 = vld [vmem:[#allocation48_spill] sm:$0xff]  ;;  %v14289_v7 = vld [vmem:[#allocation57_spill] sm:$0xff] }
  0x9c   :  { %14252 = vst [vmem:[#allocation69_spill] sm:$0xff] %v7590_v18  ;;  %14253 = vst [vmem:[#allocation70_spill] sm:$0xff] %v7594_v50  ;;  %v7629_v33 = vmul.f32 %v7566_v23, %v7472_v29  ;;  %v7635_v36 = vmul.f32 %v7566_v23, %v7477_v30  ;;  %v7639_v2 = vmul.f32 %v7566_v23, %v7482_v55  ;;  %v14279_v18 = vld [vmem:[#allocation45_spill] sm:$0xff]  ;;  %v14281_v55 = vld [vmem:[#allocation47_spill] sm:$0xff]  ;;  %v7698_v29 = vpop.permute.xlu0 %909 }
  0x9d   :  { %14254 = vst [vmem:[#allocation71_spill] sm:$0xff] %v7598_v19  ;;  %14255 = vst [vmem:[#allocation72_spill] sm:$0xff] %v7602_v20  ;;  %v7643_v60 = vmul.f32 %v7566_v23, %v7487_v44  ;;  %v7647_v40 = vmul.f32 %v7566_v23, %v7492_v43  ;;  %v7655_v11 = vmul.f32 %v705_v45, %v14267_v27  ;;  %v14278_v20 = vld [vmem:[#allocation40_spill] sm:$0xff]  ;;  %v14280_v43 = vld [vmem:[#allocation46_spill] sm:$0xff] }
  0x9e   :  { %14256 = vst [vmem:[#allocation73_spill] sm:$0xff] %v7606_v21  ;;  %14257 = vst [vmem:[#allocation74_spill] sm:$0xff] %v7610_v51  ;;  %v7658_v6 = vmul.f32 %v705_v45, %v14268_v63  ;;  %v7661_v28 = vmul.f32 %v705_v45, %v14269_v46  ;;  %v7664_v48 = vmul.f32 %v705_v45, %v14270_v47  ;;  %v7684_v21 = vpop.permute.xlu1 %914  ;;  %v14288_v59 = vld [vmem:[#allocation56_spill] sm:$0xff]  ;;  %v14291_v54 = vld [vmem:[#allocation58_spill] sm:$0xff] }
  0x9f   :  { %14258 = vst [vmem:[#allocation75_spill] sm:$0xff] %v7614_v58  ;;  %14259 = vst [vmem:[#allocation76_spill] sm:$0xff] %v7617_v49  ;;  %v7667_v52 = vmul.f32 %v705_v45, %v14271_v61  ;;  %v14272_v49 = vld [vmem:[#allocation31_spill] sm:$0xff]  ;;  %v7687_v19 = vmul.f32 %v705_v45, %v14278_v20  ;;  %v7690_v50 = vmul.f32 %v705_v45, %v14279_v18  ;;  %v14297_v35 = vld [vmem:[#allocation62_spill] sm:$0xff] }
  0xa0   :  { %14260 = vst [vmem:[#allocation77_spill] sm:$0xff] %v7621_v56  ;;  %14261 = vst [vmem:[#allocation78_spill] sm:$0xff] %v7625_v34  ;;  %v14275_v34 = vld [vmem:[#allocation38_spill] sm:$0xff]  ;;  %v14276_v58 = vld [vmem:[#allocation39_spill] sm:$0xff]  ;;  %v7693_v44 = vmul.f32 %v705_v45, %v14280_v43  ;;  %v7696_v30 = vmul.f32 %v705_v45, %v14281_v55  ;;  %v7701_v24 = vmul.f32 %v705_v45, %v14283_v25 }
  0xa1   :  { %14262 = vst [vmem:[#allocation79_spill] sm:$0xff] %v7629_v33  ;;  %14263 = vst [vmem:[#allocation80_spill] sm:$0xff] %v7635_v36  ;;  %v14274_v36 = vld [vmem:[#allocation37_spill] sm:$0xff]  ;;  %v7679_v56 = vmul.f32 %v705_v45, %v14275_v34  ;;  %v7682_v51 = vmul.f32 %v705_v45, %v14276_v58  ;;  %v7704_v57 = vmul.f32 %v705_v45, %v14284_v5  ;;  %v14293_v16 = vld [vmem:[#allocation59_spill] sm:$0xff] }
  0xa2   :  { %14264 = vst [vmem:[#allocation81_spill] sm:$0xff] %v7639_v2  ;;  %14265 = vst [vmem:[#allocation82_spill] sm:$0xff] %v7643_v60  ;;  %v14273_v60 = vld [vmem:[#allocation32_spill] sm:$0xff]  ;;  %v7676_v33 = vmul.f32 %v705_v45, %v14274_v36  ;;  %v7707_v4 = vmul.f32 %v705_v45, %v14285_v31  ;;  %v7710_v62 = vmul.f32 %v705_v45, %v14286_v3  ;;  %v14299_v38 = vld [vmem:[#allocation63_spill] sm:$0xff] }
  0xa3   :  { %14266 = vst [vmem:[#allocation83_spill] sm:$0xff] %v7647_v40  ;;  %v7670_v40 = vmul.f32 %v705_v45, %v14272_v49  ;;  %v7673_v2 = vmul.f32 %v705_v45, %v14273_v60  ;;  %14277 = vst [vmem:[#allocation84_spill] sm:$0xff] %v7684_v21  ;;  %v7713_v10 = vmul.f32 %v705_v45, %v14287_v22 }
  0xa4   :  { %14282 = vst [vmem:[#allocation85_spill] sm:$0xff] %v7698_v29  ;;  %v7716_v53 = vmul.f32 %v705_v45, %v14288_v59  ;;  %v7719_v29 = vmul.f32 %v705_v45, %v14289_v7  ;;  %v7722_v17 = vmul.f32 %v705_v45, %v14291_v54  ;;  %v7725_v15 = vmul.f32 %v705_v45, %v14293_v16 }
  0xa5   :  { %v7728_v13 = vmul.f32 %v705_v45, %v14295_v14  ;;  %v7731_v39 = vmul.f32 %v705_v45, %v14297_v35  ;;  %v7734_v37 = vmul.f32 %v705_v45, %v14299_v38  ;;  %v7737_v12 = vmul.f32 %v705_v45, %v14301_v32 }
  0xa6   :  { %14290 = vst [vmem:[#allocation86_spill] sm:$0xff] %v7719_v29  ;;  %14292 = vst [vmem:[#allocation87_spill] sm:$0xff] %v7722_v17  ;;  %v7740_v23 = vmul.f32 %v705_v45, %v14303_v41  ;;  %v7743_v21 = vmul.f32 %v705_v45, %v14305_v0  ;;  %v7751_v29 = vpop.permute.xlu0 %1111 }
  0xa7   :  { %14294 = vst [vmem:[#allocation88_spill] sm:$0xff] %v7725_v15  ;;  %14296 = vst [vmem:[#allocation89_spill] sm:$0xff] %v7728_v13  ;;  %v14307_v15 = vrot.slane %v14172_v26, 2  ;;  %v7749_v13 = vpop.permute.xlu1 %1116 }
  0xa8   :  { %14298 = vst [vmem:[#allocation90_spill] sm:$0xff] %v7731_v39  ;;  %14300 = vst [vmem:[#allocation91_spill] sm:$0xff] %v7734_v37  ;;  %v14310_v39 = vrot.slane %v14249_v9, 2  ;;  %v794_v9 = vmul.f32 %v7631_v42, %v14272_v49  ;;  %v808_v49 = vmul.f32 %v7631_v42, %v14280_v43  ;;  %v820_v43 = vmul.f32 %v7631_v42, %v14287_v22 }
  0xa9   :  { %14302 = vst [vmem:[#allocation92_spill] sm:$0xff] %v7737_v12  ;;  %14304 = vst [vmem:[#allocation93_spill] sm:$0xff] %v7740_v23  ;;  %v7747_v17 = vmul.f32 %v705_v45, %v14307_v15  ;;  %v784_v12 = vmul.f32 %v7631_v42, %v14267_v27  ;;  %v786_v23 = vmul.f32 %v7631_v42, %v14268_v63 }
  0xaa   :  { %14306 = vst [vmem:[#allocation94_spill] sm:$0xff] %v7743_v21  ;;  %14308 = vst [vmem:[#allocation95_spill] sm:$0xff] %v7749_v13  ;;  %v7755_v37 = vmul.f32 %v705_v45, %v14310_v39  ;;  %v788_v21 = vmul.f32 %v7631_v42, %v14269_v46  ;;  %v790_v15 = vmul.f32 %v7631_v42, %v14270_v47 }
  0xab   :  { %14309 = vst [vmem:[#allocation96_spill] sm:$0xff] %v7751_v29  ;;  %v792_v13 = vmul.f32 %v7631_v42, %v14271_v61  ;;  %v796_v39 = vmul.f32 %v7631_v42, %v14273_v60  ;;  %v798_v45 = vmul.f32 %v7631_v42, %v14274_v36  ;;  %v800_v29 = vmul.f32 %v7631_v42, %v14275_v34  ;;  %v7787_v63 = vpop.permute.xlu1 %1126  ;;  %v7789_v34 = vpop.permute.xlu0 %1121 }
  0xac   :  { %v802_v46 = vmul.f32 %v7631_v42, %v14276_v58  ;;  %v804_v47 = vmul.f32 %v7631_v42, %v14278_v20  ;;  %v806_v61 = vmul.f32 %v7631_v42, %v14279_v18  ;;  %v810_v60 = vmul.f32 %v7631_v42, %v14281_v55  ;;  %14311 = vst [vmem:[#allocation97_spill] sm:$0xff] %v7787_v63 }
  0xad   :  { %v812_v36 = vmul.f32 %v7631_v42, %v14283_v25  ;;  %14312 = vst [vmem:[#allocation98_spill] sm:$0xff] %v7789_v34  ;;  %v814_v58 = vmul.f32 %v7631_v42, %v14284_v5  ;;  %v816_v20 = vmul.f32 %v7631_v42, %v14285_v31  ;;  %v818_v18 = vmul.f32 %v7631_v42, %v14286_v3 }
  0xae   :  { %v822_v55 = vmul.f32 %v7631_v42, %v14288_v59  ;;  %v824_v63 = vmul.f32 %v7631_v42, %v14289_v7  ;;  %v826_v34 = vmul.f32 %v7631_v42, %v14291_v54  ;;  %v828_v5 = vmul.f32 %v7631_v42, %v14293_v16 }
  0xaf   :  { %v830_v31 = vmul.f32 %v7631_v42, %v14295_v14  ;;  %v832_v3 = vmul.f32 %v7631_v42, %v14297_v35  ;;  %v834_v22 = vmul.f32 %v7631_v42, %v14299_v38  ;;  %v836_v59 = vmul.f32 %v7631_v42, %v14301_v32 }
  0xb0   :  { %v838_v7 = vmul.f32 %v7631_v42, %v14303_v41  ;;  %v840_v54 = vmul.f32 %v7631_v42, %v14305_v0  ;;  %v14313_v16 = vrot.slane %v14172_v26, 2  ;;  %v844_v14 = vadd.f32 %v7650_v8, %v7652_v1 }
  0xb1   :  { %v846_v35 = vadd.f32 %v7650_v8, %v7655_v11  ;;  %v848_v38 = vadd.f32 %v784_v12, %v7658_v6  ;;  %v850_v32 = vadd.f32 %v786_v23, %v7661_v28  ;;  %v852_v27 = vadd.f32 %v788_v21, %v7664_v48  ;;  %v14337_v11 = vld [vmem:[#allocation22_spill] sm:$0xff]  ;;  %v14339_v6 = vld [vmem:[#allocation24_spill] sm:$0xff]  ;;  %v14344_v48 = vld [vmem:[#allocation37_spill] sm:$0xff] }
  0xb2   :  { %v842_v25 = vmul.f32 %v7631_v42, %v14313_v16  ;;  %v854_v41 = vadd.f32 %v790_v15, %v7667_v52  ;;  %v856_v0 = vadd.f32 %v792_v13, %v7670_v40  ;;  %v858_v26 = vadd.f32 %v794_v9, %v7673_v2  ;;  %v14332_v2 = vld [vmem:[#allocation94_spill] sm:$0xff]  ;;  %v14346_v9 = vld [vmem:[#allocation39_spill] sm:$0xff] }
  0xb3   :  { %v860_v16 = vadd.f32 %v796_v39, %v7676_v33  ;;  %v862_v42 = vadd.f32 %v798_v45, %v7679_v56  ;;  %v864_v1 = vadd.f32 %v800_v29, %v7682_v51  ;;  %v7836_v8 = vadd.f32 %v802_v46, %v7687_v19  ;;  %v14340_v46 = vld [vmem:[#allocation29_spill] sm:$0xff]  ;;  %v14341_v28 = vld [vmem:[#allocation30_spill] sm:$0xff]  ;;  %v14347_v45 = vld [vmem:[#allocation40_spill] sm:$0xff] }
  0xb4   :  { %v7839_v12 = vadd.f32 %v804_v47, %v7690_v50  ;;  %v7842_v23 = vadd.f32 %v806_v61, %v7693_v44  ;;  %v7845_v21 = vadd.f32 %v808_v49, %v7696_v30  ;;  %v7848_v13 = vadd.f32 %v810_v60, %v7701_v24  ;;  %v14316_v30 = vld [vmem:[#allocation86_spill] sm:$0xff]  ;;  %v14318_v24 = vld [vmem:[#allocation87_spill] sm:$0xff] }
  0xb5   :  { %v7851_v33 = vadd.f32 %v812_v36, %v7704_v57  ;;  %v7854_v29 = vadd.f32 %v814_v58, %v7707_v4  ;;  %v7857_v19 = vadd.f32 %v816_v20, %v7710_v62  ;;  %v7860_v50 = vadd.f32 %v818_v18, %v7713_v10  ;;  %v14320_v57 = vld [vmem:[#allocation88_spill] sm:$0xff]  ;;  %v14322_v4 = vld [vmem:[#allocation89_spill] sm:$0xff]  ;;  %v14324_v62 = vld [vmem:[#allocation90_spill] sm:$0xff] }
  0xb6   :  { %v7863_v44 = vadd.f32 %v820_v43, %v7716_v53  ;;  %v7866_v51 = vadd.f32 %v822_v55, %v14316_v30  ;;  %v7869_v49 = vadd.f32 %v824_v63, %v14318_v24  ;;  %v7872_v56 = vadd.f32 %v826_v34, %v14320_v57  ;;  %v14326_v10 = vld [vmem:[#allocation91_spill] sm:$0xff]  ;;  %v14328_v43 = vld [vmem:[#allocation92_spill] sm:$0xff]  ;;  %v14330_v55 = vld [vmem:[#allocation93_spill] sm:$0xff] }
  0xb7   :  { %14314 = vst [vmem:[#allocation99_spill] sm:$0xff] %v7860_v50  ;;  %v7875_v58 = vadd.f32 %v828_v5, %v14322_v4  ;;  %v7878_v20 = vadd.f32 %v830_v31, %v14324_v62  ;;  %v7881_v18 = vadd.f32 %v832_v3, %v14326_v10  ;;  %v7884_v53 = vadd.f32 %v834_v22, %v14328_v43  ;;  %v14336_v31 = vld [vmem:[#allocation84_spill] sm:$0xff]  ;;  %v14338_v63 = vld [vmem:[#allocation23_spill] sm:$0xff]  ;;  %v14345_v52 = vld [vmem:[#allocation38_spill] sm:$0xff] }
  0xb8   :  { %14315 = vst [vmem:[#allocation100_spill] sm:$0xff] %v7863_v44  ;;  %14317 = vst [vmem:[#allocation86_spill] sm:$0xff] %v7866_v51  ;;  %v7887_v36 = vadd.f32 %v836_v59, %v14330_v55  ;;  %v7890_v60 = vadd.f32 %v838_v7, %v14332_v2  ;;  %v7893_v34 = vadd.f32 %v840_v54, %v7747_v17  ;;  %v918_v40 = vmul.f32 0.0, %v14336_v31  ;;  %v14342_v54 = vld [vmem:[#allocation31_spill] sm:$0xff]  ;;  %v14348_v24 = vld [vmem:[#allocation45_spill] sm:$0xff] }
  0xb9   :  { %14319 = vst [vmem:[#allocation87_spill] sm:$0xff] %v7869_v49  ;;  %14321 = vst [vmem:[#allocation88_spill] sm:$0xff] %v7872_v56  ;;  %v7896_v5 = vadd.f32 %v842_v25, %v7755_v37  ;;  %v920_v3 = vmul.f32 %v14336_v31, %v14337_v11  ;;  %v922_v22 = vmul.f32 %v14336_v31, %v14338_v63  ;;  %v14343_v37 = vld [vmem:[#allocation32_spill] sm:$0xff]  ;;  %v14349_v4 = vld [vmem:[#allocation46_spill] sm:$0xff] }
  0xba   :  { %14323 = vst [vmem:[#allocation89_spill] sm:$0xff] %v7875_v58  ;;  %14325 = vst [vmem:[#allocation90_spill] sm:$0xff] %v7878_v20  ;;  %v924_v59 = vmul.f32 %v14336_v31, %v14339_v6  ;;  %v926_v7 = vmul.f32 %v14336_v31, %v14340_v46  ;;  %v928_v17 = vmul.f32 %v14336_v31, %v14341_v28  ;;  %v14350_v10 = vld [vmem:[#allocation47_spill] sm:$0xff]  ;;  %v14351_v55 = vld [vmem:[#allocation48_spill] sm:$0xff] }
  0xbb   :  { %14327 = vst [vmem:[#allocation91_spill] sm:$0xff] %v7881_v18  ;;  %14329 = vst [vmem:[#allocation92_spill] sm:$0xff] %v7884_v53  ;;  %v930_v25 = vmul.f32 %v14336_v31, %v14342_v54  ;;  %v932_v47 = vmul.f32 %v14336_v31, %v14343_v37  ;;  %v934_v61 = vmul.f32 %v14336_v31, %v14344_v48  ;;  %v14352_v11 = vld [vmem:[#allocation51_spill] sm:$0xff]  ;;  %v14353_v6 = vld [vmem:[#allocation52_spill] sm:$0xff] }
  0xbc   :  { %14331 = vst [vmem:[#allocation93_spill] sm:$0xff] %v7887_v36  ;;  %14333 = vst [vmem:[#allocation94_spill] sm:$0xff] %v7890_v60  ;;  %v936_v15 = vmul.f32 %v14336_v31, %v14345_v52  ;;  %v938_v39 = vmul.f32 %v14336_v31, %v14346_v9  ;;  %v940_v30 = vmul.f32 %v14336_v31, %v14347_v45  ;;  %v14354_v28 = vld [vmem:[#allocation53_spill] sm:$0xff]  ;;  %v14355_v37 = vld [vmem:[#allocation54_spill] sm:$0xff] }
  0xbd   :  { %14334 = vst [vmem:[#allocation101_spill] sm:$0xff] %v7893_v34  ;;  %14335 = vst [vmem:[#allocation102_spill] sm:$0xff] %v7896_v5  ;;  %v942_v57 = vmul.f32 %v14336_v31, %v14348_v24  ;;  %v944_v62 = vmul.f32 %v14336_v31, %v14349_v4  ;;  %v946_v43 = vmul.f32 %v14336_v31, %v14350_v10  ;;  %v14356_v52 = vld [vmem:[#allocation56_spill] sm:$0xff]  ;;  %v14357_v45 = vld [vmem:[#allocation57_spill] sm:$0xff] }
  0xbe   :  { %v948_v2 = vmul.f32 %v14336_v31, %v14351_v55  ;;  %v950_v63 = vmul.f32 %v14336_v31, %v14352_v11  ;;  %v952_v46 = vmul.f32 %v14336_v31, %v14353_v6  ;;  %v954_v54 = vmul.f32 %v14336_v31, %v14354_v28  ;;  %v14358_v4 = vld [vmem:[#allocation58_spill] sm:$0xff]  ;;  %v14359_v55 = vld [vmem:[#allocation59_spill] sm:$0xff]  ;;  %v14360_v5 = vld [vmem:[#allocation61_spill] sm:$0xff] }
  0xbf   :  { %v956_v48 = vmul.f32 %v14336_v31, %v14355_v37  ;;  %v958_v9 = vmul.f32 %v14336_v31, %v14356_v52  ;;  %v960_v24 = vmul.f32 %v14336_v31, %v14357_v45  ;;  %v962_v10 = vmul.f32 %v14336_v31, %v14358_v4  ;;  %v14361_v34 = vld [vmem:[#allocation62_spill] sm:$0xff]  ;;  %v14362_v60 = vld [vmem:[#allocation63_spill] sm:$0xff]  ;;  %v14363_v36 = vld [vmem:[#allocation64_spill] sm:$0xff] }
  0xc0   :  { %v964_v11 = vmul.f32 %v14336_v31, %v14359_v55  ;;  %v966_v6 = vmul.f32 %v14336_v31, %v14360_v5  ;;  %v968_v28 = vmul.f32 %v14336_v31, %v14361_v34  ;;  %v970_v37 = vmul.f32 %v14336_v31, %v14362_v60  ;;  %v14364_v53 = vld [vmem:[#allocation65_spill] sm:$0xff]  ;;  %v14365_v18 = vld [vmem:[#allocation66_spill] sm:$0xff] }
  0xc1   :  { %v972_v52 = vmul.f32 %v14336_v31, %v14363_v36  ;;  %v974_v45 = vmul.f32 %v14336_v31, %v14364_v53  ;;  %v976_v4 = vmul.f32 %v14336_v31, %v14365_v18  ;;  %v978_v20 = vadd.f32 %v918_v40, %v844_v14  ;;  %v14366_v14 = vld [vmem:[#allocation99_spill] sm:$0xff] }
  0xc2   :  { %v980_v55 = vadd.f32 %v918_v40, %v846_v35  ;;  %v982_v58 = vadd.f32 %v918_v40, %v848_v38  ;;  %v984_v56 = vadd.f32 %v920_v3, %v850_v32  ;;  %v986_v5 = vadd.f32 %v922_v22, %v852_v27 }
  0xc3   :  { %v988_v49 = vadd.f32 %v924_v59, %v854_v41  ;;  %v990_v51 = vadd.f32 %v926_v7, %v856_v0  ;;  %v992_v34 = vadd.f32 %v928_v17, %v858_v26  ;;  %v994_v44 = vadd.f32 %v930_v25, %v860_v16  ;;  %1046 = vst [vmem:[#allocation2 + $0x8] sm:$0x1] %v978_v20  ;;  %v14367_v26 = vld [vmem:[#allocation100_spill] sm:$0xff]  ;;  %v14376_v20 = vld [vmem:[#allocation94_spill] sm:$0xff] }
  0xc4   :  { %v996_v50 = vadd.f32 %v932_v47, %v862_v42  ;;  %v998_v60 = vadd.f32 %v934_v61, %v864_v1  ;;  %1048 = vst [vmem:[#allocation2 + $0x18] sm:$0x1] %v980_v55  ;;  %1050 = vst [vmem:[#allocation2 + $0x28] sm:$0x1] %v982_v58  ;;  %v1000_v36 = vadd.f32 %v936_v15, %v7836_v8  ;;  %v14368_v42 = vld [vmem:[#allocation86_spill] sm:$0xff]  ;;  %v14369_v8 = vld [vmem:[#allocation87_spill] sm:$0xff] }
  0xc5   :  { %v1002_v53 = vadd.f32 %v938_v39, %v7839_v12  ;;  %v1004_v18 = vadd.f32 %v940_v30, %v7842_v23  ;;  %v1006_v35 = vadd.f32 %v942_v57, %v7845_v21  ;;  %1052 = vst [vmem:[#allocation2 + $0x38] sm:$0x1] %v984_v56  ;;  %1054 = vst [vmem:[#allocation2 + $0x48] sm:$0x1] %v986_v5  ;;  %v14370_v23 = vld [vmem:[#allocation88_spill] sm:$0xff]  ;;  %v14375_v56 = vld [vmem:[#allocation93_spill] sm:$0xff] }
  0xc6   :  { %1056 = vst [vmem:[#allocation2 + $0x58] sm:$0x1] %v988_v49  ;;  %1058 = vst [vmem:[#allocation2 + $0x68] sm:$0x1] %v990_v51  ;;  %v1008_v0 = vadd.f32 %v944_v62, %v7848_v13  ;;  %v1010_v41 = vadd.f32 %v946_v43, %v7851_v33  ;;  %v1012_v32 = vadd.f32 %v948_v2, %v7854_v29  ;;  %v14371_v13 = vld [vmem:[#allocation89_spill] sm:$0xff]  ;;  %v14372_v29 = vld [vmem:[#allocation90_spill] sm:$0xff] }
  0xc7   :  { %v1014_v38 = vadd.f32 %v950_v63, %v7857_v19  ;;  %1060 = vst [vmem:[#allocation2 + $0x78] sm:$0x1] %v992_v34  ;;  %1062 = vst [vmem:[#allocation2 + $0x88] sm:$0x1] %v994_v44  ;;  %v1016_v27 = vadd.f32 %v952_v46, %v14366_v14  ;;  %v1018_v16 = vadd.f32 %v954_v54, %v14367_v26  ;;  %v14374_v51 = vld [vmem:[#allocation92_spill] sm:$0xff]  ;;  %v14377_v40 = vld [vmem:[#allocation101_spill] sm:$0xff] }
  0xc8   :  { %1064 = vst [vmem:[#allocation2 + $0x98] sm:$0x1] %v996_v50  ;;  %1066 = vst [vmem:[#allocation2 + $0xa8] sm:$0x1] %v998_v60  ;;  %v1020_v1 = vadd.f32 %v956_v48, %v14368_v42  ;;  %v1022_v12 = vadd.f32 %v958_v9, %v14369_v8  ;;  %v1024_v21 = vadd.f32 %v960_v24, %v14370_v23  ;;  %v14373_v50 = vld [vmem:[#allocation91_spill] sm:$0xff]  ;;  %v14378_v22 = vld [vmem:[#allocation102_spill] sm:$0xff] }
  0xc9   :  { %1068 = vst [vmem:[#allocation2 + $0xb8] sm:$0x1] %v1000_v36  ;;  %1070 = vst [vmem:[#allocation2 + $0xc8] sm:$0x1] %v1002_v53  ;;  %v1026_v33 = vadd.f32 %v962_v10, %v14371_v13  ;;  %v1028_v19 = vadd.f32 %v964_v11, %v14372_v29  ;;  %v1030_v44 = vadd.f32 %v966_v6, %v14373_v50  ;;  %v14379_v7 = vld [vmem:[#allocation14_spill] sm:$0xff]  ;;  %v14380_v17 = vld [vmem:[#allocation44_spill] sm:$0xff] }
  0xca   :  { %1072 = vst [vmem:[#allocation2 + $0xd8] sm:$0x1] %v1004_v18  ;;  %1074 = vst [vmem:[#allocation2 + $0xe8] sm:$0x1] %v1006_v35  ;;  %v1032_v49 = vadd.f32 %v968_v28, %v14374_v51  ;;  %v1034_v58 = vadd.f32 %v970_v37, %v14375_v56  ;;  %v1036_v31 = vadd.f32 %v972_v52, %v14376_v20  ;;  %v14382_v47 = vld [vmem:[#allocation15_spill] sm:$0xff]  ;;  %v14384_v15 = vld [vmem:[#allocation16_spill] sm:$0xff] }
  0xcb   :  { %1076 = vst [vmem:[#allocation2 + $0xf8] sm:$0x1] %v1008_v0  ;;  %1078 = vst [vmem:[#allocation2 + $0x108] sm:$0x1] %v1010_v41  ;;  %v1038_v3 = vadd.f32 %v974_v45, %v14377_v40  ;;  %v1040_v59 = vadd.f32 %v976_v4, %v14378_v22  ;;  %v7980_v25 = vmul.f32 %v14380_v17, %v14379_v7  ;;  %v14386_v30 = vld [vmem:[#allocation18_spill] sm:$0xff]  ;;  %v14388_v2 = vld [vmem:[#allocation55_spill] sm:$0xff] }
  0xcc   :  { %1080 = vst [vmem:[#allocation2 + $0x118] sm:$0x1] %v1012_v32  ;;  %1082 = vst [vmem:[#allocation2 + $0x128] sm:$0x1] %v1014_v38  ;;  %v7984_v61 = vmul.f32 %v14380_v17, %v14382_v47  ;;  %v7988_v39 = vmul.f32 %v14380_v17, %v14384_v15  ;;  %v741_v57 = vmul.f32 %v14380_v17, %v14386_v30  ;;  %v14387_v62 = vld [vmem:[#allocation50_spill] sm:$0xff]  ;;  %v14389_v46 = vld [vmem:[#allocation7_spill] sm:$0xff] }
  0xcd   :  { %1084 = vst [vmem:[#allocation2 + $0x138] sm:$0x1] %v1016_v27  ;;  %1086 = vst [vmem:[#allocation2 + $0x148] sm:$0x1] %v1018_v16  ;;  %v743_v43 = vmul.f32 %v14380_v17, %v14387_v62  ;;  %v745_v63 = vmul.f32 %v14380_v17, %v14388_v2  ;;  %v747_v54 = vmul.f32 %v14380_v17, %v14389_v46  ;;  %v14390_v48 = vld [vmem:[#allocation8_spill] sm:$0xff]  ;;  %v14391_v24 = vld [vmem:[#allocation9_spill] sm:$0xff] }
  0xce   :  { %1088 = vst [vmem:[#allocation2 + $0x158] sm:$0x1] %v1020_v1  ;;  %1090 = vst [vmem:[#allocation2 + $0x168] sm:$0x1] %v1022_v12  ;;  %v749_v9 = vmul.f32 %v14380_v17, %v14390_v48  ;;  %v751_v10 = vmul.f32 %v14380_v17, %v14391_v24  ;;  %v14392_v11 = vld [vmem:[#allocation10_spill] sm:$0xff]  ;;  %v14393_v28 = vld [vmem:[#allocation11_spill] sm:$0xff] }
  0xcf   :  { %1092 = vst [vmem:[#allocation2 + $0x178] sm:$0x1] %v1024_v21  ;;  %1094 = vst [vmem:[#allocation2 + $0x188] sm:$0x1] %v1026_v33  ;;  %v753_v6 = vmul.f32 %v14380_v17, %v14392_v11  ;;  %v755_v37 = vmul.f32 %v14380_v17, %v14393_v28  ;;  %v14394_v52 = vld [vmem:[#allocation13_spill] sm:$0xff]  ;;  %v14396_v5 = vld [vmem:[#allocation42_spill] sm:$0xff] }
  0xd0   :  { %1096 = vst [vmem:[#allocation2 + $0x198] sm:$0x1] %v1028_v19  ;;  %1098 = vst [vmem:[#allocation2 + $0x1a8] sm:$0x1] %v1030_v44  ;;  %v757_v45 = vmul.f32 %v14380_v17, %v14394_v52  ;;  %v14395_v4 = vld [vmem:[#allocation41_spill] sm:$0xff]  ;;  %v761_v34 = vmul.f32 %v14380_v17, %v14396_v5  ;;  %v14398_v53 = vld [vmem:[#allocation67_spill] sm:$0xff] }
  0xd1   :  { %14381 = vst [vmem:[#allocation84_spill] sm:$0xff] %v7980_v25  ;;  %14383 = vst [vmem:[#allocation22_spill] sm:$0xff] %v7984_v61  ;;  %v759_v55 = vmul.f32 %v14380_v17, %v14395_v4  ;;  %v14397_v60 = vld [vmem:[#allocation49_spill] sm:$0xff]  ;;  %v765_v18 = vmul.f32 %v14380_v17, %v14398_v53  ;;  %v14399_v35 = vld [vmem:[#allocation68_spill] sm:$0xff] }
  0xd2   :  { %14385 = vst [vmem:[#allocation23_spill] sm:$0xff] %v7988_v39  ;;  %1100 = vst [vmem:[#allocation2 + $0x1b8] sm:$0x1] %v1032_v49  ;;  %v763_v36 = vmul.f32 %v14380_v17, %v14397_v60  ;;  %v767_v0 = vmul.f32 %v14380_v17, %v14399_v35  ;;  %v14400_v41 = vld [vmem:[#allocation60_spill] sm:$0xff]  ;;  %v14401_v38 = vld [vmem:[#allocation34_spill] sm:$0xff] }
  0xd3   :  { %1102 = vst [vmem:[#allocation2 + $0x1c8] sm:$0x1] %v1034_v58  ;;  %1104 = vst [vmem:[#allocation2 + $0x1d8] sm:$0x1] %v1036_v31  ;;  %v769_v32 = vmul.f32 %v14380_v17, %v14400_v41  ;;  %v14402_v14 = vld [vmem:[#allocation43_spill] sm:$0xff]  ;;  %v14403_v26 = vld [vmem:[#allocation36_spill] sm:$0xff] }
  0xd4   :  { %1106 = vst [vmem:[#allocation2 + $0x1e8] sm:$0x1] %v1038_v3  ;;  %1108 = vst [vmem:[#allocation2 + $0x1f8] sm:$0x1] %v1040_v59  ;;  %v783_v27 = vmul.f32 %v14402_v14, %v14401_v38  ;;  %v785_v16 = vmul.f32 %v14402_v14, %v14403_v26  ;;  %v14404_v42 = vld [vmem:[#allocation25_spill] sm:$0xff]  ;;  %v14405_v8 = vld [vmem:[#allocation27_spill] sm:$0xff]  ;;  %v809_v17 = vmul.f32 %v14402_v14, %v14379_v7 }
  0xd5   :  { %v787_v1 = vmul.f32 %v14402_v14, %v14404_v42  ;;  %v789_v12 = vmul.f32 %v14402_v14, %v14405_v8  ;;  %v14406_v23 = vld [vmem:[#allocation28_spill] sm:$0xff]  ;;  %v14407_v13 = vld [vmem:[#allocation33_spill] sm:$0xff]  ;;  %v14408_v29 = vld [vmem:[#allocation35_spill] sm:$0xff]  ;;  %v811_v41 = vmul.f32 %v14402_v14, %v14382_v47  ;;  %v823_v7 = vmul.f32 %v14402_v14, %v14390_v48 }
  0xd6   :  { %v791_v21 = vmul.f32 %v14402_v14, %v14406_v23  ;;  %v793_v33 = vmul.f32 %v14402_v14, %v14407_v13  ;;  %v795_v19 = vmul.f32 %v14402_v14, %v14408_v29  ;;  %v14409_v50 = vld [vmem:[#allocation17_spill] sm:$0xff]  ;;  %v14410_v51 = vld [vmem:[#allocation19_spill] sm:$0xff]  ;;  %v14411_v56 = vld [vmem:[#allocation20_spill] sm:$0xff]  ;;  %v825_v47 = vmul.f32 %v14402_v14, %v14391_v24 }
  0xd7   :  { %v797_v44 = vmul.f32 %v14402_v14, %v14409_v50  ;;  %v799_v49 = vmul.f32 %v14402_v14, %v14410_v51  ;;  %v801_v58 = vmul.f32 %v14402_v14, %v14411_v56  ;;  %v14412_v20 = vld [vmem:[#allocation21_spill] sm:$0xff]  ;;  %v14413_v40 = vld [vmem:[#allocation26_spill] sm:$0xff]  ;;  %v14414_v22 = vld [vmem:[#allocation12_spill] sm:$0xff]  ;;  %v813_v51 = vmul.f32 %v14402_v14, %v14384_v15 }
  0xd8   :  { %v803_v31 = vmul.f32 %v14402_v14, %v14412_v20  ;;  %v805_v3 = vmul.f32 %v14402_v14, %v14413_v40  ;;  %v807_v59 = vmul.f32 %v14402_v14, %v14414_v22  ;;  %v815_v56 = vmul.f32 %v14402_v14, %v14386_v30  ;;  %v14415_v50 = vld [vmem:[#allocation70_spill] sm:$0xff]  ;;  %v14417_v13 = vld [vmem:[#allocation71_spill] sm:$0xff]  ;;  %v14418_v23 = vld [vmem:[#allocation72_spill] sm:$0xff] }
  0xd9   :  { %v817_v20 = vmul.f32 %v14402_v14, %v14387_v62  ;;  %v819_v40 = vmul.f32 %v14402_v14, %v14388_v2  ;;  %v821_v22 = vmul.f32 %v14402_v14, %v14389_v46  ;;  %v827_v15 = vmul.f32 %v14402_v14, %v14392_v11  ;;  %v14420_v26 = vld [vmem:[#allocation74_spill] sm:$0xff]  ;;  %v14421_v38 = vld [vmem:[#allocation75_spill] sm:$0xff] }
  0xda   :  { %v829_v30 = vmul.f32 %v14402_v14, %v14393_v28  ;;  %v831_v62 = vmul.f32 %v14402_v14, %v14394_v52  ;;  %v833_v2 = vmul.f32 %v14402_v14, %v14395_v4  ;;  %v835_v46 = vmul.f32 %v14402_v14, %v14396_v5  ;;  %v14416_v28 = vld [vmem:[#allocation69_spill] sm:$0xff]  ;;  %v14423_v25 = vld [vmem:[#allocation78_spill] sm:$0xff] }
  0xdb   :  { %v837_v48 = vmul.f32 %v14402_v14, %v14397_v60  ;;  %v839_v24 = vmul.f32 %v14402_v14, %v14398_v53  ;;  %v841_v11 = vmul.f32 %v14402_v14, %v14399_v35  ;;  %v845_v29 = vadd.f32 %v14416_v28, %v14415_v50  ;;  %v14419_v4 = vld [vmem:[#allocation73_spill] sm:$0xff]  ;;  %v14424_v14 = vld [vmem:[#allocation79_spill] sm:$0xff]  ;;  %v14425_v28 = vld [vmem:[#allocation80_spill] sm:$0xff] }
  0xdc   :  { %v847_v52 = vadd.f32 %v783_v27, %v14417_v13  ;;  %v849_v8 = vadd.f32 %v785_v16, %v14418_v23  ;;  %v851_v42 = vadd.f32 %v787_v1, %v14419_v4  ;;  %v853_v5 = vadd.f32 %v789_v12, %v14420_v26  ;;  %v14422_v60 = vld [vmem:[#allocation77_spill] sm:$0xff]  ;;  %v14427_v16 = vld [vmem:[#allocation82_spill] sm:$0xff]  ;;  %v14428_v4 = vld [vmem:[#allocation83_spill] sm:$0xff] }
  0xdd   :  { %v855_v39 = vadd.f32 %v791_v21, %v14421_v38  ;;  %v857_v61 = vadd.f32 %v793_v33, %v14422_v60  ;;  %v859_v53 = vadd.f32 %v795_v19, %v14423_v25  ;;  %v861_v35 = vadd.f32 %v797_v44, %v14424_v14  ;;  %v14426_v13 = vld [vmem:[#allocation81_spill] sm:$0xff]  ;;  %v14429_v26 = vld [vmem:[#allocation84_spill] sm:$0xff]  ;;  %v14430_v60 = vld [vmem:[#allocation22_spill] sm:$0xff] }
  0xde   :  { %v8091_v50 = vadd.f32 %v799_v49, %v14425_v28  ;;  %v8094_v27 = vadd.f32 %v801_v58, %v14426_v13  ;;  %v8097_v23 = vadd.f32 %v803_v31, %v14427_v16  ;;  %v8100_v1 = vadd.f32 %v805_v3, %v14428_v4  ;;  %v14431_v25 = vld [vmem:[#allocation23_spill] sm:$0xff]  ;;  %v14458_v28 = vld [vmem:[#allocation12_spill] sm:$0xff]  ;;  %v14459_v16 = vld [vmem:[#allocation14_spill] sm:$0xff] }
  0xdf   :  { %v8103_v38 = vadd.f32 %v807_v59, %v14429_v26  ;;  %v8106_v12 = vadd.f32 %v809_v17, %v14430_v60  ;;  %v8109_v21 = vadd.f32 %v811_v41, %v14431_v25  ;;  %v8111_v33 = vadd.f32 %v813_v51, %v741_v57  ;;  %v14455_v51 = vld [vmem:[#allocation20_spill] sm:$0xff]  ;;  %v14460_v26 = vld [vmem:[#allocation15_spill] sm:$0xff] }
  0xe0   :  { %v8113_v19 = vadd.f32 %v815_v56, %v743_v43  ;;  %v8115_v44 = vadd.f32 %v817_v20, %v745_v63  ;;  %v8117_v49 = vadd.f32 %v819_v40, %v747_v54  ;;  %v8119_v58 = vadd.f32 %v821_v22, %v749_v9  ;;  %v14456_v20 = vld [vmem:[#allocation21_spill] sm:$0xff]  ;;  %v14457_v22 = vld [vmem:[#allocation26_spill] sm:$0xff]  ;;  %v14461_v25 = vld [vmem:[#allocation16_spill] sm:$0xff] }
  0xe1   :  { %v8121_v31 = vadd.f32 %v823_v7, %v751_v10  ;;  %v8123_v3 = vadd.f32 %v825_v47, %v753_v6  ;;  %v8125_v59 = vadd.f32 %v827_v15, %v755_v37  ;;  %v8127_v17 = vadd.f32 %v829_v30, %v757_v45  ;;  %v14445_v7 = vld [vmem:[#allocation85_spill] sm:$0xff]  ;;  %v14446_v47 = vld [vmem:[#allocation34_spill] sm:$0xff]  ;;  %v14447_v6 = vld [vmem:[#allocation36_spill] sm:$0xff] }
  0xe2   :  { %14432 = vst [vmem:[#allocation24_spill] sm:$0xff] %v8115_v44  ;;  %14433 = vst [vmem:[#allocation29_spill] sm:$0xff] %v8117_v49  ;;  %v8129_v41 = vadd.f32 %v831_v62, %v759_v55  ;;  %v8131_v57 = vadd.f32 %v833_v2, %v761_v34  ;;  %v8133_v43 = vadd.f32 %v835_v46, %v763_v36  ;;  %v917_v10 = vmul.f32 0.0, %v14445_v7  ;;  %v14448_v62 = vld [vmem:[#allocation25_spill] sm:$0xff]  ;;  %v14449_v37 = vld [vmem:[#allocation27_spill] sm:$0xff] }
  0xe3   :  { %14434 = vst [vmem:[#allocation30_spill] sm:$0xff] %v8119_v58  ;;  %14435 = vst [vmem:[#allocation31_spill] sm:$0xff] %v8121_v31  ;;  %v8135_v63 = vadd.f32 %v837_v48, %v765_v18  ;;  %v8137_v54 = vadd.f32 %v839_v24, %v767_v0  ;;  %v8139_v9 = vadd.f32 %v841_v11, %v769_v32  ;;  %v14450_v48 = vld [vmem:[#allocation28_spill] sm:$0xff]  ;;  %v14451_v45 = vld [vmem:[#allocation33_spill] sm:$0xff] }
  0xe4   :  { %14436 = vst [vmem:[#allocation32_spill] sm:$0xff] %v8123_v3  ;;  %14437 = vst [vmem:[#allocation37_spill] sm:$0xff] %v8125_v59  ;;  %v919_v15 = vmul.f32 %v14445_v7, %v14446_v47  ;;  %v921_v30 = vmul.f32 %v14445_v7, %v14447_v6  ;;  %v923_v2 = vmul.f32 %v14445_v7, %v14448_v62  ;;  %v14452_v55 = vld [vmem:[#allocation35_spill] sm:$0xff]  ;;  %v14453_v36 = vld [vmem:[#allocation17_spill] sm:$0xff] }
  0xe5   :  { %14438 = vst [vmem:[#allocation38_spill] sm:$0xff] %v8127_v17  ;;  %14439 = vst [vmem:[#allocation39_spill] sm:$0xff] %v8129_v41  ;;  %v925_v46 = vmul.f32 %v14445_v7, %v14449_v37  ;;  %v927_v24 = vmul.f32 %v14445_v7, %v14450_v48  ;;  %v929_v11 = vmul.f32 %v14445_v7, %v14451_v45  ;;  %v14454_v0 = vld [vmem:[#allocation19_spill] sm:$0xff]  ;;  %v14462_v6 = vld [vmem:[#allocation18_spill] sm:$0xff] }
  0xe6   :  { %14440 = vst [vmem:[#allocation40_spill] sm:$0xff] %v8131_v57  ;;  %14441 = vst [vmem:[#allocation45_spill] sm:$0xff] %v8133_v43  ;;  %v931_v34 = vmul.f32 %v14445_v7, %v14452_v55  ;;  %v933_v18 = vmul.f32 %v14445_v7, %v14453_v36  ;;  %v935_v32 = vmul.f32 %v14445_v7, %v14454_v0  ;;  %v14463_v37 = vld [vmem:[#allocation50_spill] sm:$0xff]  ;;  %v14464_v45 = vld [vmem:[#allocation55_spill] sm:$0xff] }
  0xe7   :  { %14442 = vst [vmem:[#allocation46_spill] sm:$0xff] %v8135_v63  ;;  %14443 = vst [vmem:[#allocation47_spill] sm:$0xff] %v8137_v54  ;;  %v937_v56 = vmul.f32 %v14445_v7, %v14455_v51  ;;  %v939_v40 = vmul.f32 %v14445_v7, %v14456_v20  ;;  %v941_v14 = vmul.f32 %v14445_v7, %v14457_v22  ;;  %v14465_v36 = vld [vmem:[#allocation7_spill] sm:$0xff]  ;;  %v14466_v51 = vld [vmem:[#allocation8_spill] sm:$0xff] }
  0xe8   :  { %14444 = vst [vmem:[#allocation48_spill] sm:$0xff] %v8139_v9  ;;  %v943_v13 = vmul.f32 %v14445_v7, %v14458_v28  ;;  %v945_v4 = vmul.f32 %v14445_v7, %v14459_v16  ;;  %v947_v60 = vmul.f32 %v14445_v7, %v14460_v26  ;;  %v949_v47 = vmul.f32 %v14445_v7, %v14461_v25  ;;  %v14467_v22 = vld [vmem:[#allocation9_spill] sm:$0xff]  ;;  %v14468_v16 = vld [vmem:[#allocation10_spill] sm:$0xff]  ;;  %v14469_v25 = vld [vmem:[#allocation11_spill] sm:$0xff] }
  0xe9   :  { %v951_v62 = vmul.f32 %v14445_v7, %v14462_v6  ;;  %v953_v48 = vmul.f32 %v14445_v7, %v14463_v37  ;;  %v955_v55 = vmul.f32 %v14445_v7, %v14464_v45  ;;  %v957_v0 = vmul.f32 %v14445_v7, %v14465_v36  ;;  %v14470_v9 = vld [vmem:[#allocation13_spill] sm:$0xff]  ;;  %v14472_v63 = vld [vmem:[#allocation42_spill] sm:$0xff]  ;;  %v14474_v57 = vld [vmem:[#allocation67_spill] sm:$0xff] }
  0xea   :  { %v959_v20 = vmul.f32 %v14445_v7, %v14466_v51  ;;  %v961_v28 = vmul.f32 %v14445_v7, %v14467_v22  ;;  %v963_v26 = vmul.f32 %v14445_v7, %v14468_v16  ;;  %v965_v6 = vmul.f32 %v14445_v7, %v14469_v25  ;;  %v14471_v54 = vld [vmem:[#allocation41_spill] sm:$0xff]  ;;  %v14475_v41 = vld [vmem:[#allocation76_spill] sm:$0xff] }
  0xeb   :  { %v967_v37 = vmul.f32 %v14445_v7, %v14470_v9  ;;  %v969_v45 = vmul.f32 %v14445_v7, %v14471_v54  ;;  %v971_v36 = vmul.f32 %v14445_v7, %v14472_v63  ;;  %v14473_v43 = vld [vmem:[#allocation49_spill] sm:$0xff]  ;;  %v975_v22 = vmul.f32 %v14445_v7, %v14474_v57 }
  0xec   :  { %v973_v51 = vmul.f32 %v14445_v7, %v14473_v43  ;;  %v977_v16 = vadd.f32 %v917_v10, %v14475_v41  ;;  %v979_v17 = vadd.f32 %v917_v10, %v845_v29  ;;  %v981_v59 = vadd.f32 %v917_v10, %v847_v52  ;;  %v14477_v29 = vld [vmem:[#allocation29_spill] sm:$0xff] }
  0xed   :  { %v983_v25 = vadd.f32 %v919_v15, %v849_v8  ;;  %v985_v3 = vadd.f32 %v921_v30, %v851_v42  ;;  %v987_v31 = vadd.f32 %v923_v2, %v853_v5  ;;  %v989_v9 = vadd.f32 %v925_v46, %v855_v39  ;;  %v14476_v42 = vld [vmem:[#allocation24_spill] sm:$0xff] }
  0xee   :  { %v991_v58 = vadd.f32 %v927_v24, %v857_v61  ;;  %v993_v49 = vadd.f32 %v929_v11, %v859_v53  ;;  %v995_v54 = vadd.f32 %v931_v34, %v861_v35  ;;  %1045 = vst [vmem:[#allocation2] sm:$0xff] %v977_v16  ;;  %1047 = vst [vmem:[#allocation2 + $0x10] sm:$0xff] %v979_v17  ;;  %v14485_v17 = vld [vmem:[#allocation45_spill] sm:$0xff]  ;;  %v14487_v10 = vld [vmem:[#allocation47_spill] sm:$0xff]  ;;  %v8223_v46 = vmov 0.0  }
  0xef   :  { %v997_v63 = vadd.f32 %v933_v18, %v8091_v50  ;;  %v999_v43 = vadd.f32 %v935_v32, %v8094_v27  ;;  %v1001_v44 = vadd.f32 %v937_v56, %v8097_v23  ;;  %v1003_v57 = vadd.f32 %v939_v40, %v8100_v1  ;;  %1049 = vst [vmem:[#allocation2 + $0x20] sm:$0xff] %v981_v59  ;;  %v14478_v50 = vld [vmem:[#allocation30_spill] sm:$0xff]  ;;  %v14479_v23 = vld [vmem:[#allocation31_spill] sm:$0xff]  ;;  %v14488_v30 = vld [vmem:[#allocation48_spill] sm:$0xff] }
  0xf0   :  { %1051 = vst [vmem:[#allocation2 + $0x30] sm:$0xff] %v983_v25  ;;  %1053 = vst [vmem:[#allocation2 + $0x40] sm:$0xff] %v985_v3  ;;  %v1005_v52 = vadd.f32 %v941_v14, %v8103_v38  ;;  %v1007_v61 = vadd.f32 %v943_v13, %v8106_v12  ;;  %v1009_v39 = vadd.f32 %v945_v4, %v8109_v21  ;;  %v14480_v38 = vld [vmem:[#allocation32_spill] sm:$0xff]  ;;  %v14481_v21 = vld [vmem:[#allocation37_spill] sm:$0xff]  ;;  %v8225_v24 = vmov 0.0  }
  0xf1   :  { %1055 = vst [vmem:[#allocation2 + $0x50] sm:$0xff] %v987_v31  ;;  %v1011_v5 = vadd.f32 %v947_v60, %v8111_v33  ;;  %1057 = vst [vmem:[#allocation2 + $0x60] sm:$0xff] %v989_v9  ;;  %v1013_v53 = vadd.f32 %v949_v47, %v8113_v19  ;;  %v1015_v8 = vadd.f32 %v951_v62, %v14476_v42  ;;  %v14483_v19 = vld [vmem:[#allocation39_spill] sm:$0xff]  ;;  %v14484_v3 = vld [vmem:[#allocation40_spill] sm:$0xff]  ;;  %v8227_v11 = vmov 0.0  }
  0xf2   :  { %1059 = vst [vmem:[#allocation2 + $0x70] sm:$0xff] %v991_v58  ;;  %1061 = vst [vmem:[#allocation2 + $0x80] sm:$0xff] %v993_v49  ;;  %v1017_v35 = vadd.f32 %v953_v48, %v14477_v29  ;;  %v1019_v27 = vadd.f32 %v955_v55, %v14478_v50  ;;  %v1021_v1 = vadd.f32 %v957_v0, %v14479_v23  ;;  %v14482_v49 = vld [vmem:[#allocation38_spill] sm:$0xff]  ;;  %v8229_v34 = vmov 0.0  }
  0xf3   :  { %1063 = vst [vmem:[#allocation2 + $0x90] sm:$0xff] %v995_v54  ;;  %1065 = vst [vmem:[#allocation2 + $0xa0] sm:$0xff] %v997_v63  ;;  %v1023_v12 = vadd.f32 %v959_v20, %v14480_v38  ;;  %v1025_v33 = vadd.f32 %v961_v28, %v14481_v21  ;;  %v1027_v58 = vadd.f32 %v963_v26, %v14482_v49 }
  0xf4   :  { %1067 = vst [vmem:[#allocation2 + $0xb0] sm:$0xff] %v999_v43  ;;  %1069 = vst [vmem:[#allocation2 + $0xc0] sm:$0xff] %v1001_v44  ;;  %v1029_v31 = vadd.f32 %v965_v6, %v14483_v19  ;;  %v1031_v59 = vadd.f32 %v967_v37, %v14484_v3  ;;  %v1033_v41 = vadd.f32 %v969_v45, %v14485_v17  ;;  %v14486_v44 = vld [vmem:[#allocation46_spill] sm:$0xff] }
  0xf5   :  { %1071 = vst [vmem:[#allocation2 + $0xd0] sm:$0xff] %v1003_v57  ;;  %1073 = vst [vmem:[#allocation2 + $0xe0] sm:$0xff] %v1005_v52  ;;  %v1035_v7 = vadd.f32 %v971_v36, %v14486_v44  ;;  %v1037_v15 = vadd.f32 %v973_v51, %v14487_v10  ;;  %v1039_v2 = vadd.f32 %v975_v22, %v14488_v30 }
  0xf6   :  { %1075 = vst [vmem:[#allocation2 + $0xf0] sm:$0xff] %v1007_v61  ;;  %1077 = vst [vmem:[#allocation2 + $0x100] sm:$0xff] %v1009_v39 }
  0xf7   :  { %1079 = vst [vmem:[#allocation2 + $0x110] sm:$0xff] %v1011_v5  ;;  %1081 = vst [vmem:[#allocation2 + $0x120] sm:$0xff] %v1013_v53 }
  0xf8   :  { %1083 = vst [vmem:[#allocation2 + $0x130] sm:$0xff] %v1015_v8  ;;  %1085 = vst [vmem:[#allocation2 + $0x140] sm:$0xff] %v1017_v35 }
  0xf9   :  { %1087 = vst [vmem:[#allocation2 + $0x150] sm:$0xff] %v1019_v27  ;;  %1089 = vst [vmem:[#allocation2 + $0x160] sm:$0xff] %v1021_v1 }
  0xfa   :  { %1091 = vst [vmem:[#allocation2 + $0x170] sm:$0xff] %v1023_v12  ;;  %1093 = vst [vmem:[#allocation2 + $0x180] sm:$0xff] %v1025_v33 }
  0xfb   :  { %1095 = vst [vmem:[#allocation2 + $0x190] sm:$0xff] %v1027_v58  ;;  %1097 = vst [vmem:[#allocation2 + $0x1a0] sm:$0xff] %v1029_v31 }
  0xfc   :  { %1099 = vst [vmem:[#allocation2 + $0x1b0] sm:$0xff] %v1031_v59  ;;  %1101 = vst [vmem:[#allocation2 + $0x1c0] sm:$0xff] %v1033_v41 }
  0xfd   :  { %1103 = vst [vmem:[#allocation2 + $0x1d0] sm:$0xff] %v1035_v7  ;;  %1105 = vst [vmem:[#allocation2 + $0x1e0] sm:$0xff] %v1037_v15 }
  0xfe   :  { %1107 = vst [vmem:[#allocation2 + $0x1f0] sm:$0xff] %v1039_v2 }
  0xff LB: > { %s6064_s22 = sshll.u32 %s6341_s0, 8  ;;  %v14489_v18 = vld [vmem:[#allocation96_spill] sm:$0xff]  ;;  %v14490_v56 = vld [vmem:[#allocation95_spill] sm:$0xff]  ;;  %v14491_v14 = vld [vmem:[#allocation98_spill] sm:$0xff]  ;;  %s6065_s24 = sshll.u32 %s6341_s0, 6  ;;  %s6341_s0 = sphi %s8231_s0, %s1134_s0   ;;  %v6337_v34 = vphi %v8229_v34, %v1300_v34   ;;  %v6333_v11 = vphi %v8227_v11, %v1301_v11   ;;  %v6329_v24 = vphi %v8225_v24, %v1292_v24   ;;  %v6325_v46 = vphi %v8223_v46, %v1293_v46  }
 0x100   : > { %v1174_v32 = vmul.f32 %v6337_v34, %v14489_v18  ;;  %v1175_v40 = vmul.f32 %v6333_v11, %v14490_v56  ;;  %v1178_v13 = vmul.f32 %v6329_v24, %v14491_v14  ;;  %v14492_v4 = vld [vmem:[#allocation97_spill] sm:$0xff]  ;;  %s8245_s23 = scalar_lea.vmem [#allocation2], %s6064_s22  ;;  %v1186_v26 = vmul.f32 %v6337_v34, %v14491_v14  ;;  %s8258_s25 = scalar_lea.vmem [#allocation3], %s6065_s24 }
 0x101   : > { %v1179_v60 = vmul.f32 %v6325_v46, %v14492_v4  ;;  %v1187_v16 = vmul.f32 %v6333_v11, %v14492_v4  ;;  %s1134_s0 = sadd.s32 1, %s6341_s0  }
 0x102   : > { %p1131_p0 = scmp.ge.s32.totalorder %s1134_s0, 2  }
 0x105   : > { %v1142_v47 = vld [vmem:[%s8245_s23] sm:$0xff]  ;;  %v1143_v62 = vld [vmem:[%s8245_s23 + $0x8] sm:$0x1]  ;;  %v1144_v28 = vld [vmem:[%s8245_s23 + $0x10] sm:$0xff] }
 0x106   : > { %v1176_v48 = vsub.f32 %v1142_v47, %v1174_v32  ;;  %v1177_v55 = vsub.f32 %v1143_v62, %v1175_v40  ;;  %v1145_v36 = vld [vmem:[%s8245_s23 + $0x18] sm:$0x1]  ;;  %v1146_v61 = vld [vmem:[%s8245_s23 + $0x20] sm:$0xff]  ;;  %v1147_v53 = vld [vmem:[%s8245_s23 + $0x28] sm:$0x1] }
 0x107   : > { %v1148_v49 = vld [vmem:[%s8245_s23 + $0x30] sm:$0xff]  ;;  %v1149_v31 = vld [vmem:[%s8245_s23 + $0x38] sm:$0x1]  ;;  %v1150_v11 = vld [vmem:[%s8245_s23 + $0x40] sm:$0xff] }
 0x108   : > { %v1180_v0 = vsub.f32 %v1176_v48, %v1178_v13  ;;  %v1181_v20 = vsub.f32 %v1177_v55, %v1179_v60  ;;  %v1151_v40 = vld [vmem:[%s8245_s23 + $0x48] sm:$0x1] }
 0x10a   : > { %v1318_v6 = vrot.slane %v1180_v0, 3  ;;  %v1382_v37 = vrot.slane %v1180_v0, 6  ;;  %v1383_v45 = vrot.slane %v1181_v20, 6  ;;  %v1182_v51 = vmul.f32 %v1180_v0, %v14489_v18 }
 0x10b   : > { %v1183_v22 = vmul.f32 %v1181_v20, %v14490_v56  ;;  %v1194_v8 = vmul.f32 %v1180_v0, %v14491_v14  ;;  %v1195_v50 = vmul.f32 %v1181_v20, %v14492_v4 }
 0x10c   : > { %v1350_v25 = vadd.f32 %v1318_v6, %v1180_v0  ;;  %v1384_v9 = vsel %vm505_vm1, %v1382_v37, %v1383_v45  ;;  %v1184_v54 = vsub.f32 %v1144_v28, %v1182_v51  ;;  %v1152_v45 = vld [vmem:[%s8245_s23 + $0x50] sm:$0xff] }
 0x10d   : > { %v1185_v63 = vsub.f32 %v1145_v36, %v1183_v22  ;;  %v1153_v22 = vld [vmem:[%s8245_s23 + $0x58] sm:$0x1] }
 0x10e   : > { %v1446_v43 = vadd.f32 %v1384_v9, %v1350_v25  ;;  %v1188_v57 = vsub.f32 %v1184_v54, %v1186_v26 }
 0x10f   : > { %v1189_v52 = vsub.f32 %v1185_v63, %v1187_v16 }
 0x110   : > { %1464 = vst [vmem:[%s8258_s25] sm:$0x7] %v1446_v43  ;;  %v1319_v39 = vrot.slane %v1188_v57, 3  ;;  %v1385_v5 = vrot.slane %v1188_v57, 6  ;;  %v1190_v42 = vmul.f32 %v1188_v57, %v14489_v18  ;;  %v1202_v59 = vmul.f32 %v1188_v57, %v14491_v14 }
 0x111   : > { %v1386_v29 = vrot.slane %v1189_v52, 6  ;;  %v1191_v35 = vmul.f32 %v1189_v52, %v14490_v56  ;;  %v1203_v44 = vmul.f32 %v1189_v52, %v14492_v4 }
 0x112   : > { %v1351_v27 = vadd.f32 %v1319_v39, %v1188_v57  ;;  %v1192_v23 = vsub.f32 %v1146_v61, %v1190_v42  ;;  %v1154_v42 = vld [vmem:[%s8245_s23 + $0x60] sm:$0xff] }
 0x113   : > { %v1387_v1 = vsel %vm505_vm1, %v1385_v5, %v1386_v29  ;;  %v1193_v38 = vsub.f32 %v1147_v53, %v1191_v35  ;;  %v1155_v35 = vld [vmem:[%s8245_s23 + $0x68] sm:$0x1] }
 0x114   : > { %v1447_v12 = vadd.f32 %v1387_v1, %v1351_v27  ;;  %v1196_v21 = vsub.f32 %v1192_v23, %v1194_v8 }
 0x115   : > { %v1197_v33 = vsub.f32 %v1193_v38, %v1195_v50 }
 0x116   : > { %1465 = vst [vmem:[%s8258_s25 + $0x4] sm:$0x7] %v1447_v12  ;;  %v1320_v58 = vrot.slane %v1196_v21, 3  ;;  %v1388_v19 = vrot.slane %v1196_v21, 6  ;;  %v1198_v3 = vmul.f32 %v1196_v21, %v14489_v18  ;;  %v1210_v60 = vmul.f32 %v1196_v21, %v14491_v14 }
 0x117   : > { %v1389_v17 = vrot.slane %v1197_v33, 6  ;;  %v1199_v41 = vmul.f32 %v1197_v33, %v14490_v56  ;;  %v1211_v48 = vmul.f32 %v1197_v33, %v14492_v4 }
 0x118   : > { %v1352_v7 = vadd.f32 %v1320_v58, %v1196_v21  ;;  %v1200_v10 = vsub.f32 %v1148_v49, %v1198_v3  ;;  %v1156_v3 = vld [vmem:[%s8245_s23 + $0x70] sm:$0xff] }
 0x119   : > { %v1390_v15 = vsel %vm505_vm1, %v1388_v19, %v1389_v17  ;;  %v1201_v30 = vsub.f32 %v1149_v31, %v1199_v41  ;;  %v1157_v41 = vld [vmem:[%s8245_s23 + $0x78] sm:$0x1] }
 0x11a   : > { %v1448_v2 = vadd.f32 %v1390_v15, %v1352_v7  ;;  %v1204_v46 = vsub.f32 %v1200_v10, %v1202_v59 }
 0x11b   : > { %v1205_v24 = vsub.f32 %v1201_v30, %v1203_v44 }
 0x11c   : > { %1466 = vst [vmem:[%s8258_s25 + $0x8] sm:$0x7] %v1448_v2  ;;  %v1321_v34 = vrot.slane %v1204_v46, 3  ;;  %v1391_v32 = vrot.slane %v1204_v46, 6  ;;  %v1206_v13 = vmul.f32 %v1204_v46, %v14489_v18  ;;  %v1218_v25 = vmul.f32 %v1204_v46, %v14491_v14 }
 0x11d   : > { %v1392_v47 = vrot.slane %v1205_v24, 6  ;;  %v1207_v62 = vmul.f32 %v1205_v24, %v14490_v56  ;;  %v1219_v63 = vmul.f32 %v1205_v24, %v14492_v4 }
 0x11e   : > { %v1353_v55 = vadd.f32 %v1321_v34, %v1204_v46  ;;  %v1208_v0 = vsub.f32 %v1150_v11, %v1206_v13  ;;  %v1158_v13 = vld [vmem:[%s8245_s23 + $0x80] sm:$0xff] }
 0x11f   : > { %v1393_v20 = vsel %vm505_vm1, %v1391_v32, %v1392_v47  ;;  %v1209_v28 = vsub.f32 %v1151_v40, %v1207_v62  ;;  %v1159_v62 = vld [vmem:[%s8245_s23 + $0x88] sm:$0x1] }
 0x120   : > { %v1449_v26 = vadd.f32 %v1393_v20, %v1353_v55  ;;  %v1212_v6 = vsub.f32 %v1208_v0, %v1210_v60 }
 0x121   : > { %v1213_v37 = vsub.f32 %v1209_v28, %v1211_v48 }
 0x122   : > { %1467 = vst [vmem:[%s8258_s25 + $0xc] sm:$0x7] %v1449_v26  ;;  %v1322_v36 = vrot.slane %v1212_v6, 3  ;;  %v1394_v51 = vrot.slane %v1212_v6, 6  ;;  %v1214_v16 = vmul.f32 %v1212_v6, %v14489_v18  ;;  %v1226_v27 = vmul.f32 %v1212_v6, %v14491_v14 }
 0x123   : > { %v1395_v9 = vrot.slane %v1213_v37, 6  ;;  %v1215_v54 = vmul.f32 %v1213_v37, %v14490_v56  ;;  %v1227_v38 = vmul.f32 %v1213_v37, %v14492_v4 }
 0x124   : > { %v1354_v43 = vadd.f32 %v1322_v36, %v1212_v6  ;;  %v1216_v57 = vsub.f32 %v1152_v45, %v1214_v16  ;;  %v1160_v16 = vld [vmem:[%s8245_s23 + $0x90] sm:$0xff] }
 0x125   : > { %v1396_v52 = vsel %vm505_vm1, %v1394_v51, %v1395_v9  ;;  %v1217_v61 = vsub.f32 %v1153_v22, %v1215_v54  ;;  %v1161_v54 = vld [vmem:[%s8245_s23 + $0x98] sm:$0x1] }
 0x126   : > { %v1450_v39 = vadd.f32 %v1396_v52, %v1354_v43  ;;  %v1220_v5 = vsub.f32 %v1216_v57, %v1218_v25 }
 0x127   : > { %v1221_v53 = vsub.f32 %v1217_v61, %v1219_v63 }
 0x128   : > { %1468 = vst [vmem:[%s8258_s25 + $0x10] sm:$0x7] %v1450_v39  ;;  %v1323_v8 = vrot.slane %v1220_v5, 3  ;;  %v1397_v29 = vrot.slane %v1220_v5, 6  ;;  %v1222_v50 = vmul.f32 %v1220_v5, %v14489_v18  ;;  %v1234_v7 = vmul.f32 %v1220_v5, %v14491_v14 }
 0x129   : > { %v1398_v23 = vrot.slane %v1221_v53, 6  ;;  %v1223_v1 = vmul.f32 %v1221_v53, %v14490_v56  ;;  %v1235_v30 = vmul.f32 %v1221_v53, %v14492_v4 }
 0x12a   : > { %v1355_v12 = vadd.f32 %v1323_v8, %v1220_v5  ;;  %v1224_v21 = vsub.f32 %v1154_v42, %v1222_v50  ;;  %v1162_v50 = vld [vmem:[%s8245_s23 + $0xa0] sm:$0xff] }
 0x12b   : > { %v1399_v33 = vsel %vm505_vm1, %v1397_v29, %v1398_v23  ;;  %v1225_v49 = vsub.f32 %v1155_v35, %v1223_v1  ;;  %v1163_v1 = vld [vmem:[%s8245_s23 + $0xa8] sm:$0x1] }
 0x12c   : > { %v1451_v58 = vadd.f32 %v1399_v33, %v1355_v12  ;;  %v1228_v19 = vsub.f32 %v1224_v21, %v1226_v27 }
 0x12d   : > { %v1229_v31 = vsub.f32 %v1225_v49, %v1227_v38 }
 0x12e   : > { %1469 = vst [vmem:[%s8258_s25 + $0x14] sm:$0x7] %v1451_v58  ;;  %v1324_v59 = vrot.slane %v1228_v19, 3  ;;  %v1400_v17 = vrot.slane %v1228_v19, 6  ;;  %v1230_v44 = vmul.f32 %v1228_v19, %v14489_v18  ;;  %v1242_v55 = vmul.f32 %v1228_v19, %v14491_v14 }
 0x12f   : > { %v1401_v10 = vrot.slane %v1229_v31, 6  ;;  %v1231_v15 = vmul.f32 %v1229_v31, %v14490_v56  ;;  %v1243_v28 = vmul.f32 %v1229_v31, %v14492_v4 }
 0x130   : > { %v1356_v2 = vadd.f32 %v1324_v59, %v1228_v19  ;;  %v1232_v46 = vsub.f32 %v1156_v3, %v1230_v44  ;;  %v1164_v44 = vld [vmem:[%s8245_s23 + $0xb0] sm:$0xff] }
 0x131   : > { %v1402_v24 = vsel %vm505_vm1, %v1400_v17, %v1401_v10  ;;  %v1233_v11 = vsub.f32 %v1157_v41, %v1231_v15  ;;  %v1165_v15 = vld [vmem:[%s8245_s23 + $0xb8] sm:$0x1] }
 0x132   : > { %v1452_v34 = vadd.f32 %v1402_v24, %v1356_v2  ;;  %v1236_v32 = vsub.f32 %v1232_v46, %v1234_v7 }
 0x133   : > { %v1237_v40 = vsub.f32 %v1233_v11, %v1235_v30 }
 0x134   : > { %1470 = vst [vmem:[%s8258_s25 + $0x18] sm:$0x7] %v1452_v34  ;;  %v1325_v60 = vrot.slane %v1236_v32, 3  ;;  %v1403_v47 = vrot.slane %v1236_v32, 6  ;;  %v1238_v48 = vmul.f32 %v1236_v32, %v14489_v18  ;;  %v1250_v43 = vmul.f32 %v1236_v32, %v14491_v14 }
 0x135   : > { %v1404_v0 = vrot.slane %v1237_v40, 6  ;;  %v1239_v20 = vmul.f32 %v1237_v40, %v14490_v56  ;;  %v1251_v61 = vmul.f32 %v1237_v40, %v14492_v4 }
 0x136   : > { %v1357_v26 = vadd.f32 %v1325_v60, %v1236_v32  ;;  %v1240_v6 = vsub.f32 %v1158_v13, %v1238_v48  ;;  %v1166_v48 = vld [vmem:[%s8245_s23 + $0xc0] sm:$0xff] }
 0x137   : > { %v1405_v37 = vsel %vm505_vm1, %v1403_v47, %v1404_v0  ;;  %v1241_v45 = vsub.f32 %v1159_v62, %v1239_v20  ;;  %v1167_v20 = vld [vmem:[%s8245_s23 + $0xc8] sm:$0x1] }
 0x138   : > { %v1453_v36 = vadd.f32 %v1405_v37, %v1357_v26  ;;  %v1244_v51 = vsub.f32 %v1240_v6, %v1242_v55 }
 0x139   : > { %v1245_v22 = vsub.f32 %v1241_v45, %v1243_v28 }
 0x13a   : > { %1471 = vst [vmem:[%s8258_s25 + $0x1c] sm:$0x7] %v1453_v36  ;;  %v1326_v25 = vrot.slane %v1244_v51, 3  ;;  %v1406_v9 = vrot.slane %v1244_v51, 6  ;;  %v1246_v63 = vmul.f32 %v1244_v51, %v14489_v18  ;;  %v1258_v12 = vmul.f32 %v1244_v51, %v14491_v14 }
 0x13b   : > { %v1407_v57 = vrot.slane %v1245_v22, 6  ;;  %v1247_v52 = vmul.f32 %v1245_v22, %v14490_v56  ;;  %v1259_v49 = vmul.f32 %v1245_v22, %v14492_v4 }
 0x13c   : > { %v1358_v39 = vadd.f32 %v1326_v25, %v1244_v51  ;;  %v1248_v5 = vsub.f32 %v1160_v16, %v1246_v63  ;;  %v1168_v63 = vld [vmem:[%s8245_s23 + $0xd0] sm:$0xff] }
 0x13d   : > { %v1408_v53 = vsel %vm505_vm1, %v1406_v9, %v1407_v57  ;;  %v1249_v42 = vsub.f32 %v1161_v54, %v1247_v52  ;;  %v1169_v52 = vld [vmem:[%s8245_s23 + $0xd8] sm:$0x1] }
 0x13e   : > { %v1454_v8 = vadd.f32 %v1408_v53, %v1358_v39  ;;  %v1252_v29 = vsub.f32 %v1248_v5, %v1250_v43 }
 0x13f   : > { %v1253_v35 = vsub.f32 %v1249_v42, %v1251_v61 }
 0x140   : > { %1472 = vst [vmem:[%s8258_s25 + $0x20] sm:$0x7] %v1454_v8  ;;  %v1327_v27 = vrot.slane %v1252_v29, 3  ;;  %v1409_v23 = vrot.slane %v1252_v29, 6  ;;  %v1254_v38 = vmul.f32 %v1252_v29, %v14489_v18  ;;  %v1266_v2 = vmul.f32 %v1252_v29, %v14491_v14 }
 0x141   : > { %v1410_v21 = vrot.slane %v1253_v35, 6  ;;  %v1255_v33 = vmul.f32 %v1253_v35, %v14490_v56  ;;  %v1267_v11 = vmul.f32 %v1253_v35, %v14492_v4 }
 0x142   : > { %v1359_v58 = vadd.f32 %v1327_v27, %v1252_v29  ;;  %v1256_v19 = vsub.f32 %v1162_v50, %v1254_v38  ;;  %v1170_v38 = vld [vmem:[%s8245_s23 + $0xe0] sm:$0xff] }
 0x143   : > { %v1411_v31 = vsel %vm505_vm1, %v1409_v23, %v1410_v21  ;;  %v1257_v3 = vsub.f32 %v1163_v1, %v1255_v33  ;;  %v1171_v33 = vld [vmem:[%s8245_s23 + $0xe8] sm:$0x1] }
 0x144   : > { %v1455_v59 = vadd.f32 %v1411_v31, %v1359_v58  ;;  %v1260_v17 = vsub.f32 %v1256_v19, %v1258_v12 }
 0x145   : > { %v1261_v41 = vsub.f32 %v1257_v3, %v1259_v49 }
 0x146   : > { %1473 = vst [vmem:[%s8258_s25 + $0x24] sm:$0x7] %v1455_v59  ;;  %v1328_v7 = vrot.slane %v1260_v17, 3  ;;  %v1412_v10 = vrot.slane %v1260_v17, 6  ;;  %v1262_v30 = vmul.f32 %v1260_v17, %v14489_v18  ;;  %v1274_v26 = vmul.f32 %v1260_v17, %v14491_v14 }
 0x147   : > { %v1413_v46 = vrot.slane %v1261_v41, 6  ;;  %v1263_v24 = vmul.f32 %v1261_v41, %v14490_v56  ;;  %v1275_v45 = vmul.f32 %v1261_v41, %v14492_v4 }
 0x148   : > { %v1360_v34 = vadd.f32 %v1328_v7, %v1260_v17  ;;  %v1264_v32 = vsub.f32 %v1164_v44, %v1262_v30 }
 0x149   : > { %v1414_v40 = vsel %vm505_vm1, %v1412_v10, %v1413_v46  ;;  %v1265_v13 = vsub.f32 %v1165_v15, %v1263_v24  ;;  %v1172_v10 = vld [vmem:[%s8245_s23 + $0xf0] sm:$0xff] }
 0x14a   : > { %v1456_v60 = vadd.f32 %v1414_v40, %v1360_v34  ;;  %v1268_v47 = vsub.f32 %v1264_v32, %v1266_v2  ;;  %v1173_v2 = vld [vmem:[%s8245_s23 + $0xf8] sm:$0x1] }
 0x14b   : > { %v1269_v62 = vsub.f32 %v1265_v13, %v1267_v11 }
 0x14c   : > { %1474 = vst [vmem:[%s8258_s25 + $0x28] sm:$0x7] %v1456_v60  ;;  %v1329_v55 = vrot.slane %v1268_v47, 3  ;;  %v1415_v0 = vrot.slane %v1268_v47, 6  ;;  %v1270_v28 = vmul.f32 %v1268_v47, %v14489_v18  ;;  %v1282_v39 = vmul.f32 %v1268_v47, %v14491_v14 }
 0x14d   : > { %v1416_v6 = vrot.slane %v1269_v62, 6  ;;  %v1271_v37 = vmul.f32 %v1269_v62, %v14490_v56  ;;  %v1283_v42 = vmul.f32 %v1269_v62, %v14492_v4 }
 0x14e   : > { %v1361_v36 = vadd.f32 %v1329_v55, %v1268_v47  ;;  %v1272_v51 = vsub.f32 %v1166_v48, %v1270_v28 }
 0x14f   : > { %v1417_v22 = vsel %vm505_vm1, %v1415_v0, %v1416_v6  ;;  %v1273_v16 = vsub.f32 %v1167_v20, %v1271_v37 }
 0x150   : > { %v1457_v25 = vadd.f32 %v1417_v22, %v1361_v36  ;;  %v1276_v9 = vsub.f32 %v1272_v51, %v1274_v26  ;;  %v1514_v36 = vld [vmem:[%s13432_s3 + $0x10] sm:$0xff] (%p1131_p0)  ;;  %v1512_v51 = vld [vmem:[%s13432_s3] sm:$0xff] (%p1131_p0) }
 0x151   : > { %v1277_v54 = vsub.f32 %v1273_v16, %v1275_v45  ;;  %v14493_v45 = vmov (%p1131_p0), 0   ;;  %v1516_v22 = vld [vmem:[%s13432_s3 + $0x20] sm:$0xff] (%p1131_p0) }
 0x152   : > { %1475 = vst [vmem:[%s8258_s25 + $0x2c] sm:$0x7] %v1457_v25  ;;  %v1330_v43 = vrot.slane %v1276_v9, 3  ;;  %v1418_v57 = vrot.slane %v1276_v9, 6  ;;  %v1278_v61 = vmul.f32 %v1276_v9, %v14489_v18  ;;  %v1290_v58 = vmul.f32 %v1276_v9, %v14491_v14  ;;  %6138 = vset.pattern.permute.xlu1 (%p1131_p0), %v14493_v45  ;;  %6137 = vset.pattern.permute.xlu0 (%p1131_p0), %v14493_v45  ;;  %v1518_v16 = vld [vmem:[%s13434_s5] sm:$0x7] (%p1131_p0) }
 0x153   : > { %v1419_v5 = vrot.slane %v1277_v54, 6  ;;  %v1279_v53 = vmul.f32 %v1277_v54, %v14490_v56  ;;  %v1291_v3 = vmul.f32 %v1277_v54, %v14492_v4  ;;  %1942 = vperm.xlu1 (%p1131_p0), %6138, %v1514_v36   ;;  %1666 = vperm.xlu0 (%p1131_p0), %6137, %v1512_v51   ;;  %v1520_v25 = vld [vmem:[%s13434_s5 + $0x8] sm:$0x7] (%p1131_p0)  ;;  %v1522_v54 = vld [vmem:[%s13434_s5 + $0x10] sm:$0x7] (%p1131_p0) }
 0x154   : > { %v1362_v8 = vadd.f32 %v1330_v43, %v1276_v9  ;;  %v1280_v29 = vsub.f32 %v1168_v63, %v1278_v61  ;;  %v1519_v9 = vld [vmem:[%s13434_s5 + $0x4] sm:$0x7] (%p1131_p0)  ;;  %v1521_v63 = vld [vmem:[%s13434_s5 + $0xc] sm:$0x7] (%p1131_p0)  ;;  %v1524_v43 = vld [vmem:[%s13434_s5 + $0x18] sm:$0x7] (%p1131_p0) }
 0x155   : > { %v1420_v35 = vsel %vm505_vm1, %v1418_v57, %v1419_v5  ;;  %v1281_v50 = vsub.f32 %v1169_v52, %v1279_v53  ;;  %v1523_v57 = vld [vmem:[%s13434_s5 + $0x14] sm:$0x7] (%p1131_p0)  ;;  %v1526_v52 = vld [vmem:[%s13434_s5 + $0x20] sm:$0x7] (%p1131_p0)  ;;  %v1525_v61 = vld [vmem:[%s13434_s5 + $0x1c] sm:$0x7] (%p1131_p0) }
 0x156   : > { %v1458_v27 = vadd.f32 %v1420_v35, %v1362_v8  ;;  %v1284_v23 = vsub.f32 %v1280_v29, %v1282_v39  ;;  %v1528_v39 = vld [vmem:[%s13434_s5 + $0x28] sm:$0x7] (%p1131_p0)  ;;  %v1527_v5 = vld [vmem:[%s13434_s5 + $0x24] sm:$0x7] (%p1131_p0)  ;;  %v1530_v53 = vld [vmem:[%s13434_s5 + $0x30] sm:$0x7] (%p1131_p0) }
 0x157   : > { %v1285_v1 = vsub.f32 %v1281_v50, %v1283_v42  ;;  %2208 = vperm.xlu1 (%p1131_p0), %6138, %v1516_v22   ;;  %v1529_v42 = vld [vmem:[%s13434_s5 + $0x2c] sm:$0x7] (%p1131_p0)  ;;  %v1532_v8 = vld [vmem:[%s13434_s5 + $0x38] sm:$0x7] (%p1131_p0)  ;;  %v1531_v29 = vld [vmem:[%s13434_s5 + $0x34] sm:$0x7] (%p1131_p0) }
 0x158   : > { %1476 = vst [vmem:[%s8258_s25 + $0x30] sm:$0x7] %v1458_v27  ;;  %v1331_v12 = vrot.slane %v1284_v23, 3  ;;  %v1421_v21 = vrot.slane %v1284_v23, 6  ;;  %v1286_v49 = vmul.f32 %v1284_v23, %v14489_v18  ;;  %v1298_v34 = vmul.f32 %v1284_v23, %v14491_v14  ;;  %v1513_v14 = vld [vmem:[%s13432_s3 + $0x8] sm:$0xff] (%p1131_p0) }
 0x159   : > { %v1422_v19 = vrot.slane %v1285_v1, 6  ;;  %v1287_v31 = vmul.f32 %v1285_v1, %v14490_v56  ;;  %v1299_v13 = vmul.f32 %v1285_v1, %v14492_v4  ;;  %v1517_v4 = vld [vmem:[%s13432_s3 + $0x28] sm:$0xff] (%p1131_p0)  ;;  %v5566_v35 = vld [vmem:[%s13436_s7] sm:$0x7] (%p1131_p0)  ;;  %v1533_v50 = vld [vmem:[%s13434_s5 + $0x3c] sm:$0x7] (%p1131_p0) }
 0x15a   : > { %v1363_v59 = vadd.f32 %v1331_v12, %v1284_v23  ;;  %v1288_v17 = vsub.f32 %v1170_v38, %v1286_v49  ;;  %v5568_v27 = vld [vmem:[%s13436_s7 + $0x8] sm:$0x7] (%p1131_p0)  ;;  %v5567_v23 = vld [vmem:[%s13436_s7 + $0x4] sm:$0x7] (%p1131_p0)  ;;  %v5743_v38 = vld [vmem:[%s13437_s8] sm:$0x7] (%p1131_p0)  ;;  %v1536_v12 = vlaneseq (%p1131_p0) }
 0x15b   : > { %v1423_v41 = vsel %vm505_vm1, %v1421_v21, %v1422_v19  ;;  %v1289_v44 = vsub.f32 %v1171_v33, %v1287_v31  ;;  %v5744_v1 = vld [vmem:[%s13437_s8 + $0x4] sm:$0x7] (%p1131_p0)  ;;  %s13333_s5 = smov (%p1131_p0), 0  }
 0x15c   : > { %v1459_v7 = vadd.f32 %v1423_v41, %v1363_v59  ;;  %v1292_v24 = vsub.f32 %v1288_v17, %v1290_v58   ;;  %v8477_v21 = vshrl.u32 (%p1131_p0), %v1536_v12, 7 }
 0x15d   : > { %v1293_v46 = vsub.f32 %v1289_v44, %v1291_v3  }
 0x15e   : > { %1477 = vst [vmem:[%s8258_s25 + $0x34] sm:$0x7] %v1459_v7  ;;  %v1332_v15 = vrot.slane %v1292_v24, 3  ;;  %v1424_v30 = vrot.slane %v1292_v24, 6  ;;  %v1294_v11 = vmul.f32 %v1292_v24, %v14489_v18  ;;  %v1534_v18 = vld [vmem:[%s13433_s4] sm:$0xff] (%p1131_p0)  ;;  %14494 = vst [vmem:[#allocation51_spill] sm:$0xff] (%p1131_p0), %v8477_v21 }
 0x15f   : > { %v1295_v32 = vmul.f32 %v1293_v46, %v14490_v56  ;;  %v1425_v40 = vrot.slane %v1293_v46, 6  ;;  %1740 = vperm.xlu0 (%p1131_p0), %6137, %v1534_v18   ;;  %v1535_v56 = vld [vmem:[%s13433_s4 + $0x8] sm:$0xff] (%p1131_p0)  ;;  %v1515_v46 = vld [vmem:[%s13432_s3 + $0x18] sm:$0xff] (%p1131_p0)  ;;  %v8480_v33 = vsub.s32 (%p1131_p0), 1, %v8477_v21  ;;  %v8487_v19 = vsub.s32 (%p1131_p0), 0, %v8477_v21 }
 0x160   : > { %v1364_v60 = vadd.f32 %v1332_v15, %v1292_v24  ;;  %v1296_v47 = vsub.f32 %v1172_v10, %v1294_v11  ;;  %1745 = vperm.xlu1 (%p1131_p0), %6138, %v1535_v56   ;;  %v2408_v24 = vld [vmem:[%s13435_s6] sm:$0x7] (%p1131_p0) }
 0x161   : > { %v1426_v62 = vsel %vm505_vm1, %v1424_v30, %v1425_v40  ;;  %v1297_v48 = vsub.f32 %v1173_v2, %v1295_v32  ;;  %14495 = vst [vmem:[#allocation52_spill] sm:$0xff] (%p1131_p0), %v8480_v33  ;;  %14496 = vst [vmem:[#allocation53_spill] sm:$0xff] (%p1131_p0), %v8487_v19 }
 0x162   : > { %v1460_v55 = vadd.f32 %v1426_v62, %v1364_v60  ;;  %v1300_v34 = vsub.f32 %v1296_v47, %v1298_v34  }
 0x163   : > { %v1301_v11 = vsub.f32 %v1297_v48, %v1299_v13   ;;  %1671 = vperm.xlu0 (%p1131_p0), %6137, %v1513_v14  }
 0x164   : > { %1478 = vst [vmem:[%s8258_s25 + $0x38] sm:$0x7] %v1460_v55  ;;  %v1333_v0 = vrot.slane %v1300_v34, 3  ;;  %v1427_v20 = vrot.slane %v1300_v34, 6  ;;  %1133 = sbr.rel (!%p1131_p0) target bundleno = 255 (0xff), region = 74  ;;  %2213 = vperm.xlu1 (%p1131_p0), %6138, %v1517_v4  }
 0x165   : > { %v1428_v28 = vrot.slane %v1301_v11, 6 }
 0x166   : > { %v1365_v26 = vadd.f32 %v1333_v0, %v1300_v34 }
 0x167   : > { %v1429_v6 = vsel %vm505_vm1, %v1427_v20, %v1428_v28  ;;  %1947 = vperm.xlu0 (%p1131_p0), %6137, %v1515_v46  }
 0x168   : > { %v1461_v37 = vadd.f32 %v1429_v6, %v1365_v26  ;;  %2576 = vperm.xlu1 (%p1131_p0), %6138, %v2408_v24  }
 0x16a   : > { %1479 = vst [vmem:[%s8258_s25 + $0x3c] sm:$0x7] %v1461_v37 }
 0x16b   :  { %2539 = vperm.xlu0 %6137, %v1518_v16  }
 0x16c   :  { %2938 = vperm.xlu1 %6138, %v1520_v25  }
 0x16f   :  { %2741 = vperm.xlu0 %6137, %v1519_v9  }
 0x170   :  { %3332 = vperm.xlu1 %6138, %v1522_v54  }
 0x171   :  { %v8482_v49 = vld [vmem:[#allocation3] sm:$0x7]  ;;  %v8484_v58 = vld [vmem:[#allocation3 + $0x4] sm:$0x7]  ;;  %v8489_v31 = vld [vmem:[#allocation3 + $0x8] sm:$0x7] }
 0x172   :  { %v8491_v3 = vld [vmem:[#allocation3 + $0xc] sm:$0x7]  ;;  %v8493_v59 = vld [vmem:[#allocation3 + $0x10] sm:$0x7]  ;;  %v8495_v17 = vld [vmem:[#allocation3 + $0x14] sm:$0x7]  ;;  %v8503_v7 = vrot.slane %v8482_v49, %v8480_v33  ;;  %v8513_v2 = vrot.slane %v8484_v58, %v8480_v33  ;;  %v8517_v11 = vrot.slane %v8489_v31, %v8480_v33  ;;  %v8591_v4 = vrot.slane %v8482_v49, %v8487_v19 }
 0x173   :  { %3135 = vperm.xlu0 %6137, %v1521_v63   ;;  %v8497_v41 = vld [vmem:[#allocation3 + $0x18] sm:$0x7]  ;;  %v8499_v44 = vld [vmem:[#allocation3 + $0x1c] sm:$0x7]  ;;  %v8505_v10 = vld [vmem:[#allocation3 + $0x20] sm:$0x7]  ;;  %v8521_v34 = vrot.slane %v8491_v3, %v8480_v33  ;;  %v8525_v32 = vrot.slane %v8493_v59, %v8480_v33  ;;  %v8535_v47 = vrot.slane %v8495_v17, %v8480_v33  ;;  %v8613_v63 = vrot.slane %v8484_v58, %v8487_v19 }
 0x174   :  { %3726 = vperm.xlu1 %6138, %v1524_v43   ;;  %14497 = vst [vmem:[#allocation54_spill] sm:$0xff] %v8503_v7  ;;  %v8507_v15 = vld [vmem:[#allocation3 + $0x24] sm:$0x7]  ;;  %v8509_v30 = vld [vmem:[#allocation3 + $0x28] sm:$0x7]  ;;  %14498 = vst [vmem:[#allocation56_spill] sm:$0xff] %v8513_v2  ;;  %v8539_v62 = vrot.slane %v8497_v41, %v8480_v33  ;;  %v8543_v48 = vrot.slane %v8499_v44, %v8480_v33  ;;  %v8547_v55 = vrot.slane %v8505_v10, %v8480_v33 }
 0x175   :  { %14499 = vst [vmem:[#allocation57_spill] sm:$0xff] %v8517_v11  ;;  %14500 = vst [vmem:[#allocation58_spill] sm:$0xff] %v8521_v34  ;;  %v8527_v40 = vld [vmem:[#allocation3 + $0x2c] sm:$0x7]  ;;  %v8529_v13 = vld [vmem:[#allocation3 + $0x30] sm:$0x7]  ;;  %v8557_v26 = vrot.slane %v8507_v15, %v8480_v33  ;;  %v8561_v6 = vrot.slane %v8509_v30, %v8480_v33 }
 0x176   :  { %14501 = vst [vmem:[#allocation59_spill] sm:$0xff] %v8525_v32  ;;  %v8531_v60 = vld [vmem:[#allocation3 + $0x34] sm:$0x7]  ;;  %14502 = vst [vmem:[#allocation61_spill] sm:$0xff] %v8535_v47  ;;  %v8549_v0 = vld [vmem:[#allocation3 + $0x38] sm:$0x7]  ;;  %v8565_v37 = vrot.slane %v8527_v40, %v8480_v33  ;;  %v8569_v45 = vrot.slane %v8529_v13, %v8480_v33 }
 0x177   :  { %3529 = vperm.xlu0 %6137, %v1523_v57   ;;  %14503 = vst [vmem:[#allocation62_spill] sm:$0xff] %v8539_v62  ;;  %14504 = vst [vmem:[#allocation63_spill] sm:$0xff] %v8543_v48  ;;  %v8551_v20 = vld [vmem:[#allocation3 + $0x3c] sm:$0x7]  ;;  %v8553_v28 = vld [vmem:[#allocation3 + $0x40] sm:$0x7]  ;;  %v8579_v18 = vrot.slane %v8531_v60, %v8480_v33  ;;  %v8583_v56 = vrot.slane %v8549_v0, %v8480_v33 }
 0x178   :  { %4120 = vperm.xlu1 %6138, %v1526_v52   ;;  %14505 = vst [vmem:[#allocation64_spill] sm:$0xff] %v8547_v55  ;;  %14506 = vst [vmem:[#allocation65_spill] sm:$0xff] %v8557_v26  ;;  %v8571_v36 = vld [vmem:[#allocation3 + $0x44] sm:$0x7]  ;;  %v8573_v51 = vld [vmem:[#allocation3 + $0x48] sm:$0x7]  ;;  %v8587_v14 = vrot.slane %v8551_v20, %v8480_v33  ;;  %v8601_v25 = vrot.slane %v8553_v28, %v8480_v33 }
 0x179   :  { %14507 = vst [vmem:[#allocation66_spill] sm:$0xff] %v8561_v6  ;;  %14508 = vst [vmem:[#allocation99_spill] sm:$0xff] %v8565_v37  ;;  %v8575_v22 = vld [vmem:[#allocation3 + $0x4c] sm:$0x7]  ;;  %v8593_v46 = vld [vmem:[#allocation3 + $0x50] sm:$0x7]  ;;  %v8605_v9 = vrot.slane %v8571_v36, %v8480_v33  ;;  %v8609_v54 = vrot.slane %v8573_v51, %v8480_v33 }
 0x17a   :  { %14509 = vst [vmem:[#allocation100_spill] sm:$0xff] %v8569_v45  ;;  %14510 = vst [vmem:[#allocation86_spill] sm:$0xff] %v8579_v18  ;;  %v8595_v24 = vld [vmem:[#allocation3 + $0x54] sm:$0x7]  ;;  %v8597_v16 = vld [vmem:[#allocation3 + $0x58] sm:$0x7] }
 0x17b   :  { %3923 = vperm.xlu0 %6137, %v1525_v61   ;;  %14511 = vst [vmem:[#allocation87_spill] sm:$0xff] %v8583_v56  ;;  %14512 = vst [vmem:[#allocation88_spill] sm:$0xff] %v8587_v14  ;;  %v8615_v43 = vld [vmem:[#allocation3 + $0x5c] sm:$0x7]  ;;  %v8617_v57 = vld [vmem:[#allocation3 + $0x60] sm:$0x7]  ;;  %v8623_v61 = vrot.slane %v8575_v22, %v8480_v33 }
 0x17c   :  { %4514 = vperm.xlu1 %6138, %v1528_v39   ;;  %14513 = vst [vmem:[#allocation89_spill] sm:$0xff] %v8591_v4  ;;  %14514 = vst [vmem:[#allocation90_spill] sm:$0xff] %v8601_v25  ;;  %v8619_v52 = vld [vmem:[#allocation3 + $0x64] sm:$0x7]  ;;  %v8627_v39 = vrot.slane %v8593_v46, %v8480_v33  ;;  %v8663_v12 = vld [vmem:[#allocation3 + $0x7c] sm:$0x7] }
 0x17d   :  { %14515 = vst [vmem:[#allocation91_spill] sm:$0xff] %v8605_v9  ;;  %14516 = vst [vmem:[#allocation92_spill] sm:$0xff] %v8609_v54 }
 0x17e   :  { %14517 = vst [vmem:[#allocation93_spill] sm:$0xff] %v8613_v63  ;;  %14518 = vst [vmem:[#allocation94_spill] sm:$0xff] %v8623_v61 }
 0x17f   :  { %4317 = vperm.xlu0 %6137, %v1527_v5   ;;  %14519 = vst [vmem:[#allocation101_spill] sm:$0xff] %v8627_v39  ;;  %v8631_v5 = vrot.slane %v8595_v24, %v8480_v33 }
 0x180   :  { %4908 = vperm.xlu1 %6138, %v1530_v53   ;;  %v8635_v53 = vrot.slane %v8597_v16, %v8480_v33 }
 0x181   :  { %14520 = vst [vmem:[#allocation102_spill] sm:$0xff] %v8631_v5 }
 0x182   :  { %14521 = vst [vmem:[#allocation44_spill] sm:$0xff] %v8635_v53 }
 0x183   :  { %4711 = vperm.xlu0 %6137, %v1529_v42   ;;  %v8637_v42 = vld [vmem:[#allocation3 + $0x68] sm:$0x7] }
 0x184   :  { %5302 = vperm.xlu1 %6138, %v1532_v8   ;;  %v8639_v8 = vld [vmem:[#allocation3 + $0x6c] sm:$0x7]  ;;  %v8667_v63 = vrot.slane %v8637_v42, %v8480_v33 }
 0x185   :  { %v8671_v4 = vrot.slane %v8639_v8, %v8480_v33 }
 0x186   :  { %14526 = vst [vmem:[#allocation69_spill] sm:$0xff] %v8667_v63  ;;  %v8691_v63 = vrot.slane %v8663_v12, %v8480_v33 }
 0x187   :  { %5105 = vperm.xlu0 %6137, %v1531_v29   ;;  %v8641_v29 = vld [vmem:[#allocation3 + $0x70] sm:$0x7]  ;;  %14527 = vst [vmem:[#allocation71_spill] sm:$0xff] %v8671_v4  ;;  %v8695_v4 = vrot.slane %v8493_v59, %v8487_v19 }
 0x188   :  { %5571 = vperm.xlu1 %6138, %v5566_v35   ;;  %v8645_v35 = vrot.slane %v8615_v43, %v8480_v33  ;;  %14532 = vst [vmem:[#allocation77_spill] sm:$0xff] %v8691_v63 }
 0x189   :  { %14533 = vst [vmem:[#allocation78_spill] sm:$0xff] %v8695_v4  ;;  %v8718_v4 = vrot.slane %v8507_v15, %v8487_v19 }
 0x18a   :  { %14522 = vst [vmem:[#allocation68_spill] sm:$0xff] %v8645_v35 }
 0x18b   :  { %5499 = vperm.xlu0 %6137, %v1533_v50   ;;  %v8649_v50 = vrot.slane %v8617_v57, %v8480_v33  ;;  %14539 = vst [vmem:[#allocation84_spill] sm:$0xff] %v8718_v4  ;;  %v8742_v4 = vrot.slane %v8551_v20, %v8487_v19 }
 0x18c   :  { %5677 = vperm.xlu1 %6138, %v5568_v27   ;;  %v8653_v27 = vrot.slane %v8619_v52, %v8480_v33 }
 0x18d   :  { %14523 = vst [vmem:[#allocation60_spill] sm:$0xff] %v8649_v50  ;;  %14545 = vst [vmem:[#allocation25_spill] sm:$0xff] %v8742_v4  ;;  %v8766_v4 = vrot.slane %v8595_v24, %v8487_v19 }
 0x18e   :  { %14524 = vst [vmem:[#allocation43_spill] sm:$0xff] %v8653_v27  ;;  %v8675_v27 = vrot.slane %v8641_v29, %v8480_v33 }
 0x18f   :  { %5608 = vperm.xlu0 %6137, %v5567_v23   ;;  %v8657_v23 = vrot.slane %v8489_v31, %v8487_v19  ;;  %14551 = vst [vmem:[#allocation19_spill] sm:$0xff] %v8766_v4  ;;  %v8790_v4 = vrot.slane %v8639_v8, %v8487_v19 }
 0x190   :  { %5784 = vperm.xlu1 %6138, %v5744_v1   ;;  %v8659_v1 = vld [vmem:[#allocation3 + $0x74] sm:$0x7]  ;;  %14528 = vst [vmem:[#allocation72_spill] sm:$0xff] %v8675_v27  ;;  %v8699_v27 = vrot.slane %v8495_v17, %v8487_v19 }
 0x191   :  { %14525 = vst [vmem:[#allocation70_spill] sm:$0xff] %v8657_v23  ;;  %v8679_v23 = vrot.slane %v8491_v3, %v8487_v19  ;;  %v8683_v50 = vrot.slane %v8659_v1, %v8480_v33  ;;  %14557 = vst [vmem:[#allocation15_spill] sm:$0xff] %v8790_v4 }
 0x192   :  { %14534 = vst [vmem:[#allocation79_spill] sm:$0xff] %v8699_v27  ;;  %v8722_v27 = vrot.slane %v8509_v30, %v8487_v19 }
 0x193   :  { %5779 = vperm.xlu0 %6137, %v5743_v38   ;;  %v8661_v38 = vld [vmem:[#allocation3 + $0x78] sm:$0x7]  ;;  %14529 = vst [vmem:[#allocation73_spill] sm:$0xff] %v8679_v23  ;;  %14530 = vst [vmem:[#allocation74_spill] sm:$0xff] %v8683_v50  ;;  %v8703_v23 = vrot.slane %v8497_v41, %v8487_v19  ;;  %v8707_v50 = vrot.slane %v8499_v44, %v8487_v19 }
 0x194   :  { %v8687_v35 = vrot.slane %v8661_v38, %v8480_v33  ;;  %v8714_v33 = vrot.slane %v8505_v10, %v8487_v19  ;;  %14540 = vst [vmem:[#allocation22_spill] sm:$0xff] %v8722_v27  ;;  %v8746_v27 = vrot.slane %v8553_v28, %v8487_v19 }
 0x195   :  { %14535 = vst [vmem:[#allocation80_spill] sm:$0xff] %v8703_v23  ;;  %14536 = vst [vmem:[#allocation81_spill] sm:$0xff] %v8707_v50  ;;  %v8726_v23 = vrot.slane %v8527_v40, %v8487_v19  ;;  %v8734_v50 = vrot.slane %v8531_v60, %v8487_v19 }
 0x196   :  { %14531 = vst [vmem:[#allocation75_spill] sm:$0xff] %v8687_v35  ;;  %v8710_v35 = vsub.s32 2, %v8477_v21  ;;  %14538 = vst [vmem:[#allocation83_spill] sm:$0xff] %v8714_v33  ;;  %v8730_v21 = vrot.slane %v8529_v13, %v8487_v19  ;;  %v8738_v33 = vrot.slane %v8549_v0, %v8487_v19 }
 0x197   :  { %14541 = vst [vmem:[#allocation23_spill] sm:$0xff] %v8726_v23  ;;  %14543 = vst [vmem:[#allocation34_spill] sm:$0xff] %v8734_v50  ;;  %v8750_v23 = vrot.slane %v8571_v36, %v8487_v19  ;;  %v8758_v50 = vrot.slane %v8575_v22, %v8487_v19 }
 0x198   :  { %14537 = vst [vmem:[#allocation82_spill] sm:$0xff] %v8710_v35  ;;  %14542 = vst [vmem:[#allocation85_spill] sm:$0xff] %v8730_v21  ;;  %v8754_v21 = vrot.slane %v8573_v51, %v8487_v19  ;;  %v8814_v4 = vrot.slane %v8484_v58, %v8710_v35  ;;  %v8834_v58 = vrot.slane %v8497_v41, %v8710_v35 }
 0x199   :  { %14544 = vst [vmem:[#allocation36_spill] sm:$0xff] %v8738_v33  ;;  %14546 = vst [vmem:[#allocation27_spill] sm:$0xff] %v8746_v27  ;;  %v8762_v33 = vrot.slane %v8593_v46, %v8487_v19  ;;  %v8770_v27 = vrot.slane %v8597_v16, %v8487_v19  ;;  %v8854_v41 = vrot.slane %v8527_v40, %v8710_v35 }
 0x19a   :  { %14547 = vst [vmem:[#allocation28_spill] sm:$0xff] %v8750_v23  ;;  %14548 = vst [vmem:[#allocation33_spill] sm:$0xff] %v8754_v21  ;;  %v8774_v23 = vrot.slane %v8615_v43, %v8487_v19  ;;  %v8778_v21 = vrot.slane %v8617_v57, %v8487_v19  ;;  %v8874_v40 = vrot.slane %v8553_v28, %v8710_v35 }
 0x19b   :  { %14549 = vst [vmem:[#allocation35_spill] sm:$0xff] %v8758_v50  ;;  %14550 = vst [vmem:[#allocation17_spill] sm:$0xff] %v8762_v33  ;;  %v8782_v50 = vrot.slane %v8619_v52, %v8487_v19  ;;  %v8786_v33 = vrot.slane %v8637_v42, %v8487_v19  ;;  %v8894_v28 = vrot.slane %v8595_v24, %v8710_v35 }
 0x19c   :  { %14552 = vst [vmem:[#allocation20_spill] sm:$0xff] %v8770_v27  ;;  %14553 = vst [vmem:[#allocation21_spill] sm:$0xff] %v8774_v23  ;;  %v8794_v27 = vrot.slane %v8641_v29, %v8487_v19  ;;  %v8798_v23 = vrot.slane %v8659_v1, %v8487_v19  ;;  %v8914_v24 = vrot.slane %v8637_v42, %v8710_v35 }
 0x19d   :  { %14554 = vst [vmem:[#allocation26_spill] sm:$0xff] %v8778_v21  ;;  %14555 = vst [vmem:[#allocation12_spill] sm:$0xff] %v8782_v50  ;;  %v8802_v21 = vrot.slane %v8661_v38, %v8487_v19  ;;  %v8806_v50 = vrot.slane %v8663_v12, %v8487_v19  ;;  %v8826_v19 = vrot.slane %v8493_v59, %v8710_v35 }
 0x19e   :  { %14556 = vst [vmem:[#allocation14_spill] sm:$0xff] %v8786_v33  ;;  %14558 = vst [vmem:[#allocation16_spill] sm:$0xff] %v8794_v27  ;;  %v8810_v33 = vrot.slane %v8482_v49, %v8710_v35  ;;  %v8818_v27 = vrot.slane %v8489_v31, %v8710_v35  ;;  %v8830_v49 = vrot.slane %v8495_v17, %v8710_v35 }
 0x19f   :  { %14559 = vst [vmem:[#allocation18_spill] sm:$0xff] %v8798_v23  ;;  %14560 = vst [vmem:[#allocation50_spill] sm:$0xff] %v8802_v21  ;;  %v8822_v23 = vrot.slane %v8491_v3, %v8710_v35  ;;  %v8838_v31 = vrot.slane %v8499_v44, %v8710_v35  ;;  %v8842_v3 = vrot.slane %v8505_v10, %v8710_v35 }
 0x1a0   :  { %14561 = vst [vmem:[#allocation55_spill] sm:$0xff] %v8806_v50  ;;  %14562 = vst [vmem:[#allocation7_spill] sm:$0xff] %v8810_v33  ;;  %v8846_v59 = vrot.slane %v8507_v15, %v8710_v35  ;;  %v8850_v17 = vrot.slane %v8509_v30, %v8710_v35  ;;  %v8858_v44 = vrot.slane %v8529_v13, %v8710_v35 }
 0x1a1   :  { %14563 = vst [vmem:[#allocation8_spill] sm:$0xff] %v8814_v4  ;;  %14564 = vst [vmem:[#allocation9_spill] sm:$0xff] %v8818_v27  ;;  %v8862_v10 = vrot.slane %v8531_v60, %v8710_v35  ;;  %v8866_v15 = vrot.slane %v8549_v0, %v8710_v35  ;;  %v8870_v30 = vrot.slane %v8551_v20, %v8710_v35 }
 0x1a2   :  { %14565 = vst [vmem:[#allocation10_spill] sm:$0xff] %v8822_v23  ;;  %14566 = vst [vmem:[#allocation11_spill] sm:$0xff] %v8826_v19  ;;  %v8878_v13 = vrot.slane %v8571_v36, %v8710_v35  ;;  %v8882_v60 = vrot.slane %v8573_v51, %v8710_v35  ;;  %v8886_v0 = vrot.slane %v8575_v22, %v8710_v35 }
 0x1a3   :  { %14567 = vst [vmem:[#allocation13_spill] sm:$0xff] %v8830_v49  ;;  %14568 = vst [vmem:[#allocation41_spill] sm:$0xff] %v8834_v58  ;;  %v8890_v20 = vrot.slane %v8593_v46, %v8710_v35  ;;  %v8898_v36 = vrot.slane %v8597_v16, %v8710_v35  ;;  %v8902_v51 = vrot.slane %v8615_v43, %v8710_v35 }
 0x1a4   :  { %14569 = vst [vmem:[#allocation42_spill] sm:$0xff] %v8838_v31  ;;  %14570 = vst [vmem:[#allocation49_spill] sm:$0xff] %v8842_v3  ;;  %v8906_v22 = vrot.slane %v8617_v57, %v8710_v35  ;;  %v8910_v46 = vrot.slane %v8619_v52, %v8710_v35  ;;  %v8918_v16 = vrot.slane %v8639_v8, %v8710_v35 }
 0x1a5   :  { %14571 = vst [vmem:[#allocation67_spill] sm:$0xff] %v8846_v59  ;;  %14572 = vst [vmem:[#allocation76_spill] sm:$0xff] %v8850_v17  ;;  %v8922_v43 = vrot.slane %v8641_v29, %v8710_v35  ;;  %v8926_v57 = vrot.slane %v8659_v1, %v8710_v35  ;;  %v8930_v52 = vrot.slane %v8661_v38, %v8710_v35 }
 0x1a6   :  { %14573 = vst [vmem:[#allocation24_spill] sm:$0xff] %v8854_v41  ;;  %14574 = vst [vmem:[#allocation29_spill] sm:$0xff] %v8858_v44  ;;  %v8934_v42 = vrot.slane %v8663_v12, %v8710_v35 }
 0x1a7   :  { %14575 = vst [vmem:[#allocation30_spill] sm:$0xff] %v8862_v10  ;;  %14576 = vst [vmem:[#allocation31_spill] sm:$0xff] %v8866_v15 }
 0x1a8   :  { %14577 = vst [vmem:[#allocation32_spill] sm:$0xff] %v8870_v30  ;;  %14578 = vst [vmem:[#allocation37_spill] sm:$0xff] %v8874_v40 }
 0x1a9   :  { %14579 = vst [vmem:[#allocation38_spill] sm:$0xff] %v8878_v13  ;;  %14580 = vst [vmem:[#allocation39_spill] sm:$0xff] %v8882_v60 }
 0x1aa   :  { %14581 = vst [vmem:[#allocation40_spill] sm:$0xff] %v8886_v0  ;;  %14582 = vst [vmem:[#allocation45_spill] sm:$0xff] %v8890_v20 }
 0x1ab   :  { %14583 = vst [vmem:[#allocation46_spill] sm:$0xff] %v8894_v28  ;;  %14584 = vst [vmem:[#allocation47_spill] sm:$0xff] %v8898_v36 }
 0x1ac   :  { %14585 = vst [vmem:[#allocation48_spill] sm:$0xff] %v8902_v51  ;;  %14586 = vst [vmem:[#allocation95_spill] sm:$0xff] %v8906_v22 }
 0x1ad   :  { %14587 = vst [vmem:[#allocation96_spill] sm:$0xff] %v8910_v46  ;;  %14588 = vst [vmem:[#allocation97_spill] sm:$0xff] %v8914_v24 }
 0x1ae   :  { %14589 = vst [vmem:[#allocation98_spill] sm:$0xff] %v8918_v16  ;;  %14590 = vst [vmem:[#allocation103_spill] sm:$0xff] %v8922_v43 }
 0x1af   :  { %14591 = vst [vmem:[#allocation104_spill] sm:$0xff] %v8926_v57  ;;  %14592 = vst [vmem:[#allocation105_spill] sm:$0xff] %v8930_v52 }
 0x1b0   :  { %14593 = vst [vmem:[#allocation106_spill] sm:$0xff] %v8934_v42 }
 0x1d2   :  { %v1943_v36 = vpop.permute.xlu1 %1942 }
 0x1d3   :  { %v8937_v8 = vmul.f32 %v1943_v36, %v8503_v7  ;;  %v8940_v16 = vmul.f32 %v1943_v36, %v8513_v2  ;;  %v8943_v29 = vmul.f32 %v1943_v36, %v8517_v11  ;;  %v8946_v1 = vmul.f32 %v1943_v36, %v8521_v34 }
 0x1d4   :  { %v8949_v57 = vmul.f32 %v1943_v36, %v8525_v32  ;;  %v8952_v38 = vmul.f32 %v1943_v36, %v8535_v47  ;;  %v8955_v12 = vmul.f32 %v1943_v36, %v8539_v62  ;;  %v8958_v35 = vmul.f32 %v1943_v36, %v8543_v48 }
 0x1d5   :  { %14594 = vst [vmem:[#allocation107_spill] sm:$0xff] %v8937_v8  ;;  %14595 = vst [vmem:[#allocation108_spill] sm:$0xff] %v8940_v16  ;;  %v8961_v2 = vmul.f32 %v1943_v36, %v8547_v55  ;;  %v8964_v11 = vmul.f32 %v1943_v36, %v8557_v26  ;;  %v8967_v34 = vmul.f32 %v1943_v36, %v8561_v6  ;;  %v14664_v8 = vld [vmem:[#allocation26_spill] sm:$0xff] }
 0x1d6   :  { %14596 = vst [vmem:[#allocation109_spill] sm:$0xff] %v8943_v29  ;;  %14597 = vst [vmem:[#allocation110_spill] sm:$0xff] %v8946_v1  ;;  %v8970_v32 = vmul.f32 %v1943_v36, %v8565_v37  ;;  %v8973_v47 = vmul.f32 %v1943_v36, %v8569_v45  ;;  %v8976_v62 = vmul.f32 %v1943_v36, %v8579_v18 }
 0x1d7   :  { %14598 = vst [vmem:[#allocation111_spill] sm:$0xff] %v8949_v57  ;;  %14599 = vst [vmem:[#allocation112_spill] sm:$0xff] %v8952_v38  ;;  %v8979_v48 = vmul.f32 %v1943_v36, %v8583_v56  ;;  %v8982_v55 = vmul.f32 %v1943_v36, %v8587_v14  ;;  %v8985_v26 = vmul.f32 %v1943_v36, %v8601_v25  ;;  %v14617_v25 = vld [vmem:[#allocation68_spill] sm:$0xff] }
 0x1d8   :  { %14600 = vst [vmem:[#allocation113_spill] sm:$0xff] %v8955_v12  ;;  %14601 = vst [vmem:[#allocation114_spill] sm:$0xff] %v8958_v35  ;;  %v8988_v6 = vmul.f32 %v1943_v36, %v8605_v9  ;;  %v8991_v37 = vmul.f32 %v1943_v36, %v8609_v54  ;;  %v8994_v45 = vmul.f32 %v1943_v36, %v8623_v61  ;;  %v1667_v9 = vpop.permute.xlu0 %1666  ;;  %v14621_v54 = vld [vmem:[#allocation43_spill] sm:$0xff]  ;;  %v14623_v61 = vld [vmem:[#allocation69_spill] sm:$0xff] }
 0x1d9   :  { %14602 = vst [vmem:[#allocation115_spill] sm:$0xff] %v8961_v2  ;;  %14603 = vst [vmem:[#allocation116_spill] sm:$0xff] %v8964_v11  ;;  %v8997_v18 = vmul.f32 %v1943_v36, %v8627_v39  ;;  %v9000_v56 = vmul.f32 %v1943_v36, %v8631_v5  ;;  %v9003_v14 = vmul.f32 %v1943_v36, %v8635_v53  ;;  %v14625_v39 = vld [vmem:[#allocation71_spill] sm:$0xff]  ;;  %v14627_v5 = vld [vmem:[#allocation72_spill] sm:$0xff] }
 0x1da   :  { %14604 = vst [vmem:[#allocation117_spill] sm:$0xff] %v8967_v34  ;;  %14605 = vst [vmem:[#allocation118_spill] sm:$0xff] %v8970_v32  ;;  %v9006_v7 = vmul.f32 %v1943_v36, %v14617_v25  ;;  %v14629_v53 = vld [vmem:[#allocation74_spill] sm:$0xff]  ;;  %v14631_v25 = vld [vmem:[#allocation75_spill] sm:$0xff] }
 0x1db   :  { %14606 = vst [vmem:[#allocation119_spill] sm:$0xff] %v8973_v47  ;;  %14607 = vst [vmem:[#allocation120_spill] sm:$0xff] %v8976_v62 }
 0x1dc   :  { %14608 = vst [vmem:[#allocation121_spill] sm:$0xff] %v8979_v48  ;;  %14609 = vst [vmem:[#allocation122_spill] sm:$0xff] %v8982_v55 }
 0x1dd   :  { %14610 = vst [vmem:[#allocation123_spill] sm:$0xff] %v8985_v26  ;;  %14611 = vst [vmem:[#allocation124_spill] sm:$0xff] %v8988_v6  ;;  %v14619_v6 = vld [vmem:[#allocation60_spill] sm:$0xff] }
 0x1de   :  { %14612 = vst [vmem:[#allocation125_spill] sm:$0xff] %v8991_v37  ;;  %14613 = vst [vmem:[#allocation126_spill] sm:$0xff] %v8994_v45  ;;  %v9009_v26 = vmul.f32 %v1943_v36, %v14619_v6  ;;  %v9012_v37 = vmul.f32 %v1943_v36, %v14621_v54  ;;  %v9015_v45 = vmul.f32 %v1943_v36, %v14623_v61  ;;  %v14634_v54 = vld [vmem:[#allocation89_spill] sm:$0xff] }
 0x1df   :  { %14614 = vst [vmem:[#allocation127_spill] sm:$0xff] %v8997_v18  ;;  %14615 = vst [vmem:[#allocation128_spill] sm:$0xff] %v9000_v56  ;;  %v9018_v18 = vmul.f32 %v1943_v36, %v14625_v39  ;;  %v9021_v56 = vmul.f32 %v1943_v36, %v14627_v5  ;;  %v9030_v6 = vmul.f32 %v1943_v36, %v8691_v63  ;;  %v14635_v61 = vld [vmem:[#allocation93_spill] sm:$0xff]  ;;  %v14636_v39 = vld [vmem:[#allocation70_spill] sm:$0xff] }
 0x1e0   :  { %14616 = vst [vmem:[#allocation129_spill] sm:$0xff] %v9003_v14  ;;  %14618 = vst [vmem:[#allocation130_spill] sm:$0xff] %v9006_v7  ;;  %v9024_v14 = vmul.f32 %v1943_v36, %v14629_v53  ;;  %v9027_v7 = vmul.f32 %v1943_v36, %v14631_v25  ;;  %v14637_v5 = vld [vmem:[#allocation73_spill] sm:$0xff]  ;;  %v14638_v53 = vld [vmem:[#allocation78_spill] sm:$0xff] }
 0x1e1   :  { %14620 = vst [vmem:[#allocation131_spill] sm:$0xff] %v9009_v26  ;;  %14622 = vst [vmem:[#allocation132_spill] sm:$0xff] %v9012_v37  ;;  %v9033_v37 = vmul.f32 %v1667_v9, %v14634_v54  ;;  %v14639_v25 = vld [vmem:[#allocation79_spill] sm:$0xff]  ;;  %v14640_v36 = vld [vmem:[#allocation80_spill] sm:$0xff] }
 0x1e2   :  { %14624 = vst [vmem:[#allocation133_spill] sm:$0xff] %v9015_v45  ;;  %14626 = vst [vmem:[#allocation134_spill] sm:$0xff] %v9018_v18  ;;  %v9036_v45 = vmul.f32 %v1667_v9, %v14635_v61  ;;  %v9039_v18 = vmul.f32 %v1667_v9, %v14636_v39  ;;  %v9051_v63 = vmul.f32 %v1667_v9, %v14640_v36  ;;  %v14641_v54 = vld [vmem:[#allocation81_spill] sm:$0xff]  ;;  %v14642_v61 = vld [vmem:[#allocation83_spill] sm:$0xff] }
 0x1e3   :  { %14628 = vst [vmem:[#allocation135_spill] sm:$0xff] %v9021_v56  ;;  %14630 = vst [vmem:[#allocation136_spill] sm:$0xff] %v9024_v14  ;;  %v9042_v56 = vmul.f32 %v1667_v9, %v14637_v5  ;;  %v9045_v14 = vmul.f32 %v1667_v9, %v14638_v53  ;;  %v9057_v26 = vmul.f32 %v1667_v9, %v14642_v61  ;;  %v14643_v39 = vld [vmem:[#allocation84_spill] sm:$0xff]  ;;  %v14644_v5 = vld [vmem:[#allocation22_spill] sm:$0xff] }
 0x1e4   :  { %14632 = vst [vmem:[#allocation137_spill] sm:$0xff] %v9027_v7  ;;  %14633 = vst [vmem:[#allocation138_spill] sm:$0xff] %v9030_v6  ;;  %v9048_v7 = vmul.f32 %v1667_v9, %v14639_v25  ;;  %v9054_v6 = vmul.f32 %v1667_v9, %v14641_v54  ;;  %v9060_v55 = vmul.f32 %v1667_v9, %v14643_v39  ;;  %v14645_v53 = vld [vmem:[#allocation23_spill] sm:$0xff]  ;;  %v14646_v25 = vld [vmem:[#allocation85_spill] sm:$0xff] }
 0x1e5   :  { %v9063_v48 = vmul.f32 %v1667_v9, %v14644_v5  ;;  %v9066_v62 = vmul.f32 %v1667_v9, %v14645_v53  ;;  %v9069_v47 = vmul.f32 %v1667_v9, %v14646_v25  ;;  %v14647_v36 = vld [vmem:[#allocation34_spill] sm:$0xff]  ;;  %v14648_v54 = vld [vmem:[#allocation36_spill] sm:$0xff]  ;;  %v14649_v61 = vld [vmem:[#allocation25_spill] sm:$0xff] }
 0x1e6   :  { %v9072_v32 = vmul.f32 %v1667_v9, %v14647_v36  ;;  %v9075_v34 = vmul.f32 %v1667_v9, %v14648_v54  ;;  %v9078_v11 = vmul.f32 %v1667_v9, %v14649_v61  ;;  %v14650_v39 = vld [vmem:[#allocation27_spill] sm:$0xff]  ;;  %v14651_v5 = vld [vmem:[#allocation28_spill] sm:$0xff]  ;;  %v14653_v53 = vld [vmem:[#allocation33_spill] sm:$0xff] }
 0x1e7   :  { %v9081_v2 = vmul.f32 %v1667_v9, %v14650_v39  ;;  %v9084_v35 = vmul.f32 %v1667_v9, %v14651_v5  ;;  %v9087_v12 = vmul.f32 %v1667_v9, %v14653_v53  ;;  %v14655_v25 = vld [vmem:[#allocation35_spill] sm:$0xff]  ;;  %v14657_v36 = vld [vmem:[#allocation17_spill] sm:$0xff]  ;;  %v14661_v61 = vld [vmem:[#allocation20_spill] sm:$0xff]  ;;  %v2209_v5 = vpop.permute.xlu1 %2208 }
 0x1e8   :  { %v9090_v38 = vmul.f32 %v1667_v9, %v14655_v25  ;;  %v9093_v57 = vmul.f32 %v1667_v9, %v14657_v36  ;;  %v14659_v54 = vld [vmem:[#allocation19_spill] sm:$0xff]  ;;  %v9099_v29 = vmul.f32 %v1667_v9, %v14661_v61  ;;  %v14663_v39 = vld [vmem:[#allocation21_spill] sm:$0xff]  ;;  %v14665_v53 = vld [vmem:[#allocation12_spill] sm:$0xff] }
 0x1e9   :  { %14652 = vst [vmem:[#allocation139_spill] sm:$0xff] %v9084_v35  ;;  %14654 = vst [vmem:[#allocation140_spill] sm:$0xff] %v9087_v12  ;;  %v9096_v1 = vmul.f32 %v1667_v9, %v14659_v54  ;;  %v9102_v16 = vmul.f32 %v1667_v9, %v14663_v39  ;;  %v9105_v35 = vmul.f32 %v1667_v9, %v14664_v8  ;;  %v14666_v25 = vld [vmem:[#allocation14_spill] sm:$0xff]  ;;  %v14667_v36 = vld [vmem:[#allocation15_spill] sm:$0xff] }
 0x1ea   :  { %14656 = vst [vmem:[#allocation141_spill] sm:$0xff] %v9090_v38  ;;  %14658 = vst [vmem:[#allocation142_spill] sm:$0xff] %v9093_v57  ;;  %v9108_v12 = vmul.f32 %v1667_v9, %v14665_v53  ;;  %v9111_v38 = vmul.f32 %v1667_v9, %v14666_v25  ;;  %v9114_v57 = vmul.f32 %v1667_v9, %v14667_v36  ;;  %v14668_v54 = vld [vmem:[#allocation16_spill] sm:$0xff]  ;;  %v14669_v61 = vld [vmem:[#allocation18_spill] sm:$0xff] }
 0x1eb   :  { %14660 = vst [vmem:[#allocation143_spill] sm:$0xff] %v9096_v1  ;;  %14662 = vst [vmem:[#allocation144_spill] sm:$0xff] %v9099_v29  ;;  %v9117_v1 = vmul.f32 %v1667_v9, %v14668_v54  ;;  %v9120_v29 = vmul.f32 %v1667_v9, %v14669_v61  ;;  %v9123_v39 = vmul.f32 %v1667_v9, %v8802_v21 }
 0x1ec   :  { %v9126_v8 = vmul.f32 %v1667_v9, %v8806_v50  ;;  %v9129_v53 = vmul.f32 %v2209_v5, %v8810_v33  ;;  %v9132_v25 = vmul.f32 %v2209_v5, %v8814_v4  ;;  %v9135_v36 = vmul.f32 %v2209_v5, %v8818_v27 }
 0x1ed   :  { %v9138_v54 = vmul.f32 %v2209_v5, %v8822_v23  ;;  %v9141_v61 = vmul.f32 %v2209_v5, %v8826_v19  ;;  %v9144_v21 = vmul.f32 %v2209_v5, %v8830_v49  ;;  %v9147_v9 = vmul.f32 %v2209_v5, %v8834_v58 }
 0x1ee   :  { %v9150_v33 = vmul.f32 %v2209_v5, %v8838_v31  ;;  %v9153_v4 = vmul.f32 %v2209_v5, %v8842_v3  ;;  %v9156_v27 = vmul.f32 %v2209_v5, %v8846_v59  ;;  %v9159_v23 = vmul.f32 %v2209_v5, %v8850_v17 }
 0x1ef   :  { %v9162_v19 = vmul.f32 %v2209_v5, %v8854_v41  ;;  %v9165_v49 = vmul.f32 %v2209_v5, %v8858_v44  ;;  %v9168_v58 = vmul.f32 %v2209_v5, %v8862_v10  ;;  %v9171_v31 = vmul.f32 %v2209_v5, %v8866_v15 }
 0x1f0   :  { %v9174_v3 = vmul.f32 %v2209_v5, %v8870_v30  ;;  %v9177_v59 = vmul.f32 %v2209_v5, %v8874_v40  ;;  %v9180_v17 = vmul.f32 %v2209_v5, %v8878_v13  ;;  %v9183_v41 = vmul.f32 %v2209_v5, %v8882_v60  ;;  %v14681_v30 = vld [vmem:[#allocation47_spill] sm:$0xff]  ;;  %v1741_v13 = vpop.permute.xlu0 %1740 }
 0x1f1   :  { %14670 = vst [vmem:[#allocation145_spill] sm:$0xff] %v9162_v19  ;;  %14671 = vst [vmem:[#allocation146_spill] sm:$0xff] %v9165_v49  ;;  %v9186_v44 = vmul.f32 %v2209_v5, %v8886_v0  ;;  %v9189_v10 = vmul.f32 %v2209_v5, %v8890_v20  ;;  %v9192_v15 = vmul.f32 %v2209_v5, %v8894_v28  ;;  %v14687_v20 = vld [vmem:[#allocation98_spill] sm:$0xff]  ;;  %v14708_v49 = vld [vmem:[#allocation115_spill] sm:$0xff] }
 0x1f2   :  { %14672 = vst [vmem:[#allocation147_spill] sm:$0xff] %v9168_v58  ;;  %14673 = vst [vmem:[#allocation148_spill] sm:$0xff] %v9171_v31  ;;  %v9195_v50 = vmul.f32 %v2209_v5, %v14681_v30  ;;  %v9198_v40 = vmul.f32 %v2209_v5, %v8902_v51  ;;  %v9204_v60 = vmul.f32 %v2209_v5, %v8910_v46  ;;  %v14690_v30 = vld [vmem:[#allocation104_spill] sm:$0xff]  ;;  %v14706_v31 = vld [vmem:[#allocation113_spill] sm:$0xff] }
 0x1f3   :  { %14674 = vst [vmem:[#allocation149_spill] sm:$0xff] %v9174_v3  ;;  %14675 = vst [vmem:[#allocation150_spill] sm:$0xff] %v9177_v59  ;;  %v9207_v0 = vmul.f32 %v2209_v5, %v8914_v24  ;;  %v9213_v28 = vmul.f32 %v2209_v5, %v8922_v43  ;;  %v9219_v51 = vmul.f32 %v2209_v5, %v8930_v52  ;;  %v14704_v59 = vld [vmem:[#allocation111_spill] sm:$0xff]  ;;  %v14705_v3 = vld [vmem:[#allocation112_spill] sm:$0xff] }
 0x1f4   :  { %14676 = vst [vmem:[#allocation151_spill] sm:$0xff] %v9180_v17  ;;  %14677 = vst [vmem:[#allocation152_spill] sm:$0xff] %v9183_v41  ;;  %v9201_v17 = vmul.f32 %v2209_v5, %v8906_v22  ;;  %v9222_v22 = vmul.f32 %v2209_v5, %v8934_v42  ;;  %v1748_v46 = vadd.f32 %v1741_v13, %v9033_v37  ;;  %v14694_v42 = vld [vmem:[#allocation139_spill] sm:$0xff]  ;;  %v14703_v41 = vld [vmem:[#allocation110_spill] sm:$0xff] }
 0x1f5   :  { %14678 = vst [vmem:[#allocation153_spill] sm:$0xff] %v9186_v44  ;;  %14679 = vst [vmem:[#allocation154_spill] sm:$0xff] %v9189_v10  ;;  %v9210_v10 = vmul.f32 %v2209_v5, %v14687_v20  ;;  %v1750_v24 = vadd.f32 %v1741_v13, %v9036_v45  ;;  %v1754_v20 = vadd.f32 %v1741_v13, %v9042_v56  ;;  %v14702_v44 = vld [vmem:[#allocation109_spill] sm:$0xff]  ;;  %v14707_v58 = vld [vmem:[#allocation114_spill] sm:$0xff] }
 0x1f6   :  { %14680 = vst [vmem:[#allocation155_spill] sm:$0xff] %v9192_v15  ;;  %14682 = vst [vmem:[#allocation156_spill] sm:$0xff] %v9195_v50  ;;  %v9216_v50 = vmul.f32 %v2209_v5, %v14690_v30  ;;  %v1756_v43 = vadd.f32 %v1741_v13, %v9045_v14  ;;  %v1760_v30 = vadd.f32 %v1741_v13, %v9051_v63  ;;  %v14701_v15 = vld [vmem:[#allocation108_spill] sm:$0xff] }
 0x1f7   :  { %14683 = vst [vmem:[#allocation157_spill] sm:$0xff] %v9198_v40  ;;  %14684 = vst [vmem:[#allocation158_spill] sm:$0xff] %v9201_v17  ;;  %v1762_v52 = vadd.f32 %v1741_v13, %v9054_v6  ;;  %v1766_v5 = vadd.f32 %v1741_v13, %v9060_v55  ;;  %v1768_v37 = vadd.f32 %v1741_v13, %v9063_v48  ;;  %v14699_v17 = vld [vmem:[#allocation144_spill] sm:$0xff]  ;;  %v14700_v40 = vld [vmem:[#allocation107_spill] sm:$0xff] }
 0x1f8   :  { %14685 = vst [vmem:[#allocation159_spill] sm:$0xff] %v9204_v60  ;;  %14686 = vst [vmem:[#allocation160_spill] sm:$0xff] %v9207_v0  ;;  %v1752_v0 = vadd.f32 %v1741_v13, %v9039_v18  ;;  %v1770_v45 = vadd.f32 %v1741_v13, %v9066_v62  ;;  %v1772_v18 = vadd.f32 %v1741_v13, %v9069_v47  ;;  %v14698_v60 = vld [vmem:[#allocation143_spill] sm:$0xff]  ;;  %v14709_v19 = vld [vmem:[#allocation116_spill] sm:$0xff] }
 0x1f9   :  { %14688 = vst [vmem:[#allocation161_spill] sm:$0xff] %v9210_v10  ;;  %14689 = vst [vmem:[#allocation162_spill] sm:$0xff] %v9213_v28  ;;  %v1758_v28 = vadd.f32 %v1741_v13, %v9048_v7  ;;  %v1774_v56 = vadd.f32 %v1741_v13, %v9072_v32  ;;  %v1776_v14 = vadd.f32 %v1741_v13, %v9075_v34  ;;  %v14697_v10 = vld [vmem:[#allocation142_spill] sm:$0xff] }
 0x1fa   :  { %14691 = vst [vmem:[#allocation163_spill] sm:$0xff] %v9216_v50  ;;  %14692 = vst [vmem:[#allocation164_spill] sm:$0xff] %v9219_v51  ;;  %v1764_v51 = vadd.f32 %v1741_v13, %v9057_v26  ;;  %v1778_v7 = vadd.f32 %v1741_v13, %v9078_v11  ;;  %v1780_v63 = vadd.f32 %v1741_v13, %v9081_v2  ;;  %v14696_v50 = vld [vmem:[#allocation141_spill] sm:$0xff] }
 0x1fb   :  { %14693 = vst [vmem:[#allocation165_spill] sm:$0xff] %v9222_v22  ;;  %v1782_v6 = vadd.f32 %v1741_v13, %v14694_v42  ;;  %v14695_v22 = vld [vmem:[#allocation140_spill] sm:$0xff]  ;;  %v1786_v55 = vadd.f32 %v1741_v13, %v14696_v50  ;;  %v1788_v48 = vadd.f32 %v1741_v13, %v14697_v10  ;;  %v1790_v62 = vadd.f32 %v1741_v13, %v14698_v60 }
 0x1fc   :  { %v1784_v26 = vadd.f32 %v1741_v13, %v14695_v22  ;;  %v1792_v47 = vadd.f32 %v1741_v13, %v14699_v17  ;;  %v1794_v32 = vadd.f32 %v1741_v13, %v9102_v16  ;;  %v1796_v34 = vadd.f32 %v1741_v13, %v9105_v35 }
 0x1fd   :  { %v1798_v11 = vadd.f32 %v1741_v13, %v9108_v12  ;;  %v1800_v2 = vadd.f32 %v1741_v13, %v9111_v38  ;;  %v1802_v42 = vadd.f32 %v1741_v13, %v9114_v57  ;;  %v1804_v22 = vadd.f32 %v1741_v13, %v9117_v1 }
 0x1fe   :  { %v1806_v50 = vadd.f32 %v1741_v13, %v9120_v29  ;;  %v1808_v10 = vadd.f32 %v1741_v13, %v9123_v39  ;;  %v1810_v60 = vadd.f32 %v1741_v13, %v9126_v8  ;;  %v2014_v17 = vadd.f32 %v14700_v40, %v1748_v46  ;;  %v14710_v8 = vld [vmem:[#allocation117_spill] sm:$0xff]  ;;  %v14711_v46 = vld [vmem:[#allocation118_spill] sm:$0xff] }
 0x1ff   :  { %v2016_v16 = vadd.f32 %v14701_v15, %v1750_v24  ;;  %v2018_v35 = vadd.f32 %v14702_v44, %v1752_v0  ;;  %v2020_v12 = vadd.f32 %v14703_v41, %v1754_v20  ;;  %v2022_v38 = vadd.f32 %v14704_v59, %v1756_v43  ;;  %v14712_v24 = vld [vmem:[#allocation119_spill] sm:$0xff]  ;;  %v14713_v0 = vld [vmem:[#allocation120_spill] sm:$0xff]  ;;  %v14714_v20 = vld [vmem:[#allocation121_spill] sm:$0xff] }
 0x200   :  { %v2024_v57 = vadd.f32 %v14705_v3, %v1758_v28  ;;  %v2026_v1 = vadd.f32 %v14706_v31, %v1760_v30  ;;  %v2028_v29 = vadd.f32 %v14707_v58, %v1762_v52  ;;  %v2030_v39 = vadd.f32 %v14708_v49, %v1764_v51  ;;  %v14715_v43 = vld [vmem:[#allocation122_spill] sm:$0xff]  ;;  %v14716_v28 = vld [vmem:[#allocation123_spill] sm:$0xff]  ;;  %v14717_v30 = vld [vmem:[#allocation124_spill] sm:$0xff] }
 0x201   :  { %v2032_v13 = vadd.f32 %v14709_v19, %v1766_v5  ;;  %v2034_v40 = vadd.f32 %v14710_v8, %v1768_v37  ;;  %v2036_v15 = vadd.f32 %v14711_v46, %v1770_v45  ;;  %v2038_v44 = vadd.f32 %v14712_v24, %v1772_v18  ;;  %v14718_v52 = vld [vmem:[#allocation125_spill] sm:$0xff]  ;;  %v14719_v51 = vld [vmem:[#allocation126_spill] sm:$0xff]  ;;  %v14720_v5 = vld [vmem:[#allocation127_spill] sm:$0xff] }
 0x202   :  { %v2040_v41 = vadd.f32 %v14713_v0, %v1774_v56  ;;  %v2042_v59 = vadd.f32 %v14714_v20, %v1776_v14  ;;  %v2044_v3 = vadd.f32 %v14715_v43, %v1778_v7  ;;  %v2046_v31 = vadd.f32 %v14716_v28, %v1780_v63  ;;  %v14721_v8 = vld [vmem:[#allocation128_spill] sm:$0xff]  ;;  %v14722_v46 = vld [vmem:[#allocation129_spill] sm:$0xff]  ;;  %v14723_v24 = vld [vmem:[#allocation130_spill] sm:$0xff] }
 0x203   :  { %v2048_v58 = vadd.f32 %v14717_v30, %v1782_v6  ;;  %v2050_v49 = vadd.f32 %v14718_v52, %v1784_v26  ;;  %v2052_v19 = vadd.f32 %v14719_v51, %v1786_v55  ;;  %v2054_v37 = vadd.f32 %v14720_v5, %v1788_v48  ;;  %v14724_v0 = vld [vmem:[#allocation131_spill] sm:$0xff]  ;;  %v14725_v20 = vld [vmem:[#allocation132_spill] sm:$0xff]  ;;  %v14726_v43 = vld [vmem:[#allocation133_spill] sm:$0xff] }
 0x204   :  { %v2056_v45 = vadd.f32 %v14721_v8, %v1790_v62  ;;  %v2058_v18 = vadd.f32 %v14722_v46, %v1792_v47  ;;  %v2060_v56 = vadd.f32 %v14723_v24, %v1794_v32  ;;  %v2062_v14 = vadd.f32 %v14724_v0, %v1796_v34  ;;  %v14727_v28 = vld [vmem:[#allocation134_spill] sm:$0xff]  ;;  %v14728_v30 = vld [vmem:[#allocation135_spill] sm:$0xff]  ;;  %v14729_v52 = vld [vmem:[#allocation136_spill] sm:$0xff] }
 0x205   :  { %v2064_v7 = vadd.f32 %v14725_v20, %v1798_v11  ;;  %v2066_v63 = vadd.f32 %v14726_v43, %v1800_v2  ;;  %v2068_v6 = vadd.f32 %v14727_v28, %v1802_v42  ;;  %v2070_v26 = vadd.f32 %v14728_v30, %v1804_v22  ;;  %v14730_v51 = vld [vmem:[#allocation137_spill] sm:$0xff]  ;;  %v14731_v5 = vld [vmem:[#allocation138_spill] sm:$0xff] }
 0x206   :  { %v2072_v55 = vadd.f32 %v14729_v52, %v1806_v50  ;;  %v2074_v48 = vadd.f32 %v14730_v51, %v1808_v10  ;;  %v2076_v62 = vadd.f32 %v14731_v5, %v1810_v60  ;;  %v2280_v47 = vadd.f32 %v9129_v53, %v2014_v17  ;;  %v14757_v5 = vld [vmem:[#allocation70_spill] sm:$0xff] }
 0x207   :  { %v2282_v32 = vadd.f32 %v9132_v25, %v2016_v16  ;;  %v2284_v34 = vadd.f32 %v9135_v36, %v2018_v35  ;;  %v2286_v11 = vadd.f32 %v9138_v54, %v2020_v12  ;;  %v2288_v2 = vadd.f32 %v9141_v61, %v2022_v38  ;;  %v14732_v25 = vld [vmem:[#allocation145_spill] sm:$0xff]  ;;  %v14733_v36 = vld [vmem:[#allocation146_spill] sm:$0xff]  ;;  %v14734_v61 = vld [vmem:[#allocation147_spill] sm:$0xff] }
 0x208   :  { %v2290_v42 = vadd.f32 %v9144_v21, %v2024_v57  ;;  %v2292_v22 = vadd.f32 %v9147_v9, %v2026_v1  ;;  %v2294_v50 = vadd.f32 %v9150_v33, %v2028_v29  ;;  %v2296_v10 = vadd.f32 %v9153_v4, %v2030_v39  ;;  %v14735_v21 = vld [vmem:[#allocation148_spill] sm:$0xff]  ;;  %v14736_v33 = vld [vmem:[#allocation149_spill] sm:$0xff]  ;;  %v14737_v4 = vld [vmem:[#allocation150_spill] sm:$0xff] }
 0x209   :  { %v2298_v60 = vadd.f32 %v9156_v27, %v2032_v13  ;;  %v9299_v53 = vadd.f32 %v9159_v23, %v2034_v40  ;;  %v9302_v17 = vadd.f32 %v14732_v25, %v2036_v15  ;;  %v9305_v54 = vadd.f32 %v14733_v36, %v2038_v44  ;;  %v14738_v23 = vld [vmem:[#allocation151_spill] sm:$0xff]  ;;  %v14739_v38 = vld [vmem:[#allocation152_spill] sm:$0xff]  ;;  %v14740_v1 = vld [vmem:[#allocation153_spill] sm:$0xff] }
 0x20a   :  { %v9308_v16 = vadd.f32 %v14734_v61, %v2040_v41  ;;  %v9311_v9 = vadd.f32 %v14735_v21, %v2042_v59  ;;  %v9314_v35 = vadd.f32 %v14736_v33, %v2044_v3  ;;  %v9317_v27 = vadd.f32 %v14737_v4, %v2046_v31  ;;  %v14741_v39 = vld [vmem:[#allocation154_spill] sm:$0xff]  ;;  %v14742_v40 = vld [vmem:[#allocation155_spill] sm:$0xff]  ;;  %v14743_v44 = vld [vmem:[#allocation156_spill] sm:$0xff]  ;;  %v1672_v31 = vpop.permute.xlu0 %1671 }
 0x20b   :  { %v9320_v12 = vadd.f32 %v14738_v23, %v2048_v58  ;;  %v9323_v57 = vadd.f32 %v14739_v38, %v2050_v49  ;;  %v9326_v29 = vadd.f32 %v14740_v1, %v2052_v19  ;;  %v9329_v13 = vadd.f32 %v14741_v39, %v2054_v37  ;;  %v14744_v59 = vld [vmem:[#allocation157_spill] sm:$0xff]  ;;  %v14745_v58 = vld [vmem:[#allocation158_spill] sm:$0xff]  ;;  %v14746_v49 = vld [vmem:[#allocation159_spill] sm:$0xff] }
 0x20c   :  { %v9332_v15 = vadd.f32 %v14742_v40, %v2056_v45  ;;  %v9335_v41 = vadd.f32 %v14743_v44, %v2058_v18  ;;  %v9338_v3 = vadd.f32 %v14744_v59, %v2060_v56  ;;  %v9341_v8 = vadd.f32 %v14745_v58, %v2062_v14  ;;  %v14747_v19 = vld [vmem:[#allocation160_spill] sm:$0xff]  ;;  %v14748_v37 = vld [vmem:[#allocation161_spill] sm:$0xff]  ;;  %v14749_v45 = vld [vmem:[#allocation162_spill] sm:$0xff] }
 0x20d   :  { %v9344_v46 = vadd.f32 %v14746_v49, %v2064_v7  ;;  %v9347_v24 = vadd.f32 %v14747_v19, %v2066_v63  ;;  %v9350_v0 = vadd.f32 %v14748_v37, %v2068_v6  ;;  %v9353_v20 = vadd.f32 %v14749_v45, %v2070_v26  ;;  %v14750_v18 = vld [vmem:[#allocation163_spill] sm:$0xff]  ;;  %v14751_v56 = vld [vmem:[#allocation164_spill] sm:$0xff]  ;;  %v14753_v14 = vld [vmem:[#allocation165_spill] sm:$0xff] }
 0x20e   :  { %v9356_v43 = vadd.f32 %v14750_v18, %v2072_v55  ;;  %v9359_v28 = vadd.f32 %v14751_v56, %v2074_v48  ;;  %v9362_v30 = vadd.f32 %v14753_v14, %v2076_v62  ;;  %6139 = vtanh.f32 %v2280_v47  ;;  %v14755_v7 = vld [vmem:[#allocation89_spill] sm:$0xff]  ;;  %v14759_v36 = vld [vmem:[#allocation78_spill] sm:$0xff]  ;;  %v14760_v55 = vld [vmem:[#allocation79_spill] sm:$0xff] }
 0x20f   :  { %v1675_v52 = vmul.f32 %v1672_v31, %v14755_v7  ;;  %v14756_v63 = vld [vmem:[#allocation93_spill] sm:$0xff]  ;;  %v1679_v6 = vmul.f32 %v1672_v31, %v14757_v5  ;;  %6141 = vtanh.f32 %v2282_v32  ;;  %v1683_v61 = vmul.f32 %v1672_v31, %v14759_v36  ;;  %v14761_v48 = vld [vmem:[#allocation80_spill] sm:$0xff]  ;;  %v14763_v23 = vld [vmem:[#allocation83_spill] sm:$0xff] }
 0x210   :  { %14752 = vst [vmem:[#allocation139_spill] sm:$0xff] %v9359_v28  ;;  %14754 = vst [vmem:[#allocation140_spill] sm:$0xff] %v9362_v30  ;;  %v1677_v51 = vmul.f32 %v1672_v31, %v14756_v63  ;;  %v14758_v25 = vld [vmem:[#allocation73_spill] sm:$0xff]  ;;  %v1685_v21 = vmul.f32 %v1672_v31, %v14760_v55  ;;  %6143 = vtanh.f32 %v2284_v34  ;;  %v1687_v33 = vmul.f32 %v1672_v31, %v14761_v48  ;;  %v14764_v38 = vld [vmem:[#allocation84_spill] sm:$0xff] }
 0x211   :  { %v1681_v26 = vmul.f32 %v1672_v31, %v14758_v25  ;;  %v14762_v4 = vld [vmem:[#allocation81_spill] sm:$0xff]  ;;  %v1691_v47 = vmul.f32 %v1672_v31, %v14763_v23  ;;  %6145 = vtanh.f32 %v2286_v11  ;;  %v1693_v1 = vmul.f32 %v1672_v31, %v14764_v38  ;;  %v14765_v39 = vld [vmem:[#allocation22_spill] sm:$0xff]  ;;  %v14766_v44 = vld [vmem:[#allocation23_spill] sm:$0xff] }
 0x212   :  { %v1689_v62 = vmul.f32 %v1672_v31, %v14762_v4  ;;  %v1695_v40 = vmul.f32 %v1672_v31, %v14765_v39  ;;  %v1697_v32 = vmul.f32 %v1672_v31, %v14766_v44  ;;  %6147 = vtanh.f32 %v2288_v2  ;;  %v14767_v59 = vld [vmem:[#allocation85_spill] sm:$0xff]  ;;  %v14768_v49 = vld [vmem:[#allocation34_spill] sm:$0xff]  ;;  %v14769_v37 = vld [vmem:[#allocation36_spill] sm:$0xff] }
 0x213   :  { %v1699_v58 = vmul.f32 %v1672_v31, %v14767_v59  ;;  %v1701_v19 = vmul.f32 %v1672_v31, %v14768_v49  ;;  %v1703_v34 = vmul.f32 %v1672_v31, %v14769_v37  ;;  %6149 = vtanh.f32 %v2290_v42  ;;  %v14770_v45 = vld [vmem:[#allocation25_spill] sm:$0xff]  ;;  %v14771_v56 = vld [vmem:[#allocation27_spill] sm:$0xff]  ;;  %v14772_v7 = vld [vmem:[#allocation28_spill] sm:$0xff] }
 0x214   :  { %v1705_v18 = vmul.f32 %v1672_v31, %v14770_v45  ;;  %v1707_v14 = vmul.f32 %v1672_v31, %v14771_v56  ;;  %v1709_v11 = vmul.f32 %v1672_v31, %v14772_v7  ;;  %6151 = vtanh.f32 %v2292_v22  ;;  %v14773_v63 = vld [vmem:[#allocation33_spill] sm:$0xff]  ;;  %v14774_v25 = vld [vmem:[#allocation35_spill] sm:$0xff]  ;;  %v14777_v23 = vld [vmem:[#allocation20_spill] sm:$0xff]  ;;  %v1746_v56 = vpop.permute.xlu1 %1745 }
 0x215   :  { %v1711_v5 = vmul.f32 %v1672_v31, %v14773_v63  ;;  %v1713_v36 = vmul.f32 %v1672_v31, %v14774_v25  ;;  %v14775_v55 = vld [vmem:[#allocation17_spill] sm:$0xff]  ;;  %6153 = vtanh.f32 %v2294_v50  ;;  %v14776_v48 = vld [vmem:[#allocation19_spill] sm:$0xff]  ;;  %v1719_v38 = vmul.f32 %v1672_v31, %v14777_v23  ;;  %v14779_v44 = vld [vmem:[#allocation26_spill] sm:$0xff] }
 0x216   :  { %v1715_v2 = vmul.f32 %v1672_v31, %v14775_v55  ;;  %v1717_v4 = vmul.f32 %v1672_v31, %v14776_v48  ;;  %v14778_v39 = vld [vmem:[#allocation21_spill] sm:$0xff]  ;;  %6155 = vtanh.f32 %v2296_v10  ;;  %v1723_v59 = vmul.f32 %v1672_v31, %v14779_v44  ;;  %v14780_v49 = vld [vmem:[#allocation12_spill] sm:$0xff]  ;;  %v14781_v45 = vld [vmem:[#allocation14_spill] sm:$0xff] }
 0x217   :  { %v1721_v42 = vmul.f32 %v1672_v31, %v14778_v39  ;;  %v1725_v37 = vmul.f32 %v1672_v31, %v14780_v49  ;;  %v1727_v22 = vmul.f32 %v1672_v31, %v14781_v45  ;;  %6157 = vtanh.f32 %v2298_v60  ;;  %v14782_v7 = vld [vmem:[#allocation15_spill] sm:$0xff]  ;;  %v14783_v25 = vld [vmem:[#allocation16_spill] sm:$0xff]  ;;  %v14784_v50 = vld [vmem:[#allocation18_spill] sm:$0xff] }
 0x218   :  { %v1729_v63 = vmul.f32 %v1672_v31, %v14782_v7  ;;  %v1731_v55 = vmul.f32 %v1672_v31, %v14783_v25  ;;  %v1733_v30 = vmul.f32 %v1672_v31, %v14784_v50  ;;  %v9394_v48 = vpop.eup %6139  ;;  %6159 = vtanh.f32 %v9299_v53  ;;  %v14786_v23 = vld [vmem:[#allocation50_spill] sm:$0xff]  ;;  %v14787_v39 = vld [vmem:[#allocation55_spill] sm:$0xff] }
 0x219   :  { %14785 = vst [vmem:[#allocation141_spill] sm:$0xff] %v9394_v48  ;;  %v1735_v10 = vmul.f32 %v1672_v31, %v14786_v23  ;;  %v1737_v44 = vmul.f32 %v1672_v31, %v14787_v39  ;;  %v9399_v28 = vadd.f32 %v1746_v56, %v1675_v52  ;;  %v9401_v49 = vpop.eup %6141  ;;  %6161 = vtanh.f32 %v9302_v17 }
 0x21a   :  { %14788 = vst [vmem:[#allocation142_spill] sm:$0xff] %v9401_v49  ;;  %v9404_v60 = vadd.f32 %v1746_v56, %v1677_v51  ;;  %v9406_v45 = vadd.f32 %v1746_v56, %v1679_v6  ;;  %v9408_v7 = vadd.f32 %v1746_v56, %v1681_v26  ;;  %v9410_v25 = vpop.eup %6143  ;;  %6163 = vtanh.f32 %v9305_v54  ;;  %v14862_v49 = vld [vmem:[#allocation47_spill] sm:$0xff] }
 0x21b   :  { %14789 = vst [vmem:[#allocation143_spill] sm:$0xff] %v9410_v25  ;;  %v9413_v53 = vadd.f32 %v1746_v56, %v1683_v61  ;;  %v9415_v50 = vadd.f32 %v1746_v56, %v1685_v21  ;;  %v9417_v31 = vadd.f32 %v1746_v56, %v1687_v33  ;;  %v9419_v52 = vpop.eup %6145  ;;  %6165 = vtanh.f32 %v9308_v16 }
 0x21c   :  { %14790 = vst [vmem:[#allocation144_spill] sm:$0xff] %v9419_v52  ;;  %v9422_v17 = vadd.f32 %v1746_v56, %v1689_v62  ;;  %v9424_v51 = vadd.f32 %v1746_v56, %v1691_v47  ;;  %v9426_v6 = vadd.f32 %v1746_v56, %v1693_v1  ;;  %v9428_v26 = vpop.eup %6147  ;;  %6167 = vtanh.f32 %v9311_v9  ;;  %v14855_v52 = vld [vmem:[#allocation40_spill] sm:$0xff] }
 0x21d   :  { %14791 = vst [vmem:[#allocation107_spill] sm:$0xff] %v9428_v26  ;;  %v9431_v54 = vadd.f32 %v1746_v56, %v1695_v40  ;;  %v9433_v61 = vadd.f32 %v1746_v56, %v1697_v32  ;;  %v9435_v21 = vadd.f32 %v1746_v56, %v1699_v58  ;;  %v9437_v33 = vpop.eup %6149  ;;  %6169 = vtanh.f32 %v9314_v35 }
 0x21e   :  { %14792 = vst [vmem:[#allocation108_spill] sm:$0xff] %v9437_v33  ;;  %v9440_v16 = vadd.f32 %v1746_v56, %v1701_v19  ;;  %v9442_v62 = vadd.f32 %v1746_v56, %v1703_v34  ;;  %v9444_v47 = vadd.f32 %v1746_v56, %v1705_v18  ;;  %v9446_v1 = vpop.eup %6151  ;;  %6171 = vtanh.f32 %v9317_v27  ;;  %v14848_v33 = vld [vmem:[#allocation37_spill] sm:$0xff] }
 0x21f   :  { %14793 = vst [vmem:[#allocation109_spill] sm:$0xff] %v9446_v1  ;;  %v9449_v9 = vadd.f32 %v1746_v56, %v1707_v14  ;;  %v9451_v40 = vadd.f32 %v1746_v56, %v1709_v11  ;;  %v9453_v32 = vadd.f32 %v1746_v56, %v1711_v5  ;;  %v9455_v58 = vpop.eup %6153  ;;  %6173 = vtanh.f32 %v9320_v12  ;;  %v9473_v5 = vpop.permute.xlu1 %2213 }
 0x220   :  { %14794 = vst [vmem:[#allocation110_spill] sm:$0xff] %v9455_v58  ;;  %v9458_v35 = vadd.f32 %v1746_v56, %v1713_v36  ;;  %v9460_v19 = vadd.f32 %v1746_v56, %v1715_v2  ;;  %v9462_v34 = vadd.f32 %v1746_v56, %v1717_v4  ;;  %v9464_v18 = vpop.eup %6155  ;;  %6175 = vtanh.f32 %v9323_v57  ;;  %v14841_v58 = vld [vmem:[#allocation30_spill] sm:$0xff] }
 0x221   :  { %14797 = vst [vmem:[#allocation113_spill] sm:$0xff] %v9464_v18  ;;  %v9467_v27 = vadd.f32 %v1746_v56, %v1719_v38  ;;  %v9469_v14 = vadd.f32 %v1746_v56, %v1721_v42  ;;  %v9471_v11 = vadd.f32 %v1746_v56, %v1723_v59  ;;  %v9475_v23 = vpop.eup %6157  ;;  %6177 = vtanh.f32 %v9326_v29 }
 0x222   :  { %14795 = vst [vmem:[#allocation111_spill] sm:$0xff] %v9460_v19  ;;  %14796 = vst [vmem:[#allocation112_spill] sm:$0xff] %v9462_v34  ;;  %v9478_v12 = vadd.f32 %v1746_v56, %v1725_v37  ;;  %v9480_v36 = vadd.f32 %v1746_v56, %v1727_v22  ;;  %v9482_v2 = vadd.f32 %v1746_v56, %v1729_v63  ;;  %v9484_v4 = vpop.eup %6159  ;;  %6179 = vtanh.f32 %v9329_v13  ;;  %v14811_v37 = vld [vmem:[#allocation7_spill] sm:$0xff]  ;;  %v14813_v63 = vld [vmem:[#allocation8_spill] sm:$0xff] }
 0x223   :  { %14798 = vst [vmem:[#allocation114_spill] sm:$0xff] %v9467_v27  ;;  %14799 = vst [vmem:[#allocation115_spill] sm:$0xff] %v9469_v14  ;;  %v9487_v57 = vadd.f32 %v1746_v56, %v1731_v55  ;;  %v9489_v38 = vadd.f32 %v1746_v56, %v1733_v30  ;;  %v9491_v42 = vadd.f32 %v1746_v56, %v1735_v10  ;;  %v9493_v59 = vpop.eup %6161  ;;  %6181 = vtanh.f32 %v9332_v15  ;;  %v14816_v30 = vld [vmem:[#allocation9_spill] sm:$0xff]  ;;  %v14818_v10 = vld [vmem:[#allocation10_spill] sm:$0xff] }
 0x224   :  { %14800 = vst [vmem:[#allocation116_spill] sm:$0xff] %v9471_v11  ;;  %14801 = vst [vmem:[#allocation117_spill] sm:$0xff] %v9475_v23  ;;  %v9496_v29 = vadd.f32 %v1746_v56, %v1737_v44  ;;  %v9500_v22 = vmul.f32 %v9473_v5, %v14811_v37  ;;  %v9504_v39 = vmul.f32 %v9473_v5, %v14813_v63  ;;  %v9506_v13 = vpop.eup %6163  ;;  %6183 = vtanh.f32 %v9335_v41  ;;  %v14820_v56 = vld [vmem:[#allocation11_spill] sm:$0xff]  ;;  %v14823_v63 = vld [vmem:[#allocation13_spill] sm:$0xff] }
 0x225   :  { %14802 = vst [vmem:[#allocation118_spill] sm:$0xff] %v9478_v12  ;;  %14803 = vst [vmem:[#allocation119_spill] sm:$0xff] %v9480_v36  ;;  %v9511_v55 = vmul.f32 %v9473_v5, %v14816_v30  ;;  %v9515_v15 = vmul.f32 %v9473_v5, %v14818_v10  ;;  %v9519_v44 = vmul.f32 %v9473_v5, %v14820_v56  ;;  %v9521_v37 = vpop.eup %6165  ;;  %6185 = vtanh.f32 %v9338_v3  ;;  %v14825_v41 = vld [vmem:[#allocation41_spill] sm:$0xff]  ;;  %v14832_v3 = vld [vmem:[#allocation67_spill] sm:$0xff] }
 0x226   :  { %14804 = vst [vmem:[#allocation120_spill] sm:$0xff] %v9482_v2  ;;  %14805 = vst [vmem:[#allocation121_spill] sm:$0xff] %v9484_v4  ;;  %v9530_v30 = vmul.f32 %v9473_v5, %v14825_v41  ;;  %v9536_v4 = vpop.eup %6167  ;;  %6187 = vtanh.f32 %v9341_v8  ;;  %v14830_v56 = vld [vmem:[#allocation49_spill] sm:$0xff]  ;;  %v14834_v23 = vld [vmem:[#allocation76_spill] sm:$0xff] }
 0x227   :  { %14806 = vst [vmem:[#allocation122_spill] sm:$0xff] %v9487_v57  ;;  %14807 = vst [vmem:[#allocation123_spill] sm:$0xff] %v9489_v38  ;;  %v9549_v41 = vmul.f32 %v9473_v5, %v14834_v23  ;;  %v9551_v18 = vpop.eup %6169  ;;  %6189 = vtanh.f32 %v9344_v46  ;;  %v14839_v8 = vld [vmem:[#allocation29_spill] sm:$0xff]  ;;  %v14844_v23 = vld [vmem:[#allocation31_spill] sm:$0xff] }
 0x228   :  { %14808 = vst [vmem:[#allocation124_spill] sm:$0xff] %v9491_v42  ;;  %14809 = vst [vmem:[#allocation125_spill] sm:$0xff] %v9493_v59  ;;  %v14827_v59 = vld [vmem:[#allocation42_spill] sm:$0xff]  ;;  %v9566_v1 = vpop.eup %6171  ;;  %6191 = vtanh.f32 %v9347_v24  ;;  %v14846_v46 = vld [vmem:[#allocation32_spill] sm:$0xff] }
 0x229   :  { %14810 = vst [vmem:[#allocation126_spill] sm:$0xff] %v9496_v29  ;;  %14812 = vst [vmem:[#allocation127_spill] sm:$0xff] %v9500_v22  ;;  %v9534_v10 = vmul.f32 %v9473_v5, %v14827_v59  ;;  %v14837_v59 = vld [vmem:[#allocation24_spill] sm:$0xff]  ;;  %v9581_v26 = vpop.eup %6173  ;;  %6193 = vtanh.f32 %v9350_v0  ;;  %v14853_v24 = vld [vmem:[#allocation39_spill] sm:$0xff] }
 0x22a   :  { %14814 = vst [vmem:[#allocation128_spill] sm:$0xff] %v9504_v39  ;;  %14815 = vst [vmem:[#allocation129_spill] sm:$0xff] %v9506_v13  ;;  %v9526_v13 = vmul.f32 %v9473_v5, %v14823_v63  ;;  %v9545_v63 = vmul.f32 %v9473_v5, %v14832_v3  ;;  %v9564_v3 = vmul.f32 %v9473_v5, %v14841_v58  ;;  %v14851_v58 = vld [vmem:[#allocation38_spill] sm:$0xff]  ;;  %v9596_v25 = vpop.eup %6175  ;;  %6195 = vtanh.f32 %v9353_v20  ;;  %v14867_v20 = vld [vmem:[#allocation95_spill] sm:$0xff] }
 0x22b   :  { %14817 = vst [vmem:[#allocation130_spill] sm:$0xff] %v9511_v55  ;;  %14819 = vst [vmem:[#allocation131_spill] sm:$0xff] %v9515_v15  ;;  %v14860_v0 = vld [vmem:[#allocation46_spill] sm:$0xff]  ;;  %v9611_v48 = vpop.eup %6177  ;;  %6197 = vtanh.f32 %v9356_v43  ;;  %v14909_v15 = vld [vmem:[#allocation91_spill] sm:$0xff] }
 0x22c   :  { %14821 = vst [vmem:[#allocation132_spill] sm:$0xff] %v9519_v44  ;;  %14822 = vst [vmem:[#allocation133_spill] sm:$0xff] %v9521_v37  ;;  %v9541_v37 = vmul.f32 %v9473_v5, %v14830_v56  ;;  %v9560_v56 = vmul.f32 %v9473_v5, %v14839_v8  ;;  %v9579_v8 = vmul.f32 %v9473_v5, %v14848_v33  ;;  %v14858_v33 = vld [vmem:[#allocation45_spill] sm:$0xff]  ;;  %v14910_v55 = vld [vmem:[#allocation92_spill] sm:$0xff] }
 0x22d   :  { %14824 = vst [vmem:[#allocation134_spill] sm:$0xff] %v9526_v13  ;;  %14826 = vst [vmem:[#allocation135_spill] sm:$0xff] %v9530_v30  ;;  %v14905_v30 = vld [vmem:[#allocation87_spill] sm:$0xff]  ;;  %v14906_v13 = vld [vmem:[#allocation88_spill] sm:$0xff] }
 0x22e   :  { %14828 = vst [vmem:[#allocation136_spill] sm:$0xff] %v9534_v10  ;;  %14829 = vst [vmem:[#allocation137_spill] sm:$0xff] %v9536_v4  ;;  %v9556_v4 = vmul.f32 %v9473_v5, %v14837_v59  ;;  %v9575_v59 = vmul.f32 %v9473_v5, %v14846_v46  ;;  %v9594_v46 = vmul.f32 %v9473_v5, %v14855_v52  ;;  %v14865_v52 = vld [vmem:[#allocation48_spill] sm:$0xff]  ;;  %v14904_v10 = vld [vmem:[#allocation86_spill] sm:$0xff] }
 0x22f   :  { %14831 = vst [vmem:[#allocation138_spill] sm:$0xff] %v9541_v37  ;;  %14833 = vst [vmem:[#allocation145_spill] sm:$0xff] %v9545_v63  ;;  %v14901_v63 = vld [vmem:[#allocation99_spill] sm:$0xff]  ;;  %v14911_v39 = vld [vmem:[#allocation94_spill] sm:$0xff] }
 0x230   :  { %14835 = vst [vmem:[#allocation146_spill] sm:$0xff] %v9549_v41  ;;  %14836 = vst [vmem:[#allocation147_spill] sm:$0xff] %v9551_v18  ;;  %v9571_v18 = vmul.f32 %v9473_v5, %v14844_v23  ;;  %v9590_v23 = vmul.f32 %v9473_v5, %v14853_v24  ;;  %v9609_v24 = vmul.f32 %v9473_v5, %v14862_v49  ;;  %v14872_v49 = vld [vmem:[#allocation139_spill] sm:$0xff]  ;;  %v14900_v41 = vld [vmem:[#allocation66_spill] sm:$0xff] }
 0x231   :  { %14838 = vst [vmem:[#allocation148_spill] sm:$0xff] %v9556_v4  ;;  %14840 = vst [vmem:[#allocation149_spill] sm:$0xff] %v9560_v56  ;;  %6199 = vtanh.f32 %v14872_v49  ;;  %v14883_v49 = vld [vmem:[#allocation105_spill] sm:$0xff]  ;;  %v14914_v29 = vld [vmem:[#allocation102_spill] sm:$0xff] }
 0x232   :  { %14842 = vst [vmem:[#allocation150_spill] sm:$0xff] %v9564_v3  ;;  %14843 = vst [vmem:[#allocation151_spill] sm:$0xff] %v9566_v1  ;;  %v9586_v1 = vmul.f32 %v9473_v5, %v14851_v58  ;;  %v9605_v58 = vmul.f32 %v9473_v5, %v14860_v0  ;;  %v14895_v3 = vld [vmem:[#allocation62_spill] sm:$0xff]  ;;  %v14899_v4 = vld [vmem:[#allocation65_spill] sm:$0xff] }
 0x233   :  { %14845 = vst [vmem:[#allocation152_spill] sm:$0xff] %v9571_v18  ;;  %14847 = vst [vmem:[#allocation153_spill] sm:$0xff] %v9575_v59  ;;  %v14915_v42 = vld [vmem:[#allocation44_spill] sm:$0xff]  ;;  %v14919_v2 = vld [vmem:[#allocation43_spill] sm:$0xff] }
 0x234   :  { %14849 = vst [vmem:[#allocation154_spill] sm:$0xff] %v9579_v8  ;;  %14850 = vst [vmem:[#allocation155_spill] sm:$0xff] %v9581_v26  ;;  %v9601_v26 = vmul.f32 %v9473_v5, %v14858_v33  ;;  %v9620_v33 = vmul.f32 %v9473_v5, %v14867_v20  ;;  %v14891_v8 = vld [vmem:[#allocation58_spill] sm:$0xff]  ;;  %v14916_v38 = vld [vmem:[#allocation68_spill] sm:$0xff] }
 0x235   :  { %14852 = vst [vmem:[#allocation156_spill] sm:$0xff] %v9586_v1  ;;  %14854 = vst [vmem:[#allocation157_spill] sm:$0xff] %v9590_v23  ;;  %v14889_v23 = vld [vmem:[#allocation56_spill] sm:$0xff]  ;;  %v14890_v1 = vld [vmem:[#allocation57_spill] sm:$0xff] }
 0x236   :  { %14856 = vst [vmem:[#allocation158_spill] sm:$0xff] %v9594_v46  ;;  %14857 = vst [vmem:[#allocation159_spill] sm:$0xff] %v9596_v25  ;;  %v9616_v25 = vmul.f32 %v9473_v5, %v14865_v52  ;;  %v9626_v46 = vpop.eup %6179  ;;  %v14920_v36 = vld [vmem:[#allocation69_spill] sm:$0xff]  ;;  %v14921_v12 = vld [vmem:[#allocation71_spill] sm:$0xff] }
 0x237   :  { %14859 = vst [vmem:[#allocation160_spill] sm:$0xff] %v9601_v26  ;;  %14861 = vst [vmem:[#allocation161_spill] sm:$0xff] %v9605_v58  ;;  %v14869_v26 = vld [vmem:[#allocation96_spill] sm:$0xff]  ;;  %v1948_v58 = vpop.permute.xlu0 %1947  ;;  %v14924_v14 = vld [vmem:[#allocation74_spill] sm:$0xff] }
 0x238   :  { %14863 = vst [vmem:[#allocation162_spill] sm:$0xff] %v9609_v24  ;;  %14864 = vst [vmem:[#allocation163_spill] sm:$0xff] %v9611_v48  ;;  %v9624_v0 = vmul.f32 %v9473_v5, %v14869_v26  ;;  %v14873_v48 = vld [vmem:[#allocation97_spill] sm:$0xff]  ;;  %v14875_v24 = vld [vmem:[#allocation98_spill] sm:$0xff]  ;;  %v1957_v59 = vmul.f32 %v1948_v58, %v14891_v8  ;;  %v1963_v56 = vmul.f32 %v1948_v58, %v14895_v3 }
 0x239   :  { %14866 = vst [vmem:[#allocation164_spill] sm:$0xff] %v9616_v25  ;;  %14868 = vst [vmem:[#allocation165_spill] sm:$0xff] %v9620_v33  ;;  %v9631_v43 = vmul.f32 %v9473_v5, %v14873_v48  ;;  %v9635_v52 = vmul.f32 %v9473_v5, %v14875_v24  ;;  %v14877_v25 = vld [vmem:[#allocation103_spill] sm:$0xff]  ;;  %v9641_v33 = vpop.eup %6181  ;;  %v14880_v26 = vld [vmem:[#allocation140_spill] sm:$0xff]  ;;  %v9650_v48 = vmul.f32 %v9473_v5, %v14883_v49 }
 0x23a   :  { %14870 = vst [vmem:[#allocation89_spill] sm:$0xff] %v9624_v0  ;;  %14871 = vst [vmem:[#allocation93_spill] sm:$0xff] %v9626_v46  ;;  %v9639_v20 = vmul.f32 %v9473_v5, %v14877_v25  ;;  %6201 = vtanh.f32 %v14880_v26  ;;  %v14881_v0 = vld [vmem:[#allocation104_spill] sm:$0xff]  ;;  %v14888_v25 = vld [vmem:[#allocation54_spill] sm:$0xff]  ;;  %v1955_v26 = vmul.f32 %v1948_v58, %v14890_v1  ;;  %v1971_v1 = vmul.f32 %v1948_v58, %v14900_v41 }
 0x23b   :  { %14874 = vst [vmem:[#allocation70_spill] sm:$0xff] %v9631_v43  ;;  %14876 = vst [vmem:[#allocation73_spill] sm:$0xff] %v9635_v52  ;;  %v9646_v46 = vmul.f32 %v9473_v5, %v14881_v0  ;;  %v14885_v43 = vld [vmem:[#allocation106_spill] sm:$0xff]  ;;  %v9656_v52 = vpop.eup %6183  ;;  %v14894_v49 = vld [vmem:[#allocation61_spill] sm:$0xff]  ;;  %v1973_v8 = vmul.f32 %v1948_v58, %v14901_v63  ;;  %v1979_v3 = vmul.f32 %v1948_v58, %v14905_v30 }
 0x23c   :  { %14878 = vst [vmem:[#allocation78_spill] sm:$0xff] %v9639_v20  ;;  %14879 = vst [vmem:[#allocation79_spill] sm:$0xff] %v9641_v33  ;;  %v9654_v24 = vmul.f32 %v9473_v5, %v14885_v43  ;;  %v1951_v20 = vmul.f32 %v1948_v58, %v14888_v25  ;;  %v1953_v33 = vmul.f32 %v1948_v58, %v14889_v23  ;;  %v9662_v0 = vpop.eup %6185  ;;  %v14896_v5 = vld [vmem:[#allocation63_spill] sm:$0xff]  ;;  %v14926_v34 = vld [vmem:[#allocation77_spill] sm:$0xff] }
 0x23d   :  { %14882 = vst [vmem:[#allocation80_spill] sm:$0xff] %v9646_v46  ;;  %14884 = vst [vmem:[#allocation81_spill] sm:$0xff] %v9650_v48  ;;  %v14893_v46 = vld [vmem:[#allocation59_spill] sm:$0xff]  ;;  %v1961_v48 = vmul.f32 %v1948_v58, %v14894_v49  ;;  %v1965_v43 = vmul.f32 %v1948_v58, %v14896_v5  ;;  %v1969_v23 = vmul.f32 %v1948_v58, %v14899_v4 }
 0x23e   :  { %14886 = vst [vmem:[#allocation83_spill] sm:$0xff] %v9654_v24  ;;  %14887 = vst [vmem:[#allocation84_spill] sm:$0xff] %v9656_v52  ;;  %v1959_v18 = vmul.f32 %v1948_v58, %v14893_v46  ;;  %v9668_v24 = vpop.eup %6187  ;;  %v14898_v52 = vld [vmem:[#allocation64_spill] sm:$0xff]  ;;  %v1977_v49 = vmul.f32 %v1948_v58, %v14904_v10  ;;  %v1981_v5 = vmul.f32 %v1948_v58, %v14906_v13  ;;  %v14925_v27 = vld [vmem:[#allocation75_spill] sm:$0xff] }
 0x23f   :  { %14892 = vst [vmem:[#allocation22_spill] sm:$0xff] %v9662_v0  ;;  %14897 = vst [vmem:[#allocation23_spill] sm:$0xff] %v9668_v24  ;;  %v1967_v25 = vmul.f32 %v1948_v58, %v14898_v52  ;;  %v9674_v37 = vpop.eup %6189  ;;  %v14903_v0 = vld [vmem:[#allocation100_spill] sm:$0xff]  ;;  %v14908_v24 = vld [vmem:[#allocation90_spill] sm:$0xff]  ;;  %v1985_v4 = vmul.f32 %v1948_v58, %v14909_v15  ;;  %v1987_v41 = vmul.f32 %v1948_v58, %v14910_v55 }
 0x240   :  { %14902 = vst [vmem:[#allocation85_spill] sm:$0xff] %v9674_v37  ;;  %v1975_v46 = vmul.f32 %v1948_v58, %v14903_v0  ;;  %v9680_v44 = vpop.eup %6191  ;;  %v1983_v52 = vmul.f32 %v1948_v58, %v14908_v24  ;;  %v1989_v63 = vmul.f32 %v1948_v58, %v14911_v39  ;;  %v14913_v37 = vld [vmem:[#allocation101_spill] sm:$0xff]  ;;  %v1993_v10 = vmul.f32 %v1948_v58, %v14914_v29 }
 0x241   :  { %14907 = vst [vmem:[#allocation34_spill] sm:$0xff] %v9680_v44  ;;  %v9686_v22 = vpop.eup %6193  ;;  %v1991_v0 = vmul.f32 %v1948_v58, %v14913_v37  ;;  %v1995_v30 = vmul.f32 %v1948_v58, %v14915_v42  ;;  %v1997_v13 = vmul.f32 %v1948_v58, %v14916_v38  ;;  %v14918_v44 = vld [vmem:[#allocation60_spill] sm:$0xff]  ;;  %v2001_v15 = vmul.f32 %v1948_v58, %v14919_v2 }
 0x242   :  { %14912 = vst [vmem:[#allocation36_spill] sm:$0xff] %v9686_v22  ;;  %v9692_v57 = vpop.eup %6195  ;;  %v1999_v24 = vmul.f32 %v1948_v58, %v14918_v44  ;;  %v2003_v55 = vmul.f32 %v1948_v58, %v14920_v36  ;;  %v2005_v39 = vmul.f32 %v1948_v58, %v14921_v12  ;;  %v14923_v22 = vld [vmem:[#allocation72_spill] sm:$0xff]  ;;  %v2009_v29 = vmul.f32 %v1948_v58, %v14924_v14 }
 0x243   :  { %14917 = vst [vmem:[#allocation25_spill] sm:$0xff] %v9692_v57  ;;  %v9698_v11 = vpop.eup %6197  ;;  %v2007_v37 = vmul.f32 %v1948_v58, %v14923_v22  ;;  %v2011_v42 = vmul.f32 %v1948_v58, %v14925_v27  ;;  %v2013_v38 = vmul.f32 %v1948_v58, %v14926_v34  ;;  %v2015_v44 = vadd.f32 %v1951_v20, %v9399_v28  ;;  %v14932_v20 = vld [vmem:[#allocation115_spill] sm:$0xff] }
 0x244   :  { %14922 = vst [vmem:[#allocation27_spill] sm:$0xff] %v9698_v11  ;;  %v9704_v19 = vpop.eup %6199  ;;  %v2017_v2 = vadd.f32 %v1953_v33, %v9404_v60  ;;  %v2019_v36 = vadd.f32 %v1955_v26, %v9406_v45  ;;  %v2021_v12 = vadd.f32 %v1957_v59, %v9408_v7  ;;  %v2023_v22 = vadd.f32 %v1959_v18, %v9413_v53  ;;  %v14929_v18 = vld [vmem:[#allocation111_spill] sm:$0xff]  ;;  %v14931_v33 = vld [vmem:[#allocation114_spill] sm:$0xff] }
 0x245   :  { %14927 = vst [vmem:[#allocation28_spill] sm:$0xff] %v9704_v19  ;;  %v9710_v57 = vpop.eup %6201  ;;  %v2025_v14 = vadd.f32 %v1961_v48, %v9415_v50  ;;  %v2027_v27 = vadd.f32 %v1963_v56, %v9417_v31  ;;  %v2029_v34 = vadd.f32 %v1965_v43, %v9422_v17  ;;  %v2031_v58 = vadd.f32 %v1967_v25, %v9424_v51  ;;  %v14930_v56 = vld [vmem:[#allocation112_spill] sm:$0xff]  ;;  %v14934_v26 = vld [vmem:[#allocation118_spill] sm:$0xff]  ;;  %v14935_v43 = vld [vmem:[#allocation119_spill] sm:$0xff] }
 0x246   :  { %14928 = vst [vmem:[#allocation33_spill] sm:$0xff] %v9710_v57  ;;  %v2033_v28 = vadd.f32 %v1969_v23, %v9426_v6  ;;  %v2035_v60 = vadd.f32 %v1971_v1, %v9431_v54  ;;  %v2037_v45 = vadd.f32 %v1973_v8, %v9433_v61  ;;  %v2039_v7 = vadd.f32 %v1975_v46, %v9435_v21  ;;  %v14933_v48 = vld [vmem:[#allocation116_spill] sm:$0xff]  ;;  %v14937_v23 = vld [vmem:[#allocation122_spill] sm:$0xff]  ;;  %v14938_v1 = vld [vmem:[#allocation123_spill] sm:$0xff] }
 0x247   :  { %v2041_v59 = vadd.f32 %v1977_v49, %v9440_v16  ;;  %v2043_v53 = vadd.f32 %v1979_v3, %v9442_v62  ;;  %v2045_v50 = vadd.f32 %v1981_v5, %v9444_v47  ;;  %v2047_v31 = vadd.f32 %v1983_v52, %v9449_v9  ;;  %v14936_v25 = vld [vmem:[#allocation120_spill] sm:$0xff]  ;;  %v14940_v49 = vld [vmem:[#allocation126_spill] sm:$0xff]  ;;  %v14941_v5 = vld [vmem:[#allocation127_spill] sm:$0xff] }
 0x248   :  { %v2049_v17 = vadd.f32 %v1985_v4, %v9451_v40  ;;  %v2051_v51 = vadd.f32 %v1987_v41, %v9453_v32  ;;  %v2053_v6 = vadd.f32 %v1989_v63, %v9458_v35  ;;  %v2055_v54 = vadd.f32 %v1991_v0, %v14929_v18  ;;  %v14939_v8 = vld [vmem:[#allocation124_spill] sm:$0xff]  ;;  %v14943_v63 = vld [vmem:[#allocation130_spill] sm:$0xff] }
 0x249   :  { %v2057_v61 = vadd.f32 %v1993_v10, %v14930_v56  ;;  %v2059_v21 = vadd.f32 %v1995_v30, %v14931_v33  ;;  %v2061_v16 = vadd.f32 %v1997_v13, %v14932_v20  ;;  %v2063_v62 = vadd.f32 %v1999_v24, %v14933_v48  ;;  %v14942_v4 = vld [vmem:[#allocation128_spill] sm:$0xff]  ;;  %v14944_v10 = vld [vmem:[#allocation131_spill] sm:$0xff]  ;;  %v14949_v56 = vld [vmem:[#allocation138_spill] sm:$0xff] }
 0x24a   :  { %v2065_v47 = vadd.f32 %v2001_v15, %v14934_v26  ;;  %v2067_v9 = vadd.f32 %v2003_v55, %v14935_v43  ;;  %v2069_v40 = vadd.f32 %v2005_v39, %v14936_v25  ;;  %v2071_v32 = vadd.f32 %v2007_v37, %v14937_v23  ;;  %v14945_v13 = vld [vmem:[#allocation132_spill] sm:$0xff]  ;;  %v14946_v15 = vld [vmem:[#allocation134_spill] sm:$0xff]  ;;  %v14947_v39 = vld [vmem:[#allocation135_spill] sm:$0xff] }
 0x24b   :  { %v2073_v35 = vadd.f32 %v2009_v29, %v14938_v1  ;;  %v2075_v46 = vadd.f32 %v2011_v42, %v14939_v8  ;;  %v2077_v3 = vadd.f32 %v2013_v38, %v14940_v49  ;;  %v2281_v52 = vadd.f32 %v14941_v5, %v2015_v44  ;;  %v14948_v18 = vld [vmem:[#allocation136_spill] sm:$0xff]  ;;  %v14950_v33 = vld [vmem:[#allocation145_spill] sm:$0xff]  ;;  %v14951_v20 = vld [vmem:[#allocation146_spill] sm:$0xff] }
 0x24c   :  { %v2283_v41 = vadd.f32 %v14942_v4, %v2017_v2  ;;  %v2285_v0 = vadd.f32 %v14943_v63, %v2019_v36  ;;  %v2287_v30 = vadd.f32 %v14944_v10, %v2021_v12  ;;  %v2289_v24 = vadd.f32 %v14945_v13, %v2023_v22  ;;  %v14952_v2 = vld [vmem:[#allocation148_spill] sm:$0xff]  ;;  %v14953_v36 = vld [vmem:[#allocation149_spill] sm:$0xff]  ;;  %v14954_v22 = vld [vmem:[#allocation150_spill] sm:$0xff] }
 0x24d   :  { %v2291_v55 = vadd.f32 %v14946_v15, %v2025_v14  ;;  %v2293_v37 = vadd.f32 %v14947_v39, %v2027_v27  ;;  %v2295_v29 = vadd.f32 %v14948_v18, %v2029_v34  ;;  %v2297_v42 = vadd.f32 %v14949_v56, %v2031_v58  ;;  %v14955_v14 = vld [vmem:[#allocation152_spill] sm:$0xff]  ;;  %v14956_v34 = vld [vmem:[#allocation153_spill] sm:$0xff]  ;;  %v14957_v58 = vld [vmem:[#allocation154_spill] sm:$0xff] }
 0x24e   :  { %v2299_v38 = vadd.f32 %v14950_v33, %v2033_v28  ;;  %v9751_v44 = vadd.f32 %v14951_v20, %v2035_v60  ;;  %v9754_v48 = vadd.f32 %v14952_v2, %v2037_v45  ;;  %v9757_v12 = vadd.f32 %v14953_v36, %v2039_v7  ;;  %v14958_v60 = vld [vmem:[#allocation156_spill] sm:$0xff]  ;;  %v14959_v45 = vld [vmem:[#allocation157_spill] sm:$0xff]  ;;  %v14960_v7 = vld [vmem:[#allocation158_spill] sm:$0xff] }
 0x24f   :  { %v9760_v26 = vadd.f32 %v14954_v22, %v2041_v59  ;;  %v9763_v27 = vadd.f32 %v14955_v14, %v2043_v53  ;;  %v9766_v43 = vadd.f32 %v14956_v34, %v2045_v50  ;;  %v9769_v28 = vadd.f32 %v14957_v58, %v2047_v31  ;;  %v14961_v59 = vld [vmem:[#allocation160_spill] sm:$0xff]  ;;  %v14962_v53 = vld [vmem:[#allocation161_spill] sm:$0xff]  ;;  %v14963_v50 = vld [vmem:[#allocation162_spill] sm:$0xff] }
 0x250   :  { %v9772_v25 = vadd.f32 %v14958_v60, %v2049_v17  ;;  %v9775_v23 = vadd.f32 %v14959_v45, %v2051_v51  ;;  %v9778_v1 = vadd.f32 %v14960_v7, %v2053_v6  ;;  %v9781_v8 = vadd.f32 %v14961_v59, %v2055_v54  ;;  %v14964_v31 = vld [vmem:[#allocation164_spill] sm:$0xff]  ;;  %v14965_v17 = vld [vmem:[#allocation165_spill] sm:$0xff]  ;;  %v14967_v6 = vld [vmem:[#allocation70_spill] sm:$0xff] }
 0x251   :  { %v9784_v49 = vadd.f32 %v14962_v53, %v2057_v61  ;;  %v9787_v5 = vadd.f32 %v14963_v50, %v2059_v21  ;;  %v9790_v4 = vadd.f32 %v14964_v31, %v2061_v16  ;;  %v9793_v63 = vadd.f32 %v14965_v17, %v2063_v62  ;;  %v14966_v51 = vld [vmem:[#allocation89_spill] sm:$0xff]  ;;  %v14969_v61 = vld [vmem:[#allocation78_spill] sm:$0xff]  ;;  %v14970_v21 = vld [vmem:[#allocation80_spill] sm:$0xff] }
 0x252   :  { %v9796_v10 = vadd.f32 %v14966_v51, %v2065_v47  ;;  %v9799_v13 = vadd.f32 %v14967_v6, %v2067_v9  ;;  %v14968_v54 = vld [vmem:[#allocation73_spill] sm:$0xff]  ;;  %v9805_v39 = vadd.f32 %v14969_v61, %v2071_v32  ;;  %v9808_v18 = vadd.f32 %v14970_v21, %v2073_v35  ;;  %v14974_v62 = vld [vmem:[#allocation83_spill] sm:$0xff]  ;;  %v14978_v2 = vld [vmem:[#allocation142_spill] sm:$0xff] }
 0x253   :  { %v9802_v15 = vadd.f32 %v14968_v54, %v2069_v40  ;;  %v14972_v16 = vld [vmem:[#allocation81_spill] sm:$0xff]  ;;  %v9814_v33 = vadd.f32 %v14974_v62, %v2077_v3  ;;  %6203 = vtanh.f32 %v2281_v52  ;;  %v14979_v36 = vld [vmem:[#allocation143_spill] sm:$0xff]  ;;  %v14980_v35 = vld [vmem:[#allocation144_spill] sm:$0xff] }
 0x254   :  { %14971 = vst [vmem:[#allocation35_spill] sm:$0xff] %v9808_v18  ;;  %v9811_v56 = vadd.f32 %v14972_v16, %v2075_v46  ;;  %v14976_v47 = vld [vmem:[#allocation53_spill] sm:$0xff]  ;;  %6205 = vtanh.f32 %v2283_v41  ;;  %v14981_v46 = vld [vmem:[#allocation107_spill] sm:$0xff]  ;;  %v14982_v3 = vld [vmem:[#allocation108_spill] sm:$0xff] }
 0x255   :  { %14975 = vst [vmem:[#allocation19_spill] sm:$0xff] %v9814_v33  ;;  %v14977_v20 = vld [vmem:[#allocation141_spill] sm:$0xff]  ;;  %v2416_v40 = vrot.slane %v14978_v2, %v14976_v47  ;;  %v2420_v32 = vrot.slane %v14979_v36, %v14976_v47  ;;  %v2424_v22 = vrot.slane %v14980_v35, %v14976_v47  ;;  %v2428_v14 = vrot.slane %v14981_v46, %v14976_v47  ;;  %v14984_v60 = vld [vmem:[#allocation110_spill] sm:$0xff] }
 0x256   :  { %14973 = vst [vmem:[#allocation17_spill] sm:$0xff] %v9811_v56  ;;  %v2412_v9 = vrot.slane %v14977_v20, %v14976_v47  ;;  %v2432_v34 = vrot.slane %v14982_v3, %v14976_v47  ;;  %6207 = vtanh.f32 %v2285_v0  ;;  %v14983_v52 = vld [vmem:[#allocation109_spill] sm:$0xff]  ;;  %v2440_v45 = vrot.slane %v14984_v60, %v14976_v47  ;;  %v14996_v60 = vld [vmem:[#allocation163_spill] sm:$0xff]  ;;  %v14999_v3 = vld [vmem:[#allocation84_spill] sm:$0xff] }
 0x257   :  { %v2436_v58 = vrot.slane %v14983_v52, %v14976_v47  ;;  %v14985_v7 = vld [vmem:[#allocation113_spill] sm:$0xff]  ;;  %6209 = vtanh.f32 %v2287_v30  ;;  %v14992_v30 = vld [vmem:[#allocation147_spill] sm:$0xff]  ;;  %v15000_v46 = vld [vmem:[#allocation22_spill] sm:$0xff] }
 0x258   :  { %v2444_v59 = vrot.slane %v14985_v7, %v14976_v47  ;;  %v14986_v41 = vld [vmem:[#allocation117_spill] sm:$0xff]  ;;  %6211 = vtanh.f32 %v2289_v24  ;;  %v2472_v62 = vrot.slane %v14992_v30, %v14976_v47  ;;  %v14994_v7 = vld [vmem:[#allocation155_spill] sm:$0xff]  ;;  %v15003_v36 = vld [vmem:[#allocation34_spill] sm:$0xff] }
 0x259   :  { %v2448_v53 = vrot.slane %v14986_v41, %v14976_v47  ;;  %v14987_v50 = vld [vmem:[#allocation121_spill] sm:$0xff]  ;;  %6213 = vtanh.f32 %v2291_v55  ;;  %v14993_v41 = vld [vmem:[#allocation151_spill] sm:$0xff] }
 0x25a   :  { %v2452_v31 = vrot.slane %v14987_v50, %v14976_v47  ;;  %v14988_v17 = vld [vmem:[#allocation125_spill] sm:$0xff]  ;;  %v2476_v50 = vrot.slane %v14993_v41, %v14976_v47  ;;  %6215 = vtanh.f32 %v2293_v37  ;;  %v14995_v24 = vld [vmem:[#allocation159_spill] sm:$0xff]  ;;  %v2500_v41 = vrot.slane %v14999_v3, %v14976_v47 }
 0x25b   :  { %v2456_v51 = vrot.slane %v14988_v17, %v14976_v47  ;;  %v14989_v0 = vld [vmem:[#allocation129_spill] sm:$0xff]  ;;  %v2480_v17 = vrot.slane %v14994_v7, %v14976_v47  ;;  %6217 = vtanh.f32 %v2295_v29  ;;  %v14998_v55 = vld [vmem:[#allocation79_spill] sm:$0xff]  ;;  %v2504_v7 = vrot.slane %v15000_v46, %v14976_v47  ;;  %v2540_v29 = vpop.permute.xlu0 %2539 }
 0x25c   :  { %v2460_v6 = vrot.slane %v14989_v0, %v14976_v47  ;;  %v14990_v54 = vld [vmem:[#allocation133_spill] sm:$0xff]  ;;  %v2484_v0 = vrot.slane %v14995_v24, %v14976_v47  ;;  %v2496_v30 = vrot.slane %v14998_v55, %v14976_v47  ;;  %6219 = vtanh.f32 %v2297_v42  ;;  %v15001_v37 = vld [vmem:[#allocation23_spill] sm:$0xff]  ;;  %v15004_v55 = vld [vmem:[#allocation36_spill] sm:$0xff] }
 0x25d   :  { %v2464_v61 = vrot.slane %v14990_v54, %v14976_v47  ;;  %v14991_v21 = vld [vmem:[#allocation137_spill] sm:$0xff]  ;;  %v2488_v54 = vrot.slane %v14996_v60, %v14976_v47  ;;  %v2508_v24 = vrot.slane %v15001_v37, %v14976_v47  ;;  %6221 = vtanh.f32 %v2299_v38  ;;  %v9876_v46 = vpop.eup %6203 }
 0x25e   :  { %v2468_v16 = vrot.slane %v14991_v21, %v14976_v47  ;;  %v14997_v52 = vld [vmem:[#allocation93_spill] sm:$0xff]  ;;  %v2520_v2 = vrot.slane %v15004_v55, %v14976_v47  ;;  %v2528_v42 = vrot.slane %v9698_v11, %v14976_v47  ;;  %15006 = vst [vmem:[#allocation20_spill] sm:$0xff] %v9876_v46  ;;  %6223 = vtanh.f32 %v9751_v44  ;;  %v9883_v37 = vpop.eup %6205 }
 0x25f   :  { %v2492_v21 = vrot.slane %v14997_v52, %v14976_v47  ;;  %v15002_v35 = vld [vmem:[#allocation85_spill] sm:$0xff]  ;;  %v2516_v52 = vrot.slane %v15003_v36, %v14976_v47  ;;  %v2536_v38 = vrot.slane %v9710_v57, %v14976_v47  ;;  %v2542_v36 = vmul.f32 %v2540_v29, %v2412_v9  ;;  %15007 = vst [vmem:[#allocation21_spill] sm:$0xff] %v9883_v37 }
 0x260   :  { %v2512_v60 = vrot.slane %v15002_v35, %v14976_v47  ;;  %v15005_v3 = vld [vmem:[#allocation25_spill] sm:$0xff]  ;;  %v2532_v35 = vrot.slane %v9704_v19, %v14976_v47  ;;  %6225 = vtanh.f32 %v9754_v48  ;;  %v2543_v55 = vmul.f32 %v2540_v29, %v2416_v40  ;;  %v9886_v56 = vpop.eup %6207 }
 0x261   :  { %v2524_v20 = vrot.slane %v15005_v3, %v14976_v47  ;;  %v2544_v3 = vmul.f32 %v2540_v29, %v2420_v32  ;;  %v2545_v33 = vmul.f32 %v2540_v29, %v2424_v22  ;;  %15008 = vst [vmem:[#allocation26_spill] sm:$0xff] %v9886_v56  ;;  %6227 = vtanh.f32 %v9757_v12  ;;  %v9889_v18 = vpop.eup %6209  ;;  %v15082_v56 = vld [vmem:[#allocation137_spill] sm:$0xff] }
 0x262   :  { %v2546_v46 = vmul.f32 %v2540_v29, %v2428_v14  ;;  %v2547_v44 = vmul.f32 %v2540_v29, %v2432_v34  ;;  %v2548_v11 = vmul.f32 %v2540_v29, %v2436_v58  ;;  %15009 = vst [vmem:[#allocation12_spill] sm:$0xff] %v9889_v18  ;;  %6229 = vtanh.f32 %v9760_v26  ;;  %v9892_v37 = vpop.eup %6211  ;;  %v15081_v18 = vld [vmem:[#allocation133_spill] sm:$0xff] }
 0x263   :  { %v2549_v47 = vmul.f32 %v2540_v29, %v2440_v45  ;;  %v2550_v9 = vmul.f32 %v2540_v29, %v2444_v59  ;;  %v2551_v57 = vmul.f32 %v2540_v29, %v2448_v53  ;;  %15010 = vst [vmem:[#allocation14_spill] sm:$0xff] %v9892_v37  ;;  %6231 = vtanh.f32 %v9763_v27  ;;  %v9895_v22 = vpop.eup %6213 }
 0x264   :  { %v2552_v48 = vmul.f32 %v2540_v29, %v2452_v31  ;;  %v2553_v40 = vmul.f32 %v2540_v29, %v2456_v51  ;;  %v2554_v32 = vmul.f32 %v2540_v29, %v2460_v6  ;;  %15011 = vst [vmem:[#allocation15_spill] sm:$0xff] %v9895_v22  ;;  %6233 = vtanh.f32 %v9766_v43  ;;  %v9898_v58 = vpop.eup %6215  ;;  %v15080_v22 = vld [vmem:[#allocation129_spill] sm:$0xff] }
 0x265   :  { %v2555_v12 = vmul.f32 %v2540_v29, %v2464_v61  ;;  %v2556_v14 = vmul.f32 %v2540_v29, %v2468_v16  ;;  %v2557_v34 = vmul.f32 %v2540_v29, %v2472_v62  ;;  %15012 = vst [vmem:[#allocation16_spill] sm:$0xff] %v9898_v58  ;;  %6235 = vtanh.f32 %v9769_v28  ;;  %v9901_v53 = vpop.eup %6217 }
 0x266   :  { %v2558_v26 = vmul.f32 %v2540_v29, %v2476_v50  ;;  %v2559_v45 = vmul.f32 %v2540_v29, %v2480_v17  ;;  %v2560_v59 = vmul.f32 %v2540_v29, %v2484_v0  ;;  %15013 = vst [vmem:[#allocation18_spill] sm:$0xff] %v9901_v53  ;;  %6237 = vtanh.f32 %v9772_v25  ;;  %v9904_v6 = vpop.eup %6219  ;;  %v2577_v25 = vpop.permute.xlu1 %2576 }
 0x267   :  { %v2561_v27 = vmul.f32 %v2540_v29, %v2488_v54  ;;  %v2562_v31 = vmul.f32 %v2540_v29, %v2492_v21  ;;  %v2563_v51 = vmul.f32 %v2540_v29, %v2496_v30  ;;  %15014 = vst [vmem:[#allocation50_spill] sm:$0xff] %v9904_v6  ;;  %6239 = vtanh.f32 %v9775_v23  ;;  %v9907_v62 = vpop.eup %6221 }
 0x268   :  { %v2564_v43 = vmul.f32 %v2540_v29, %v2500_v41  ;;  %v2565_v61 = vmul.f32 %v2540_v29, %v2504_v7  ;;  %v2566_v16 = vmul.f32 %v2540_v29, %v2508_v24  ;;  %15015 = vst [vmem:[#allocation55_spill] sm:$0xff] %v9907_v62  ;;  %6241 = vtanh.f32 %v9778_v1  ;;  %v9910_v0 = vpop.eup %6223  ;;  %v15078_v62 = vld [vmem:[#allocation125_spill] sm:$0xff] }
 0x269   :  { %v2567_v28 = vmul.f32 %v2540_v29, %v2512_v60  ;;  %v2568_v50 = vmul.f32 %v2540_v29, %v2516_v52  ;;  %v2569_v17 = vmul.f32 %v2540_v29, %v2520_v2  ;;  %15016 = vst [vmem:[#allocation7_spill] sm:$0xff] %v9910_v0  ;;  %6243 = vtanh.f32 %v9781_v8 }
 0x26a   :  { %v2570_v54 = vmul.f32 %v2540_v29, %v2524_v20  ;;  %v2571_v21 = vmul.f32 %v2540_v29, %v2528_v42  ;;  %v2572_v30 = vmul.f32 %v2540_v29, %v2532_v35  ;;  %v9913_v6 = vpop.eup %6225  ;;  %6245 = vtanh.f32 %v9784_v49 }
 0x26b   :  { %15017 = vst [vmem:[#allocation8_spill] sm:$0xff] %v9913_v6  ;;  %v2573_v23 = vmul.f32 %v2540_v29, %v2536_v38  ;;  %v9916_v7 = vadd.f32 %v2577_v25, %v2542_v36  ;;  %v9918_v41 = vadd.f32 %v2577_v25, %v2543_v55  ;;  %v9920_v1 = vpop.eup %6227  ;;  %6247 = vtanh.f32 %v9787_v5  ;;  %v15077_v6 = vld [vmem:[#allocation121_spill] sm:$0xff] }
 0x26c   :  { %15020 = vst [vmem:[#allocation11_spill] sm:$0xff] %v9920_v1  ;;  %v9923_v2 = vadd.f32 %v2577_v25, %v2544_v3  ;;  %v9925_v8 = vadd.f32 %v2577_v25, %v2545_v33  ;;  %v9927_v20 = vadd.f32 %v2577_v25, %v2546_v46  ;;  %v9929_v35 = vpop.eup %6229  ;;  %6249 = vtanh.f32 %v9790_v4  ;;  %v15076_v1 = vld [vmem:[#allocation117_spill] sm:$0xff] }
 0x26d   :  { %15018 = vst [vmem:[#allocation9_spill] sm:$0xff] %v9916_v7  ;;  %15019 = vst [vmem:[#allocation10_spill] sm:$0xff] %v9918_v41  ;;  %v9932_v49 = vadd.f32 %v2577_v25, %v2547_v44  ;;  %v9934_v36 = vadd.f32 %v2577_v25, %v2548_v11  ;;  %v9936_v52 = vadd.f32 %v2577_v25, %v2549_v47  ;;  %v9938_v60 = vpop.eup %6231  ;;  %6251 = vtanh.f32 %v9793_v63 }
 0x26e   :  { %15021 = vst [vmem:[#allocation13_spill] sm:$0xff] %v9923_v2  ;;  %15022 = vst [vmem:[#allocation41_spill] sm:$0xff] %v9925_v8  ;;  %v9941_v5 = vadd.f32 %v2577_v25, %v2550_v9  ;;  %v9943_v33 = vadd.f32 %v2577_v25, %v2551_v57  ;;  %v9945_v46 = vadd.f32 %v2577_v25, %v2552_v48  ;;  %v9947_v3 = vpop.eup %6233  ;;  %6253 = vtanh.f32 %v9796_v10  ;;  %v2939_v8 = vpop.permute.xlu1 %2938  ;;  %v15100_v2 = vld [vmem:[#allocation25_spill] sm:$0xff] }
 0x26f   :  { %15023 = vst [vmem:[#allocation42_spill] sm:$0xff] %v9927_v20  ;;  %15024 = vst [vmem:[#allocation49_spill] sm:$0xff] %v9929_v35  ;;  %v9950_v4 = vadd.f32 %v2577_v25, %v2553_v40  ;;  %v9952_v11 = vadd.f32 %v2577_v25, %v2554_v32  ;;  %v9954_v47 = vadd.f32 %v2577_v25, %v2555_v12  ;;  %v9956_v24 = vpop.eup %6235  ;;  %6255 = vtanh.f32 %v9799_v13  ;;  %v15049_v32 = vld [vmem:[#allocation35_spill] sm:$0xff] }
 0x270   :  { %15025 = vst [vmem:[#allocation67_spill] sm:$0xff] %v9932_v49  ;;  %15026 = vst [vmem:[#allocation76_spill] sm:$0xff] %v9934_v36  ;;  %v9959_v63 = vadd.f32 %v2577_v25, %v2556_v14  ;;  %v9961_v57 = vadd.f32 %v2577_v25, %v2557_v34  ;;  %v9963_v55 = vadd.f32 %v2577_v25, %v2558_v26  ;;  %v9965_v29 = vpop.eup %6237  ;;  %6257 = vtanh.f32 %v9802_v15  ;;  %v15054_v26 = vld [vmem:[#allocation17_spill] sm:$0xff]  ;;  %v15098_v36 = vld [vmem:[#allocation36_spill] sm:$0xff] }
 0x271   :  { %15027 = vst [vmem:[#allocation24_spill] sm:$0xff] %v9936_v52  ;;  %15028 = vst [vmem:[#allocation29_spill] sm:$0xff] %v9938_v60  ;;  %v9968_v10 = vadd.f32 %v2577_v25, %v2559_v45  ;;  %v9970_v42 = vadd.f32 %v2577_v25, %v2560_v59  ;;  %v9972_v38 = vadd.f32 %v2577_v25, %v2561_v27  ;;  %v9974_v44 = vpop.eup %6239  ;;  %6259 = vtanh.f32 %v9805_v39  ;;  %v15075_v60 = vld [vmem:[#allocation113_spill] sm:$0xff] }
 0x272   :  { %15029 = vst [vmem:[#allocation30_spill] sm:$0xff] %v9941_v5  ;;  %15030 = vst [vmem:[#allocation31_spill] sm:$0xff] %v9943_v33  ;;  %v9977_v13 = vadd.f32 %v2577_v25, %v2562_v31  ;;  %v9979_v9 = vadd.f32 %v2577_v25, %v2563_v51  ;;  %v9981_v48 = vadd.f32 %v2577_v25, %v2564_v43  ;;  %v9983_v40 = vpop.eup %6241  ;;  %6261 = vtanh.f32 %v15049_v32  ;;  %v15059_v31 = vld [vmem:[#allocation19_spill] sm:$0xff]  ;;  %v15065_v32 = vld [vmem:[#allocation141_spill] sm:$0xff] }
 0x273   :  { %15031 = vst [vmem:[#allocation32_spill] sm:$0xff] %v9945_v46  ;;  %15032 = vst [vmem:[#allocation37_spill] sm:$0xff] %v9947_v3  ;;  %v9986_v15 = vadd.f32 %v2577_v25, %v2565_v61  ;;  %v9988_v12 = vadd.f32 %v2577_v25, %v2566_v16  ;;  %v9990_v14 = vadd.f32 %v2577_v25, %v2567_v28  ;;  %v9992_v34 = vpop.eup %6243  ;;  %6263 = vtanh.f32 %v15054_v26  ;;  %v15064_v28 = vld [vmem:[#allocation82_spill] sm:$0xff]  ;;  %v15096_v33 = vld [vmem:[#allocation85_spill] sm:$0xff] }
 0x274   :  { %15033 = vst [vmem:[#allocation38_spill] sm:$0xff] %v9950_v4  ;;  %15034 = vst [vmem:[#allocation39_spill] sm:$0xff] %v9952_v11  ;;  %v9995_v39 = vadd.f32 %v2577_v25, %v2568_v50  ;;  %v9997_v45 = vadd.f32 %v2577_v25, %v2569_v17  ;;  %v9999_v59 = vadd.f32 %v2577_v25, %v2570_v54  ;;  %v10001_v27 = vpop.eup %6245  ;;  %6265 = vtanh.f32 %v15059_v31  ;;  %v15066_v17 = vld [vmem:[#allocation142_spill] sm:$0xff]  ;;  %v15067_v54 = vld [vmem:[#allocation143_spill] sm:$0xff] }
 0x275   :  { %15035 = vst [vmem:[#allocation40_spill] sm:$0xff] %v9954_v47  ;;  %15036 = vst [vmem:[#allocation45_spill] sm:$0xff] %v9956_v24  ;;  %v10004_v51 = vadd.f32 %v2577_v25, %v2571_v21  ;;  %v10006_v43 = vadd.f32 %v2577_v25, %v2572_v30  ;;  %v10008_v61 = vadd.f32 %v2577_v25, %v2573_v23  ;;  %v10010_v16 = vpop.eup %6247  ;;  %v15070_v30 = vld [vmem:[#allocation107_spill] sm:$0xff]  ;;  %v15071_v23 = vld [vmem:[#allocation108_spill] sm:$0xff] }
 0x276   :  { %15037 = vst [vmem:[#allocation46_spill] sm:$0xff] %v9959_v63  ;;  %15038 = vst [vmem:[#allocation47_spill] sm:$0xff] %v9961_v57  ;;  %v2811_v50 = vrot.slane %v15065_v32, %v15064_v28  ;;  %v2815_v26 = vrot.slane %v15066_v17, %v15064_v28  ;;  %v10020_v21 = vpop.eup %6249  ;;  %v2827_v25 = vrot.slane %v15070_v30, %v15064_v28  ;;  %v15093_v63 = vld [vmem:[#allocation22_spill] sm:$0xff]  ;;  %v15095_v4 = vld [vmem:[#allocation23_spill] sm:$0xff] }
 0x277   :  { %15039 = vst [vmem:[#allocation48_spill] sm:$0xff] %v9963_v55  ;;  %15040 = vst [vmem:[#allocation95_spill] sm:$0xff] %v9965_v29  ;;  %v15073_v29 = vld [vmem:[#allocation110_spill] sm:$0xff]  ;;  %v10030_v3 = vpop.eup %6251  ;;  %v2843_v35 = vrot.slane %v15075_v60, %v15064_v28  ;;  %v2851_v0 = vrot.slane %v15077_v6, %v15064_v28  ;;  %v2855_v53 = vrot.slane %v15078_v62, %v15064_v28  ;;  %v15092_v55 = vld [vmem:[#allocation84_spill] sm:$0xff] }
 0x278   :  { %15041 = vst [vmem:[#allocation96_spill] sm:$0xff] %v9968_v10  ;;  %15042 = vst [vmem:[#allocation139_spill] sm:$0xff] %v9970_v42  ;;  %v2839_v24 = vrot.slane %v15073_v29, %v15064_v28  ;;  %v10040_v58 = vpop.eup %6253  ;;  %v2859_v37 = vrot.slane %v15080_v22, %v15064_v28  ;;  %v15091_v10 = vld [vmem:[#allocation79_spill] sm:$0xff]  ;;  %v2899_v57 = vrot.slane %v15092_v55, %v15064_v28  ;;  %v15097_v5 = vld [vmem:[#allocation34_spill] sm:$0xff] }
 0x279   :  { %15043 = vst [vmem:[#allocation97_spill] sm:$0xff] %v9972_v38  ;;  %15044 = vst [vmem:[#allocation98_spill] sm:$0xff] %v9974_v44  ;;  %v15090_v38 = vld [vmem:[#allocation93_spill] sm:$0xff]  ;;  %v2903_v47 = vrot.slane %v15093_v63, %v15064_v28  ;;  %v2907_v46 = vrot.slane %v15095_v4, %v15064_v28  ;;  %v2915_v52 = vrot.slane %v15097_v5, %v15064_v28 }
 0x27a   :  { %15045 = vst [vmem:[#allocation103_spill] sm:$0xff] %v9977_v13  ;;  %15046 = vst [vmem:[#allocation140_spill] sm:$0xff] %v9979_v9  ;;  %v2891_v42 = vrot.slane %v15090_v38, %v15064_v28  ;;  %v2919_v49 = vrot.slane %v15098_v36, %v15064_v28  ;;  %v2923_v41 = vrot.slane %v15100_v2, %v15064_v28 }
 0x27b   :  { %15047 = vst [vmem:[#allocation104_spill] sm:$0xff] %v9981_v48  ;;  %15048 = vst [vmem:[#allocation105_spill] sm:$0xff] %v9983_v40  ;;  %v15072_v40 = vld [vmem:[#allocation109_spill] sm:$0xff]  ;;  %v15088_v48 = vld [vmem:[#allocation163_spill] sm:$0xff]  ;;  %v2931_v4 = vrot.slane %v9704_v19, %v15064_v28  ;;  %v10092_v5 = vmul.f32 %v2939_v8, %v2811_v50  ;;  %v10094_v36 = vmul.f32 %v2939_v8, %v2815_v26 }
 0x27c   :  { %15050 = vst [vmem:[#allocation106_spill] sm:$0xff] %v9986_v15  ;;  %15051 = vst [vmem:[#allocation54_spill] sm:$0xff] %v9988_v12  ;;  %v2835_v44 = vrot.slane %v15072_v40, %v15064_v28  ;;  %v15087_v12 = vld [vmem:[#allocation159_spill] sm:$0xff]  ;;  %v2887_v9 = vrot.slane %v15088_v48, %v15064_v28  ;;  %v10102_v38 = vmul.f32 %v2939_v8, %v2827_v25 }
 0x27d   :  { %15052 = vst [vmem:[#allocation56_spill] sm:$0xff] %v9990_v14  ;;  %15053 = vst [vmem:[#allocation57_spill] sm:$0xff] %v9992_v34  ;;  %v2819_v34 = vrot.slane %v15067_v54, %v15064_v28  ;;  %v15086_v14 = vld [vmem:[#allocation155_spill] sm:$0xff]  ;;  %v2883_v15 = vrot.slane %v15087_v12, %v15064_v28  ;;  %v10108_v48 = vmul.f32 %v2939_v8, %v2839_v24 }
 0x27e   :  { %15055 = vst [vmem:[#allocation58_spill] sm:$0xff] %v9995_v39  ;;  %15056 = vst [vmem:[#allocation59_spill] sm:$0xff] %v9997_v45  ;;  %v15085_v45 = vld [vmem:[#allocation151_spill] sm:$0xff]  ;;  %v10106_v19 = vmul.f32 %v2939_v8, %v2835_v44  ;;  %v10114_v26 = vmul.f32 %v2939_v8, %v2851_v0  ;;  %v10134_v0 = vmul.f32 %v2939_v8, %v2891_v42 }
 0x27f   :  { %15057 = vst [vmem:[#allocation61_spill] sm:$0xff] %v9999_v59  ;;  %15058 = vst [vmem:[#allocation62_spill] sm:$0xff] %v10001_v27  ;;  %v15068_v27 = vld [vmem:[#allocation144_spill] sm:$0xff]  ;;  %v10050_v59 = vpop.eup %6255  ;;  %v2875_v39 = vrot.slane %v15085_v45, %v15064_v28  ;;  %v10154_v42 = vmul.f32 %v2939_v8, %v2931_v4 }
 0x280   :  { %15060 = vst [vmem:[#allocation63_spill] sm:$0xff] %v10004_v51  ;;  %15061 = vst [vmem:[#allocation64_spill] sm:$0xff] %v10006_v43  ;;  %v2823_v31 = vrot.slane %v15068_v27, %v15064_v28  ;;  %v15083_v43 = vld [vmem:[#allocation147_spill] sm:$0xff]  ;;  %v10060_v13 = vpop.eup %6257 }
 0x281   :  { %15062 = vst [vmem:[#allocation65_spill] sm:$0xff] %v10008_v61  ;;  %15063 = vst [vmem:[#allocation66_spill] sm:$0xff] %v10010_v16  ;;  %v2831_v16 = vrot.slane %v15071_v23, %v15064_v28  ;;  %v2867_v61 = vrot.slane %v15082_v56, %v15064_v28  ;;  %v2871_v51 = vrot.slane %v15083_v43, %v15064_v28  ;;  %v10070_v11 = vpop.eup %6259 }
 0x282   :  { %15069 = vst [vmem:[#allocation99_spill] sm:$0xff] %v10020_v21  ;;  %15074 = vst [vmem:[#allocation100_spill] sm:$0xff] %v10030_v3  ;;  %v2847_v21 = vrot.slane %v15076_v1, %v15064_v28  ;;  %v2863_v3 = vrot.slane %v15081_v18, %v15064_v28  ;;  %v10080_v20 = vpop.eup %6261  ;;  %v10126_v44 = vmul.f32 %v2939_v8, %v2875_v39 }
 0x283   :  { %15079 = vst [vmem:[#allocation86_spill] sm:$0xff] %v10040_v58  ;;  %15084 = vst [vmem:[#allocation87_spill] sm:$0xff] %v10050_v59  ;;  %v2879_v58 = vrot.slane %v15086_v14, %v15064_v28  ;;  %v2895_v59 = vrot.slane %v15091_v10, %v15064_v28  ;;  %v10090_v55 = vpop.eup %6263  ;;  %v10098_v10 = vmul.f32 %v2939_v8, %v2823_v31 }
 0x284   :  { %15089 = vst [vmem:[#allocation88_spill] sm:$0xff] %v10060_v13  ;;  %15094 = vst [vmem:[#allocation90_spill] sm:$0xff] %v10070_v11  ;;  %v2911_v13 = vrot.slane %v15096_v33, %v15064_v28  ;;  %v15101_v11 = vld [vmem:[#allocation27_spill] sm:$0xff]  ;;  %v15102_v33 = vld [vmem:[#allocation33_spill] sm:$0xff]  ;;  %v10100_v2 = vpop.eup %6265  ;;  %v10112_v50 = vmul.f32 %v2939_v8, %v2847_v21  ;;  %v10118_v31 = vmul.f32 %v2939_v8, %v2859_v37 }
 0x285   :  { %15099 = vst [vmem:[#allocation91_spill] sm:$0xff] %v10080_v20  ;;  %v2927_v7 = vrot.slane %v15101_v11, %v15064_v28  ;;  %v2935_v63 = vrot.slane %v15102_v33, %v15064_v28  ;;  %15103 = vst [vmem:[#allocation92_spill] sm:$0xff] %v10090_v55  ;;  %v10096_v20 = vmul.f32 %v2939_v8, %v2819_v34 }
 0x286   :  { %15104 = vst [vmem:[#allocation94_spill] sm:$0xff] %v10100_v2  ;;  %v10104_v11 = vmul.f32 %v2939_v8, %v2831_v16  ;;  %15105 = vst [vmem:[#allocation101_spill] sm:$0xff] %v10106_v19  ;;  %v10110_v28 = vmul.f32 %v2939_v8, %v2843_v35  ;;  %v10116_v34 = vmul.f32 %v2939_v8, %v2855_v53 }
 0x287   :  { %15106 = vst [vmem:[#allocation102_spill] sm:$0xff] %v10108_v48  ;;  %15108 = vst [vmem:[#allocation68_spill] sm:$0xff] %v10112_v50  ;;  %v10120_v55 = vmul.f32 %v2939_v8, %v2863_v3  ;;  %v10122_v25 = vmul.f32 %v2939_v8, %v2867_v61  ;;  %v10124_v16 = vmul.f32 %v2939_v8, %v2871_v51  ;;  %v15139_v50 = vld [vmem:[#allocation34_spill] sm:$0xff]  ;;  %v15140_v48 = vld [vmem:[#allocation36_spill] sm:$0xff] }
 0x288   :  { %15107 = vst [vmem:[#allocation44_spill] sm:$0xff] %v10110_v28  ;;  %15109 = vst [vmem:[#allocation60_spill] sm:$0xff] %v10114_v26  ;;  %v10128_v24 = vmul.f32 %v2939_v8, %v2879_v58  ;;  %v10130_v35 = vmul.f32 %v2939_v8, %v2883_v15  ;;  %v10132_v21 = vmul.f32 %v2939_v8, %v2887_v9 }
 0x289   :  { %15110 = vst [vmem:[#allocation43_spill] sm:$0xff] %v10116_v34  ;;  %15111 = vst [vmem:[#allocation69_spill] sm:$0xff] %v10118_v31  ;;  %v10136_v53 = vmul.f32 %v2939_v8, %v2895_v59  ;;  %v10138_v37 = vmul.f32 %v2939_v8, %v2899_v57  ;;  %v10140_v3 = vmul.f32 %v2939_v8, %v2903_v47  ;;  %v15131_v57 = vld [vmem:[#allocation52_spill] sm:$0xff]  ;;  %v15138_v34 = vld [vmem:[#allocation85_spill] sm:$0xff] }
 0x28a   :  { %15112 = vst [vmem:[#allocation71_spill] sm:$0xff] %v10120_v55  ;;  %15113 = vst [vmem:[#allocation72_spill] sm:$0xff] %v10122_v25  ;;  %v10142_v61 = vmul.f32 %v2939_v8, %v2907_v46  ;;  %v10144_v51 = vmul.f32 %v2939_v8, %v2911_v13  ;;  %v10146_v39 = vmul.f32 %v2939_v8, %v2915_v52  ;;  %v15137_v55 = vld [vmem:[#allocation23_spill] sm:$0xff] }
 0x28b   :  { %15114 = vst [vmem:[#allocation74_spill] sm:$0xff] %v10124_v16  ;;  %15115 = vst [vmem:[#allocation75_spill] sm:$0xff] %v10126_v44  ;;  %v10148_v58 = vmul.f32 %v2939_v8, %v2919_v49  ;;  %v10150_v15 = vmul.f32 %v2939_v8, %v2923_v41  ;;  %v10152_v9 = vmul.f32 %v2939_v8, %v2927_v7  ;;  %v15136_v16 = vld [vmem:[#allocation22_spill] sm:$0xff] }
 0x28c   :  { %15116 = vst [vmem:[#allocation77_spill] sm:$0xff] %v10128_v24  ;;  %15117 = vst [vmem:[#allocation111_spill] sm:$0xff] %v10130_v35  ;;  %v10156_v59 = vmul.f32 %v2939_v8, %v2935_v63  ;;  %v2614_v47 = vrot.slane %v15065_v32, %v15131_v57  ;;  %v2618_v46 = vrot.slane %v15066_v17, %v15131_v57  ;;  %v15135_v24 = vld [vmem:[#allocation84_spill] sm:$0xff] }
 0x28d   :  { %15118 = vst [vmem:[#allocation112_spill] sm:$0xff] %v10132_v21  ;;  %15119 = vst [vmem:[#allocation114_spill] sm:$0xff] %v10134_v0  ;;  %v2622_v52 = vrot.slane %v15067_v54, %v15131_v57  ;;  %v2626_v49 = vrot.slane %v15068_v27, %v15131_v57  ;;  %v2630_v7 = vrot.slane %v15070_v30, %v15131_v57  ;;  %v15134_v21 = vld [vmem:[#allocation79_spill] sm:$0xff] }
 0x28e   :  { %15120 = vst [vmem:[#allocation115_spill] sm:$0xff] %v10136_v53  ;;  %15121 = vst [vmem:[#allocation116_spill] sm:$0xff] %v10138_v37  ;;  %v2634_v41 = vrot.slane %v15071_v23, %v15131_v57  ;;  %v2638_v8 = vrot.slane %v15072_v40, %v15131_v57  ;;  %v2642_v4 = vrot.slane %v15073_v29, %v15131_v57  ;;  %v15133_v53 = vld [vmem:[#allocation93_spill] sm:$0xff] }
 0x28f   :  { %15122 = vst [vmem:[#allocation118_spill] sm:$0xff] %v10140_v3  ;;  %15123 = vst [vmem:[#allocation119_spill] sm:$0xff] %v10142_v61  ;;  %v2646_v63 = vrot.slane %v15075_v60, %v15131_v57  ;;  %v2650_v13 = vrot.slane %v15076_v1, %v15131_v57  ;;  %v2654_v2 = vrot.slane %v15077_v6, %v15131_v57  ;;  %v15132_v3 = vld [vmem:[#allocation163_spill] sm:$0xff] }
 0x290   :  { %15124 = vst [vmem:[#allocation120_spill] sm:$0xff] %v10144_v51  ;;  %15125 = vst [vmem:[#allocation122_spill] sm:$0xff] %v10146_v39  ;;  %v2678_v39 = vrot.slane %v15085_v45, %v15131_v57  ;;  %v2682_v51 = vrot.slane %v15086_v14, %v15131_v57  ;;  %v2686_v61 = vrot.slane %v15087_v12, %v15131_v57 }
 0x291   :  { %15126 = vst [vmem:[#allocation123_spill] sm:$0xff] %v10148_v58  ;;  %15127 = vst [vmem:[#allocation124_spill] sm:$0xff] %v10150_v15  ;;  %v2670_v15 = vrot.slane %v15082_v56, %v15131_v57  ;;  %v2674_v58 = vrot.slane %v15083_v43, %v15131_v57  ;;  %v2690_v37 = vrot.slane %v15132_v3, %v15131_v57 }
 0x292   :  { %15128 = vst [vmem:[#allocation126_spill] sm:$0xff] %v10152_v9  ;;  %15129 = vst [vmem:[#allocation127_spill] sm:$0xff] %v10154_v42  ;;  %v2662_v42 = vrot.slane %v15080_v22, %v15131_v57  ;;  %v2666_v9 = vrot.slane %v15081_v18, %v15131_v57  ;;  %v2694_v0 = vrot.slane %v15133_v53, %v15131_v57  ;;  %v2742_v53 = vpop.permute.xlu0 %2741 }
 0x293   :  { %15130 = vst [vmem:[#allocation128_spill] sm:$0xff] %v10156_v59  ;;  %v2658_v59 = vrot.slane %v15078_v62, %v15131_v57  ;;  %v2698_v35 = vrot.slane %v15134_v21, %v15131_v57  ;;  %v2702_v44 = vrot.slane %v15135_v24, %v15131_v57  ;;  %v2706_v25 = vrot.slane %v15136_v16, %v15131_v57  ;;  %v15141_v21 = vld [vmem:[#allocation25_spill] sm:$0xff]  ;;  %v15142_v24 = vld [vmem:[#allocation27_spill] sm:$0xff]  ;;  %v15143_v16 = vld [vmem:[#allocation28_spill] sm:$0xff] }
 0x294   :  { %v2710_v31 = vrot.slane %v15137_v55, %v15131_v57  ;;  %v2714_v26 = vrot.slane %v15138_v34, %v15131_v57  ;;  %v2718_v28 = vrot.slane %v15139_v50, %v15131_v57  ;;  %v2722_v19 = vrot.slane %v15140_v48, %v15131_v57 }
 0x295   :  { %v2726_v3 = vrot.slane %v15141_v21, %v15131_v57  ;;  %v2730_v12 = vrot.slane %v15142_v24, %v15131_v57  ;;  %v2734_v14 = vrot.slane %v15143_v16, %v15131_v57  ;;  %v2738_v55 = vrot.slane %v15102_v33, %v15131_v57 }
 0x296   :  { %v2744_v34 = vmul.f32 %v2742_v53, %v2614_v47  ;;  %v2745_v45 = vmul.f32 %v2742_v53, %v2618_v46  ;;  %v2746_v43 = vmul.f32 %v2742_v53, %v2622_v52  ;;  %v2747_v50 = vmul.f32 %v2742_v53, %v2626_v49 }
 0x297   :  { %v2748_v56 = vmul.f32 %v2742_v53, %v2630_v7  ;;  %v2749_v18 = vmul.f32 %v2742_v53, %v2634_v41  ;;  %v2750_v48 = vmul.f32 %v2742_v53, %v2638_v8  ;;  %v2751_v22 = vmul.f32 %v2742_v53, %v2642_v4 }
 0x298   :  { %v2752_v62 = vmul.f32 %v2742_v53, %v2646_v63  ;;  %v2753_v6 = vmul.f32 %v2742_v53, %v2650_v13  ;;  %v2754_v21 = vmul.f32 %v2742_v53, %v2654_v2  ;;  %v2755_v1 = vmul.f32 %v2742_v53, %v2658_v59 }
 0x299   :  { %v2756_v60 = vmul.f32 %v2742_v53, %v2662_v42  ;;  %v2757_v24 = vmul.f32 %v2742_v53, %v2666_v9  ;;  %v2758_v29 = vmul.f32 %v2742_v53, %v2670_v15  ;;  %v2759_v40 = vmul.f32 %v2742_v53, %v2674_v58  ;;  %v15144_v42 = vld [vmem:[#allocation9_spill] sm:$0xff]  ;;  %v15145_v15 = vld [vmem:[#allocation10_spill] sm:$0xff] }
 0x29a   :  { %v2760_v16 = vmul.f32 %v2742_v53, %v2678_v39  ;;  %v2761_v23 = vmul.f32 %v2742_v53, %v2682_v51  ;;  %v2762_v30 = vmul.f32 %v2742_v53, %v2686_v61  ;;  %v2763_v57 = vmul.f32 %v2742_v53, %v2690_v37  ;;  %v15146_v39 = vld [vmem:[#allocation13_spill] sm:$0xff] }
 0x29b   :  { %v2764_v47 = vmul.f32 %v2742_v53, %v2694_v0  ;;  %v2765_v46 = vmul.f32 %v2742_v53, %v2698_v35  ;;  %v2766_v52 = vmul.f32 %v2742_v53, %v2702_v44  ;;  %v2767_v49 = vmul.f32 %v2742_v53, %v2706_v25  ;;  %v15147_v61 = vld [vmem:[#allocation41_spill] sm:$0xff]  ;;  %v15148_v0 = vld [vmem:[#allocation42_spill] sm:$0xff]  ;;  %v15149_v44 = vld [vmem:[#allocation67_spill] sm:$0xff] }
 0x29c   :  { %v2768_v7 = vmul.f32 %v2742_v53, %v2710_v31  ;;  %v2769_v41 = vmul.f32 %v2742_v53, %v2714_v26  ;;  %v2770_v8 = vmul.f32 %v2742_v53, %v2718_v28  ;;  %v2771_v4 = vmul.f32 %v2742_v53, %v2722_v19  ;;  %v15150_v31 = vld [vmem:[#allocation76_spill] sm:$0xff] }
 0x29d   :  { %v2772_v63 = vmul.f32 %v2742_v53, %v2726_v3  ;;  %v2773_v13 = vmul.f32 %v2742_v53, %v2730_v12  ;;  %v2774_v2 = vmul.f32 %v2742_v53, %v2734_v14  ;;  %v2775_v59 = vmul.f32 %v2742_v53, %v2738_v55  ;;  %v15151_v19 = vld [vmem:[#allocation24_spill] sm:$0xff]  ;;  %v15152_v12 = vld [vmem:[#allocation30_spill] sm:$0xff]  ;;  %v15153_v14 = vld [vmem:[#allocation31_spill] sm:$0xff] }
 0x29e   :  { %v2776_v9 = vadd.f32 %v2744_v34, %v15144_v42  ;;  %v2777_v58 = vadd.f32 %v2745_v45, %v15145_v15  ;;  %v2778_v51 = vadd.f32 %v2746_v43, %v15146_v39  ;;  %v2779_v37 = vadd.f32 %v2747_v50, %v15147_v61  ;;  %v15154_v45 = vld [vmem:[#allocation32_spill] sm:$0xff]  ;;  %v15155_v50 = vld [vmem:[#allocation38_spill] sm:$0xff] }
 0x29f   :  { %v2780_v35 = vadd.f32 %v2748_v56, %v15148_v0  ;;  %v2781_v25 = vadd.f32 %v2749_v18, %v15149_v44  ;;  %v10229_v26 = vadd.f32 %v2750_v48, %v15150_v31  ;;  %v10232_v28 = vadd.f32 %v2751_v22, %v15151_v19  ;;  %v15156_v56 = vld [vmem:[#allocation39_spill] sm:$0xff]  ;;  %v15157_v48 = vld [vmem:[#allocation40_spill] sm:$0xff]  ;;  %v15158_v22 = vld [vmem:[#allocation46_spill] sm:$0xff] }
 0x2a0   :  { %v10235_v55 = vadd.f32 %v2752_v62, %v15152_v12  ;;  %v10238_v34 = vadd.f32 %v2753_v6, %v15153_v14  ;;  %v10241_v43 = vadd.f32 %v2754_v21, %v15154_v45  ;;  %v10244_v53 = vadd.f32 %v2755_v1, %v15155_v50  ;;  %v15159_v62 = vld [vmem:[#allocation47_spill] sm:$0xff]  ;;  %v15160_v6 = vld [vmem:[#allocation48_spill] sm:$0xff] }
 0x2a1   :  { %v10247_v18 = vadd.f32 %v2756_v60, %v15156_v56  ;;  %v10250_v3 = vadd.f32 %v2757_v24, %v15157_v48  ;;  %v10253_v42 = vadd.f32 %v2758_v29, %v15158_v22  ;;  %v10256_v15 = vadd.f32 %v2759_v40, %v15159_v62  ;;  %v15161_v21 = vld [vmem:[#allocation96_spill] sm:$0xff]  ;;  %v15162_v1 = vld [vmem:[#allocation139_spill] sm:$0xff]  ;;  %v15163_v60 = vld [vmem:[#allocation97_spill] sm:$0xff] }
 0x2a2   :  { %v10259_v39 = vadd.f32 %v2760_v16, %v15160_v6  ;;  %v10262_v61 = vadd.f32 %v2761_v23, %v15161_v21  ;;  %v10265_v0 = vadd.f32 %v2762_v30, %v15162_v1  ;;  %v10268_v44 = vadd.f32 %v2763_v57, %v15163_v60  ;;  %v15164_v24 = vld [vmem:[#allocation103_spill] sm:$0xff]  ;;  %v15165_v29 = vld [vmem:[#allocation140_spill] sm:$0xff]  ;;  %v15167_v16 = vld [vmem:[#allocation106_spill] sm:$0xff] }
 0x2a3   :  { %v10271_v31 = vadd.f32 %v2764_v47, %v15164_v24  ;;  %v10274_v19 = vadd.f32 %v2765_v46, %v15165_v29  ;;  %v15166_v40 = vld [vmem:[#allocation104_spill] sm:$0xff]  ;;  %v10280_v14 = vadd.f32 %v2767_v49, %v15167_v16  ;;  %v15168_v23 = vld [vmem:[#allocation54_spill] sm:$0xff]  ;;  %v15173_v47 = vld [vmem:[#allocation59_spill] sm:$0xff]  ;;  %v10328_v60 = vadd.f32 %v10104_v11, %v2781_v25 }
 0x2a4   :  { %v10277_v12 = vadd.f32 %v2766_v52, %v15166_v40  ;;  %v10283_v45 = vadd.f32 %v2768_v7, %v15168_v23  ;;  %v15169_v30 = vld [vmem:[#allocation56_spill] sm:$0xff]  ;;  %v15171_v57 = vld [vmem:[#allocation58_spill] sm:$0xff]  ;;  %v10292_v48 = vadd.f32 %v2771_v4, %v15173_v47  ;;  %v15175_v46 = vld [vmem:[#allocation61_spill] sm:$0xff]  ;;  %v10313_v4 = vadd.f32 %v10092_v5, %v2776_v9 }
 0x2a5   :  { %v10286_v50 = vadd.f32 %v2769_v41, %v15169_v30  ;;  %v10289_v56 = vadd.f32 %v2770_v8, %v15171_v57  ;;  %v10295_v22 = vadd.f32 %v2772_v63, %v15175_v46  ;;  %v15177_v52 = vld [vmem:[#allocation63_spill] sm:$0xff]  ;;  %v15179_v49 = vld [vmem:[#allocation64_spill] sm:$0xff]  ;;  %v15181_v7 = vld [vmem:[#allocation65_spill] sm:$0xff]  ;;  %v10316_v63 = vadd.f32 %v10094_v36, %v2777_v58  ;;  %15191 = vst [vmem:[#allocation154_spill] sm:$0xff] %v10328_v60 }
 0x2a6   :  { %15174 = vst [vmem:[#allocation132_spill] sm:$0xff] %v10292_v48  ;;  %v10298_v62 = vadd.f32 %v2773_v13, %v15177_v52  ;;  %v10301_v6 = vadd.f32 %v2774_v2, %v15179_v49  ;;  %v10304_v21 = vadd.f32 %v2775_v59, %v15181_v7  ;;  %v15183_v41 = vld [vmem:[#allocation51_spill] sm:$0xff]  ;;  %15186 = vst [vmem:[#allocation148_spill] sm:$0xff] %v10313_v4  ;;  %v15194_v11 = vld [vmem:[#allocation109_spill] sm:$0xff] }
 0x2a7   :  { %15170 = vst [vmem:[#allocation130_spill] sm:$0xff] %v10286_v50  ;;  %15172 = vst [vmem:[#allocation131_spill] sm:$0xff] %v10289_v56  ;;  %v10307_v1 = vsub.s32 4, %v15183_v41  ;;  %v10310_v8 = vsub.s32 3, %v15183_v41  ;;  %v10319_v13 = vadd.f32 %v10096_v20, %v2778_v51  ;;  %v10322_v2 = vadd.f32 %v10098_v10, %v2779_v37  ;;  %v15192_v10 = vld [vmem:[#allocation107_spill] sm:$0xff]  ;;  %v15195_v37 = vld [vmem:[#allocation110_spill] sm:$0xff] }
 0x2a8   :  { %15176 = vst [vmem:[#allocation134_spill] sm:$0xff] %v10295_v22  ;;  %15178 = vst [vmem:[#allocation135_spill] sm:$0xff] %v10298_v62  ;;  %v10325_v59 = vadd.f32 %v10102_v38, %v2780_v35  ;;  %v15193_v38 = vld [vmem:[#allocation108_spill] sm:$0xff]  ;;  %v15196_v25 = vld [vmem:[#allocation113_spill] sm:$0xff] }
 0x2a9   :  { %15180 = vst [vmem:[#allocation136_spill] sm:$0xff] %v10301_v6  ;;  %15182 = vst [vmem:[#allocation138_spill] sm:$0xff] %v10304_v21  ;;  %v3205_v24 = vrot.slane %v15065_v32, %v10307_v1  ;;  %v3209_v5 = vrot.slane %v15066_v17, %v10307_v1  ;;  %v3213_v36 = vrot.slane %v15067_v54, %v10307_v1  ;;  %v15197_v40 = vld [vmem:[#allocation117_spill] sm:$0xff]  ;;  %v15205_v4 = vld [vmem:[#allocation155_spill] sm:$0xff] }
 0x2aa   :  { %15184 = vst [vmem:[#allocation145_spill] sm:$0xff] %v10307_v1  ;;  %15185 = vst [vmem:[#allocation146_spill] sm:$0xff] %v10310_v8  ;;  %v3217_v20 = vrot.slane %v15068_v27, %v10307_v1  ;;  %v3221_v9 = vrot.slane %v15192_v10, %v10307_v1  ;;  %v3225_v58 = vrot.slane %v15193_v38, %v10307_v1  ;;  %v15198_v23 = vld [vmem:[#allocation121_spill] sm:$0xff] }
 0x2ab   :  { %15187 = vst [vmem:[#allocation149_spill] sm:$0xff] %v10316_v63  ;;  %15188 = vst [vmem:[#allocation150_spill] sm:$0xff] %v10319_v13  ;;  %v3229_v51 = vrot.slane %v15194_v11, %v10307_v1  ;;  %v3233_v35 = vrot.slane %v15195_v37, %v10307_v1  ;;  %v3237_v29 = vrot.slane %v15196_v25, %v10307_v1  ;;  %v15199_v57 = vld [vmem:[#allocation125_spill] sm:$0xff]  ;;  %v15204_v13 = vld [vmem:[#allocation151_spill] sm:$0xff]  ;;  %v3333_v37 = vpop.permute.xlu1 %3332 }
 0x2ac   :  { %15189 = vst [vmem:[#allocation152_spill] sm:$0xff] %v10322_v2  ;;  %15190 = vst [vmem:[#allocation153_spill] sm:$0xff] %v10325_v59  ;;  %v3241_v16 = vrot.slane %v15197_v40, %v10307_v1  ;;  %v3245_v30 = vrot.slane %v15198_v23, %v10307_v1  ;;  %v3249_v47 = vrot.slane %v15199_v57, %v10307_v1  ;;  %v15200_v46 = vld [vmem:[#allocation129_spill] sm:$0xff]  ;;  %v15203_v59 = vld [vmem:[#allocation147_spill] sm:$0xff] }
 0x2ad   :  { %v3253_v52 = vrot.slane %v15200_v46, %v10307_v1  ;;  %v15201_v49 = vld [vmem:[#allocation133_spill] sm:$0xff]  ;;  %v3265_v2 = vrot.slane %v15203_v59, %v10307_v1  ;;  %v3269_v63 = vrot.slane %v15204_v13, %v10307_v1  ;;  %v3273_v23 = vrot.slane %v15205_v4, %v10307_v1  ;;  %v15206_v57 = vld [vmem:[#allocation159_spill] sm:$0xff]  ;;  %v15210_v59 = vld [vmem:[#allocation84_spill] sm:$0xff] }
 0x2ae   :  { %v3257_v7 = vrot.slane %v15201_v49, %v10307_v1  ;;  %v15202_v41 = vld [vmem:[#allocation137_spill] sm:$0xff]  ;;  %v3277_v40 = vrot.slane %v15206_v57, %v10307_v1  ;;  %v15207_v46 = vld [vmem:[#allocation163_spill] sm:$0xff]  ;;  %v3293_v10 = vrot.slane %v15210_v59, %v10307_v1  ;;  %v15211_v13 = vld [vmem:[#allocation22_spill] sm:$0xff]  ;;  %v10394_v22 = vmul.f32 %v3333_v37, %v3205_v24 }
 0x2af   :  { %v3261_v60 = vrot.slane %v15202_v41, %v10307_v1  ;;  %v3281_v25 = vrot.slane %v15207_v46, %v10307_v1  ;;  %v15208_v49 = vld [vmem:[#allocation93_spill] sm:$0xff]  ;;  %v15209_v41 = vld [vmem:[#allocation79_spill] sm:$0xff]  ;;  %v3297_v27 = vrot.slane %v15211_v13, %v10307_v1  ;;  %v15214_v46 = vld [vmem:[#allocation34_spill] sm:$0xff]  ;;  %v10400_v48 = vmul.f32 %v3333_v37, %v3217_v20 }
 0x2b0   :  { %v3285_v11 = vrot.slane %v15208_v49, %v10307_v1  ;;  %v3289_v38 = vrot.slane %v15209_v41, %v10307_v1  ;;  %v15212_v4 = vld [vmem:[#allocation23_spill] sm:$0xff]  ;;  %v15213_v57 = vld [vmem:[#allocation85_spill] sm:$0xff]  ;;  %v3309_v32 = vrot.slane %v15214_v46, %v10307_v1  ;;  %v15215_v49 = vld [vmem:[#allocation36_spill] sm:$0xff]  ;;  %15219 = vst [vmem:[#allocation156_spill] sm:$0xff] %v10394_v22  ;;  %v10398_v46 = vmul.f32 %v3333_v37, %v3213_v36 }
 0x2b1   :  { %v3301_v54 = vrot.slane %v15212_v4, %v10307_v1  ;;  %v3305_v17 = vrot.slane %v15213_v57, %v10307_v1  ;;  %v3313_v8 = vrot.slane %v15215_v49, %v10307_v1  ;;  %v15216_v41 = vld [vmem:[#allocation25_spill] sm:$0xff]  ;;  %v15217_v59 = vld [vmem:[#allocation27_spill] sm:$0xff]  ;;  %v15218_v13 = vld [vmem:[#allocation28_spill] sm:$0xff]  ;;  %v3329_v4 = vrot.slane %v15102_v33, %v10307_v1  ;;  %15222 = vst [vmem:[#allocation160_spill] sm:$0xff] %v10400_v48 }
 0x2b2   :  { %v3317_v21 = vrot.slane %v15216_v41, %v10307_v1  ;;  %v3321_v6 = vrot.slane %v15217_v59, %v10307_v1  ;;  %v3325_v62 = vrot.slane %v15218_v13, %v10307_v1  ;;  %v10396_v57 = vmul.f32 %v3333_v37, %v3209_v5  ;;  %15221 = vst [vmem:[#allocation158_spill] sm:$0xff] %v10398_v46  ;;  %v15280_v1 = vld [vmem:[#allocation120_spill] sm:$0xff] }
 0x2b3   :  { %v10402_v49 = vmul.f32 %v3333_v37, %v3221_v9  ;;  %v10404_v41 = vmul.f32 %v3333_v37, %v3225_v58  ;;  %v10406_v56 = vmul.f32 %v3333_v37, %v3229_v51  ;;  %v10408_v59 = vmul.f32 %v3333_v37, %v3233_v35 }
 0x2b4   :  { %15220 = vst [vmem:[#allocation157_spill] sm:$0xff] %v10396_v57  ;;  %v10410_v13 = vmul.f32 %v3333_v37, %v3237_v29  ;;  %v10412_v50 = vmul.f32 %v3333_v37, %v3241_v16  ;;  %v10414_v24 = vmul.f32 %v3333_v37, %v3245_v30  ;;  %v10416_v5 = vmul.f32 %v3333_v37, %v3249_v47 }
 0x2b5   :  { %15223 = vst [vmem:[#allocation161_spill] sm:$0xff] %v10402_v49  ;;  %15224 = vst [vmem:[#allocation162_spill] sm:$0xff] %v10404_v41  ;;  %v10418_v36 = vmul.f32 %v3333_v37, %v3253_v52  ;;  %v10420_v20 = vmul.f32 %v3333_v37, %v3257_v7  ;;  %v10422_v9 = vmul.f32 %v3333_v37, %v3261_v60  ;;  %v15316_v41 = vld [vmem:[#allocation147_spill] sm:$0xff] }
 0x2b6   :  { %15225 = vst [vmem:[#allocation164_spill] sm:$0xff] %v10406_v56  ;;  %15226 = vst [vmem:[#allocation165_spill] sm:$0xff] %v10408_v59  ;;  %v10424_v58 = vmul.f32 %v3333_v37, %v3265_v2  ;;  %v10426_v51 = vmul.f32 %v3333_v37, %v3269_v63  ;;  %v10428_v35 = vmul.f32 %v3333_v37, %v3273_v23  ;;  %v15315_v59 = vld [vmem:[#allocation137_spill] sm:$0xff] }
 0x2b7   :  { %15227 = vst [vmem:[#allocation89_spill] sm:$0xff] %v10410_v13  ;;  %15228 = vst [vmem:[#allocation70_spill] sm:$0xff] %v10412_v50  ;;  %v10430_v29 = vmul.f32 %v3333_v37, %v3277_v40  ;;  %v10432_v16 = vmul.f32 %v3333_v37, %v3281_v25  ;;  %v10434_v30 = vmul.f32 %v3333_v37, %v3285_v11  ;;  %v15314_v50 = vld [vmem:[#allocation133_spill] sm:$0xff] }
 0x2b8   :  { %15229 = vst [vmem:[#allocation73_spill] sm:$0xff] %v10414_v24  ;;  %15230 = vst [vmem:[#allocation78_spill] sm:$0xff] %v10416_v5  ;;  %v10436_v47 = vmul.f32 %v3333_v37, %v3289_v38  ;;  %v10438_v52 = vmul.f32 %v3333_v37, %v3293_v10  ;;  %v10440_v7 = vmul.f32 %v3333_v37, %v3297_v27  ;;  %v15251_v10 = vld [vmem:[#allocation101_spill] sm:$0xff] }
 0x2b9   :  { %15231 = vst [vmem:[#allocation80_spill] sm:$0xff] %v10418_v36  ;;  %15232 = vst [vmem:[#allocation81_spill] sm:$0xff] %v10420_v20  ;;  %v10442_v60 = vmul.f32 %v3333_v37, %v3301_v54  ;;  %v10444_v2 = vmul.f32 %v3333_v37, %v3305_v17  ;;  %v10446_v63 = vmul.f32 %v3333_v37, %v3309_v32  ;;  %v15252_v54 = vld [vmem:[#allocation102_spill] sm:$0xff]  ;;  %v15253_v32 = vld [vmem:[#allocation44_spill] sm:$0xff] }
 0x2ba   :  { %15233 = vst [vmem:[#allocation83_spill] sm:$0xff] %v10422_v9  ;;  %15234 = vst [vmem:[#allocation35_spill] sm:$0xff] %v10424_v58  ;;  %v10448_v23 = vmul.f32 %v3333_v37, %v3313_v8  ;;  %v10450_v40 = vmul.f32 %v3333_v37, %v3317_v21  ;;  %v10452_v25 = vmul.f32 %v3333_v37, %v3321_v6  ;;  %v15254_v21 = vld [vmem:[#allocation68_spill] sm:$0xff]  ;;  %v15311_v58 = vld [vmem:[#allocation121_spill] sm:$0xff] }
 0x2bb   :  { %15235 = vst [vmem:[#allocation17_spill] sm:$0xff] %v10426_v51  ;;  %15236 = vst [vmem:[#allocation19_spill] sm:$0xff] %v10428_v35  ;;  %v10454_v11 = vmul.f32 %v3333_v37, %v3325_v62  ;;  %v10456_v38 = vmul.f32 %v3333_v37, %v3329_v4  ;;  %v10460_v27 = vadd.f32 %v15251_v10, %v10229_v26  ;;  %v15255_v62 = vld [vmem:[#allocation60_spill] sm:$0xff]  ;;  %v15256_v37 = vld [vmem:[#allocation43_spill] sm:$0xff] }
 0x2bc   :  { %15237 = vst [vmem:[#allocation9_spill] sm:$0xff] %v10430_v29  ;;  %15238 = vst [vmem:[#allocation10_spill] sm:$0xff] %v10432_v16  ;;  %v10464_v17 = vadd.f32 %v15252_v54, %v10232_v28  ;;  %v10468_v8 = vadd.f32 %v15253_v32, %v10235_v55  ;;  %v10472_v6 = vadd.f32 %v15254_v21, %v10238_v34  ;;  %v15257_v10 = vld [vmem:[#allocation69_spill] sm:$0xff]  ;;  %v15258_v54 = vld [vmem:[#allocation71_spill] sm:$0xff] }
 0x2bd   :  { %15239 = vst [vmem:[#allocation13_spill] sm:$0xff] %v10434_v30  ;;  %15240 = vst [vmem:[#allocation41_spill] sm:$0xff] %v10436_v47  ;;  %v10476_v4 = vadd.f32 %v15255_v62, %v10241_v43  ;;  %v10480_v26 = vadd.f32 %v15256_v37, %v10244_v53  ;;  %v10484_v28 = vadd.f32 %v15257_v10, %v10247_v18  ;;  %v15259_v32 = vld [vmem:[#allocation72_spill] sm:$0xff]  ;;  %v15260_v21 = vld [vmem:[#allocation74_spill] sm:$0xff] }
 0x2be   :  { %15241 = vst [vmem:[#allocation42_spill] sm:$0xff] %v10438_v52  ;;  %15242 = vst [vmem:[#allocation67_spill] sm:$0xff] %v10440_v7  ;;  %v10488_v55 = vadd.f32 %v15258_v54, %v10250_v3  ;;  %v10492_v34 = vadd.f32 %v15259_v32, %v10253_v42  ;;  %v10496_v43 = vadd.f32 %v15260_v21, %v10256_v15  ;;  %v15261_v62 = vld [vmem:[#allocation75_spill] sm:$0xff]  ;;  %v15263_v37 = vld [vmem:[#allocation77_spill] sm:$0xff] }
 0x2bf   :  { %15243 = vst [vmem:[#allocation76_spill] sm:$0xff] %v10442_v60  ;;  %15244 = vst [vmem:[#allocation24_spill] sm:$0xff] %v10444_v2  ;;  %v10500_v53 = vadd.f32 %v15261_v62, %v10259_v39  ;;  %v10504_v18 = vadd.f32 %v15263_v37, %v10262_v61  ;;  %v15265_v10 = vld [vmem:[#allocation111_spill] sm:$0xff]  ;;  %v15267_v54 = vld [vmem:[#allocation112_spill] sm:$0xff] }
 0x2c0   :  { %15245 = vst [vmem:[#allocation30_spill] sm:$0xff] %v10446_v63  ;;  %15246 = vst [vmem:[#allocation31_spill] sm:$0xff] %v10448_v23  ;;  %v10508_v3 = vadd.f32 %v15265_v10, %v10265_v0  ;;  %v10512_v42 = vadd.f32 %v15267_v54, %v10268_v44  ;;  %v15269_v32 = vld [vmem:[#allocation114_spill] sm:$0xff]  ;;  %v15271_v21 = vld [vmem:[#allocation115_spill] sm:$0xff] }
 0x2c1   :  { %15247 = vst [vmem:[#allocation32_spill] sm:$0xff] %v10450_v40  ;;  %15248 = vst [vmem:[#allocation38_spill] sm:$0xff] %v10452_v25  ;;  %v10516_v15 = vadd.f32 %v15269_v32, %v10271_v31  ;;  %v10520_v39 = vadd.f32 %v15271_v21, %v10274_v19  ;;  %v15273_v62 = vld [vmem:[#allocation116_spill] sm:$0xff]  ;;  %v15275_v37 = vld [vmem:[#allocation118_spill] sm:$0xff] }
 0x2c2   :  { %15249 = vst [vmem:[#allocation39_spill] sm:$0xff] %v10454_v11  ;;  %15250 = vst [vmem:[#allocation40_spill] sm:$0xff] %v10456_v38  ;;  %v10524_v61 = vadd.f32 %v15273_v62, %v10277_v12  ;;  %v10528_v0 = vadd.f32 %v15275_v37, %v10280_v14  ;;  %v15277_v10 = vld [vmem:[#allocation119_spill] sm:$0xff]  ;;  %v15279_v54 = vld [vmem:[#allocation130_spill] sm:$0xff] }
 0x2c3   :  { %15262 = vst [vmem:[#allocation46_spill] sm:$0xff] %v10500_v53  ;;  %15264 = vst [vmem:[#allocation47_spill] sm:$0xff] %v10504_v18  ;;  %v10532_v44 = vadd.f32 %v15277_v10, %v10283_v45  ;;  %v10536_v31 = vadd.f32 %v15280_v1, %v15279_v54  ;;  %v15282_v32 = vld [vmem:[#allocation131_spill] sm:$0xff]  ;;  %v15283_v38 = vld [vmem:[#allocation122_spill] sm:$0xff] }
 0x2c4   :  { %15266 = vst [vmem:[#allocation48_spill] sm:$0xff] %v10508_v3  ;;  %15268 = vst [vmem:[#allocation96_spill] sm:$0xff] %v10512_v42  ;;  %v10540_v19 = vadd.f32 %v15283_v38, %v15282_v32  ;;  %v15285_v21 = vld [vmem:[#allocation132_spill] sm:$0xff]  ;;  %v15286_v11 = vld [vmem:[#allocation123_spill] sm:$0xff] }
 0x2c5   :  { %15270 = vst [vmem:[#allocation139_spill] sm:$0xff] %v10516_v15  ;;  %15272 = vst [vmem:[#allocation97_spill] sm:$0xff] %v10520_v39  ;;  %v10544_v12 = vadd.f32 %v15286_v11, %v15285_v21  ;;  %v15288_v62 = vld [vmem:[#allocation134_spill] sm:$0xff]  ;;  %v15289_v25 = vld [vmem:[#allocation124_spill] sm:$0xff] }
 0x2c6   :  { %15274 = vst [vmem:[#allocation103_spill] sm:$0xff] %v10524_v61  ;;  %15276 = vst [vmem:[#allocation140_spill] sm:$0xff] %v10528_v0  ;;  %v10548_v14 = vadd.f32 %v15289_v25, %v15288_v62  ;;  %v15291_v37 = vld [vmem:[#allocation135_spill] sm:$0xff]  ;;  %v15292_v40 = vld [vmem:[#allocation126_spill] sm:$0xff] }
 0x2c7   :  { %15278 = vst [vmem:[#allocation104_spill] sm:$0xff] %v10532_v44  ;;  %15281 = vst [vmem:[#allocation106_spill] sm:$0xff] %v10536_v31  ;;  %v10552_v45 = vadd.f32 %v15292_v40, %v15291_v37  ;;  %v15294_v10 = vld [vmem:[#allocation136_spill] sm:$0xff]  ;;  %v15295_v23 = vld [vmem:[#allocation127_spill] sm:$0xff] }
 0x2c8   :  { %15284 = vst [vmem:[#allocation54_spill] sm:$0xff] %v10540_v19  ;;  %15287 = vst [vmem:[#allocation56_spill] sm:$0xff] %v10544_v12  ;;  %v10556_v1 = vadd.f32 %v15295_v23, %v15294_v10  ;;  %v15297_v54 = vld [vmem:[#allocation138_spill] sm:$0xff]  ;;  %v15298_v63 = vld [vmem:[#allocation128_spill] sm:$0xff] }
 0x2c9   :  { %15290 = vst [vmem:[#allocation58_spill] sm:$0xff] %v10548_v14  ;;  %15293 = vst [vmem:[#allocation59_spill] sm:$0xff] %v10552_v45  ;;  %v10560_v38 = vadd.f32 %v15298_v63, %v15297_v54  ;;  %v15300_v32 = vld [vmem:[#allocation146_spill] sm:$0xff]  ;;  %v15301_v2 = vld [vmem:[#allocation141_spill] sm:$0xff] }
 0x2ca   :  { %15296 = vst [vmem:[#allocation61_spill] sm:$0xff] %v10556_v1  ;;  %v3008_v11 = vrot.slane %v15301_v2, %v15300_v32  ;;  %v15302_v21 = vld [vmem:[#allocation142_spill] sm:$0xff]  ;;  %v15303_v25 = vld [vmem:[#allocation143_spill] sm:$0xff]  ;;  %v15304_v40 = vld [vmem:[#allocation144_spill] sm:$0xff]  ;;  %v3048_v9 = vrot.slane %v15311_v58, %v15300_v32  ;;  %v3060_v13 = vrot.slane %v15314_v50, %v15300_v32  ;;  %v3064_v56 = vrot.slane %v15315_v59, %v15300_v32 }
 0x2cb   :  { %15299 = vst [vmem:[#allocation63_spill] sm:$0xff] %v10560_v38  ;;  %v3012_v60 = vrot.slane %v15302_v21, %v15300_v32  ;;  %v3016_v62 = vrot.slane %v15303_v25, %v15300_v32  ;;  %v3020_v37 = vrot.slane %v15304_v40, %v15300_v32  ;;  %v15305_v7 = vld [vmem:[#allocation107_spill] sm:$0xff]  ;;  %v15306_v10 = vld [vmem:[#allocation108_spill] sm:$0xff]  ;;  %v15307_v63 = vld [vmem:[#allocation109_spill] sm:$0xff]  ;;  %v3068_v49 = vrot.slane %v15316_v41, %v15300_v32 }
 0x2cc   :  { %v3024_v23 = vrot.slane %v15305_v7, %v15300_v32  ;;  %v3028_v52 = vrot.slane %v15306_v10, %v15300_v32  ;;  %v3032_v54 = vrot.slane %v15307_v63, %v15300_v32  ;;  %v15308_v47 = vld [vmem:[#allocation110_spill] sm:$0xff]  ;;  %v15309_v16 = vld [vmem:[#allocation113_spill] sm:$0xff]  ;;  %v15318_v58 = vld [vmem:[#allocation155_spill] sm:$0xff]  ;;  %v3136_v63 = vpop.permute.xlu0 %3135 }
 0x2cd   :  { %v3036_v30 = vrot.slane %v15308_v47, %v15300_v32  ;;  %v3040_v29 = vrot.slane %v15309_v16, %v15300_v32  ;;  %v15310_v35 = vld [vmem:[#allocation117_spill] sm:$0xff]  ;;  %v3076_v47 = vrot.slane %v15318_v58, %v15300_v32  ;;  %v15322_v59 = vld [vmem:[#allocation79_spill] sm:$0xff]  ;;  %v15323_v41 = vld [vmem:[#allocation84_spill] sm:$0xff]  ;;  %v3138_v14 = vmul.f32 %v3136_v63, %v3008_v11 }
 0x2ce   :  { %v3044_v51 = vrot.slane %v15310_v35, %v15300_v32  ;;  %v15312_v20 = vld [vmem:[#allocation125_spill] sm:$0xff]  ;;  %v15317_v35 = vld [vmem:[#allocation151_spill] sm:$0xff]  ;;  %v3092_v25 = vrot.slane %v15322_v59, %v15300_v32  ;;  %v3096_v21 = vrot.slane %v15323_v41, %v15300_v32  ;;  %v3140_v12 = vmul.f32 %v3136_v63, %v3016_v62 }
 0x2cf   :  { %v3052_v36 = vrot.slane %v15312_v20, %v15300_v32  ;;  %v15313_v5 = vld [vmem:[#allocation129_spill] sm:$0xff]  ;;  %v3072_v16 = vrot.slane %v15317_v35, %v15300_v32  ;;  %v15319_v20 = vld [vmem:[#allocation159_spill] sm:$0xff]  ;;  %v15324_v35 = vld [vmem:[#allocation22_spill] sm:$0xff]  ;;  %v3141_v19 = vmul.f32 %v3136_v63, %v3020_v37  ;;  %v3143_v31 = vmul.f32 %v3136_v63, %v3028_v52 }
 0x2d0   :  { %v3056_v24 = vrot.slane %v15313_v5, %v15300_v32  ;;  %v3080_v10 = vrot.slane %v15319_v20, %v15300_v32  ;;  %v15320_v5 = vld [vmem:[#allocation163_spill] sm:$0xff]  ;;  %v15321_v50 = vld [vmem:[#allocation93_spill] sm:$0xff]  ;;  %v3100_v2 = vrot.slane %v15324_v35, %v15300_v32  ;;  %v15331_v35 = vld [vmem:[#allocation28_spill] sm:$0xff]  ;;  %v3144_v44 = vmul.f32 %v3136_v63, %v3032_v54 }
 0x2d1   :  { %v3084_v7 = vrot.slane %v15320_v5, %v15300_v32  ;;  %v3088_v40 = vrot.slane %v15321_v50, %v15300_v32  ;;  %v15325_v58 = vld [vmem:[#allocation23_spill] sm:$0xff]  ;;  %v15326_v20 = vld [vmem:[#allocation85_spill] sm:$0xff]  ;;  %v15327_v5 = vld [vmem:[#allocation34_spill] sm:$0xff]  ;;  %v3128_v45 = vrot.slane %v15331_v35, %v15300_v32  ;;  %v3146_v0 = vmul.f32 %v3136_v63, %v3040_v29 }
 0x2d2   :  { %v3104_v48 = vrot.slane %v15325_v58, %v15300_v32  ;;  %v3108_v46 = vrot.slane %v15326_v20, %v15300_v32  ;;  %v3112_v57 = vrot.slane %v15327_v5, %v15300_v32  ;;  %v15328_v50 = vld [vmem:[#allocation36_spill] sm:$0xff]  ;;  %v15329_v59 = vld [vmem:[#allocation25_spill] sm:$0xff]  ;;  %v15330_v41 = vld [vmem:[#allocation27_spill] sm:$0xff]  ;;  %v3132_v58 = vrot.slane %v15102_v33, %v15300_v32 }
 0x2d3   :  { %v3116_v22 = vrot.slane %v15328_v50, %v15300_v32  ;;  %v3120_v38 = vrot.slane %v15329_v59, %v15300_v32  ;;  %v3124_v1 = vrot.slane %v15330_v41, %v15300_v32  ;;  %v3139_v20 = vmul.f32 %v3136_v63, %v3012_v60 }
 0x2d4   :  { %v3142_v5 = vmul.f32 %v3136_v63, %v3024_v23  ;;  %v3145_v50 = vmul.f32 %v3136_v63, %v3036_v30  ;;  %v3147_v61 = vmul.f32 %v3136_v63, %v3044_v51  ;;  %v3148_v59 = vmul.f32 %v3136_v63, %v3048_v9 }
 0x2d5   :  { %v3149_v39 = vmul.f32 %v3136_v63, %v3052_v36  ;;  %v3150_v15 = vmul.f32 %v3136_v63, %v3056_v24  ;;  %v3151_v41 = vmul.f32 %v3136_v63, %v3060_v13  ;;  %v3152_v42 = vmul.f32 %v3136_v63, %v3064_v56  ;;  %v15332_v24 = vld [vmem:[#allocation148_spill] sm:$0xff]  ;;  %v15333_v56 = vld [vmem:[#allocation149_spill] sm:$0xff] }
 0x2d6   :  { %v3153_v3 = vmul.f32 %v3136_v63, %v3068_v49  ;;  %v3154_v35 = vmul.f32 %v3136_v63, %v3072_v16  ;;  %v3155_v18 = vmul.f32 %v3136_v63, %v3076_v47  ;;  %v3156_v53 = vmul.f32 %v3136_v63, %v3080_v10  ;;  %v15334_v16 = vld [vmem:[#allocation150_spill] sm:$0xff]  ;;  %v15335_v10 = vld [vmem:[#allocation152_spill] sm:$0xff] }
 0x2d7   :  { %v3157_v32 = vmul.f32 %v3136_v63, %v3084_v7  ;;  %v3158_v11 = vmul.f32 %v3136_v63, %v3088_v40  ;;  %v3159_v60 = vmul.f32 %v3136_v63, %v3092_v25  ;;  %v3160_v62 = vmul.f32 %v3136_v63, %v3096_v21  ;;  %v15336_v40 = vld [vmem:[#allocation153_spill] sm:$0xff] }
 0x2d8   :  { %v3161_v37 = vmul.f32 %v3136_v63, %v3100_v2  ;;  %v3162_v23 = vmul.f32 %v3136_v63, %v3104_v48  ;;  %v3163_v52 = vmul.f32 %v3136_v63, %v3108_v46  ;;  %v3164_v54 = vmul.f32 %v3136_v63, %v3112_v57  ;;  %v15337_v2 = vld [vmem:[#allocation154_spill] sm:$0xff] }
 0x2d9   :  { %v3165_v30 = vmul.f32 %v3136_v63, %v3116_v22  ;;  %v3166_v29 = vmul.f32 %v3136_v63, %v3120_v38  ;;  %v3167_v51 = vmul.f32 %v3136_v63, %v3124_v1  ;;  %v3168_v9 = vmul.f32 %v3136_v63, %v3128_v45  ;;  %v15355_v1 = vld [vmem:[#allocation58_spill] sm:$0xff] }
 0x2da   :  { %v3169_v36 = vmul.f32 %v3136_v63, %v3132_v58  ;;  %v3170_v13 = vadd.f32 %v3138_v14, %v15332_v24  ;;  %v3171_v49 = vadd.f32 %v3139_v20, %v15333_v56  ;;  %v3172_v47 = vadd.f32 %v3140_v12, %v15334_v16  ;;  %v15353_v14 = vld [vmem:[#allocation56_spill] sm:$0xff]  ;;  %v15359_v63 = vld [vmem:[#allocation61_spill] sm:$0xff] }
 0x2db   :  { %v3173_v7 = vadd.f32 %v3141_v19, %v15335_v10  ;;  %v10631_v25 = vadd.f32 %v3142_v5, %v15336_v40  ;;  %v10634_v48 = vadd.f32 %v3143_v31, %v15337_v2  ;;  %v10637_v22 = vadd.f32 %v3144_v44, %v10460_v27  ;;  %v15351_v19 = vld [vmem:[#allocation54_spill] sm:$0xff] }
 0x2dc   :  { %v10640_v57 = vadd.f32 %v3145_v50, %v10464_v17  ;;  %v10643_v46 = vadd.f32 %v3146_v0, %v10468_v8  ;;  %v10646_v20 = vadd.f32 %v3147_v61, %v10472_v6  ;;  %v10649_v58 = vadd.f32 %v3148_v59, %v10476_v4  ;;  %v15338_v8 = vld [vmem:[#allocation46_spill] sm:$0xff]  ;;  %v15339_v59 = vld [vmem:[#allocation47_spill] sm:$0xff] }
 0x2dd   :  { %v10652_v5 = vadd.f32 %v3149_v39, %v10480_v26  ;;  %v10655_v31 = vadd.f32 %v3150_v15, %v10484_v28  ;;  %v10658_v27 = vadd.f32 %v3151_v41, %v10488_v55  ;;  %v10661_v50 = vadd.f32 %v3152_v42, %v10492_v34  ;;  %v15340_v26 = vld [vmem:[#allocation48_spill] sm:$0xff]  ;;  %v15342_v41 = vld [vmem:[#allocation139_spill] sm:$0xff]  ;;  %v15343_v34 = vld [vmem:[#allocation97_spill] sm:$0xff] }
 0x2de   :  { %v10664_v17 = vadd.f32 %v3153_v3, %v10496_v43  ;;  %v10667_v6 = vadd.f32 %v3154_v35, %v15338_v8  ;;  %v10670_v4 = vadd.f32 %v3155_v18, %v15339_v59  ;;  %v10673_v39 = vadd.f32 %v3156_v53, %v15340_v26  ;;  %v15341_v28 = vld [vmem:[#allocation96_spill] sm:$0xff]  ;;  %v15344_v43 = vld [vmem:[#allocation103_spill] sm:$0xff]  ;;  %v15349_v53 = vld [vmem:[#allocation106_spill] sm:$0xff] }
 0x2df   :  { %v10676_v15 = vadd.f32 %v3157_v32, %v15341_v28  ;;  %v10679_v55 = vadd.f32 %v3158_v11, %v15342_v41  ;;  %v10682_v42 = vadd.f32 %v3159_v60, %v15343_v34  ;;  %v10685_v3 = vadd.f32 %v3160_v62, %v15344_v43  ;;  %v15345_v35 = vld [vmem:[#allocation140_spill] sm:$0xff]  ;;  %v15357_v32 = vld [vmem:[#allocation59_spill] sm:$0xff]  ;;  %v15375_v40 = vld [vmem:[#allocation142_spill] sm:$0xff] }
 0x2e0   :  { %v10688_v61 = vadd.f32 %v3161_v37, %v15345_v35  ;;  %v15347_v18 = vld [vmem:[#allocation104_spill] sm:$0xff]  ;;  %v10694_v44 = vadd.f32 %v3163_v52, %v15349_v53  ;;  %v10697_v12 = vadd.f32 %v3164_v54, %v15351_v19  ;;  %v10700_v45 = vadd.f32 %v3165_v30, %v15353_v14  ;;  %v15361_v60 = vld [vmem:[#allocation63_spill] sm:$0xff]  ;;  %v15381_v43 = vld [vmem:[#allocation110_spill] sm:$0xff] }
 0x2e1   :  { %v10691_v0 = vadd.f32 %v3162_v23, %v15347_v18  ;;  %v10703_v38 = vadd.f32 %v3166_v29, %v15355_v1  ;;  %v10706_v21 = vadd.f32 %v3167_v51, %v15357_v32  ;;  %v10709_v11 = vadd.f32 %v3168_v9, %v15359_v63  ;;  %v15363_v37 = vld [vmem:[#allocation51_spill] sm:$0xff]  ;;  %v15366_v54 = vld [vmem:[#allocation156_spill] sm:$0xff]  ;;  %v15368_v29 = vld [vmem:[#allocation157_spill] sm:$0xff] }
 0x2e2   :  { %15346 = vst [vmem:[#allocation64_spill] sm:$0xff] %v10688_v61  ;;  %15350 = vst [vmem:[#allocation101_spill] sm:$0xff] %v10694_v44  ;;  %v10712_v62 = vadd.f32 %v3169_v36, %v15361_v60  ;;  %v10715_v23 = vsub.s32 6, %v15363_v37  ;;  %v10718_v52 = vsub.s32 5, %v15363_v37  ;;  %v10721_v30 = vadd.f32 %v15366_v54, %v3170_v13  ;;  %v15370_v51 = vld [vmem:[#allocation158_spill] sm:$0xff]  ;;  %v15372_v9 = vld [vmem:[#allocation160_spill] sm:$0xff] }
 0x2e3   :  { %15348 = vst [vmem:[#allocation65_spill] sm:$0xff] %v10691_v0  ;;  %15352 = vst [vmem:[#allocation102_spill] sm:$0xff] %v10697_v12  ;;  %v10724_v24 = vadd.f32 %v15368_v29, %v3171_v49  ;;  %v10727_v56 = vadd.f32 %v15370_v51, %v3172_v47  ;;  %v10730_v16 = vadd.f32 %v15372_v9, %v3173_v7  ;;  %v15374_v36 = vld [vmem:[#allocation141_spill] sm:$0xff]  ;;  %v15376_v8 = vld [vmem:[#allocation143_spill] sm:$0xff] }
 0x2e4   :  { %15354 = vst [vmem:[#allocation44_spill] sm:$0xff] %v10700_v45  ;;  %15356 = vst [vmem:[#allocation68_spill] sm:$0xff] %v10703_v38  ;;  %v3599_v10 = vrot.slane %v15374_v36, %v10715_v23  ;;  %v3603_v2 = vrot.slane %v15375_v40, %v10715_v23  ;;  %v3607_v59 = vrot.slane %v15376_v8, %v10715_v23  ;;  %v15377_v13 = vld [vmem:[#allocation144_spill] sm:$0xff]  ;;  %v15378_v49 = vld [vmem:[#allocation107_spill] sm:$0xff] }
 0x2e5   :  { %15358 = vst [vmem:[#allocation60_spill] sm:$0xff] %v10706_v21  ;;  %15360 = vst [vmem:[#allocation43_spill] sm:$0xff] %v10709_v11  ;;  %v3611_v26 = vrot.slane %v15377_v13, %v10715_v23  ;;  %v3615_v28 = vrot.slane %v15378_v49, %v10715_v23  ;;  %v15379_v47 = vld [vmem:[#allocation108_spill] sm:$0xff]  ;;  %v15380_v7 = vld [vmem:[#allocation109_spill] sm:$0xff]  ;;  %v3627_v35 = vrot.slane %v15381_v43, %v10715_v23 }
 0x2e6   :  { %15362 = vst [vmem:[#allocation69_spill] sm:$0xff] %v10712_v62  ;;  %15364 = vst [vmem:[#allocation71_spill] sm:$0xff] %v10715_v23  ;;  %v3619_v41 = vrot.slane %v15379_v47, %v10715_v23  ;;  %v3623_v34 = vrot.slane %v15380_v7, %v10715_v23  ;;  %v15382_v18 = vld [vmem:[#allocation113_spill] sm:$0xff]  ;;  %v3727_v47 = vpop.permute.xlu1 %3726 }
 0x2e7   :  { %15365 = vst [vmem:[#allocation72_spill] sm:$0xff] %v10718_v52  ;;  %15367 = vst [vmem:[#allocation74_spill] sm:$0xff] %v10721_v30  ;;  %v3631_v53 = vrot.slane %v15382_v18, %v10715_v23  ;;  %v15383_v19 = vld [vmem:[#allocation117_spill] sm:$0xff]  ;;  %v15390_v30 = vld [vmem:[#allocation151_spill] sm:$0xff]  ;;  %v10796_v12 = vmul.f32 %v3727_v47, %v3599_v10  ;;  %v10802_v44 = vmul.f32 %v3727_v47, %v3611_v26 }
 0x2e8   :  { %15369 = vst [vmem:[#allocation75_spill] sm:$0xff] %v10724_v24  ;;  %15371 = vst [vmem:[#allocation77_spill] sm:$0xff] %v10727_v56  ;;  %v3635_v14 = vrot.slane %v15383_v19, %v10715_v23  ;;  %v15384_v1 = vld [vmem:[#allocation121_spill] sm:$0xff]  ;;  %v15389_v56 = vld [vmem:[#allocation147_spill] sm:$0xff]  ;;  %v3663_v19 = vrot.slane %v15390_v30, %v10715_v23  ;;  %v10808_v0 = vmul.f32 %v3727_v47, %v3623_v34 }
 0x2e9   :  { %15373 = vst [vmem:[#allocation111_spill] sm:$0xff] %v10730_v16  ;;  %v3639_v32 = vrot.slane %v15384_v1, %v10715_v23  ;;  %v15385_v63 = vld [vmem:[#allocation125_spill] sm:$0xff]  ;;  %v3659_v24 = vrot.slane %v15389_v56, %v10715_v23  ;;  %v15391_v1 = vld [vmem:[#allocation155_spill] sm:$0xff]  ;;  %v15396_v56 = vld [vmem:[#allocation84_spill] sm:$0xff] }
 0x2ea   :  { %v3643_v60 = vrot.slane %v15385_v63, %v10715_v23  ;;  %v15386_v54 = vld [vmem:[#allocation129_spill] sm:$0xff]  ;;  %v3667_v18 = vrot.slane %v15391_v1, %v10715_v23  ;;  %v15392_v63 = vld [vmem:[#allocation159_spill] sm:$0xff]  ;;  %v3687_v8 = vrot.slane %v15396_v56, %v10715_v23  ;;  %v15397_v30 = vld [vmem:[#allocation22_spill] sm:$0xff]  ;;  %15405 = vst [vmem:[#allocation112_spill] sm:$0xff] %v10796_v12  ;;  %v10814_v61 = vmul.f32 %v3727_v47, %v3635_v14 }
 0x2eb   :  { %v3647_v29 = vrot.slane %v15386_v54, %v10715_v23  ;;  %v15387_v51 = vld [vmem:[#allocation133_spill] sm:$0xff]  ;;  %v3671_v43 = vrot.slane %v15392_v63, %v10715_v23  ;;  %v15393_v54 = vld [vmem:[#allocation163_spill] sm:$0xff]  ;;  %v3691_v40 = vrot.slane %v15397_v30, %v10715_v23  ;;  %v15404_v30 = vld [vmem:[#allocation28_spill] sm:$0xff]  ;;  %15408 = vst [vmem:[#allocation116_spill] sm:$0xff] %v10802_v44  ;;  %v10816_v10 = vmul.f32 %v3727_v47, %v3639_v32 }
 0x2ec   :  { %v3651_v9 = vrot.slane %v15387_v51, %v10715_v23  ;;  %v15388_v37 = vld [vmem:[#allocation137_spill] sm:$0xff]  ;;  %v3675_v7 = vrot.slane %v15393_v54, %v10715_v23  ;;  %v15398_v1 = vld [vmem:[#allocation23_spill] sm:$0xff]  ;;  %v15400_v54 = vld [vmem:[#allocation34_spill] sm:$0xff]  ;;  %v3719_v45 = vrot.slane %v15404_v30, %v10715_v23  ;;  %15411 = vst [vmem:[#allocation130_spill] sm:$0xff] %v10808_v0  ;;  %v10812_v30 = vmul.f32 %v3727_v47, %v3631_v53  ;;  %v3530_v0 = vpop.permute.xlu0 %3529 }
 0x2ed   :  { %v3655_v16 = vrot.slane %v15388_v37, %v10715_v23  ;;  %v15394_v51 = vld [vmem:[#allocation93_spill] sm:$0xff]  ;;  %v15395_v37 = vld [vmem:[#allocation79_spill] sm:$0xff]  ;;  %v3695_v36 = vrot.slane %v15398_v1, %v10715_v23  ;;  %v3703_v62 = vrot.slane %v15400_v54, %v10715_v23  ;;  %v3723_v1 = vrot.slane %v15102_v33, %v10715_v23  ;;  %15414 = vst [vmem:[#allocation122_spill] sm:$0xff] %v10814_v61 }
 0x2ee   :  { %v3679_v49 = vrot.slane %v15394_v51, %v10715_v23  ;;  %v3683_v13 = vrot.slane %v15395_v37, %v10715_v23  ;;  %v15399_v63 = vld [vmem:[#allocation85_spill] sm:$0xff]  ;;  %v15401_v51 = vld [vmem:[#allocation36_spill] sm:$0xff]  ;;  %v15403_v56 = vld [vmem:[#allocation27_spill] sm:$0xff]  ;;  %v10800_v54 = vmul.f32 %v3727_v47, %v3607_v59  ;;  %15413 = vst [vmem:[#allocation131_spill] sm:$0xff] %v10812_v30  ;;  %v10820_v59 = vmul.f32 %v3727_v47, %v3647_v29 }
 0x2ef   :  { %v3699_v52 = vrot.slane %v15399_v63, %v10715_v23  ;;  %v3707_v11 = vrot.slane %v15401_v51, %v10715_v23  ;;  %v15402_v37 = vld [vmem:[#allocation25_spill] sm:$0xff]  ;;  %v3715_v38 = vrot.slane %v15403_v56, %v10715_v23  ;;  %v10798_v63 = vmul.f32 %v3727_v47, %v3603_v2  ;;  %15415 = vst [vmem:[#allocation132_spill] sm:$0xff] %v10816_v10 }
 0x2f0   :  { %v3711_v21 = vrot.slane %v15402_v37, %v10715_v23  ;;  %15407 = vst [vmem:[#allocation115_spill] sm:$0xff] %v10800_v54  ;;  %v10804_v51 = vmul.f32 %v3727_v47, %v3615_v28  ;;  %v10806_v37 = vmul.f32 %v3727_v47, %v3619_v41  ;;  %v10810_v56 = vmul.f32 %v3727_v47, %v3627_v35  ;;  %v15466_v23 = vld [vmem:[#allocation67_spill] sm:$0xff] }
 0x2f1   :  { %15406 = vst [vmem:[#allocation114_spill] sm:$0xff] %v10798_v63  ;;  %v10818_v2 = vmul.f32 %v3727_v47, %v3643_v60  ;;  %15417 = vst [vmem:[#allocation134_spill] sm:$0xff] %v10820_v59  ;;  %v10822_v26 = vmul.f32 %v3727_v47, %v3651_v9  ;;  %v10824_v28 = vmul.f32 %v3727_v47, %v3655_v16 }
 0x2f2   :  { %15409 = vst [vmem:[#allocation118_spill] sm:$0xff] %v10804_v51  ;;  %15410 = vst [vmem:[#allocation119_spill] sm:$0xff] %v10806_v37  ;;  %v10826_v41 = vmul.f32 %v3727_v47, %v3659_v24  ;;  %v10828_v34 = vmul.f32 %v3727_v47, %v3663_v19  ;;  %v10830_v35 = vmul.f32 %v3727_v47, %v3667_v18 }
 0x2f3   :  { %15412 = vst [vmem:[#allocation120_spill] sm:$0xff] %v10810_v56  ;;  %15416 = vst [vmem:[#allocation123_spill] sm:$0xff] %v10818_v2  ;;  %v10832_v53 = vmul.f32 %v3727_v47, %v3671_v43  ;;  %v10834_v14 = vmul.f32 %v3727_v47, %v3675_v7  ;;  %v10836_v32 = vmul.f32 %v3727_v47, %v3679_v49 }
 0x2f4   :  { %15418 = vst [vmem:[#allocation124_spill] sm:$0xff] %v10822_v26  ;;  %15419 = vst [vmem:[#allocation135_spill] sm:$0xff] %v10824_v28  ;;  %v10838_v60 = vmul.f32 %v3727_v47, %v3683_v13  ;;  %v10840_v29 = vmul.f32 %v3727_v47, %v3687_v8  ;;  %v10842_v9 = vmul.f32 %v3727_v47, %v3691_v40  ;;  %v15437_v8 = vld [vmem:[#allocation161_spill] sm:$0xff] }
 0x2f5   :  { %15420 = vst [vmem:[#allocation126_spill] sm:$0xff] %v10826_v41  ;;  %15421 = vst [vmem:[#allocation136_spill] sm:$0xff] %v10828_v34  ;;  %v10844_v16 = vmul.f32 %v3727_v47, %v3695_v36  ;;  %v10846_v24 = vmul.f32 %v3727_v47, %v3699_v52  ;;  %v10848_v19 = vmul.f32 %v3727_v47, %v3703_v62  ;;  %v15438_v36 = vld [vmem:[#allocation162_spill] sm:$0xff]  ;;  %v15439_v62 = vld [vmem:[#allocation164_spill] sm:$0xff] }
 0x2f6   :  { %15422 = vst [vmem:[#allocation127_spill] sm:$0xff] %v10830_v35  ;;  %15423 = vst [vmem:[#allocation138_spill] sm:$0xff] %v10832_v53  ;;  %v10850_v18 = vmul.f32 %v3727_v47, %v3707_v11  ;;  %v10852_v43 = vmul.f32 %v3727_v47, %v3711_v21  ;;  %v10854_v7 = vmul.f32 %v3727_v47, %v3715_v38  ;;  %v15440_v21 = vld [vmem:[#allocation165_spill] sm:$0xff] }
 0x2f7   :  { %15424 = vst [vmem:[#allocation128_spill] sm:$0xff] %v10834_v14  ;;  %15425 = vst [vmem:[#allocation148_spill] sm:$0xff] %v10836_v32  ;;  %v10856_v49 = vmul.f32 %v3727_v47, %v3719_v45  ;;  %v10858_v13 = vmul.f32 %v3727_v47, %v3723_v1  ;;  %v10862_v40 = vadd.f32 %v15437_v8, %v10631_v25  ;;  %v15441_v45 = vld [vmem:[#allocation89_spill] sm:$0xff]  ;;  %v15442_v1 = vld [vmem:[#allocation70_spill] sm:$0xff] }
 0x2f8   :  { %15426 = vst [vmem:[#allocation149_spill] sm:$0xff] %v10838_v60  ;;  %15427 = vst [vmem:[#allocation150_spill] sm:$0xff] %v10840_v29  ;;  %v10866_v52 = vadd.f32 %v15438_v36, %v10634_v48  ;;  %v10870_v11 = vadd.f32 %v15439_v62, %v10637_v22  ;;  %v10874_v38 = vadd.f32 %v15440_v21, %v10640_v57  ;;  %v15443_v8 = vld [vmem:[#allocation73_spill] sm:$0xff]  ;;  %v15444_v36 = vld [vmem:[#allocation78_spill] sm:$0xff] }
 0x2f9   :  { %15428 = vst [vmem:[#allocation152_spill] sm:$0xff] %v10842_v9  ;;  %15429 = vst [vmem:[#allocation153_spill] sm:$0xff] %v10844_v16  ;;  %v10878_v47 = vadd.f32 %v15441_v45, %v10643_v46  ;;  %v10882_v25 = vadd.f32 %v15442_v1, %v10646_v20  ;;  %v10886_v48 = vadd.f32 %v15443_v8, %v10649_v58  ;;  %v15445_v62 = vld [vmem:[#allocation80_spill] sm:$0xff]  ;;  %v15446_v21 = vld [vmem:[#allocation81_spill] sm:$0xff] }
 0x2fa   :  { %15430 = vst [vmem:[#allocation154_spill] sm:$0xff] %v10846_v24  ;;  %15431 = vst [vmem:[#allocation46_spill] sm:$0xff] %v10848_v19  ;;  %v10890_v22 = vadd.f32 %v15444_v36, %v10652_v5  ;;  %v10894_v57 = vadd.f32 %v15445_v62, %v10655_v31  ;;  %v10898_v46 = vadd.f32 %v15446_v21, %v10658_v27  ;;  %v15447_v45 = vld [vmem:[#allocation83_spill] sm:$0xff]  ;;  %v15451_v8 = vld [vmem:[#allocation17_spill] sm:$0xff] }
 0x2fb   :  { %15432 = vst [vmem:[#allocation47_spill] sm:$0xff] %v10850_v18  ;;  %15433 = vst [vmem:[#allocation48_spill] sm:$0xff] %v10852_v43  ;;  %v10902_v20 = vadd.f32 %v15447_v45, %v10661_v50  ;;  %v15449_v1 = vld [vmem:[#allocation35_spill] sm:$0xff]  ;;  %v10910_v5 = vadd.f32 %v15451_v8, %v10667_v6  ;;  %v15455_v62 = vld [vmem:[#allocation9_spill] sm:$0xff] }
 0x2fc   :  { %15434 = vst [vmem:[#allocation96_spill] sm:$0xff] %v10854_v7  ;;  %15435 = vst [vmem:[#allocation139_spill] sm:$0xff] %v10856_v49  ;;  %v10906_v58 = vadd.f32 %v15449_v1, %v10664_v17  ;;  %v15453_v36 = vld [vmem:[#allocation19_spill] sm:$0xff]  ;;  %v10918_v27 = vadd.f32 %v15455_v62, %v10673_v39  ;;  %v15457_v21 = vld [vmem:[#allocation10_spill] sm:$0xff] }
 0x2fd   :  { %15436 = vst [vmem:[#allocation97_spill] sm:$0xff] %v10858_v13  ;;  %15448 = vst [vmem:[#allocation103_spill] sm:$0xff] %v10902_v20  ;;  %v10914_v31 = vadd.f32 %v15453_v36, %v10670_v4  ;;  %v10922_v50 = vadd.f32 %v15457_v21, %v10676_v15  ;;  %v15459_v45 = vld [vmem:[#allocation13_spill] sm:$0xff]  ;;  %v15463_v8 = vld [vmem:[#allocation42_spill] sm:$0xff] }
 0x2fe   :  { %15450 = vst [vmem:[#allocation140_spill] sm:$0xff] %v10906_v58  ;;  %15452 = vst [vmem:[#allocation104_spill] sm:$0xff] %v10910_v5  ;;  %v10926_v17 = vadd.f32 %v15459_v45, %v10679_v55  ;;  %v15461_v1 = vld [vmem:[#allocation41_spill] sm:$0xff]  ;;  %v10934_v4 = vadd.f32 %v15463_v8, %v10685_v3  ;;  %v15465_v36 = vld [vmem:[#allocation64_spill] sm:$0xff] }
 0x2ff   :  { %15454 = vst [vmem:[#allocation106_spill] sm:$0xff] %v10914_v31  ;;  %15456 = vst [vmem:[#allocation54_spill] sm:$0xff] %v10918_v27  ;;  %v10930_v6 = vadd.f32 %v15461_v1, %v10682_v42  ;;  %v10938_v39 = vadd.f32 %v15466_v23, %v15465_v36  ;;  %v15468_v62 = vld [vmem:[#allocation65_spill] sm:$0xff]  ;;  %v15469_v13 = vld [vmem:[#allocation76_spill] sm:$0xff] }
 0x300   :  { %15458 = vst [vmem:[#allocation56_spill] sm:$0xff] %v10922_v50  ;;  %15460 = vst [vmem:[#allocation58_spill] sm:$0xff] %v10926_v17  ;;  %v10942_v15 = vadd.f32 %v15469_v13, %v15468_v62  ;;  %v15471_v21 = vld [vmem:[#allocation101_spill] sm:$0xff]  ;;  %v15472_v49 = vld [vmem:[#allocation24_spill] sm:$0xff] }
 0x301   :  { %15462 = vst [vmem:[#allocation59_spill] sm:$0xff] %v10930_v6  ;;  %15464 = vst [vmem:[#allocation61_spill] sm:$0xff] %v10934_v4  ;;  %v10946_v55 = vadd.f32 %v15472_v49, %v15471_v21  ;;  %v15474_v45 = vld [vmem:[#allocation102_spill] sm:$0xff]  ;;  %v15477_v1 = vld [vmem:[#allocation44_spill] sm:$0xff] }
 0x302   :  { %15467 = vst [vmem:[#allocation63_spill] sm:$0xff] %v10938_v39  ;;  %15470 = vst [vmem:[#allocation156_spill] sm:$0xff] %v10942_v15  ;;  %v15475_v7 = vld [vmem:[#allocation30_spill] sm:$0xff]  ;;  %v15478_v43 = vld [vmem:[#allocation31_spill] sm:$0xff] }
 0x303   :  { %15473 = vst [vmem:[#allocation157_spill] sm:$0xff] %v10946_v55  ;;  %v10950_v42 = vadd.f32 %v15475_v7, %v15474_v45  ;;  %v10954_v3 = vadd.f32 %v15478_v43, %v15477_v1  ;;  %v15480_v8 = vld [vmem:[#allocation68_spill] sm:$0xff]  ;;  %v15484_v19 = vld [vmem:[#allocation38_spill] sm:$0xff]  ;;  %v15486_v62 = vld [vmem:[#allocation43_spill] sm:$0xff] }
 0x304   :  { %v15481_v18 = vld [vmem:[#allocation32_spill] sm:$0xff]  ;;  %v15487_v24 = vld [vmem:[#allocation39_spill] sm:$0xff]  ;;  %v15489_v21 = vld [vmem:[#allocation69_spill] sm:$0xff] }
 0x305   :  { %15476 = vst [vmem:[#allocation158_spill] sm:$0xff] %v10950_v42  ;;  %15479 = vst [vmem:[#allocation160_spill] sm:$0xff] %v10954_v3  ;;  %v10958_v23 = vadd.f32 %v15481_v18, %v15480_v8  ;;  %v15483_v36 = vld [vmem:[#allocation60_spill] sm:$0xff]  ;;  %v10966_v49 = vadd.f32 %v15487_v24, %v15486_v62  ;;  %v15493_v9 = vld [vmem:[#allocation141_spill] sm:$0xff] }
 0x306   :  { %v10962_v13 = vadd.f32 %v15484_v19, %v15483_v36  ;;  %v15490_v16 = vld [vmem:[#allocation40_spill] sm:$0xff]  ;;  %v15494_v1 = vld [vmem:[#allocation142_spill] sm:$0xff]  ;;  %v15495_v18 = vld [vmem:[#allocation143_spill] sm:$0xff] }
 0x307   :  { %15482 = vst [vmem:[#allocation161_spill] sm:$0xff] %v10958_v23  ;;  %15488 = vst [vmem:[#allocation164_spill] sm:$0xff] %v10966_v49  ;;  %v10970_v7 = vadd.f32 %v15490_v16, %v15489_v21  ;;  %v15492_v45 = vld [vmem:[#allocation72_spill] sm:$0xff]  ;;  %v15497_v60 = vld [vmem:[#allocation107_spill] sm:$0xff] }
 0x308   :  { %15485 = vst [vmem:[#allocation162_spill] sm:$0xff] %v10962_v13  ;;  %v3402_v43 = vrot.slane %v15493_v9, %v15492_v45  ;;  %v3406_v29 = vrot.slane %v15494_v1, %v15492_v45  ;;  %v3410_v8 = vrot.slane %v15495_v18, %v15492_v45  ;;  %v15496_v19 = vld [vmem:[#allocation144_spill] sm:$0xff]  ;;  %v3418_v24 = vrot.slane %v15497_v60, %v15492_v45  ;;  %v15499_v16 = vld [vmem:[#allocation109_spill] sm:$0xff]  ;;  %v15500_v9 = vld [vmem:[#allocation110_spill] sm:$0xff] }
 0x309   :  { %15491 = vst [vmem:[#allocation165_spill] sm:$0xff] %v10970_v7  ;;  %v3414_v36 = vrot.slane %v15496_v19, %v15492_v45  ;;  %v15498_v62 = vld [vmem:[#allocation108_spill] sm:$0xff]  ;;  %v3426_v21 = vrot.slane %v15499_v16, %v15492_v45  ;;  %v3430_v14 = vrot.slane %v15500_v9, %v15492_v45  ;;  %v15501_v1 = vld [vmem:[#allocation113_spill] sm:$0xff] }
 0x30a   :  { %v3422_v32 = vrot.slane %v15498_v62, %v15492_v45  ;;  %v3434_v53 = vrot.slane %v15501_v1, %v15492_v45  ;;  %v15502_v18 = vld [vmem:[#allocation117_spill] sm:$0xff]  ;;  %v15508_v1 = vld [vmem:[#allocation147_spill] sm:$0xff]  ;;  %v3532_v42 = vmul.f32 %v3530_v0, %v3402_v43  ;;  %v3534_v55 = vmul.f32 %v3530_v0, %v3410_v8 }
 0x30b   :  { %v3438_v35 = vrot.slane %v15502_v18, %v15492_v45  ;;  %v15503_v19 = vld [vmem:[#allocation121_spill] sm:$0xff]  ;;  %v3462_v2 = vrot.slane %v15508_v1, %v15492_v45  ;;  %v15509_v18 = vld [vmem:[#allocation151_spill] sm:$0xff]  ;;  %v15515_v1 = vld [vmem:[#allocation84_spill] sm:$0xff]  ;;  %v3535_v15 = vmul.f32 %v3530_v0, %v3414_v36  ;;  %v3538_v4 = vmul.f32 %v3530_v0, %v3426_v21 }
 0x30c   :  { %v3442_v34 = vrot.slane %v15503_v19, %v15492_v45  ;;  %v15504_v60 = vld [vmem:[#allocation125_spill] sm:$0xff]  ;;  %v3466_v10 = vrot.slane %v15509_v18, %v15492_v45  ;;  %v15510_v19 = vld [vmem:[#allocation155_spill] sm:$0xff]  ;;  %v3490_v44 = vrot.slane %v15515_v1, %v15492_v45  ;;  %v15516_v18 = vld [vmem:[#allocation22_spill] sm:$0xff]  ;;  %v3537_v39 = vmul.f32 %v3530_v0, %v3422_v32 }
 0x30d   :  { %v3446_v41 = vrot.slane %v15504_v60, %v15492_v45  ;;  %v15505_v62 = vld [vmem:[#allocation129_spill] sm:$0xff]  ;;  %v3470_v61 = vrot.slane %v15510_v19, %v15492_v45  ;;  %v15511_v60 = vld [vmem:[#allocation159_spill] sm:$0xff]  ;;  %v3494_v54 = vrot.slane %v15516_v18, %v15492_v45  ;;  %v15523_v18 = vld [vmem:[#allocation28_spill] sm:$0xff]  ;;  %v3540_v6 = vmul.f32 %v3530_v0, %v3434_v53 }
 0x30e   :  { %v3450_v28 = vrot.slane %v15505_v62, %v15492_v45  ;;  %v15506_v16 = vld [vmem:[#allocation133_spill] sm:$0xff]  ;;  %v3474_v30 = vrot.slane %v15511_v60, %v15492_v45  ;;  %v15512_v62 = vld [vmem:[#allocation163_spill] sm:$0xff]  ;;  %v3522_v3 = vrot.slane %v15523_v18, %v15492_v45  ;;  %v3541_v17 = vmul.f32 %v3530_v0, %v3438_v35 }
 0x30f   :  { %v3454_v26 = vrot.slane %v15506_v16, %v15492_v45  ;;  %v15507_v9 = vld [vmem:[#allocation137_spill] sm:$0xff]  ;;  %v3478_v56 = vrot.slane %v15512_v62, %v15492_v45  ;;  %v15517_v19 = vld [vmem:[#allocation23_spill] sm:$0xff]  ;;  %v15519_v62 = vld [vmem:[#allocation34_spill] sm:$0xff]  ;;  %v3543_v50 = vmul.f32 %v3530_v0, %v3446_v41  ;;  %v3547_v5 = vmul.f32 %v3530_v0, %v3462_v2 }
 0x310   :  { %v3458_v59 = vrot.slane %v15507_v9, %v15492_v45  ;;  %v15513_v16 = vld [vmem:[#allocation93_spill] sm:$0xff]  ;;  %v15514_v9 = vld [vmem:[#allocation79_spill] sm:$0xff]  ;;  %v3498_v63 = vrot.slane %v15517_v19, %v15492_v45  ;;  %v3506_v7 = vrot.slane %v15519_v62, %v15492_v45  ;;  %v3526_v19 = vrot.slane %v15102_v33, %v15492_v45 }
 0x311   :  { %v3482_v37 = vrot.slane %v15513_v16, %v15492_v45  ;;  %v3486_v51 = vrot.slane %v15514_v9, %v15492_v45  ;;  %v15518_v60 = vld [vmem:[#allocation85_spill] sm:$0xff]  ;;  %v15520_v16 = vld [vmem:[#allocation36_spill] sm:$0xff]  ;;  %v15522_v1 = vld [vmem:[#allocation27_spill] sm:$0xff]  ;;  %v3536_v62 = vmul.f32 %v3530_v0, %v3418_v24  ;;  %v3544_v27 = vmul.f32 %v3530_v0, %v3450_v28 }
 0x312   :  { %v3502_v12 = vrot.slane %v15518_v60, %v15492_v45  ;;  %v3510_v49 = vrot.slane %v15520_v16, %v15492_v45  ;;  %v15521_v9 = vld [vmem:[#allocation25_spill] sm:$0xff]  ;;  %v3518_v23 = vrot.slane %v15522_v1, %v15492_v45  ;;  %v3533_v60 = vmul.f32 %v3530_v0, %v3406_v29  ;;  %v15524_v28 = vld [vmem:[#allocation74_spill] sm:$0xff]  ;;  %v15525_v2 = vld [vmem:[#allocation75_spill] sm:$0xff] }
 0x313   :  { %v3514_v13 = vrot.slane %v15521_v9, %v15492_v45  ;;  %v3539_v16 = vmul.f32 %v3530_v0, %v3430_v14  ;;  %v3542_v9 = vmul.f32 %v3530_v0, %v3442_v34  ;;  %v3545_v1 = vmul.f32 %v3530_v0, %v3454_v26 }
 0x314   :  { %v3546_v31 = vmul.f32 %v3530_v0, %v3458_v59  ;;  %v3548_v18 = vmul.f32 %v3530_v0, %v3466_v10  ;;  %v3549_v58 = vmul.f32 %v3530_v0, %v3470_v61  ;;  %v3550_v20 = vmul.f32 %v3530_v0, %v3474_v30  ;;  %v15526_v61 = vld [vmem:[#allocation77_spill] sm:$0xff] }
 0x315   :  { %v3551_v45 = vmul.f32 %v3530_v0, %v3478_v56  ;;  %v3552_v43 = vmul.f32 %v3530_v0, %v3482_v37  ;;  %v3553_v29 = vmul.f32 %v3530_v0, %v3486_v51  ;;  %v3554_v8 = vmul.f32 %v3530_v0, %v3490_v44  ;;  %v15527_v37 = vld [vmem:[#allocation111_spill] sm:$0xff] }
 0x316   :  { %v3555_v36 = vmul.f32 %v3530_v0, %v3494_v54  ;;  %v3556_v24 = vmul.f32 %v3530_v0, %v3498_v63  ;;  %v3557_v32 = vmul.f32 %v3530_v0, %v3502_v12  ;;  %v3558_v21 = vmul.f32 %v3530_v0, %v3506_v7  ;;  %v15549_v7 = vld [vmem:[#allocation160_spill] sm:$0xff] }
 0x317   :  { %v3559_v14 = vmul.f32 %v3530_v0, %v3510_v49  ;;  %v3560_v53 = vmul.f32 %v3530_v0, %v3514_v13  ;;  %v3561_v35 = vmul.f32 %v3530_v0, %v3518_v23  ;;  %v3562_v34 = vmul.f32 %v3530_v0, %v3522_v3  ;;  %v15547_v13 = vld [vmem:[#allocation158_spill] sm:$0xff] }
 0x318   :  { %v3563_v41 = vmul.f32 %v3530_v0, %v3526_v19  ;;  %v11037_v26 = vadd.f32 %v3532_v42, %v15524_v28  ;;  %v11040_v10 = vadd.f32 %v3533_v60, %v15525_v2  ;;  %v11043_v30 = vadd.f32 %v3534_v55, %v15526_v61  ;;  %v15541_v55 = vld [vmem:[#allocation63_spill] sm:$0xff]  ;;  %v15553_v19 = vld [vmem:[#allocation162_spill] sm:$0xff] }
 0x319   :  { %v11046_v44 = vadd.f32 %v3535_v15, %v15527_v37  ;;  %v11049_v12 = vadd.f32 %v3536_v62, %v10862_v40  ;;  %v11052_v56 = vadd.f32 %v3537_v39, %v10866_v52  ;;  %v11055_v0 = vadd.f32 %v3538_v4, %v10870_v11  ;;  %v15528_v11 = vld [vmem:[#allocation103_spill] sm:$0xff] }
 0x31a   :  { %v11058_v63 = vadd.f32 %v3539_v16, %v10874_v38  ;;  %v11061_v54 = vadd.f32 %v3540_v6, %v10878_v47  ;;  %v11064_v51 = vadd.f32 %v3541_v17, %v10882_v25  ;;  %v11067_v59 = vadd.f32 %v3542_v9, %v10886_v48  ;;  %v15529_v47 = vld [vmem:[#allocation140_spill] sm:$0xff]  ;;  %v15531_v9 = vld [vmem:[#allocation106_spill] sm:$0xff] }
 0x31b   :  { %v11070_v60 = vadd.f32 %v3543_v50, %v10890_v22  ;;  %v11073_v40 = vadd.f32 %v3544_v27, %v10894_v57  ;;  %v11076_v52 = vadd.f32 %v3545_v1, %v10898_v46  ;;  %v11079_v38 = vadd.f32 %v3546_v31, %v15528_v11  ;;  %v15530_v25 = vld [vmem:[#allocation104_spill] sm:$0xff]  ;;  %v15532_v22 = vld [vmem:[#allocation54_spill] sm:$0xff]  ;;  %v15537_v31 = vld [vmem:[#allocation59_spill] sm:$0xff] }
 0x31c   :  { %v11082_v6 = vadd.f32 %v3547_v5, %v15529_v47  ;;  %v11085_v17 = vadd.f32 %v3548_v18, %v15530_v25  ;;  %v11088_v48 = vadd.f32 %v3549_v58, %v15531_v9  ;;  %v11091_v50 = vadd.f32 %v3550_v20, %v15532_v22  ;;  %v15533_v57 = vld [vmem:[#allocation56_spill] sm:$0xff]  ;;  %v15535_v46 = vld [vmem:[#allocation58_spill] sm:$0xff]  ;;  %v15539_v5 = vld [vmem:[#allocation61_spill] sm:$0xff] }
 0x31d   :  { %v11094_v27 = vadd.f32 %v3551_v45, %v15533_v57  ;;  %v11097_v4 = vadd.f32 %v3552_v43, %v15535_v46  ;;  %v11100_v39 = vadd.f32 %v3553_v29, %v15537_v31  ;;  %v11103_v15 = vadd.f32 %v3554_v8, %v15539_v5  ;;  %v15543_v58 = vld [vmem:[#allocation156_spill] sm:$0xff]  ;;  %v15545_v20 = vld [vmem:[#allocation157_spill] sm:$0xff]  ;;  %v15567_v25 = vld [vmem:[#allocation18_spill] sm:$0xff] }
 0x31e   :  { %v11106_v42 = vadd.f32 %v3555_v36, %v15541_v55  ;;  %v11109_v3 = vadd.f32 %v3556_v24, %v15543_v58  ;;  %v11112_v23 = vadd.f32 %v3557_v32, %v15545_v20  ;;  %v11115_v49 = vadd.f32 %v3558_v21, %v15547_v13  ;;  %v15551_v1 = vld [vmem:[#allocation161_spill] sm:$0xff]  ;;  %v15555_v16 = vld [vmem:[#allocation164_spill] sm:$0xff]  ;;  %v15568_v22 = vld [vmem:[#allocation50_spill] sm:$0xff] }
 0x31f   :  { %15534 = vst [vmem:[#allocation89_spill] sm:$0xff] %v11094_v27  ;;  %15536 = vst [vmem:[#allocation70_spill] sm:$0xff] %v11097_v4  ;;  %v11118_v45 = vadd.f32 %v3559_v14, %v15549_v7  ;;  %v11121_v18 = vadd.f32 %v3560_v53, %v15551_v1  ;;  %v11124_v62 = vadd.f32 %v3561_v35, %v15553_v19  ;;  %v15557_v29 = vld [vmem:[#allocation165_spill] sm:$0xff]  ;;  %v15560_v24 = vld [vmem:[#allocation20_spill] sm:$0xff] }
 0x320   :  { %15538 = vst [vmem:[#allocation73_spill] sm:$0xff] %v11100_v39  ;;  %15540 = vst [vmem:[#allocation78_spill] sm:$0xff] %v11103_v15  ;;  %v11127_v43 = vadd.f32 %v3562_v34, %v15555_v16  ;;  %v11130_v8 = vadd.f32 %v3563_v41, %v15557_v29  ;;  %v15559_v36 = vld [vmem:[#allocation53_spill] sm:$0xff]  ;;  %v15562_v14 = vld [vmem:[#allocation26_spill] sm:$0xff] }
 0x321   :  { %15542 = vst [vmem:[#allocation80_spill] sm:$0xff] %v11106_v42  ;;  %15544 = vst [vmem:[#allocation81_spill] sm:$0xff] %v11109_v3  ;;  %v3993_v32 = vrot.slane %v15560_v24, %v15559_v36  ;;  %v15561_v21 = vld [vmem:[#allocation21_spill] sm:$0xff]  ;;  %v4001_v2 = vrot.slane %v15562_v14, %v15559_v36  ;;  %v15563_v53 = vld [vmem:[#allocation12_spill] sm:$0xff]  ;;  %v4021_v9 = vrot.slane %v15567_v25, %v15559_v36  ;;  %v4121_v14 = vpop.permute.xlu1 %4120 }
 0x322   :  { %15546 = vst [vmem:[#allocation83_spill] sm:$0xff] %v11112_v23  ;;  %15548 = vst [vmem:[#allocation35_spill] sm:$0xff] %v11115_v49  ;;  %v3997_v28 = vrot.slane %v15561_v21, %v15559_v36  ;;  %v4005_v61 = vrot.slane %v15563_v53, %v15559_v36  ;;  %v15564_v35 = vld [vmem:[#allocation14_spill] sm:$0xff]  ;;  %v15565_v34 = vld [vmem:[#allocation15_spill] sm:$0xff]  ;;  %v4025_v57 = vrot.slane %v15568_v22, %v15559_v36 }
 0x323   :  { %15550 = vst [vmem:[#allocation17_spill] sm:$0xff] %v11118_v45  ;;  %15552 = vst [vmem:[#allocation19_spill] sm:$0xff] %v11121_v18  ;;  %v4009_v37 = vrot.slane %v15564_v35, %v15559_v36  ;;  %v4013_v11 = vrot.slane %v15565_v34, %v15559_v36  ;;  %v15566_v41 = vld [vmem:[#allocation16_spill] sm:$0xff]  ;;  %v15569_v46 = vld [vmem:[#allocation55_spill] sm:$0xff]  ;;  %v11196_v15 = vmul.f32 %v4121_v14, %v3993_v32 }
 0x324   :  { %15554 = vst [vmem:[#allocation9_spill] sm:$0xff] %v11124_v62  ;;  %15556 = vst [vmem:[#allocation10_spill] sm:$0xff] %v11127_v43  ;;  %v4017_v47 = vrot.slane %v15566_v41, %v15559_v36  ;;  %v4029_v31 = vrot.slane %v15569_v46, %v15559_v36  ;;  %v15570_v5 = vld [vmem:[#allocation7_spill] sm:$0xff]  ;;  %v15571_v58 = vld [vmem:[#allocation8_spill] sm:$0xff]  ;;  %v11202_v39 = vmul.f32 %v4121_v14, %v4005_v61 }
 0x325   :  { %15558 = vst [vmem:[#allocation13_spill] sm:$0xff] %v11130_v8  ;;  %v4033_v55 = vrot.slane %v15570_v5, %v15559_v36  ;;  %v4037_v20 = vrot.slane %v15571_v58, %v15559_v36  ;;  %v15572_v13 = vld [vmem:[#allocation11_spill] sm:$0xff]  ;;  %v15573_v1 = vld [vmem:[#allocation49_spill] sm:$0xff]  ;;  %v15578_v58 = vld [vmem:[#allocation98_spill] sm:$0xff] }
 0x326   :  { %v4041_v7 = vrot.slane %v15572_v13, %v15559_v36  ;;  %v4045_v19 = vrot.slane %v15573_v1, %v15559_v36  ;;  %v15574_v16 = vld [vmem:[#allocation29_spill] sm:$0xff]  ;;  %v15577_v5 = vld [vmem:[#allocation95_spill] sm:$0xff]  ;;  %v4065_v35 = vrot.slane %v15578_v58, %v15559_v36  ;;  %v15585_v58 = vld [vmem:[#allocation86_spill] sm:$0xff]  ;;  %15592 = vst [vmem:[#allocation41_spill] sm:$0xff] %v11196_v15  ;;  %v11208_v4 = vmul.f32 %v4121_v14, %v4017_v47 }
 0x327   :  { %v4049_v29 = vrot.slane %v15574_v16, %v15559_v36  ;;  %v15575_v22 = vld [vmem:[#allocation37_spill] sm:$0xff]  ;;  %v4061_v34 = vrot.slane %v15577_v5, %v15559_v36  ;;  %v15581_v16 = vld [vmem:[#allocation62_spill] sm:$0xff]  ;;  %v15584_v5 = vld [vmem:[#allocation100_spill] sm:$0xff]  ;;  %v4093_v62 = vrot.slane %v15585_v58, %v15559_v36  ;;  %v11198_v58 = vmul.f32 %v4121_v14, %v3997_v28  ;;  %15595 = vst [vmem:[#allocation67_spill] sm:$0xff] %v11202_v39 }
 0x328   :  { %v4053_v25 = vrot.slane %v15575_v22, %v15559_v36  ;;  %v15576_v46 = vld [vmem:[#allocation45_spill] sm:$0xff]  ;;  %v4077_v24 = vrot.slane %v15581_v16, %v15559_v36  ;;  %v15582_v22 = vld [vmem:[#allocation66_spill] sm:$0xff]  ;;  %v4089_v43 = vrot.slane %v15584_v5, %v15559_v36  ;;  %15598 = vst [vmem:[#allocation101_spill] sm:$0xff] %v11208_v4  ;;  %v11214_v27 = vmul.f32 %v4121_v14, %v4029_v31 }
 0x329   :  { %v4057_v41 = vrot.slane %v15576_v46, %v15559_v36  ;;  %v15579_v13 = vld [vmem:[#allocation105_spill] sm:$0xff]  ;;  %v4081_v33 = vrot.slane %v15582_v22, %v15559_v36  ;;  %v15583_v46 = vld [vmem:[#allocation99_spill] sm:$0xff]  ;;  %v15588_v16 = vld [vmem:[#allocation90_spill] sm:$0xff]  ;;  %15593 = vst [vmem:[#allocation42_spill] sm:$0xff] %v11198_v58  ;;  %v11218_v32 = vmul.f32 %v4121_v14, %v4037_v20  ;;  %v11220_v28 = vmul.f32 %v4121_v14, %v4041_v7  ;;  %v3924_v58 = vpop.permute.xlu0 %3923 }
 0x32a   :  { %v4069_v53 = vrot.slane %v15579_v13, %v15559_v36  ;;  %v15580_v1 = vld [vmem:[#allocation57_spill] sm:$0xff]  ;;  %v4085_v8 = vrot.slane %v15583_v46, %v15559_v36  ;;  %v15586_v13 = vld [vmem:[#allocation87_spill] sm:$0xff]  ;;  %v4105_v49 = vrot.slane %v15588_v16, %v15559_v36  ;;  %v15590_v46 = vld [vmem:[#allocation92_spill] sm:$0xff]  ;;  %v11206_v16 = vmul.f32 %v4121_v14, %v4013_v11  ;;  %15601 = vst [vmem:[#allocation30_spill] sm:$0xff] %v11214_v27 }
 0x32b   :  { %v4073_v21 = vrot.slane %v15580_v1, %v15559_v36  ;;  %v4097_v18 = vrot.slane %v15586_v13, %v15559_v36  ;;  %v15587_v1 = vld [vmem:[#allocation88_spill] sm:$0xff]  ;;  %v15589_v22 = vld [vmem:[#allocation91_spill] sm:$0xff]  ;;  %v4113_v3 = vrot.slane %v15590_v46, %v15559_v36  ;;  %v15591_v5 = vld [vmem:[#allocation94_spill] sm:$0xff]  ;;  %v11200_v13 = vmul.f32 %v4121_v14, %v4001_v2  ;;  %15603 = vst [vmem:[#allocation31_spill] sm:$0xff] %v11218_v32 }
 0x32c   :  { %v4101_v45 = vrot.slane %v15587_v1, %v15559_v36  ;;  %v4109_v23 = vrot.slane %v15589_v22, %v15559_v36  ;;  %v4117_v42 = vrot.slane %v15591_v5, %v15559_v36  ;;  %v11204_v1 = vmul.f32 %v4121_v14, %v4009_v37  ;;  %15597 = vst [vmem:[#allocation76_spill] sm:$0xff] %v11206_v16 }
 0x32d   :  { %15594 = vst [vmem:[#allocation64_spill] sm:$0xff] %v11200_v13  ;;  %v11210_v22 = vmul.f32 %v4121_v14, %v4021_v9  ;;  %v11212_v46 = vmul.f32 %v4121_v14, %v4025_v57  ;;  %v11216_v36 = vmul.f32 %v4121_v14, %v4033_v55  ;;  %15604 = vst [vmem:[#allocation68_spill] sm:$0xff] %v11220_v28 }
 0x32e   :  { %15596 = vst [vmem:[#allocation65_spill] sm:$0xff] %v11204_v1  ;;  %v11222_v2 = vmul.f32 %v4121_v14, %v4045_v19  ;;  %v11224_v61 = vmul.f32 %v4121_v14, %v4049_v29  ;;  %v11226_v37 = vmul.f32 %v4121_v14, %v4053_v25  ;;  %v11228_v11 = vmul.f32 %v4121_v14, %v4057_v41 }
 0x32f   :  { %15599 = vst [vmem:[#allocation24_spill] sm:$0xff] %v11210_v22  ;;  %15600 = vst [vmem:[#allocation102_spill] sm:$0xff] %v11212_v46  ;;  %v11230_v47 = vmul.f32 %v4121_v14, %v4061_v34  ;;  %v11232_v9 = vmul.f32 %v4121_v14, %v4065_v35  ;;  %v11234_v57 = vmul.f32 %v4121_v14, %v4069_v53 }
 0x330   :  { %15602 = vst [vmem:[#allocation44_spill] sm:$0xff] %v11216_v36  ;;  %15605 = vst [vmem:[#allocation32_spill] sm:$0xff] %v11222_v2  ;;  %v11236_v31 = vmul.f32 %v4121_v14, %v4073_v21  ;;  %v11238_v55 = vmul.f32 %v4121_v14, %v4077_v24  ;;  %v11240_v20 = vmul.f32 %v4121_v14, %v4081_v33  ;;  %v15624_v33 = vld [vmem:[#allocation51_spill] sm:$0xff] }
 0x331   :  { %15606 = vst [vmem:[#allocation60_spill] sm:$0xff] %v11224_v61  ;;  %15607 = vst [vmem:[#allocation38_spill] sm:$0xff] %v11226_v37  ;;  %v11242_v7 = vmul.f32 %v4121_v14, %v4085_v8  ;;  %v11244_v19 = vmul.f32 %v4121_v14, %v4089_v43  ;;  %v11246_v25 = vmul.f32 %v4121_v14, %v4093_v62  ;;  %v11261_v29 = vsub.s32 7, %v15624_v33  ;;  %v15626_v43 = vld [vmem:[#allocation112_spill] sm:$0xff]  ;;  %v15631_v33 = vld [vmem:[#allocation119_spill] sm:$0xff] }
 0x332   :  { %15608 = vst [vmem:[#allocation43_spill] sm:$0xff] %v11228_v11  ;;  %15609 = vst [vmem:[#allocation39_spill] sm:$0xff] %v11230_v47  ;;  %v11248_v41 = vmul.f32 %v4121_v14, %v4097_v18  ;;  %v11250_v34 = vmul.f32 %v4121_v14, %v4101_v45  ;;  %v11252_v35 = vmul.f32 %v4121_v14, %v4105_v49  ;;  %v15627_v18 = vld [vmem:[#allocation114_spill] sm:$0xff]  ;;  %v15628_v49 = vld [vmem:[#allocation115_spill] sm:$0xff] }
 0x333   :  { %15610 = vst [vmem:[#allocation69_spill] sm:$0xff] %v11232_v9  ;;  %15611 = vst [vmem:[#allocation40_spill] sm:$0xff] %v11234_v57  ;;  %v11254_v53 = vmul.f32 %v4121_v14, %v4109_v23  ;;  %v11256_v21 = vmul.f32 %v4121_v14, %v4113_v3  ;;  %v11258_v24 = vmul.f32 %v4121_v14, %v4117_v42  ;;  %v15629_v3 = vld [vmem:[#allocation116_spill] sm:$0xff]  ;;  %v15630_v42 = vld [vmem:[#allocation118_spill] sm:$0xff] }
 0x334   :  { %15612 = vst [vmem:[#allocation74_spill] sm:$0xff] %v11236_v31  ;;  %15613 = vst [vmem:[#allocation75_spill] sm:$0xff] %v11238_v55  ;;  %v11265_v8 = vadd.f32 %v15626_v43, %v11037_v26  ;;  %v11269_v62 = vadd.f32 %v15627_v18, %v11040_v10  ;;  %v11273_v45 = vadd.f32 %v15628_v49, %v11043_v30  ;;  %v15632_v43 = vld [vmem:[#allocation130_spill] sm:$0xff]  ;;  %v15633_v18 = vld [vmem:[#allocation120_spill] sm:$0xff] }
 0x335   :  { %15614 = vst [vmem:[#allocation77_spill] sm:$0xff] %v11240_v20  ;;  %15615 = vst [vmem:[#allocation111_spill] sm:$0xff] %v11242_v7  ;;  %v11277_v23 = vadd.f32 %v15629_v3, %v11046_v44  ;;  %v11281_v14 = vadd.f32 %v15630_v42, %v11049_v12  ;;  %v11285_v26 = vadd.f32 %v15631_v33, %v11052_v56  ;;  %v15634_v49 = vld [vmem:[#allocation131_spill] sm:$0xff]  ;;  %v15635_v3 = vld [vmem:[#allocation122_spill] sm:$0xff] }
 0x336   :  { %15616 = vst [vmem:[#allocation103_spill] sm:$0xff] %v11244_v19  ;;  %15617 = vst [vmem:[#allocation140_spill] sm:$0xff] %v11246_v25  ;;  %v11289_v10 = vadd.f32 %v15632_v43, %v11055_v0  ;;  %v11293_v30 = vadd.f32 %v15633_v18, %v11058_v63  ;;  %v11297_v44 = vadd.f32 %v15634_v49, %v11061_v54  ;;  %v15636_v42 = vld [vmem:[#allocation132_spill] sm:$0xff]  ;;  %v15638_v33 = vld [vmem:[#allocation123_spill] sm:$0xff] }
 0x337   :  { %15618 = vst [vmem:[#allocation104_spill] sm:$0xff] %v11248_v41  ;;  %15619 = vst [vmem:[#allocation106_spill] sm:$0xff] %v11250_v34  ;;  %v11301_v12 = vadd.f32 %v15635_v3, %v11064_v51  ;;  %v11305_v56 = vadd.f32 %v15636_v42, %v11067_v59  ;;  %v11309_v0 = vadd.f32 %v15638_v33, %v11070_v60  ;;  %v15640_v43 = vld [vmem:[#allocation134_spill] sm:$0xff]  ;;  %v15642_v18 = vld [vmem:[#allocation124_spill] sm:$0xff] }
 0x338   :  { %15620 = vst [vmem:[#allocation54_spill] sm:$0xff] %v11252_v35  ;;  %15621 = vst [vmem:[#allocation56_spill] sm:$0xff] %v11254_v53  ;;  %v11313_v63 = vadd.f32 %v15640_v43, %v11073_v40  ;;  %v11317_v54 = vadd.f32 %v15642_v18, %v11076_v52  ;;  %v15644_v49 = vld [vmem:[#allocation135_spill] sm:$0xff]  ;;  %v15646_v3 = vld [vmem:[#allocation126_spill] sm:$0xff] }
 0x339   :  { %15622 = vst [vmem:[#allocation58_spill] sm:$0xff] %v11256_v21  ;;  %15623 = vst [vmem:[#allocation59_spill] sm:$0xff] %v11258_v24  ;;  %v11321_v51 = vadd.f32 %v15644_v49, %v11079_v38  ;;  %v11325_v59 = vadd.f32 %v15646_v3, %v11082_v6  ;;  %v15648_v42 = vld [vmem:[#allocation136_spill] sm:$0xff]  ;;  %v15650_v33 = vld [vmem:[#allocation127_spill] sm:$0xff] }
 0x33a   :  { %15625 = vst [vmem:[#allocation61_spill] sm:$0xff] %v11261_v29  ;;  %15637 = vst [vmem:[#allocation63_spill] sm:$0xff] %v11305_v56  ;;  %v11329_v60 = vadd.f32 %v15648_v42, %v11085_v17  ;;  %v11333_v40 = vadd.f32 %v15650_v33, %v11088_v48  ;;  %v15652_v43 = vld [vmem:[#allocation138_spill] sm:$0xff]  ;;  %v15654_v18 = vld [vmem:[#allocation89_spill] sm:$0xff] }
 0x33b   :  { %15639 = vst [vmem:[#allocation156_spill] sm:$0xff] %v11309_v0  ;;  %15641 = vst [vmem:[#allocation157_spill] sm:$0xff] %v11313_v63  ;;  %v11337_v52 = vadd.f32 %v15652_v43, %v11091_v50  ;;  %v15655_v53 = vld [vmem:[#allocation128_spill] sm:$0xff]  ;;  %v15657_v49 = vld [vmem:[#allocation70_spill] sm:$0xff] }
 0x33c   :  { %15643 = vst [vmem:[#allocation158_spill] sm:$0xff] %v11317_v54  ;;  %15645 = vst [vmem:[#allocation160_spill] sm:$0xff] %v11321_v51  ;;  %v11341_v38 = vadd.f32 %v15655_v53, %v15654_v18  ;;  %v15658_v35 = vld [vmem:[#allocation148_spill] sm:$0xff]  ;;  %v15660_v3 = vld [vmem:[#allocation73_spill] sm:$0xff] }
 0x33d   :  { %15647 = vst [vmem:[#allocation161_spill] sm:$0xff] %v11325_v59  ;;  %15649 = vst [vmem:[#allocation162_spill] sm:$0xff] %v11329_v60  ;;  %v11345_v6 = vadd.f32 %v15658_v35, %v15657_v49  ;;  %v15661_v34 = vld [vmem:[#allocation149_spill] sm:$0xff]  ;;  %v15663_v42 = vld [vmem:[#allocation78_spill] sm:$0xff] }
 0x33e   :  { %15651 = vst [vmem:[#allocation164_spill] sm:$0xff] %v11333_v40  ;;  %15653 = vst [vmem:[#allocation165_spill] sm:$0xff] %v11337_v52  ;;  %v11349_v17 = vadd.f32 %v15661_v34, %v15660_v3  ;;  %v15664_v41 = vld [vmem:[#allocation150_spill] sm:$0xff]  ;;  %v15666_v33 = vld [vmem:[#allocation80_spill] sm:$0xff] }
 0x33f   :  { %15656 = vst [vmem:[#allocation53_spill] sm:$0xff] %v11341_v38  ;;  %15659 = vst [vmem:[#allocation51_spill] sm:$0xff] %v11345_v6  ;;  %v11353_v48 = vadd.f32 %v15664_v41, %v15663_v42  ;;  %v15667_v25 = vld [vmem:[#allocation152_spill] sm:$0xff]  ;;  %v15669_v43 = vld [vmem:[#allocation81_spill] sm:$0xff] }
 0x340   :  { %15662 = vst [vmem:[#allocation112_spill] sm:$0xff] %v11349_v17  ;;  %v11357_v50 = vadd.f32 %v15667_v25, %v15666_v33  ;;  %v15670_v19 = vld [vmem:[#allocation153_spill] sm:$0xff]  ;;  %v15672_v18 = vld [vmem:[#allocation83_spill] sm:$0xff]  ;;  %v15673_v7 = vld [vmem:[#allocation154_spill] sm:$0xff] }
 0x341   :  { %15665 = vst [vmem:[#allocation114_spill] sm:$0xff] %v11353_v48  ;;  %v11361_v53 = vadd.f32 %v15670_v19, %v15669_v43  ;;  %v11365_v35 = vadd.f32 %v15673_v7, %v15672_v18  ;;  %v15675_v49 = vld [vmem:[#allocation35_spill] sm:$0xff]  ;;  %v15676_v20 = vld [vmem:[#allocation46_spill] sm:$0xff]  ;;  %v15678_v3 = vld [vmem:[#allocation17_spill] sm:$0xff] }
 0x342   :  { %15668 = vst [vmem:[#allocation115_spill] sm:$0xff] %v11357_v50  ;;  %v11369_v34 = vadd.f32 %v15676_v20, %v15675_v49  ;;  %v15679_v55 = vld [vmem:[#allocation47_spill] sm:$0xff]  ;;  %v15682_v31 = vld [vmem:[#allocation48_spill] sm:$0xff]  ;;  %v15684_v33 = vld [vmem:[#allocation9_spill] sm:$0xff] }
 0x343   :  { %15671 = vst [vmem:[#allocation116_spill] sm:$0xff] %v11361_v53  ;;  %15674 = vst [vmem:[#allocation118_spill] sm:$0xff] %v11365_v35  ;;  %v11373_v41 = vadd.f32 %v15679_v55, %v15678_v3  ;;  %v15681_v42 = vld [vmem:[#allocation19_spill] sm:$0xff]  ;;  %v15685_v57 = vld [vmem:[#allocation96_spill] sm:$0xff] }
 0x344   :  { %15677 = vst [vmem:[#allocation119_spill] sm:$0xff] %v11369_v34  ;;  %v11377_v25 = vadd.f32 %v15682_v31, %v15681_v42  ;;  %v11381_v19 = vadd.f32 %v15685_v57, %v15684_v33  ;;  %v15687_v43 = vld [vmem:[#allocation10_spill] sm:$0xff]  ;;  %v15688_v9 = vld [vmem:[#allocation139_spill] sm:$0xff]  ;;  %v15690_v18 = vld [vmem:[#allocation13_spill] sm:$0xff] }
 0x345   :  { %15680 = vst [vmem:[#allocation130_spill] sm:$0xff] %v11373_v41  ;;  %v11385_v7 = vadd.f32 %v15688_v9, %v15687_v43  ;;  %v15691_v47 = vld [vmem:[#allocation97_spill] sm:$0xff]  ;;  %v15694_v3 = vld [vmem:[#allocation142_spill] sm:$0xff]  ;;  %v15695_v31 = vld [vmem:[#allocation143_spill] sm:$0xff] }
 0x346   :  { %15683 = vst [vmem:[#allocation120_spill] sm:$0xff] %v11377_v25  ;;  %15686 = vst [vmem:[#allocation131_spill] sm:$0xff] %v11381_v19  ;;  %v11389_v20 = vadd.f32 %v15691_v47, %v15690_v18  ;;  %v15693_v49 = vld [vmem:[#allocation141_spill] sm:$0xff]  ;;  %v3800_v11 = vrot.slane %v15694_v3, %v11261_v29  ;;  %v3804_v42 = vrot.slane %v15695_v31, %v11261_v29  ;;  %v15696_v57 = vld [vmem:[#allocation144_spill] sm:$0xff] }
 0x347   :  { %15689 = vst [vmem:[#allocation122_spill] sm:$0xff] %v11385_v7  ;;  %v3796_v55 = vrot.slane %v15693_v49, %v11261_v29  ;;  %v3808_v33 = vrot.slane %v15696_v57, %v11261_v29  ;;  %v15697_v37 = vld [vmem:[#allocation107_spill] sm:$0xff]  ;;  %v15698_v43 = vld [vmem:[#allocation108_spill] sm:$0xff]  ;;  %v15699_v47 = vld [vmem:[#allocation109_spill] sm:$0xff] }
 0x348   :  { %15692 = vst [vmem:[#allocation132_spill] sm:$0xff] %v11389_v20  ;;  %v3812_v9 = vrot.slane %v15697_v37, %v11261_v29  ;;  %v3816_v61 = vrot.slane %v15698_v43, %v11261_v29  ;;  %v3820_v18 = vrot.slane %v15699_v47, %v11261_v29  ;;  %v15700_v49 = vld [vmem:[#allocation110_spill] sm:$0xff]  ;;  %v15701_v3 = vld [vmem:[#allocation113_spill] sm:$0xff]  ;;  %v3928_v17 = vmul.f32 %v3924_v58, %v3804_v42 }
 0x349   :  { %v3824_v2 = vrot.slane %v15700_v49, %v11261_v29  ;;  %v3828_v28 = vrot.slane %v15701_v3, %v11261_v29  ;;  %v15702_v31 = vld [vmem:[#allocation117_spill] sm:$0xff]  ;;  %v15708_v3 = vld [vmem:[#allocation147_spill] sm:$0xff]  ;;  %v3926_v48 = vmul.f32 %v3924_v58, %v3796_v55  ;;  %v3929_v6 = vmul.f32 %v3924_v58, %v3808_v33 }
 0x34a   :  { %v3832_v32 = vrot.slane %v15702_v31, %v11261_v29  ;;  %v15703_v57 = vld [vmem:[#allocation121_spill] sm:$0xff]  ;;  %v3856_v16 = vrot.slane %v15708_v3, %v11261_v29  ;;  %v15709_v31 = vld [vmem:[#allocation151_spill] sm:$0xff]  ;;  %v15715_v3 = vld [vmem:[#allocation84_spill] sm:$0xff]  ;;  %v3931_v38 = vmul.f32 %v3924_v58, %v3816_v61  ;;  %v3932_v52 = vmul.f32 %v3924_v58, %v3820_v18 }
 0x34b   :  { %v3836_v36 = vrot.slane %v15703_v57, %v11261_v29  ;;  %v15704_v37 = vld [vmem:[#allocation125_spill] sm:$0xff]  ;;  %v3860_v1 = vrot.slane %v15709_v31, %v11261_v29  ;;  %v15710_v57 = vld [vmem:[#allocation155_spill] sm:$0xff]  ;;  %v3884_v5 = vrot.slane %v15715_v3, %v11261_v29  ;;  %v15716_v31 = vld [vmem:[#allocation22_spill] sm:$0xff]  ;;  %v3934_v40 = vmul.f32 %v3924_v58, %v3828_v28 }
 0x34c   :  { %v3840_v27 = vrot.slane %v15704_v37, %v11261_v29  ;;  %v15705_v43 = vld [vmem:[#allocation129_spill] sm:$0xff]  ;;  %v3864_v39 = vrot.slane %v15710_v57, %v11261_v29  ;;  %v15711_v37 = vld [vmem:[#allocation159_spill] sm:$0xff]  ;;  %v3888_v20 = vrot.slane %v15716_v31, %v11261_v29  ;;  %v15723_v31 = vld [vmem:[#allocation28_spill] sm:$0xff]  ;;  %v3935_v60 = vmul.f32 %v3924_v58, %v3832_v32 }
 0x34d   :  { %v3844_v46 = vrot.slane %v15705_v43, %v11261_v29  ;;  %v15706_v47 = vld [vmem:[#allocation133_spill] sm:$0xff]  ;;  %v3868_v13 = vrot.slane %v15711_v37, %v11261_v29  ;;  %v15712_v43 = vld [vmem:[#allocation163_spill] sm:$0xff]  ;;  %v3916_v53 = vrot.slane %v15723_v31, %v11261_v29  ;;  %v3941_v63 = vmul.f32 %v3924_v58, %v3856_v16 }
 0x34e   :  { %v3848_v22 = vrot.slane %v15706_v47, %v11261_v29  ;;  %v15707_v49 = vld [vmem:[#allocation137_spill] sm:$0xff]  ;;  %v3872_v15 = vrot.slane %v15712_v43, %v11261_v29  ;;  %v15717_v57 = vld [vmem:[#allocation23_spill] sm:$0xff]  ;;  %v15719_v43 = vld [vmem:[#allocation34_spill] sm:$0xff]  ;;  %v3937_v59 = vmul.f32 %v3924_v58, %v3840_v27  ;;  %v3942_v31 = vmul.f32 %v3924_v58, %v3860_v1 }
 0x34f   :  { %v3852_v4 = vrot.slane %v15707_v49, %v11261_v29  ;;  %v15713_v47 = vld [vmem:[#allocation93_spill] sm:$0xff]  ;;  %v15714_v49 = vld [vmem:[#allocation79_spill] sm:$0xff]  ;;  %v3892_v7 = vrot.slane %v15717_v57, %v11261_v29  ;;  %v3900_v25 = vrot.slane %v15719_v43, %v11261_v29  ;;  %v3930_v43 = vmul.f32 %v3924_v58, %v3812_v9 }
 0x350   :  { %v3876_v24 = vrot.slane %v15713_v47, %v11261_v29  ;;  %v3880_v21 = vrot.slane %v15714_v49, %v11261_v29  ;;  %v15718_v37 = vld [vmem:[#allocation85_spill] sm:$0xff]  ;;  %v15720_v47 = vld [vmem:[#allocation36_spill] sm:$0xff]  ;;  %v15722_v3 = vld [vmem:[#allocation27_spill] sm:$0xff]  ;;  %v3938_v51 = vmul.f32 %v3924_v58, %v3844_v46  ;;  %v3943_v0 = vmul.f32 %v3924_v58, %v3864_v39 }
 0x351   :  { %v3896_v19 = vrot.slane %v15718_v37, %v11261_v29  ;;  %v3904_v41 = vrot.slane %v15720_v47, %v11261_v29  ;;  %v15721_v49 = vld [vmem:[#allocation25_spill] sm:$0xff]  ;;  %v3912_v35 = vrot.slane %v15722_v3, %v11261_v29  ;;  %v3927_v37 = vmul.f32 %v3924_v58, %v3800_v11 }
 0x352   :  { %v3908_v34 = vrot.slane %v15721_v49, %v11261_v29  ;;  %v15724_v57 = vld [vmem:[#allocation33_spill] sm:$0xff]  ;;  %v3933_v47 = vmul.f32 %v3924_v58, %v3824_v2  ;;  %v3936_v49 = vmul.f32 %v3924_v58, %v3836_v36  ;;  %v3939_v3 = vmul.f32 %v3924_v58, %v3848_v22 }
 0x353   :  { %v3920_v50 = vrot.slane %v15724_v57, %v11261_v29  ;;  %v3940_v54 = vmul.f32 %v3924_v58, %v3852_v4  ;;  %v3944_v56 = vmul.f32 %v3924_v58, %v3868_v13  ;;  %v3945_v57 = vmul.f32 %v3924_v58, %v3872_v15 }
 0x354   :  { %v3946_v55 = vmul.f32 %v3924_v58, %v3876_v24  ;;  %v3947_v11 = vmul.f32 %v3924_v58, %v3880_v21  ;;  %v3948_v42 = vmul.f32 %v3924_v58, %v3884_v5  ;;  %v3949_v33 = vmul.f32 %v3924_v58, %v3888_v20  ;;  %v15735_v21 = vld [vmem:[#allocation63_spill] sm:$0xff] }
 0x355   :  { %v3950_v9 = vmul.f32 %v3924_v58, %v3892_v7  ;;  %v3951_v61 = vmul.f32 %v3924_v58, %v3896_v19  ;;  %v3952_v18 = vmul.f32 %v3924_v58, %v3900_v25  ;;  %v3953_v2 = vmul.f32 %v3924_v58, %v3904_v41  ;;  %v15767_v7 = vld [vmem:[#allocation119_spill] sm:$0xff] }
 0x356   :  { %v3954_v28 = vmul.f32 %v3924_v58, %v3908_v34  ;;  %v3955_v32 = vmul.f32 %v3924_v58, %v3912_v35  ;;  %v3956_v36 = vmul.f32 %v3924_v58, %v3916_v53  ;;  %v3957_v27 = vmul.f32 %v3924_v58, %v3920_v50  ;;  %v15761_v34 = vld [vmem:[#allocation115_spill] sm:$0xff] }
 0x357   :  { %v11456_v22 = vadd.f32 %v3926_v48, %v11265_v8  ;;  %v11459_v4 = vadd.f32 %v3927_v37, %v11269_v62  ;;  %v11462_v39 = vadd.f32 %v3928_v17, %v11273_v45  ;;  %v11465_v15 = vadd.f32 %v3929_v6, %v11277_v23  ;;  %v15737_v8 = vld [vmem:[#allocation156_spill] sm:$0xff]  ;;  %v15739_v45 = vld [vmem:[#allocation157_spill] sm:$0xff]  ;;  %v15755_v48 = vld [vmem:[#allocation51_spill] sm:$0xff] }
 0x358   :  { %v11468_v46 = vadd.f32 %v3930_v43, %v11281_v14  ;;  %v11471_v5 = vadd.f32 %v3931_v38, %v11285_v26  ;;  %v11474_v58 = vadd.f32 %v3932_v52, %v11289_v10  ;;  %v11477_v13 = vadd.f32 %v3933_v47, %v11293_v30  ;;  %v15741_v14 = vld [vmem:[#allocation158_spill] sm:$0xff]  ;;  %v15743_v10 = vld [vmem:[#allocation160_spill] sm:$0xff] }
 0x359   :  { %15725 = vst [vmem:[#allocation123_spill] sm:$0xff] %v11456_v22  ;;  %15726 = vst [vmem:[#allocation134_spill] sm:$0xff] %v11459_v4  ;;  %v11480_v1 = vadd.f32 %v3934_v40, %v11297_v44  ;;  %v11483_v16 = vadd.f32 %v3935_v60, %v11301_v12  ;;  %v11486_v24 = vadd.f32 %v3936_v49, %v15735_v21  ;;  %v15745_v44 = vld [vmem:[#allocation161_spill] sm:$0xff]  ;;  %v15747_v12 = vld [vmem:[#allocation162_spill] sm:$0xff] }
 0x35a   :  { %15727 = vst [vmem:[#allocation124_spill] sm:$0xff] %v11462_v39  ;;  %15728 = vst [vmem:[#allocation135_spill] sm:$0xff] %v11465_v15  ;;  %v11489_v62 = vadd.f32 %v3937_v59, %v15737_v8  ;;  %v11492_v23 = vadd.f32 %v3938_v51, %v15739_v45  ;;  %v11495_v26 = vadd.f32 %v3939_v3, %v15741_v14  ;;  %v15749_v52 = vld [vmem:[#allocation164_spill] sm:$0xff]  ;;  %v15751_v59 = vld [vmem:[#allocation165_spill] sm:$0xff] }
 0x35b   :  { %15729 = vst [vmem:[#allocation126_spill] sm:$0xff] %v11468_v46  ;;  %15730 = vst [vmem:[#allocation136_spill] sm:$0xff] %v11471_v5  ;;  %v11498_v30 = vadd.f32 %v3940_v54, %v15743_v10  ;;  %v11501_v40 = vadd.f32 %v3941_v63, %v15745_v44  ;;  %v11504_v60 = vadd.f32 %v3942_v31, %v15747_v12  ;;  %v15753_v51 = vld [vmem:[#allocation53_spill] sm:$0xff]  ;;  %v15757_v54 = vld [vmem:[#allocation112_spill] sm:$0xff] }
 0x35c   :  { %15731 = vst [vmem:[#allocation127_spill] sm:$0xff] %v11474_v58  ;;  %15732 = vst [vmem:[#allocation138_spill] sm:$0xff] %v11477_v13  ;;  %v11507_v38 = vadd.f32 %v3943_v0, %v15749_v52  ;;  %v11510_v6 = vadd.f32 %v3944_v56, %v15751_v59  ;;  %v11513_v17 = vadd.f32 %v3945_v57, %v15753_v51  ;;  %v15759_v63 = vld [vmem:[#allocation114_spill] sm:$0xff]  ;;  %v15763_v0 = vld [vmem:[#allocation116_spill] sm:$0xff] }
 0x35d   :  { %15733 = vst [vmem:[#allocation89_spill] sm:$0xff] %v11480_v1  ;;  %15734 = vst [vmem:[#allocation128_spill] sm:$0xff] %v11483_v16  ;;  %v11516_v50 = vadd.f32 %v3946_v55, %v15755_v48  ;;  %v11519_v53 = vadd.f32 %v3947_v11, %v15757_v54  ;;  %v11522_v35 = vadd.f32 %v3948_v42, %v15759_v63  ;;  %v15765_v56 = vld [vmem:[#allocation118_spill] sm:$0xff]  ;;  %v15771_v47 = vld [vmem:[#allocation120_spill] sm:$0xff] }
 0x35e   :  { %15736 = vst [vmem:[#allocation70_spill] sm:$0xff] %v11486_v24  ;;  %15738 = vst [vmem:[#allocation148_spill] sm:$0xff] %v11489_v62  ;;  %v11525_v41 = vadd.f32 %v3949_v33, %v15761_v34  ;;  %v11528_v25 = vadd.f32 %v3950_v9, %v15763_v0  ;;  %v11531_v19 = vadd.f32 %v3951_v61, %v15765_v56  ;;  %v15769_v37 = vld [vmem:[#allocation130_spill] sm:$0xff]  ;;  %v15773_v3 = vld [vmem:[#allocation131_spill] sm:$0xff] }
 0x35f   :  { %15740 = vst [vmem:[#allocation73_spill] sm:$0xff] %v11492_v23  ;;  %15742 = vst [vmem:[#allocation149_spill] sm:$0xff] %v11495_v26  ;;  %v11534_v20 = vadd.f32 %v3952_v18, %v15767_v7  ;;  %v11537_v43 = vadd.f32 %v3953_v2, %v15769_v37  ;;  %v11540_v49 = vadd.f32 %v3954_v28, %v15771_v47  ;;  %v15775_v57 = vld [vmem:[#allocation122_spill] sm:$0xff]  ;;  %v15776_v11 = vld [vmem:[#allocation132_spill] sm:$0xff] }
 0x360   :  { %15744 = vst [vmem:[#allocation78_spill] sm:$0xff] %v11498_v30  ;;  %15746 = vst [vmem:[#allocation150_spill] sm:$0xff] %v11501_v40  ;;  %v11543_v31 = vadd.f32 %v3955_v32, %v15773_v3  ;;  %v11546_v55 = vadd.f32 %v3956_v36, %v15775_v57  ;;  %v11549_v42 = vadd.f32 %v3957_v27, %v15776_v11  ;;  %v15777_v33 = vld [vmem:[#allocation82_spill] sm:$0xff]  ;;  %v15778_v9 = vld [vmem:[#allocation20_spill] sm:$0xff] }
 0x361   :  { %15748 = vst [vmem:[#allocation80_spill] sm:$0xff] %v11504_v60  ;;  %15750 = vst [vmem:[#allocation152_spill] sm:$0xff] %v11507_v38  ;;  %v4387_v61 = vrot.slane %v15778_v9, %v15777_v33  ;;  %v15779_v18 = vld [vmem:[#allocation21_spill] sm:$0xff]  ;;  %v15780_v2 = vld [vmem:[#allocation26_spill] sm:$0xff] }
 0x362   :  { %15752 = vst [vmem:[#allocation81_spill] sm:$0xff] %v11510_v6  ;;  %15754 = vst [vmem:[#allocation153_spill] sm:$0xff] %v11513_v17  ;;  %v4391_v21 = vrot.slane %v15779_v18, %v15777_v33  ;;  %v4395_v8 = vrot.slane %v15780_v2, %v15777_v33  ;;  %v15781_v28 = vld [vmem:[#allocation12_spill] sm:$0xff]  ;;  %v15782_v32 = vld [vmem:[#allocation14_spill] sm:$0xff] }
 0x363   :  { %15756 = vst [vmem:[#allocation83_spill] sm:$0xff] %v11516_v50  ;;  %15758 = vst [vmem:[#allocation154_spill] sm:$0xff] %v11519_v53  ;;  %v4399_v45 = vrot.slane %v15781_v28, %v15777_v33  ;;  %v4403_v14 = vrot.slane %v15782_v32, %v15777_v33  ;;  %v15783_v36 = vld [vmem:[#allocation15_spill] sm:$0xff]  ;;  %v15784_v27 = vld [vmem:[#allocation16_spill] sm:$0xff]  ;;  %v4515_v53 = vpop.permute.xlu1 %4514 }
 0x364   :  { %15760 = vst [vmem:[#allocation35_spill] sm:$0xff] %v11522_v35  ;;  %15762 = vst [vmem:[#allocation46_spill] sm:$0xff] %v11525_v41  ;;  %v4407_v10 = vrot.slane %v15783_v36, %v15777_v33  ;;  %v4411_v44 = vrot.slane %v15784_v27, %v15777_v33  ;;  %v15785_v12 = vld [vmem:[#allocation18_spill] sm:$0xff]  ;;  %v15787_v48 = vld [vmem:[#allocation55_spill] sm:$0xff] }
 0x365   :  { %15764 = vst [vmem:[#allocation17_spill] sm:$0xff] %v11528_v25  ;;  %15766 = vst [vmem:[#allocation47_spill] sm:$0xff] %v11531_v19  ;;  %v4415_v52 = vrot.slane %v15785_v12, %v15777_v33  ;;  %v15786_v59 = vld [vmem:[#allocation50_spill] sm:$0xff]  ;;  %v4423_v54 = vrot.slane %v15787_v48, %v15777_v33  ;;  %v15788_v63 = vld [vmem:[#allocation7_spill] sm:$0xff] }
 0x366   :  { %15768 = vst [vmem:[#allocation19_spill] sm:$0xff] %v11534_v20  ;;  %15770 = vst [vmem:[#allocation48_spill] sm:$0xff] %v11537_v43  ;;  %v4419_v51 = vrot.slane %v15786_v59, %v15777_v33  ;;  %v4427_v34 = vrot.slane %v15788_v63, %v15777_v33  ;;  %v15789_v0 = vld [vmem:[#allocation8_spill] sm:$0xff]  ;;  %v15790_v7 = vld [vmem:[#allocation11_spill] sm:$0xff] }
 0x367   :  { %15772 = vst [vmem:[#allocation9_spill] sm:$0xff] %v11540_v49  ;;  %15774 = vst [vmem:[#allocation96_spill] sm:$0xff] %v11543_v31  ;;  %v4431_v56 = vrot.slane %v15789_v0, %v15777_v33  ;;  %v4435_v37 = vrot.slane %v15790_v7, %v15777_v33  ;;  %v15791_v47 = vld [vmem:[#allocation49_spill] sm:$0xff]  ;;  %v15795_v19 = vld [vmem:[#allocation95_spill] sm:$0xff] }
 0x368   :  { %v4439_v3 = vrot.slane %v15791_v47, %v15777_v33  ;;  %v15792_v57 = vld [vmem:[#allocation29_spill] sm:$0xff]  ;;  %v4455_v25 = vrot.slane %v15795_v19, %v15777_v33  ;;  %v15796_v41 = vld [vmem:[#allocation98_spill] sm:$0xff]  ;;  %v15801_v23 = vld [vmem:[#allocation99_spill] sm:$0xff]  ;;  %v11633_v19 = vmul.f32 %v4515_v53, %v4423_v54 }
 0x369   :  { %v4443_v11 = vrot.slane %v15792_v57, %v15777_v33  ;;  %v15793_v31 = vld [vmem:[#allocation37_spill] sm:$0xff]  ;;  %v4459_v35 = vrot.slane %v15796_v41, %v15777_v33  ;;  %v15799_v60 = vld [vmem:[#allocation62_spill] sm:$0xff]  ;;  %v4479_v62 = vrot.slane %v15801_v23, %v15777_v33  ;;  %v15802_v24 = vld [vmem:[#allocation100_spill] sm:$0xff]  ;;  %v11627_v41 = vmul.f32 %v4515_v53, %v4411_v44 }
 0x36a   :  { %v4447_v49 = vrot.slane %v15793_v31, %v15777_v33  ;;  %v15794_v43 = vld [vmem:[#allocation45_spill] sm:$0xff]  ;;  %v4471_v40 = vrot.slane %v15799_v60, %v15777_v33  ;;  %v15800_v30 = vld [vmem:[#allocation66_spill] sm:$0xff]  ;;  %v4483_v16 = vrot.slane %v15802_v24, %v15777_v33  ;;  %v15804_v58 = vld [vmem:[#allocation87_spill] sm:$0xff]  ;;  %15819 = vst [vmem:[#allocation108_spill] sm:$0xff] %v11633_v19  ;;  %v11649_v44 = vmul.f32 %v4515_v53, %v4455_v25 }
 0x36b   :  { %v4451_v20 = vrot.slane %v15794_v43, %v15777_v33  ;;  %v15797_v50 = vld [vmem:[#allocation105_spill] sm:$0xff]  ;;  %v4475_v26 = vrot.slane %v15800_v30, %v15777_v33  ;;  %v15803_v1 = vld [vmem:[#allocation86_spill] sm:$0xff]  ;;  %v4491_v5 = vrot.slane %v15804_v58, %v15777_v33  ;;  %v15805_v46 = vld [vmem:[#allocation88_spill] sm:$0xff]  ;;  %v11619_v58 = vmul.f32 %v4515_v53, %v4395_v8  ;;  %15816 = vst [vmem:[#allocation143_spill] sm:$0xff] %v11627_v41 }
 0x36c   :  { %v4463_v17 = vrot.slane %v15797_v50, %v15777_v33  ;;  %v15798_v6 = vld [vmem:[#allocation57_spill] sm:$0xff]  ;;  %v4487_v13 = vrot.slane %v15803_v1, %v15777_v33  ;;  %v4495_v15 = vrot.slane %v15805_v46, %v15777_v33  ;;  %v15806_v39 = vld [vmem:[#allocation90_spill] sm:$0xff]  ;;  %v15807_v22 = vld [vmem:[#allocation91_spill] sm:$0xff]  ;;  %v11617_v1 = vmul.f32 %v4515_v53, %v4391_v21  ;;  %15827 = vst [vmem:[#allocation133_spill] sm:$0xff] %v11649_v44 }
 0x36d   :  { %v4467_v38 = vrot.slane %v15798_v6, %v15777_v33  ;;  %v4499_v4 = vrot.slane %v15806_v39, %v15777_v33  ;;  %v4503_v29 = vrot.slane %v15807_v22, %v15777_v33  ;;  %v15808_v23 = vld [vmem:[#allocation92_spill] sm:$0xff]  ;;  %v15809_v24 = vld [vmem:[#allocation94_spill] sm:$0xff]  ;;  %v11615_v6 = vmul.f32 %v4515_v53, %v4387_v61  ;;  %15812 = vst [vmem:[#allocation13_spill] sm:$0xff] %v11619_v58 }
 0x36e   :  { %v4507_v30 = vrot.slane %v15808_v23, %v15777_v33  ;;  %v4511_v60 = vrot.slane %v15809_v24, %v15777_v33  ;;  %15811 = vst [vmem:[#allocation139_spill] sm:$0xff] %v11617_v1  ;;  %v11621_v50 = vmul.f32 %v4515_v53, %v4399_v45  ;;  %v11623_v46 = vmul.f32 %v4515_v53, %v4403_v14  ;;  %v15883_v41 = vld [vmem:[#allocation124_spill] sm:$0xff]  ;;  %v15896_v58 = vld [vmem:[#allocation102_spill] sm:$0xff]  ;;  %v15904_v1 = vld [vmem:[#allocation73_spill] sm:$0xff] }
 0x36f   :  { %15810 = vst [vmem:[#allocation10_spill] sm:$0xff] %v11615_v6  ;;  %v11625_v39 = vmul.f32 %v4515_v53, %v4407_v10  ;;  %v11629_v22 = vmul.f32 %v4515_v53, %v4415_v52  ;;  %v11631_v23 = vmul.f32 %v4515_v53, %v4419_v51  ;;  %v11635_v33 = vmul.f32 %v4515_v53, %v4427_v34  ;;  %v15906_v6 = vld [vmem:[#allocation149_spill] sm:$0xff] }
 0x370   :  { %15813 = vst [vmem:[#allocation97_spill] sm:$0xff] %v11621_v50  ;;  %15814 = vst [vmem:[#allocation141_spill] sm:$0xff] %v11623_v46  ;;  %v11637_v61 = vmul.f32 %v4515_v53, %v4431_v56  ;;  %v11639_v21 = vmul.f32 %v4515_v53, %v4435_v37  ;;  %v11641_v8 = vmul.f32 %v4515_v53, %v4439_v3  ;;  %v15894_v50 = vld [vmem:[#allocation24_spill] sm:$0xff] }
 0x371   :  { %15815 = vst [vmem:[#allocation142_spill] sm:$0xff] %v11625_v39  ;;  %15817 = vst [vmem:[#allocation144_spill] sm:$0xff] %v11629_v22  ;;  %v11643_v45 = vmul.f32 %v4515_v53, %v4443_v11  ;;  %v11645_v14 = vmul.f32 %v4515_v53, %v4447_v49  ;;  %v11647_v10 = vmul.f32 %v4515_v53, %v4451_v20  ;;  %v15884_v39 = vld [vmem:[#allocation64_spill] sm:$0xff] }
 0x372   :  { %15818 = vst [vmem:[#allocation107_spill] sm:$0xff] %v11631_v23  ;;  %15820 = vst [vmem:[#allocation109_spill] sm:$0xff] %v11635_v33  ;;  %v11651_v52 = vmul.f32 %v4515_v53, %v4459_v35  ;;  %v11653_v51 = vmul.f32 %v4515_v53, %v4463_v17  ;;  %v11655_v54 = vmul.f32 %v4515_v53, %v4467_v38 }
 0x373   :  { %15821 = vst [vmem:[#allocation110_spill] sm:$0xff] %v11637_v61  ;;  %15822 = vst [vmem:[#allocation113_spill] sm:$0xff] %v11639_v21  ;;  %v11657_v34 = vmul.f32 %v4515_v53, %v4471_v40  ;;  %v11659_v56 = vmul.f32 %v4515_v53, %v4475_v26  ;;  %v11661_v37 = vmul.f32 %v4515_v53, %v4479_v62  ;;  %v15840_v26 = vld [vmem:[#allocation58_spill] sm:$0xff] }
 0x374   :  { %15823 = vst [vmem:[#allocation117_spill] sm:$0xff] %v11641_v8  ;;  %15824 = vst [vmem:[#allocation121_spill] sm:$0xff] %v11643_v45  ;;  %v11663_v3 = vmul.f32 %v4515_v53, %v4483_v16  ;;  %v11665_v49 = vmul.f32 %v4515_v53, %v4487_v13  ;;  %v11667_v20 = vmul.f32 %v4515_v53, %v4491_v5  ;;  %v15841_v16 = vld [vmem:[#allocation59_spill] sm:$0xff]  ;;  %v15842_v5 = vld [vmem:[#allocation52_spill] sm:$0xff] }
 0x375   :  { %15825 = vst [vmem:[#allocation125_spill] sm:$0xff] %v11645_v14  ;;  %15826 = vst [vmem:[#allocation129_spill] sm:$0xff] %v11647_v10  ;;  %v11669_v25 = vmul.f32 %v4515_v53, %v4495_v15  ;;  %v11671_v35 = vmul.f32 %v4515_v53, %v4499_v4  ;;  %v11673_v17 = vmul.f32 %v4515_v53, %v4503_v29 }
 0x376   :  { %15828 = vst [vmem:[#allocation137_spill] sm:$0xff] %v11651_v52  ;;  %15829 = vst [vmem:[#allocation147_spill] sm:$0xff] %v11653_v51  ;;  %v11675_v38 = vmul.f32 %v4515_v53, %v4507_v30  ;;  %v11677_v40 = vmul.f32 %v4515_v53, %v4511_v60  ;;  %v11681_v62 = vadd.f32 %v15840_v26, %v11546_v55  ;;  %v4318_v53 = vpop.permute.xlu0 %4317 }
 0x377   :  { %15830 = vst [vmem:[#allocation151_spill] sm:$0xff] %v11655_v54  ;;  %15831 = vst [vmem:[#allocation155_spill] sm:$0xff] %v11657_v34  ;;  %v11685_v13 = vadd.f32 %v15841_v16, %v11549_v42  ;;  %v4190_v15 = vrot.slane %v15778_v9, %v15842_v5  ;;  %v4194_v4 = vrot.slane %v15779_v18, %v15842_v5 }
 0x378   :  { %15832 = vst [vmem:[#allocation159_spill] sm:$0xff] %v11659_v56  ;;  %15833 = vst [vmem:[#allocation163_spill] sm:$0xff] %v11661_v37  ;;  %v4198_v29 = vrot.slane %v15780_v2, %v15842_v5  ;;  %v4202_v30 = vrot.slane %v15781_v28, %v15842_v5  ;;  %v4206_v60 = vrot.slane %v15782_v32, %v15842_v5 }
 0x379   :  { %15834 = vst [vmem:[#allocation93_spill] sm:$0xff] %v11663_v3  ;;  %15835 = vst [vmem:[#allocation79_spill] sm:$0xff] %v11665_v49  ;;  %v4210_v55 = vrot.slane %v15783_v36, %v15842_v5  ;;  %v4214_v42 = vrot.slane %v15784_v27, %v15842_v5  ;;  %v4218_v11 = vrot.slane %v15785_v12, %v15842_v5 }
 0x37a   :  { %15836 = vst [vmem:[#allocation84_spill] sm:$0xff] %v11667_v20  ;;  %15837 = vst [vmem:[#allocation22_spill] sm:$0xff] %v11669_v25  ;;  %v4222_v26 = vrot.slane %v15786_v59, %v15842_v5  ;;  %v4226_v16 = vrot.slane %v15787_v48, %v15842_v5  ;;  %v4230_v28 = vrot.slane %v15788_v63, %v15842_v5  ;;  %v15843_v63 = vld [vmem:[#allocation95_spill] sm:$0xff] }
 0x37b   :  { %15838 = vst [vmem:[#allocation23_spill] sm:$0xff] %v11671_v35  ;;  %15839 = vst [vmem:[#allocation85_spill] sm:$0xff] %v11673_v17  ;;  %v4234_v32 = vrot.slane %v15789_v0, %v15842_v5  ;;  %v4238_v36 = vrot.slane %v15790_v7, %v15842_v5  ;;  %v4242_v27 = vrot.slane %v15791_v47, %v15842_v5  ;;  %v15844_v0 = vld [vmem:[#allocation98_spill] sm:$0xff]  ;;  %v15845_v7 = vld [vmem:[#allocation105_spill] sm:$0xff] }
 0x37c   :  { %v4246_v12 = vrot.slane %v15792_v57, %v15842_v5  ;;  %v4250_v59 = vrot.slane %v15793_v31, %v15842_v5  ;;  %v4254_v48 = vrot.slane %v15794_v43, %v15842_v5  ;;  %v4258_v2 = vrot.slane %v15843_v63, %v15842_v5  ;;  %v15846_v47 = vld [vmem:[#allocation57_spill] sm:$0xff]  ;;  %v15847_v57 = vld [vmem:[#allocation62_spill] sm:$0xff]  ;;  %v15849_v43 = vld [vmem:[#allocation99_spill] sm:$0xff] }
 0x37d   :  { %v4262_v18 = vrot.slane %v15844_v0, %v15842_v5  ;;  %v4266_v9 = vrot.slane %v15845_v7, %v15842_v5  ;;  %v4270_v17 = vrot.slane %v15846_v47, %v15842_v5  ;;  %v4274_v35 = vrot.slane %v15847_v57, %v15842_v5  ;;  %v15848_v31 = vld [vmem:[#allocation66_spill] sm:$0xff]  ;;  %v15850_v63 = vld [vmem:[#allocation100_spill] sm:$0xff]  ;;  %v15852_v7 = vld [vmem:[#allocation87_spill] sm:$0xff] }
 0x37e   :  { %v4278_v25 = vrot.slane %v15848_v31, %v15842_v5  ;;  %v4282_v20 = vrot.slane %v15849_v43, %v15842_v5  ;;  %v4286_v49 = vrot.slane %v15850_v63, %v15842_v5  ;;  %v15851_v0 = vld [vmem:[#allocation86_spill] sm:$0xff]  ;;  %v4294_v37 = vrot.slane %v15852_v7, %v15842_v5  ;;  %v15853_v47 = vld [vmem:[#allocation88_spill] sm:$0xff]  ;;  %v15855_v31 = vld [vmem:[#allocation91_spill] sm:$0xff] }
 0x37f   :  { %v4290_v3 = vrot.slane %v15851_v0, %v15842_v5  ;;  %v4298_v56 = vrot.slane %v15853_v47, %v15842_v5  ;;  %v15854_v57 = vld [vmem:[#allocation90_spill] sm:$0xff]  ;;  %v4306_v54 = vrot.slane %v15855_v31, %v15842_v5  ;;  %v15856_v43 = vld [vmem:[#allocation92_spill] sm:$0xff]  ;;  %v4314_v63 = vrot.slane %v15809_v24, %v15842_v5  ;;  %v11753_v0 = vpop.permute.xlu0 %4711 }
 0x380   :  { %v4302_v34 = vrot.slane %v15854_v57, %v15842_v5  ;;  %v4310_v51 = vrot.slane %v15856_v43, %v15842_v5  ;;  %v11751_v52 = vmul.f32 %v4318_v53, %v4190_v15  ;;  %15857 = vst [vmem:[#allocation34_spill] sm:$0xff] %v11753_v0  ;;  %v11755_v7 = vmul.f32 %v4318_v53, %v4194_v4  ;;  %v11771_v5 = vpop.permute.xlu1 %4908 }
 0x381   :  { %v11757_v44 = vmul.f32 %v4318_v53, %v4198_v29  ;;  %v11759_v47 = vmul.f32 %v4318_v53, %v4202_v30  ;;  %v11761_v57 = vmul.f32 %v4318_v53, %v4206_v60  ;;  %v11763_v10 = vmul.f32 %v4318_v53, %v4210_v55  ;;  %15858 = vst [vmem:[#allocation36_spill] sm:$0xff] %v11771_v5 }
 0x382   :  { %v11765_v31 = vmul.f32 %v4318_v53, %v4214_v42  ;;  %v11767_v14 = vmul.f32 %v4318_v53, %v4218_v11  ;;  %v11769_v45 = vmul.f32 %v4318_v53, %v4222_v26  ;;  %v11773_v15 = vmul.f32 %v4318_v53, %v4226_v16 }
 0x383   :  { %v11775_v4 = vmul.f32 %v4318_v53, %v4230_v28  ;;  %v11777_v29 = vmul.f32 %v4318_v53, %v4234_v32  ;;  %v11779_v30 = vmul.f32 %v4318_v53, %v4238_v36  ;;  %v11781_v60 = vmul.f32 %v4318_v53, %v4242_v27 }
 0x384   :  { %v11783_v55 = vmul.f32 %v4318_v53, %v4246_v12  ;;  %v11785_v42 = vmul.f32 %v4318_v53, %v4250_v59  ;;  %v11787_v11 = vmul.f32 %v4318_v53, %v4254_v48  ;;  %v11789_v26 = vmul.f32 %v4318_v53, %v4258_v2  ;;  %v11805_v59 = vpop.permute.xlu0 %5105  ;;  %v11819_v61 = vpop.permute.xlu1 %5302 }
 0x385   :  { %v11791_v8 = vmul.f32 %v4318_v53, %v4262_v18  ;;  %v11793_v16 = vmul.f32 %v4318_v53, %v4266_v9  ;;  %v11795_v28 = vmul.f32 %v4318_v53, %v4270_v17  ;;  %v11797_v32 = vmul.f32 %v4318_v53, %v4274_v35  ;;  %15864 = vst [vmem:[#allocation156_spill] sm:$0xff] %v11805_v59 }
 0x386   :  { %v11799_v36 = vmul.f32 %v4318_v53, %v4278_v25  ;;  %v11801_v27 = vmul.f32 %v4318_v53, %v4282_v20  ;;  %v11803_v12 = vmul.f32 %v4318_v53, %v4286_v49  ;;  %v11807_v48 = vmul.f32 %v4318_v53, %v4290_v3  ;;  %v15870_v25 = vld [vmem:[#allocation145_spill] sm:$0xff]  ;;  %15871 = vst [vmem:[#allocation164_spill] sm:$0xff] %v11819_v61  ;;  %v15872_v3 = vld [vmem:[#allocation146_spill] sm:$0xff] }
 0x387   :  { %15859 = vst [vmem:[#allocation25_spill] sm:$0xff] %v11795_v28  ;;  %15860 = vst [vmem:[#allocation27_spill] sm:$0xff] %v11797_v32  ;;  %v11809_v2 = vmul.f32 %v4318_v53, %v4294_v37  ;;  %v11811_v18 = vmul.f32 %v4318_v53, %v4298_v56  ;;  %v11813_v9 = vmul.f32 %v4318_v53, %v4302_v34  ;;  %v15873_v34 = vld [vmem:[#allocation71_spill] sm:$0xff]  ;;  %v15934_v32 = vld [vmem:[#allocation104_spill] sm:$0xff] }
 0x388   :  { %15861 = vst [vmem:[#allocation28_spill] sm:$0xff] %v11799_v36  ;;  %15862 = vst [vmem:[#allocation33_spill] sm:$0xff] %v11801_v27  ;;  %v11815_v17 = vmul.f32 %v4318_v53, %v4306_v54  ;;  %v4350_v35 = vmul.f32 %v4318_v53, %v4310_v51  ;;  %v4351_v21 = vmul.f32 %v4318_v53, %v4314_v63  ;;  %v15930_v27 = vld [vmem:[#allocation103_spill] sm:$0xff]  ;;  %v15932_v36 = vld [vmem:[#allocation140_spill] sm:$0xff] }
 0x389   :  { %15863 = vst [vmem:[#allocation63_spill] sm:$0xff] %v11803_v12  ;;  %15865 = vst [vmem:[#allocation157_spill] sm:$0xff] %v11807_v48  ;;  %v4901_v20 = vrot.slane %v15856_v43, %v15870_v25  ;;  %v4905_v49 = vrot.slane %v15809_v24, %v15870_v25  ;;  %v4704_v37 = vrot.slane %v15856_v43, %v15872_v3  ;;  %v15928_v12 = vld [vmem:[#allocation111_spill] sm:$0xff]  ;;  %v15936_v28 = vld [vmem:[#allocation106_spill] sm:$0xff] }
 0x38a   :  { %15866 = vst [vmem:[#allocation158_spill] sm:$0xff] %v11809_v2  ;;  %15867 = vst [vmem:[#allocation160_spill] sm:$0xff] %v11811_v18  ;;  %v4708_v56 = vrot.slane %v15809_v24, %v15872_v3  ;;  %v5295_v54 = vrot.slane %v15856_v43, %v15873_v34  ;;  %v4382_v51 = vadd.f32 %v4350_v35, %v11681_v62 }
 0x38b   :  { %15868 = vst [vmem:[#allocation161_spill] sm:$0xff] %v11813_v9  ;;  %15869 = vst [vmem:[#allocation162_spill] sm:$0xff] %v11815_v17  ;;  %v4383_v63 = vadd.f32 %v4351_v21, %v11685_v13  ;;  %v4941_v53 = vmul.f32 %v11771_v5, %v4901_v20  ;;  %v5299_v33 = vrot.slane %v15809_v24, %v15873_v34  ;;  %v15875_v13 = vld [vmem:[#allocation72_spill] sm:$0xff]  ;;  %v11845_v20 = vpop.permute.xlu0 %5499  ;;  %v15881_v34 = vld [vmem:[#allocation42_spill] sm:$0xff] }
 0x38c   :  { %v4942_v25 = vmul.f32 %v11771_v5, %v4905_v49  ;;  %v4744_v19 = vmul.f32 %v11753_v0, %v4704_v37  ;;  %v4745_v23 = vmul.f32 %v11753_v0, %v4708_v56  ;;  %v11838_v3 = vmul.f32 %v11819_v61, %v5295_v54  ;;  %15876 = vst [vmem:[#allocation53_spill] sm:$0xff] %v11845_v20  ;;  %v15877_v37 = vld [vmem:[#allocation61_spill] sm:$0xff]  ;;  %v15908_v17 = vld [vmem:[#allocation78_spill] sm:$0xff] }
 0x38d   :  { %v4579_v22 = vadd.f32 %v11675_v38, %v4382_v51  ;;  %v4580_v62 = vadd.f32 %v11677_v40, %v4383_v63  ;;  %v5336_v21 = vmul.f32 %v11819_v61, %v5299_v33  ;;  %v5098_v35 = vrot.slane %v15856_v43, %v15875_v13  ;;  %v15879_v38 = vld [vmem:[#allocation41_spill] sm:$0xff]  ;;  %v15880_v61 = vld [vmem:[#allocation134_spill] sm:$0xff] }
 0x38e   :  { %15874 = vst [vmem:[#allocation165_spill] sm:$0xff] %v11838_v3  ;;  %v5102_v49 = vrot.slane %v15809_v24, %v15875_v13  ;;  %v5492_v56 = vrot.slane %v15856_v43, %v15877_v37  ;;  %v5496_v54 = vrot.slane %v15809_v24, %v15877_v37  ;;  %v15878_v3 = vld [vmem:[#allocation123_spill] sm:$0xff]  ;;  %v4156_v5 = vadd.f32 %v15881_v34, %v15880_v61  ;;  %v15890_v61 = vld [vmem:[#allocation76_spill] sm:$0xff] }
 0x38f   :  { %v4155_v51 = vadd.f32 %v15879_v38, %v15878_v3  ;;  %v4776_v40 = vadd.f32 %v4744_v19, %v4579_v22  ;;  %v4777_v63 = vadd.f32 %v4745_v23, %v4580_v62  ;;  %v5138_v33 = vmul.f32 %v11805_v59, %v5098_v35  ;;  %v15885_v3 = vld [vmem:[#allocation135_spill] sm:$0xff]  ;;  %v15887_v19 = vld [vmem:[#allocation126_spill] sm:$0xff]  ;;  %v15888_v62 = vld [vmem:[#allocation65_spill] sm:$0xff] }
 0x390   :  { %v5139_v0 = vmul.f32 %v11805_v59, %v5102_v49  ;;  %v11860_v13 = vmul.f32 %v11845_v20, %v5492_v56  ;;  %v5533_v43 = vmul.f32 %v11845_v20, %v5496_v54  ;;  %v4157_v24 = vadd.f32 %v15884_v39, %v15883_v41  ;;  %v15886_v22 = vld [vmem:[#allocation67_spill] sm:$0xff]  ;;  %v15889_v38 = vld [vmem:[#allocation136_spill] sm:$0xff]  ;;  %v15892_v59 = vld [vmem:[#allocation101_spill] sm:$0xff] }
 0x391   :  { %v4973_v37 = vadd.f32 %v4941_v53, %v4776_v40  ;;  %v4974_v46 = vadd.f32 %v4942_v25, %v4777_v63  ;;  %v4158_v23 = vadd.f32 %v15886_v22, %v15885_v3  ;;  %v4159_v35 = vadd.f32 %v15888_v62, %v15887_v19  ;;  %v15891_v49 = vld [vmem:[#allocation127_spill] sm:$0xff]  ;;  %v15895_v20 = vld [vmem:[#allocation89_spill] sm:$0xff]  ;;  %v15898_v53 = vld [vmem:[#allocation128_spill] sm:$0xff] }
 0x392   :  { %15882 = vst [vmem:[#allocation51_spill] sm:$0xff] %v11860_v13  ;;  %v4160_v34 = vadd.f32 %v15890_v61, %v15889_v38  ;;  %v4161_v56 = vadd.f32 %v15892_v59, %v15891_v49  ;;  %v15893_v13 = vld [vmem:[#allocation138_spill] sm:$0xff]  ;;  %v4163_v39 = vadd.f32 %v15896_v58, %v15895_v20  ;;  %v15901_v22 = vld [vmem:[#allocation44_spill] sm:$0xff]  ;;  %v15903_v38 = vld [vmem:[#allocation31_spill] sm:$0xff] }
 0x393   :  { %v4162_v54 = vadd.f32 %v15894_v50, %v15893_v13  ;;  %v11877_v41 = vadd.f32 %v5138_v33, %v4973_v37  ;;  %v5171_v25 = vadd.f32 %v5139_v0, %v4974_v46  ;;  %v15899_v40 = vld [vmem:[#allocation30_spill] sm:$0xff]  ;;  %v15902_v62 = vld [vmem:[#allocation148_spill] sm:$0xff] }
 0x394   :  { %v4164_v63 = vadd.f32 %v15899_v40, %v15898_v53  ;;  %v15900_v3 = vld [vmem:[#allocation70_spill] sm:$0xff]  ;;  %v4166_v61 = vadd.f32 %v15903_v38, %v15902_v62  ;;  %v15905_v59 = vld [vmem:[#allocation68_spill] sm:$0xff]  ;;  %v15913_v40 = vld [vmem:[#allocation43_spill] sm:$0xff] }
 0x395   :  { %15897 = vst [vmem:[#allocation112_spill] sm:$0xff] %v11877_v41  ;;  %v4165_v19 = vadd.f32 %v15901_v22, %v15900_v3  ;;  %v4167_v49 = vadd.f32 %v15905_v59, %v15904_v1  ;;  %v15907_v50 = vld [vmem:[#allocation32_spill] sm:$0xff]  ;;  %v5368_v37 = vadd.f32 %v5336_v21, %v5171_v25  ;;  %v15910_v46 = vld [vmem:[#allocation150_spill] sm:$0xff]  ;;  %v15915_v22 = vld [vmem:[#allocation39_spill] sm:$0xff] }
 0x396   :  { %v4168_v13 = vadd.f32 %v15907_v50, %v15906_v6  ;;  %v15909_v58 = vld [vmem:[#allocation60_spill] sm:$0xff]  ;;  %v15911_v0 = vld [vmem:[#allocation38_spill] sm:$0xff]  ;;  %v15916_v62 = vld [vmem:[#allocation81_spill] sm:$0xff] }
 0x397   :  { %v4169_v20 = vadd.f32 %v15909_v58, %v15908_v17  ;;  %v4170_v33 = vadd.f32 %v15911_v0, %v15910_v46  ;;  %v15912_v53 = vld [vmem:[#allocation80_spill] sm:$0xff]  ;;  %v15917_v38 = vld [vmem:[#allocation69_spill] sm:$0xff]  ;;  %v15920_v6 = vld [vmem:[#allocation83_spill] sm:$0xff]  ;;  %v11905_v58 = vadd.f32 %v5533_v43, %v5368_v37 }
 0x398   :  { %v4171_v41 = vadd.f32 %v15913_v40, %v15912_v53  ;;  %v15914_v3 = vld [vmem:[#allocation152_spill] sm:$0xff]  ;;  %v4173_v18 = vadd.f32 %v15917_v38, %v15916_v62  ;;  %v15918_v1 = vld [vmem:[#allocation153_spill] sm:$0xff]  ;;  %v15921_v50 = vld [vmem:[#allocation74_spill] sm:$0xff] }
 0x399   :  { %v4172_v9 = vadd.f32 %v15915_v22, %v15914_v3  ;;  %v15919_v59 = vld [vmem:[#allocation40_spill] sm:$0xff]  ;;  %v4175_v48 = vadd.f32 %v15921_v50, %v15920_v6  ;;  %v15922_v17 = vld [vmem:[#allocation154_spill] sm:$0xff]  ;;  %v15923_v21 = vld [vmem:[#allocation75_spill] sm:$0xff]  ;;  %15924 = vst [vmem:[#allocation114_spill] sm:$0xff] %v11905_v58 }
 0x39a   :  { %v4174_v2 = vadd.f32 %v15919_v59, %v15918_v1  ;;  %v4176_v25 = vadd.f32 %v15923_v21, %v15922_v17  ;;  %v15925_v46 = vld [vmem:[#allocation35_spill] sm:$0xff]  ;;  %v15926_v0 = vld [vmem:[#allocation77_spill] sm:$0xff]  ;;  %v15927_v40 = vld [vmem:[#allocation46_spill] sm:$0xff] }
 0x39b   :  { %v4177_v53 = vadd.f32 %v15926_v0, %v15925_v46  ;;  %v4178_v3 = vadd.f32 %v15928_v12, %v15927_v40  ;;  %v15929_v22 = vld [vmem:[#allocation17_spill] sm:$0xff]  ;;  %v15931_v38 = vld [vmem:[#allocation47_spill] sm:$0xff]  ;;  %v15935_v50 = vld [vmem:[#allocation48_spill] sm:$0xff]  ;;  %v4352_v12 = vadd.f32 %v11751_v52, %v4155_v51  ;;  %v4353_v40 = vadd.f32 %v11755_v7, %v4156_v5 }
 0x39c   :  { %v4179_v62 = vadd.f32 %v15930_v27, %v15929_v22  ;;  %v4180_v1 = vadd.f32 %v15932_v36, %v15931_v38  ;;  %v15933_v59 = vld [vmem:[#allocation19_spill] sm:$0xff]  ;;  %v4182_v17 = vadd.f32 %v15936_v28, %v15935_v50  ;;  %v15937_v43 = vld [vmem:[#allocation9_spill] sm:$0xff]  ;;  %v15938_v37 = vld [vmem:[#allocation54_spill] sm:$0xff]  ;;  %v4354_v27 = vadd.f32 %v11757_v44, %v4157_v24 }
 0x39d   :  { %v4181_v6 = vadd.f32 %v15934_v32, %v15933_v59  ;;  %v4183_v21 = vadd.f32 %v15938_v37, %v15937_v43  ;;  %v15939_v58 = vld [vmem:[#allocation96_spill] sm:$0xff]  ;;  %v4355_v36 = vadd.f32 %v11759_v47, %v4158_v23  ;;  %v4356_v22 = vadd.f32 %v11761_v57, %v4159_v35  ;;  %v15942_v51 = vld [vmem:[#allocation27_spill] sm:$0xff]  ;;  %v15944_v23 = vld [vmem:[#allocation33_spill] sm:$0xff] }
 0x39e   :  { %v15940_v46 = vld [vmem:[#allocation56_spill] sm:$0xff]  ;;  %v4357_v32 = vadd.f32 %v11763_v10, %v4160_v34  ;;  %v4358_v28 = vadd.f32 %v11765_v31, %v4161_v56  ;;  %v4359_v38 = vadd.f32 %v11767_v14, %v4162_v54  ;;  %v4360_v59 = vadd.f32 %v11769_v45, %v4163_v39  ;;  %v15945_v35 = vld [vmem:[#allocation63_spill] sm:$0xff]  ;;  %v15946_v34 = vld [vmem:[#allocation157_spill] sm:$0xff] }
 0x39f   :  { %v4184_v0 = vadd.f32 %v15940_v46, %v15939_v58  ;;  %v4361_v58 = vadd.f32 %v11773_v15, %v4164_v63  ;;  %v4362_v52 = vadd.f32 %v11775_v4, %v4165_v19  ;;  %v4363_v7 = vadd.f32 %v11777_v29, %v4166_v61  ;;  %v15941_v15 = vld [vmem:[#allocation25_spill] sm:$0xff]  ;;  %v15943_v24 = vld [vmem:[#allocation28_spill] sm:$0xff]  ;;  %v15947_v56 = vld [vmem:[#allocation158_spill] sm:$0xff] }
 0x3a0   :  { %v4364_v44 = vadd.f32 %v11779_v30, %v4167_v49  ;;  %v4365_v47 = vadd.f32 %v11781_v60, %v4168_v13  ;;  %v4366_v57 = vadd.f32 %v11783_v55, %v4169_v20  ;;  %v4367_v10 = vadd.f32 %v11785_v42, %v4170_v33  ;;  %v15948_v54 = vld [vmem:[#allocation160_spill] sm:$0xff]  ;;  %v15952_v39 = vld [vmem:[#allocation139_spill] sm:$0xff]  ;;  %v15953_v63 = vld [vmem:[#allocation13_spill] sm:$0xff] }
 0x3a1   :  { %v4368_v31 = vadd.f32 %v11787_v11, %v4171_v41  ;;  %v4369_v14 = vadd.f32 %v11789_v26, %v4172_v9  ;;  %v4370_v45 = vadd.f32 %v11791_v8, %v4173_v18  ;;  %v4371_v5 = vadd.f32 %v11793_v16, %v4174_v2  ;;  %v15949_v9 = vld [vmem:[#allocation161_spill] sm:$0xff]  ;;  %v15950_v18 = vld [vmem:[#allocation162_spill] sm:$0xff] }
 0x3a2   :  { %v4372_v4 = vadd.f32 %v15941_v15, %v4175_v48  ;;  %v4373_v29 = vadd.f32 %v15942_v51, %v4176_v25  ;;  %v4374_v30 = vadd.f32 %v15943_v24, %v4177_v53  ;;  %v4375_v60 = vadd.f32 %v15944_v23, %v4178_v3  ;;  %v15951_v2 = vld [vmem:[#allocation10_spill] sm:$0xff]  ;;  %v15954_v61 = vld [vmem:[#allocation97_spill] sm:$0xff]  ;;  %v15957_v53 = vld [vmem:[#allocation143_spill] sm:$0xff] }
 0x3a3   :  { %v4376_v55 = vadd.f32 %v15945_v35, %v4179_v62  ;;  %v4377_v42 = vadd.f32 %v15946_v34, %v4180_v1  ;;  %v4378_v11 = vadd.f32 %v15947_v56, %v4181_v6  ;;  %v4379_v26 = vadd.f32 %v15948_v54, %v4182_v17  ;;  %v15955_v13 = vld [vmem:[#allocation141_spill] sm:$0xff]  ;;  %v15956_v33 = vld [vmem:[#allocation142_spill] sm:$0xff]  ;;  %v15958_v62 = vld [vmem:[#allocation144_spill] sm:$0xff] }
 0x3a4   :  { %v4380_v8 = vadd.f32 %v15949_v9, %v4183_v21  ;;  %v4381_v16 = vadd.f32 %v15950_v18, %v4184_v0  ;;  %v11954_v48 = vadd.f32 %v15951_v2, %v4352_v12  ;;  %v11957_v41 = vadd.f32 %v15952_v39, %v4353_v40  ;;  %v15959_v6 = vld [vmem:[#allocation107_spill] sm:$0xff]  ;;  %v15960_v17 = vld [vmem:[#allocation108_spill] sm:$0xff]  ;;  %v15961_v37 = vld [vmem:[#allocation109_spill] sm:$0xff] }
 0x3a5   :  { %v11960_v19 = vadd.f32 %v15953_v63, %v4354_v27  ;;  %v11963_v49 = vadd.f32 %v15954_v61, %v4355_v36  ;;  %v11966_v20 = vadd.f32 %v15955_v13, %v4356_v22  ;;  %v11969_v25 = vadd.f32 %v15956_v33, %v4357_v32  ;;  %v15962_v46 = vld [vmem:[#allocation110_spill] sm:$0xff]  ;;  %v15963_v12 = vld [vmem:[#allocation113_spill] sm:$0xff]  ;;  %v15990_v61 = vld [vmem:[#allocation20_spill] sm:$0xff] }
 0x3a6   :  { %v11972_v3 = vadd.f32 %v15957_v53, %v4358_v28  ;;  %v11975_v1 = vadd.f32 %v15958_v62, %v4359_v38  ;;  %v11978_v50 = vadd.f32 %v15959_v6, %v4360_v59  ;;  %v11981_v43 = vadd.f32 %v15960_v17, %v4361_v58  ;;  %v15964_v27 = vld [vmem:[#allocation117_spill] sm:$0xff] }
 0x3a7   :  { %v11984_v21 = vadd.f32 %v15961_v37, %v4362_v52  ;;  %v11987_v0 = vadd.f32 %v15962_v46, %v4363_v7  ;;  %v11990_v40 = vadd.f32 %v15963_v12, %v4364_v44  ;;  %v11993_v36 = vadd.f32 %v15964_v27, %v4365_v47  ;;  %v15965_v22 = vld [vmem:[#allocation121_spill] sm:$0xff]  ;;  %v15970_v44 = vld [vmem:[#allocation147_spill] sm:$0xff]  ;;  %v15997_v46 = vld [vmem:[#allocation18_spill] sm:$0xff] }
 0x3a8   :  { %v11996_v32 = vadd.f32 %v15965_v22, %v4366_v57  ;;  %v15966_v28 = vld [vmem:[#allocation125_spill] sm:$0xff]  ;;  %v12011_v24 = vadd.f32 %v15970_v44, %v4371_v5  ;;  %v15971_v47 = vld [vmem:[#allocation151_spill] sm:$0xff]  ;;  %v15981_v5 = vld [vmem:[#allocation84_spill] sm:$0xff] }
 0x3a9   :  { %v11999_v38 = vadd.f32 %v15966_v28, %v4367_v10  ;;  %v15967_v59 = vld [vmem:[#allocation129_spill] sm:$0xff]  ;;  %v12014_v23 = vadd.f32 %v15971_v47, %v4372_v4  ;;  %v15972_v57 = vld [vmem:[#allocation155_spill] sm:$0xff]  ;;  %v12032_v18 = vadd.f32 %v15981_v5, %v4378_v11  ;;  %v15983_v4 = vld [vmem:[#allocation22_spill] sm:$0xff] }
 0x3aa   :  { %v12002_v58 = vadd.f32 %v15967_v59, %v4368_v31  ;;  %v15968_v52 = vld [vmem:[#allocation133_spill] sm:$0xff]  ;;  %v12017_v35 = vadd.f32 %v15972_v57, %v4373_v29  ;;  %v15973_v10 = vld [vmem:[#allocation159_spill] sm:$0xff]  ;;  %v12035_v2 = vadd.f32 %v15983_v4, %v4379_v26  ;;  %v15993_v11 = vld [vmem:[#allocation12_spill] sm:$0xff] }
 0x3ab   :  { %v12005_v15 = vadd.f32 %v15968_v52, %v4369_v14  ;;  %v15969_v7 = vld [vmem:[#allocation137_spill] sm:$0xff]  ;;  %v12020_v34 = vadd.f32 %v15973_v10, %v4374_v30  ;;  %v15975_v31 = vld [vmem:[#allocation163_spill] sm:$0xff]  ;;  %15982 = vst [vmem:[#allocation130_spill] sm:$0xff] %v12032_v18  ;;  %v15994_v26 = vld [vmem:[#allocation14_spill] sm:$0xff] }
 0x3ac   :  { %v12008_v51 = vadd.f32 %v15969_v7, %v4370_v45  ;;  %v12023_v56 = vadd.f32 %v15975_v31, %v4375_v60  ;;  %v15977_v14 = vld [vmem:[#allocation93_spill] sm:$0xff]  ;;  %v15979_v45 = vld [vmem:[#allocation79_spill] sm:$0xff]  ;;  %15984 = vst [vmem:[#allocation120_spill] sm:$0xff] %v12035_v2  ;;  %v15989_v60 = vld [vmem:[#allocation146_spill] sm:$0xff] }
 0x3ad   :  { %15974 = vst [vmem:[#allocation115_spill] sm:$0xff] %v12020_v34  ;;  %v12026_v54 = vadd.f32 %v15977_v14, %v4376_v55  ;;  %v12029_v9 = vadd.f32 %v15979_v45, %v4377_v42  ;;  %v15985_v29 = vld [vmem:[#allocation23_spill] sm:$0xff]  ;;  %v15987_v30 = vld [vmem:[#allocation85_spill] sm:$0xff]  ;;  %v4584_v13 = vrot.slane %v15990_v61, %v15989_v60  ;;  %v15992_v42 = vld [vmem:[#allocation26_spill] sm:$0xff]  ;;  %v4596_v62 = vrot.slane %v15993_v11, %v15989_v60 }
 0x3ae   :  { %15976 = vst [vmem:[#allocation116_spill] sm:$0xff] %v12023_v56  ;;  %v12038_v39 = vadd.f32 %v15985_v29, %v4380_v8  ;;  %v12041_v63 = vadd.f32 %v15987_v30, %v4381_v16  ;;  %v15991_v55 = vld [vmem:[#allocation21_spill] sm:$0xff]  ;;  %v4592_v53 = vrot.slane %v15992_v42, %v15989_v60  ;;  %v4600_v6 = vrot.slane %v15994_v26, %v15989_v60  ;;  %v15995_v8 = vld [vmem:[#allocation15_spill] sm:$0xff]  ;;  %v15996_v16 = vld [vmem:[#allocation16_spill] sm:$0xff]  ;;  %v12089_v42 = vpop.permute.xlu1 %5571 }
 0x3af   :  { %15978 = vst [vmem:[#allocation118_spill] sm:$0xff] %v12026_v54  ;;  %15980 = vst [vmem:[#allocation119_spill] sm:$0xff] %v12029_v9  ;;  %v4588_v33 = vrot.slane %v15991_v55, %v15989_v60  ;;  %v4604_v17 = vrot.slane %v15995_v8, %v15989_v60  ;;  %v4608_v37 = vrot.slane %v15996_v16, %v15989_v60  ;;  %v15998_v27 = vld [vmem:[#allocation50_spill] sm:$0xff]  ;;  %v15999_v28 = vld [vmem:[#allocation55_spill] sm:$0xff] }
 0x3b0   :  { %15986 = vst [vmem:[#allocation131_spill] sm:$0xff] %v12038_v39  ;;  %15988 = vst [vmem:[#allocation122_spill] sm:$0xff] %v12041_v63  ;;  %v4612_v12 = vrot.slane %v15997_v46, %v15989_v60  ;;  %v4616_v22 = vrot.slane %v15998_v27, %v15989_v60  ;;  %v4620_v59 = vrot.slane %v15999_v28, %v15989_v60  ;;  %v16000_v52 = vld [vmem:[#allocation7_spill] sm:$0xff]  ;;  %v16001_v44 = vld [vmem:[#allocation8_spill] sm:$0xff] }
 0x3b1   :  { %v4624_v7 = vrot.slane %v16000_v52, %v15989_v60  ;;  %v4628_v47 = vrot.slane %v16001_v44, %v15989_v60  ;;  %v16002_v57 = vld [vmem:[#allocation11_spill] sm:$0xff]  ;;  %v16003_v31 = vld [vmem:[#allocation49_spill] sm:$0xff]  ;;  %v16008_v44 = vld [vmem:[#allocation98_spill] sm:$0xff]  ;;  %16013 = vst [vmem:[#allocation132_spill] sm:$0xff] %v12089_v42 }
 0x3b2   :  { %v4632_v10 = vrot.slane %v16002_v57, %v15989_v60  ;;  %v4636_v14 = vrot.slane %v16003_v31, %v15989_v60  ;;  %v16004_v45 = vld [vmem:[#allocation29_spill] sm:$0xff]  ;;  %v16007_v52 = vld [vmem:[#allocation95_spill] sm:$0xff]  ;;  %v4656_v46 = vrot.slane %v16008_v44, %v15989_v60  ;;  %v16015_v55 = vld [vmem:[#allocation100_spill] sm:$0xff] }
 0x3b3   :  { %v4640_v5 = vrot.slane %v16004_v45, %v15989_v60  ;;  %v16005_v4 = vld [vmem:[#allocation37_spill] sm:$0xff]  ;;  %v4652_v27 = vrot.slane %v16007_v52, %v15989_v60  ;;  %v16011_v45 = vld [vmem:[#allocation62_spill] sm:$0xff]  ;;  %v4680_v44 = vrot.slane %v16015_v55, %v15989_v60  ;;  %v16017_v63 = vld [vmem:[#allocation87_spill] sm:$0xff] }
 0x3b4   :  { %v4644_v29 = vrot.slane %v16005_v4, %v15989_v60  ;;  %v16006_v30 = vld [vmem:[#allocation45_spill] sm:$0xff]  ;;  %v4668_v26 = vrot.slane %v16011_v45, %v15989_v60  ;;  %v16012_v4 = vld [vmem:[#allocation66_spill] sm:$0xff]  ;;  %v16018_v39 = vld [vmem:[#allocation88_spill] sm:$0xff] }
 0x3b5   :  { %v4648_v28 = vrot.slane %v16006_v30, %v15989_v60  ;;  %v16009_v57 = vld [vmem:[#allocation105_spill] sm:$0xff]  ;;  %v4672_v11 = vrot.slane %v16012_v4, %v15989_v60  ;;  %v16014_v30 = vld [vmem:[#allocation99_spill] sm:$0xff]  ;;  %v16016_v61 = vld [vmem:[#allocation86_spill] sm:$0xff]  ;;  %v4692_v45 = vrot.slane %v16018_v39, %v15989_v60 }
 0x3b6   :  { %v4660_v16 = vrot.slane %v16009_v57, %v15989_v60  ;;  %v16010_v31 = vld [vmem:[#allocation57_spill] sm:$0xff]  ;;  %v4676_v52 = vrot.slane %v16014_v30, %v15989_v60  ;;  %v4684_v57 = vrot.slane %v16016_v61, %v15989_v60  ;;  %v16019_v2 = vld [vmem:[#allocation90_spill] sm:$0xff]  ;;  %v16020_v42 = vld [vmem:[#allocation91_spill] sm:$0xff] }
 0x3b7   :  { %v4664_v8 = vrot.slane %v16010_v31, %v15989_v60  ;;  %v4688_v31 = vrot.slane %v16017_v63, %v15989_v60  ;;  %v4696_v4 = vrot.slane %v16019_v2, %v15989_v60  ;;  %v4700_v18 = vrot.slane %v16020_v42, %v15989_v60  ;;  %v16021_v9 = vld [vmem:[#allocation34_spill] sm:$0xff]  ;;  %v12122_v42 = vpop.permute.xlu1 %5677 }
 0x3b8   :  { %v4714_v30 = vmul.f32 %v16021_v9, %v4584_v13  ;;  %v4715_v54 = vmul.f32 %v16021_v9, %v4588_v33  ;;  %v4716_v55 = vmul.f32 %v16021_v9, %v4592_v53  ;;  %v4717_v61 = vmul.f32 %v16021_v9, %v4596_v62  ;;  %16022 = vst [vmem:[#allocation82_spill] sm:$0xff] %v12122_v42  ;;  %v16059_v42 = vld [vmem:[#allocation45_spill] sm:$0xff] }
 0x3b9   :  { %v4718_v56 = vmul.f32 %v16021_v9, %v4600_v6  ;;  %v4719_v63 = vmul.f32 %v16021_v9, %v4604_v17  ;;  %v4720_v39 = vmul.f32 %v16021_v9, %v4608_v37  ;;  %v4721_v34 = vmul.f32 %v16021_v9, %v4612_v12 }
 0x3ba   :  { %v4722_v2 = vmul.f32 %v16021_v9, %v4616_v22  ;;  %v4723_v60 = vmul.f32 %v16021_v9, %v4620_v59  ;;  %v4724_v13 = vmul.f32 %v16021_v9, %v4624_v7  ;;  %v4725_v33 = vmul.f32 %v16021_v9, %v4628_v47  ;;  %v12128_v47 = vpop.permute.xlu0 %5608 }
 0x3bb   :  { %v4726_v53 = vmul.f32 %v16021_v9, %v4632_v10  ;;  %v4727_v62 = vmul.f32 %v16021_v9, %v4636_v14  ;;  %v4728_v6 = vmul.f32 %v16021_v9, %v4640_v5  ;;  %v4729_v17 = vmul.f32 %v16021_v9, %v4644_v29  ;;  %16023 = vst [vmem:[#allocation94_spill] sm:$0xff] %v12128_v47 }
 0x3bc   :  { %v4730_v37 = vmul.f32 %v16021_v9, %v4648_v28  ;;  %v4731_v12 = vmul.f32 %v16021_v9, %v4652_v27  ;;  %v4732_v22 = vmul.f32 %v16021_v9, %v4656_v46  ;;  %v4733_v59 = vmul.f32 %v16021_v9, %v4660_v16 }
 0x3bd   :  { %v4734_v7 = vmul.f32 %v16021_v9, %v4664_v8  ;;  %v4735_v10 = vmul.f32 %v16021_v9, %v4668_v26  ;;  %v4736_v14 = vmul.f32 %v16021_v9, %v4672_v11  ;;  %v4737_v5 = vmul.f32 %v16021_v9, %v4676_v52 }
 0x3be   :  { %v4738_v28 = vmul.f32 %v16021_v9, %v4680_v44  ;;  %v4739_v29 = vmul.f32 %v16021_v9, %v4684_v57  ;;  %v4740_v27 = vmul.f32 %v16021_v9, %v4688_v31  ;;  %v4741_v46 = vmul.f32 %v16021_v9, %v4692_v45  ;;  %v16040_v31 = vld [vmem:[#allocation122_spill] sm:$0xff] }
 0x3bf   :  { %v4742_v16 = vmul.f32 %v16021_v9, %v4696_v4  ;;  %v4743_v8 = vmul.f32 %v16021_v9, %v4700_v18  ;;  %v12140_v47 = vadd.f32 %v4714_v30, %v11954_v48  ;;  %v12143_v26 = vadd.f32 %v4715_v54, %v11957_v41  ;;  %v16042_v4 = vld [vmem:[#allocation145_spill] sm:$0xff]  ;;  %v16043_v30 = vld [vmem:[#allocation20_spill] sm:$0xff] }
 0x3c0   :  { %v12146_v11 = vadd.f32 %v4716_v55, %v11960_v19  ;;  %v12149_v52 = vadd.f32 %v4717_v61, %v11963_v49  ;;  %v12152_v44 = vadd.f32 %v4718_v56, %v11966_v20  ;;  %v12155_v57 = vadd.f32 %v4719_v63, %v11969_v25 }
 0x3c1   :  { %v12158_v9 = vadd.f32 %v4720_v39, %v11972_v3  ;;  %v12161_v48 = vadd.f32 %v4721_v34, %v11975_v1  ;;  %v12164_v41 = vadd.f32 %v4722_v2, %v11978_v50  ;;  %v12167_v19 = vadd.f32 %v4723_v60, %v11981_v43  ;;  %v12184_v50 = vpop.permute.xlu1 %5784  ;;  %v12186_v34 = vpop.permute.xlu0 %5779 }
 0x3c2   :  { %v12170_v49 = vadd.f32 %v4724_v13, %v11984_v21  ;;  %v12173_v20 = vadd.f32 %v4725_v33, %v11987_v0  ;;  %v12176_v25 = vadd.f32 %v4726_v53, %v11990_v40  ;;  %v12179_v3 = vadd.f32 %v4727_v62, %v11993_v36  ;;  %16024 = vst [vmem:[#allocation58_spill] sm:$0xff] %v12184_v50  ;;  %v16044_v13 = vld [vmem:[#allocation21_spill] sm:$0xff]  ;;  %v16045_v53 = vld [vmem:[#allocation26_spill] sm:$0xff] }
 0x3c3   :  { %v12182_v1 = vadd.f32 %v4728_v6, %v11996_v32  ;;  %16025 = vst [vmem:[#allocation59_spill] sm:$0xff] %v12186_v34  ;;  %v12189_v43 = vadd.f32 %v4729_v17, %v11999_v38  ;;  %v12192_v21 = vadd.f32 %v4730_v37, %v12002_v58  ;;  %v12195_v0 = vadd.f32 %v4731_v12, %v12005_v15  ;;  %v16026_v38 = vld [vmem:[#allocation115_spill] sm:$0xff]  ;;  %v16028_v58 = vld [vmem:[#allocation116_spill] sm:$0xff]  ;;  %v16030_v15 = vld [vmem:[#allocation118_spill] sm:$0xff] }
 0x3c4   :  { %v12198_v40 = vadd.f32 %v4732_v22, %v12008_v51  ;;  %v12201_v36 = vadd.f32 %v4733_v59, %v12011_v24  ;;  %v12204_v32 = vadd.f32 %v4734_v7, %v12014_v23  ;;  %v12207_v56 = vadd.f32 %v4735_v10, %v12017_v35  ;;  %v16032_v51 = vld [vmem:[#allocation119_spill] sm:$0xff]  ;;  %v16034_v24 = vld [vmem:[#allocation130_spill] sm:$0xff]  ;;  %v16036_v23 = vld [vmem:[#allocation120_spill] sm:$0xff] }
 0x3c5   :  { %v12210_v54 = vadd.f32 %v4736_v14, %v16026_v38  ;;  %v12213_v18 = vadd.f32 %v4737_v5, %v16028_v58  ;;  %v12216_v2 = vadd.f32 %v4738_v28, %v16030_v15  ;;  %v12219_v39 = vadd.f32 %v4739_v29, %v16032_v51  ;;  %v16038_v35 = vld [vmem:[#allocation131_spill] sm:$0xff]  ;;  %v16046_v6 = vld [vmem:[#allocation12_spill] sm:$0xff]  ;;  %v16047_v37 = vld [vmem:[#allocation14_spill] sm:$0xff] }
 0x3c6   :  { %v12222_v63 = vadd.f32 %v4740_v27, %v16034_v24  ;;  %v12225_v61 = vadd.f32 %v4741_v46, %v16036_v23  ;;  %v12228_v55 = vadd.f32 %v4742_v16, %v16038_v35  ;;  %v12231_v45 = vadd.f32 %v4743_v8, %v16040_v31  ;;  %v16048_v22 = vld [vmem:[#allocation15_spill] sm:$0xff]  ;;  %v16049_v7 = vld [vmem:[#allocation16_spill] sm:$0xff]  ;;  %v16050_v14 = vld [vmem:[#allocation18_spill] sm:$0xff] }
 0x3c7   :  { %16027 = vst [vmem:[#allocation52_spill] sm:$0xff] %v12210_v54  ;;  %16029 = vst [vmem:[#allocation92_spill] sm:$0xff] %v12213_v18  ;;  %v4781_v60 = vrot.slane %v16043_v30, %v16042_v4  ;;  %v4785_v33 = vrot.slane %v16044_v13, %v16042_v4  ;;  %v4789_v62 = vrot.slane %v16045_v53, %v16042_v4  ;;  %v16051_v28 = vld [vmem:[#allocation50_spill] sm:$0xff]  ;;  %v16052_v27 = vld [vmem:[#allocation55_spill] sm:$0xff] }
 0x3c8   :  { %16031 = vst [vmem:[#allocation123_spill] sm:$0xff] %v12216_v2  ;;  %16033 = vst [vmem:[#allocation41_spill] sm:$0xff] %v12219_v39  ;;  %v4793_v17 = vrot.slane %v16046_v6, %v16042_v4  ;;  %v4797_v12 = vrot.slane %v16047_v37, %v16042_v4  ;;  %v4801_v59 = vrot.slane %v16048_v22, %v16042_v4  ;;  %v16053_v16 = vld [vmem:[#allocation7_spill] sm:$0xff]  ;;  %v16054_v38 = vld [vmem:[#allocation8_spill] sm:$0xff] }
 0x3c9   :  { %16035 = vst [vmem:[#allocation134_spill] sm:$0xff] %v12222_v63  ;;  %16037 = vst [vmem:[#allocation42_spill] sm:$0xff] %v12225_v61  ;;  %v4805_v10 = vrot.slane %v16049_v7, %v16042_v4  ;;  %v4809_v5 = vrot.slane %v16050_v14, %v16042_v4  ;;  %v4813_v29 = vrot.slane %v16051_v28, %v16042_v4  ;;  %v16055_v15 = vld [vmem:[#allocation11_spill] sm:$0xff]  ;;  %v16056_v24 = vld [vmem:[#allocation49_spill] sm:$0xff] }
 0x3ca   :  { %16039 = vst [vmem:[#allocation124_spill] sm:$0xff] %v12228_v55  ;;  %16041 = vst [vmem:[#allocation64_spill] sm:$0xff] %v12231_v45  ;;  %v4817_v46 = vrot.slane %v16052_v27, %v16042_v4  ;;  %v4821_v8 = vrot.slane %v16053_v16, %v16042_v4  ;;  %v4825_v58 = vrot.slane %v16054_v38, %v16042_v4  ;;  %v16057_v35 = vld [vmem:[#allocation29_spill] sm:$0xff]  ;;  %v16060_v16 = vld [vmem:[#allocation95_spill] sm:$0xff] }
 0x3cb   :  { %v4829_v51 = vrot.slane %v16055_v15, %v16042_v4  ;;  %v4833_v23 = vrot.slane %v16056_v24, %v16042_v4  ;;  %v4837_v31 = vrot.slane %v16057_v35, %v16042_v4  ;;  %v16058_v50 = vld [vmem:[#allocation37_spill] sm:$0xff]  ;;  %v4845_v27 = vrot.slane %v16059_v42, %v16042_v4  ;;  %v16061_v38 = vld [vmem:[#allocation98_spill] sm:$0xff]  ;;  %v16066_v42 = vld [vmem:[#allocation99_spill] sm:$0xff] }
 0x3cc   :  { %v4841_v34 = vrot.slane %v16058_v50, %v16042_v4  ;;  %v4849_v28 = vrot.slane %v16060_v16, %v16042_v4  ;;  %v4853_v14 = vrot.slane %v16061_v38, %v16042_v4  ;;  %v16062_v15 = vld [vmem:[#allocation105_spill] sm:$0xff]  ;;  %v16064_v35 = vld [vmem:[#allocation62_spill] sm:$0xff]  ;;  %v4873_v53 = vrot.slane %v16066_v42, %v16042_v4  ;;  %v16067_v16 = vld [vmem:[#allocation100_spill] sm:$0xff] }
 0x3cd   :  { %v4857_v7 = vrot.slane %v16062_v15, %v16042_v4  ;;  %v16063_v24 = vld [vmem:[#allocation57_spill] sm:$0xff]  ;;  %v4865_v37 = vrot.slane %v16064_v35, %v16042_v4  ;;  %v16065_v50 = vld [vmem:[#allocation66_spill] sm:$0xff]  ;;  %v4877_v13 = vrot.slane %v16067_v16, %v16042_v4  ;;  %v16069_v15 = vld [vmem:[#allocation87_spill] sm:$0xff] }
 0x3ce   :  { %v4861_v22 = vrot.slane %v16063_v24, %v16042_v4  ;;  %v4869_v6 = vrot.slane %v16065_v50, %v16042_v4  ;;  %v16068_v38 = vld [vmem:[#allocation86_spill] sm:$0xff]  ;;  %v4885_v45 = vrot.slane %v16069_v15, %v16042_v4  ;;  %v16070_v24 = vld [vmem:[#allocation88_spill] sm:$0xff]  ;;  %v16072_v50 = vld [vmem:[#allocation91_spill] sm:$0xff] }
 0x3cf   :  { %v4881_v30 = vrot.slane %v16068_v38, %v16042_v4  ;;  %v4889_v55 = vrot.slane %v16070_v24, %v16042_v4  ;;  %v16071_v35 = vld [vmem:[#allocation90_spill] sm:$0xff]  ;;  %v4897_v63 = vrot.slane %v16072_v50, %v16042_v4  ;;  %v16073_v39 = vld [vmem:[#allocation36_spill] sm:$0xff] }
 0x3d0   :  { %v4893_v61 = vrot.slane %v16071_v35, %v16042_v4  ;;  %v4911_v42 = vmul.f32 %v16073_v39, %v4781_v60  ;;  %v4912_v2 = vmul.f32 %v16073_v39, %v4785_v33  ;;  %v4913_v16 = vmul.f32 %v16073_v39, %v4789_v62 }
 0x3d1   :  { %v4914_v38 = vmul.f32 %v16073_v39, %v4793_v17  ;;  %v4915_v18 = vmul.f32 %v16073_v39, %v4797_v12  ;;  %v4916_v15 = vmul.f32 %v16073_v39, %v4801_v59  ;;  %v4917_v24 = vmul.f32 %v16073_v39, %v4805_v10 }
 0x3d2   :  { %v4918_v54 = vmul.f32 %v16073_v39, %v4809_v5  ;;  %v4919_v35 = vmul.f32 %v16073_v39, %v4813_v29  ;;  %v4920_v4 = vmul.f32 %v16073_v39, %v4817_v46  ;;  %v4921_v60 = vmul.f32 %v16073_v39, %v4821_v8 }
 0x3d3   :  { %v4922_v33 = vmul.f32 %v16073_v39, %v4825_v58  ;;  %v4923_v62 = vmul.f32 %v16073_v39, %v4829_v51  ;;  %v4924_v17 = vmul.f32 %v16073_v39, %v4833_v23  ;;  %v4925_v12 = vmul.f32 %v16073_v39, %v4837_v31 }
 0x3d4   :  { %v4926_v59 = vmul.f32 %v16073_v39, %v4841_v34  ;;  %v4927_v10 = vmul.f32 %v16073_v39, %v4845_v27  ;;  %v4928_v5 = vmul.f32 %v16073_v39, %v4849_v28  ;;  %v4929_v29 = vmul.f32 %v16073_v39, %v4853_v14 }
 0x3d5   :  { %v4930_v46 = vmul.f32 %v16073_v39, %v4857_v7  ;;  %v4931_v8 = vmul.f32 %v16073_v39, %v4861_v22  ;;  %v4932_v58 = vmul.f32 %v16073_v39, %v4865_v37  ;;  %v4933_v51 = vmul.f32 %v16073_v39, %v4869_v6  ;;  %v16088_v6 = vld [vmem:[#allocation64_spill] sm:$0xff] }
 0x3d6   :  { %v4934_v23 = vmul.f32 %v16073_v39, %v4873_v53  ;;  %v4935_v31 = vmul.f32 %v16073_v39, %v4877_v13  ;;  %v4936_v34 = vmul.f32 %v16073_v39, %v4881_v30  ;;  %v4937_v27 = vmul.f32 %v16073_v39, %v4885_v45 }
 0x3d7   :  { %v4938_v28 = vmul.f32 %v16073_v39, %v4889_v55  ;;  %v4939_v14 = vmul.f32 %v16073_v39, %v4893_v61  ;;  %v4940_v7 = vmul.f32 %v16073_v39, %v4897_v63  ;;  %v12324_v22 = vadd.f32 %v4911_v42, %v12140_v47 }
 0x3d8   :  { %v12327_v37 = vadd.f32 %v4912_v2, %v12143_v26  ;;  %v12330_v53 = vadd.f32 %v4913_v16, %v12146_v11  ;;  %v12333_v13 = vadd.f32 %v4914_v38, %v12149_v52  ;;  %v12336_v45 = vadd.f32 %v4915_v18, %v12152_v44  ;;  %v16090_v38 = vld [vmem:[#allocation72_spill] sm:$0xff] }
 0x3d9   :  { %v12339_v55 = vadd.f32 %v4916_v15, %v12155_v57  ;;  %v12342_v39 = vadd.f32 %v4917_v24, %v12158_v9  ;;  %v12345_v42 = vadd.f32 %v4918_v54, %v12161_v48  ;;  %v12348_v47 = vadd.f32 %v4919_v35, %v12164_v41  ;;  %v16091_v15 = vld [vmem:[#allocation20_spill] sm:$0xff]  ;;  %v16092_v35 = vld [vmem:[#allocation21_spill] sm:$0xff] }
 0x3da   :  { %v12351_v26 = vadd.f32 %v4920_v4, %v12167_v19  ;;  %v12354_v11 = vadd.f32 %v4921_v60, %v12170_v49  ;;  %v12357_v52 = vadd.f32 %v4922_v33, %v12173_v20  ;;  %v12360_v44 = vadd.f32 %v4923_v62, %v12176_v25  ;;  %v16093_v60 = vld [vmem:[#allocation26_spill] sm:$0xff]  ;;  %v16094_v62 = vld [vmem:[#allocation12_spill] sm:$0xff] }
 0x3db   :  { %v12363_v57 = vadd.f32 %v4924_v17, %v12179_v3  ;;  %v12366_v9 = vadd.f32 %v4925_v12, %v12182_v1  ;;  %v12369_v48 = vadd.f32 %v4926_v59, %v12189_v43  ;;  %v12372_v41 = vadd.f32 %v4927_v10, %v12192_v21  ;;  %v16074_v1 = vld [vmem:[#allocation52_spill] sm:$0xff]  ;;  %v16095_v12 = vld [vmem:[#allocation14_spill] sm:$0xff]  ;;  %v16096_v10 = vld [vmem:[#allocation15_spill] sm:$0xff] }
 0x3dc   :  { %v12375_v19 = vadd.f32 %v4928_v5, %v12195_v0  ;;  %v12378_v49 = vadd.f32 %v4929_v29, %v12198_v40  ;;  %v12381_v20 = vadd.f32 %v4930_v46, %v12201_v36  ;;  %v12384_v25 = vadd.f32 %v4931_v8, %v12204_v32  ;;  %v16076_v21 = vld [vmem:[#allocation92_spill] sm:$0xff]  ;;  %v16078_v0 = vld [vmem:[#allocation123_spill] sm:$0xff]  ;;  %v16080_v40 = vld [vmem:[#allocation41_spill] sm:$0xff] }
 0x3dd   :  { %v12387_v3 = vadd.f32 %v4932_v58, %v12207_v56  ;;  %v12390_v43 = vadd.f32 %v4933_v51, %v16074_v1  ;;  %v12393_v54 = vadd.f32 %v4934_v23, %v16076_v21  ;;  %v12396_v18 = vadd.f32 %v4935_v31, %v16078_v0  ;;  %v16082_v36 = vld [vmem:[#allocation134_spill] sm:$0xff]  ;;  %v16086_v56 = vld [vmem:[#allocation124_spill] sm:$0xff]  ;;  %v16100_v31 = vld [vmem:[#allocation55_spill] sm:$0xff] }
 0x3de   :  { %v12399_v2 = vadd.f32 %v4936_v34, %v16080_v40  ;;  %v12402_v63 = vadd.f32 %v4937_v27, %v16082_v36  ;;  %v16084_v32 = vld [vmem:[#allocation42_spill] sm:$0xff]  ;;  %v12408_v30 = vadd.f32 %v4939_v14, %v16086_v56  ;;  %v12411_v16 = vadd.f32 %v4940_v7, %v16088_v6  ;;  %v16097_v29 = vld [vmem:[#allocation16_spill] sm:$0xff]  ;;  %v16101_v27 = vld [vmem:[#allocation7_spill] sm:$0xff] }
 0x3df   :  { %16075 = vst [vmem:[#allocation135_spill] sm:$0xff] %v12390_v43  ;;  %16077 = vst [vmem:[#allocation67_spill] sm:$0xff] %v12393_v54  ;;  %v12405_v61 = vadd.f32 %v4938_v28, %v16084_v32  ;;  %v4978_v24 = vrot.slane %v16091_v15, %v16090_v38  ;;  %v4982_v4 = vrot.slane %v16092_v35, %v16090_v38  ;;  %v16098_v8 = vld [vmem:[#allocation18_spill] sm:$0xff]  ;;  %v16102_v14 = vld [vmem:[#allocation8_spill] sm:$0xff] }
 0x3e0   :  { %16079 = vst [vmem:[#allocation126_spill] sm:$0xff] %v12396_v18  ;;  %16081 = vst [vmem:[#allocation65_spill] sm:$0xff] %v12399_v2  ;;  %v4986_v33 = vrot.slane %v16093_v60, %v16090_v38  ;;  %v4990_v17 = vrot.slane %v16094_v62, %v16090_v38  ;;  %v4994_v59 = vrot.slane %v16095_v12, %v16090_v38  ;;  %v16099_v51 = vld [vmem:[#allocation50_spill] sm:$0xff]  ;;  %v16103_v1 = vld [vmem:[#allocation11_spill] sm:$0xff] }
 0x3e1   :  { %16083 = vst [vmem:[#allocation136_spill] sm:$0xff] %v12402_v63  ;;  %16085 = vst [vmem:[#allocation76_spill] sm:$0xff] %v12405_v61  ;;  %v4998_v5 = vrot.slane %v16096_v10, %v16090_v38  ;;  %v5002_v46 = vrot.slane %v16097_v29, %v16090_v38  ;;  %v5006_v58 = vrot.slane %v16098_v8, %v16090_v38  ;;  %v16104_v0 = vld [vmem:[#allocation49_spill] sm:$0xff]  ;;  %v16120_v2 = vld [vmem:[#allocation156_spill] sm:$0xff] }
 0x3e2   :  { %16087 = vst [vmem:[#allocation127_spill] sm:$0xff] %v12408_v30  ;;  %16089 = vst [vmem:[#allocation101_spill] sm:$0xff] %v12411_v16  ;;  %v5010_v23 = vrot.slane %v16099_v51, %v16090_v38  ;;  %v5014_v34 = vrot.slane %v16100_v31, %v16090_v38  ;;  %v5018_v28 = vrot.slane %v16101_v27, %v16090_v38  ;;  %v16105_v36 = vld [vmem:[#allocation29_spill] sm:$0xff]  ;;  %v16108_v27 = vld [vmem:[#allocation95_spill] sm:$0xff] }
 0x3e3   :  { %v5022_v7 = vrot.slane %v16102_v14, %v16090_v38  ;;  %v5026_v21 = vrot.slane %v16103_v1, %v16090_v38  ;;  %v5030_v40 = vrot.slane %v16104_v0, %v16090_v38  ;;  %v5034_v32 = vrot.slane %v16105_v36, %v16090_v38  ;;  %v16106_v56 = vld [vmem:[#allocation37_spill] sm:$0xff]  ;;  %v16109_v14 = vld [vmem:[#allocation98_spill] sm:$0xff] }
 0x3e4   :  { %v5038_v6 = vrot.slane %v16106_v56, %v16090_v38  ;;  %v16107_v31 = vld [vmem:[#allocation45_spill] sm:$0xff]  ;;  %v5046_v8 = vrot.slane %v16108_v27, %v16090_v38  ;;  %v5050_v29 = vrot.slane %v16109_v14, %v16090_v38  ;;  %v16112_v36 = vld [vmem:[#allocation62_spill] sm:$0xff]  ;;  %v16115_v27 = vld [vmem:[#allocation100_spill] sm:$0xff]  ;;  %v5109_v18 = vmul.f32 %v16120_v2, %v4982_v4 }
 0x3e5   :  { %v5042_v51 = vrot.slane %v16107_v31, %v16090_v38  ;;  %v16110_v1 = vld [vmem:[#allocation105_spill] sm:$0xff]  ;;  %v5062_v62 = vrot.slane %v16112_v36, %v16090_v38  ;;  %v16113_v56 = vld [vmem:[#allocation66_spill] sm:$0xff]  ;;  %v16114_v31 = vld [vmem:[#allocation99_spill] sm:$0xff]  ;;  %v5074_v15 = vrot.slane %v16115_v27, %v16090_v38  ;;  %v5110_v27 = vmul.f32 %v16120_v2, %v4986_v33 }
 0x3e6   :  { %v5054_v10 = vrot.slane %v16110_v1, %v16090_v38  ;;  %v16111_v0 = vld [vmem:[#allocation57_spill] sm:$0xff]  ;;  %v5066_v60 = vrot.slane %v16113_v56, %v16090_v38  ;;  %v5070_v35 = vrot.slane %v16114_v31, %v16090_v38  ;;  %v16116_v14 = vld [vmem:[#allocation86_spill] sm:$0xff]  ;;  %v16117_v1 = vld [vmem:[#allocation87_spill] sm:$0xff]  ;;  %v5094_v56 = vrot.slane %v16072_v50, %v16090_v38 }
 0x3e7   :  { %v5058_v12 = vrot.slane %v16111_v0, %v16090_v38  ;;  %v5078_v16 = vrot.slane %v16116_v14, %v16090_v38  ;;  %v5082_v30 = vrot.slane %v16117_v1, %v16090_v38  ;;  %v16118_v0 = vld [vmem:[#allocation88_spill] sm:$0xff]  ;;  %v16119_v36 = vld [vmem:[#allocation90_spill] sm:$0xff]  ;;  %v5108_v31 = vmul.f32 %v16120_v2, %v4978_v24 }
 0x3e8   :  { %v5086_v61 = vrot.slane %v16118_v0, %v16090_v38  ;;  %v5090_v63 = vrot.slane %v16119_v36, %v16090_v38  ;;  %v5111_v14 = vmul.f32 %v16120_v2, %v4990_v17  ;;  %v5112_v54 = vmul.f32 %v16120_v2, %v4994_v59 }
 0x3e9   :  { %v5113_v1 = vmul.f32 %v16120_v2, %v4998_v5  ;;  %v5114_v0 = vmul.f32 %v16120_v2, %v5002_v46  ;;  %v5115_v43 = vmul.f32 %v16120_v2, %v5006_v58  ;;  %v5116_v36 = vmul.f32 %v16120_v2, %v5010_v23 }
 0x3ea   :  { %v5117_v38 = vmul.f32 %v16120_v2, %v5014_v34  ;;  %v5118_v24 = vmul.f32 %v16120_v2, %v5018_v28  ;;  %v5119_v4 = vmul.f32 %v16120_v2, %v5022_v7  ;;  %v5120_v33 = vmul.f32 %v16120_v2, %v5026_v21 }
 0x3eb   :  { %v5121_v17 = vmul.f32 %v16120_v2, %v5030_v40  ;;  %v5122_v59 = vmul.f32 %v16120_v2, %v5034_v32  ;;  %v5123_v5 = vmul.f32 %v16120_v2, %v5038_v6  ;;  %v5124_v46 = vmul.f32 %v16120_v2, %v5042_v51 }
 0x3ec   :  { %v5125_v58 = vmul.f32 %v16120_v2, %v5046_v8  ;;  %v5126_v23 = vmul.f32 %v16120_v2, %v5050_v29  ;;  %v5127_v34 = vmul.f32 %v16120_v2, %v5054_v10  ;;  %v5128_v28 = vmul.f32 %v16120_v2, %v5058_v12 }
 0x3ed   :  { %v5129_v7 = vmul.f32 %v16120_v2, %v5062_v62  ;;  %v5130_v21 = vmul.f32 %v16120_v2, %v5066_v60  ;;  %v5131_v40 = vmul.f32 %v16120_v2, %v5070_v35  ;;  %v5132_v32 = vmul.f32 %v16120_v2, %v5074_v15 }
 0x3ee   :  { %v5133_v6 = vmul.f32 %v16120_v2, %v5078_v16  ;;  %v5134_v51 = vmul.f32 %v16120_v2, %v5082_v30  ;;  %v5135_v8 = vmul.f32 %v16120_v2, %v5086_v61  ;;  %v5136_v29 = vmul.f32 %v16120_v2, %v5090_v63 }
 0x3ef   :  { %v5137_v10 = vmul.f32 %v16120_v2, %v5094_v56  ;;  %v12504_v12 = vadd.f32 %v5108_v31, %v12324_v22  ;;  %v12507_v62 = vadd.f32 %v5109_v18, %v12327_v37  ;;  %v12510_v35 = vadd.f32 %v5110_v27, %v12330_v53  ;;  %v16135_v27 = vld [vmem:[#allocation101_spill] sm:$0xff] }
 0x3f0   :  { %v12513_v15 = vadd.f32 %v5111_v14, %v12333_v13  ;;  %v12516_v30 = vadd.f32 %v5112_v54, %v12336_v45  ;;  %v12519_v61 = vadd.f32 %v5113_v1, %v12339_v55  ;;  %v12522_v2 = vadd.f32 %v5114_v0, %v12342_v39  ;;  %v16137_v1 = vld [vmem:[#allocation71_spill] sm:$0xff]  ;;  %v16138_v0 = vld [vmem:[#allocation20_spill] sm:$0xff]  ;;  %v16139_v56 = vld [vmem:[#allocation21_spill] sm:$0xff] }
 0x3f1   :  { %v12525_v22 = vadd.f32 %v5115_v43, %v12345_v42  ;;  %v12528_v37 = vadd.f32 %v5116_v36, %v12348_v47  ;;  %v12531_v53 = vadd.f32 %v5117_v38, %v12351_v26  ;;  %v12534_v13 = vadd.f32 %v5118_v24, %v12354_v11  ;;  %v16140_v24 = vld [vmem:[#allocation26_spill] sm:$0xff] }
 0x3f2   :  { %v12537_v45 = vadd.f32 %v5119_v4, %v12357_v52  ;;  %v12540_v55 = vadd.f32 %v5120_v33, %v12360_v44  ;;  %v12543_v39 = vadd.f32 %v5121_v17, %v12363_v57  ;;  %v12546_v42 = vadd.f32 %v5122_v59, %v12366_v9  ;;  %v16141_v33 = vld [vmem:[#allocation12_spill] sm:$0xff]  ;;  %v16142_v59 = vld [vmem:[#allocation14_spill] sm:$0xff] }
 0x3f3   :  { %v12549_v47 = vadd.f32 %v5123_v5, %v12369_v48  ;;  %v12552_v26 = vadd.f32 %v5124_v46, %v12372_v41  ;;  %v12555_v11 = vadd.f32 %v5125_v58, %v12375_v19  ;;  %v12558_v52 = vadd.f32 %v5126_v23, %v12378_v49  ;;  %v16121_v48 = vld [vmem:[#allocation135_spill] sm:$0xff]  ;;  %v16125_v19 = vld [vmem:[#allocation126_spill] sm:$0xff]  ;;  %v16127_v49 = vld [vmem:[#allocation65_spill] sm:$0xff] }
 0x3f4   :  { %v12561_v44 = vadd.f32 %v5127_v34, %v12381_v20  ;;  %v12564_v57 = vadd.f32 %v5128_v28, %v12384_v25  ;;  %v12567_v9 = vadd.f32 %v5129_v7, %v12387_v3  ;;  %v12570_v43 = vadd.f32 %v5130_v21, %v16121_v48  ;;  %v16123_v41 = vld [vmem:[#allocation67_spill] sm:$0xff]  ;;  %v16129_v20 = vld [vmem:[#allocation136_spill] sm:$0xff]  ;;  %v16145_v28 = vld [vmem:[#allocation18_spill] sm:$0xff] }
 0x3f5   :  { %v12573_v54 = vadd.f32 %v5131_v40, %v16123_v41  ;;  %v12576_v18 = vadd.f32 %v5132_v32, %v16125_v19  ;;  %v12579_v63 = vadd.f32 %v5133_v6, %v16127_v49  ;;  %v12582_v16 = vadd.f32 %v5134_v51, %v16129_v20  ;;  %v16131_v25 = vld [vmem:[#allocation76_spill] sm:$0xff]  ;;  %v16133_v3 = vld [vmem:[#allocation127_spill] sm:$0xff]  ;;  %v16146_v21 = vld [vmem:[#allocation50_spill] sm:$0xff] }
 0x3f6   :  { %16122 = vst [vmem:[#allocation138_spill] sm:$0xff] %v12570_v43  ;;  %v12585_v60 = vadd.f32 %v5135_v8, %v16131_v25  ;;  %v12588_v31 = vadd.f32 %v5136_v29, %v16133_v3  ;;  %v12591_v14 = vadd.f32 %v5137_v10, %v16135_v27  ;;  %v5175_v36 = vrot.slane %v16138_v0, %v16137_v1  ;;  %v16143_v46 = vld [vmem:[#allocation15_spill] sm:$0xff]  ;;  %v16144_v23 = vld [vmem:[#allocation16_spill] sm:$0xff]  ;;  %v16151_v19 = vld [vmem:[#allocation49_spill] sm:$0xff] }
 0x3f7   :  { %16124 = vst [vmem:[#allocation24_spill] sm:$0xff] %v12573_v54  ;;  %16126 = vst [vmem:[#allocation89_spill] sm:$0xff] %v12576_v18  ;;  %v5179_v38 = vrot.slane %v16139_v56, %v16137_v1  ;;  %v5183_v4 = vrot.slane %v16140_v24, %v16137_v1  ;;  %v5187_v17 = vrot.slane %v16141_v33, %v16137_v1  ;;  %v16147_v32 = vld [vmem:[#allocation55_spill] sm:$0xff]  ;;  %v16149_v29 = vld [vmem:[#allocation8_spill] sm:$0xff] }
 0x3f8   :  { %16128 = vst [vmem:[#allocation102_spill] sm:$0xff] %v12579_v63  ;;  %16130 = vst [vmem:[#allocation128_spill] sm:$0xff] %v12582_v16  ;;  %v5191_v5 = vrot.slane %v16142_v59, %v16137_v1  ;;  %v5195_v58 = vrot.slane %v16143_v46, %v16137_v1  ;;  %v5199_v34 = vrot.slane %v16144_v23, %v16137_v1  ;;  %v16148_v51 = vld [vmem:[#allocation7_spill] sm:$0xff]  ;;  %v16152_v20 = vld [vmem:[#allocation29_spill] sm:$0xff] }
 0x3f9   :  { %16132 = vst [vmem:[#allocation30_spill] sm:$0xff] %v12585_v60  ;;  %16134 = vst [vmem:[#allocation70_spill] sm:$0xff] %v12588_v31  ;;  %v5203_v7 = vrot.slane %v16145_v28, %v16137_v1  ;;  %v5207_v40 = vrot.slane %v16146_v21, %v16137_v1  ;;  %v5211_v6 = vrot.slane %v16147_v32, %v16137_v1  ;;  %v16150_v48 = vld [vmem:[#allocation11_spill] sm:$0xff]  ;;  %v16153_v3 = vld [vmem:[#allocation37_spill] sm:$0xff] }
 0x3fa   :  { %16136 = vst [vmem:[#allocation44_spill] sm:$0xff] %v12591_v14  ;;  %v5215_v8 = vrot.slane %v16148_v51, %v16137_v1  ;;  %v5219_v10 = vrot.slane %v16149_v29, %v16137_v1  ;;  %v5223_v41 = vrot.slane %v16150_v48, %v16137_v1  ;;  %v5227_v49 = vrot.slane %v16151_v19, %v16137_v1  ;;  %v16154_v32 = vld [vmem:[#allocation45_spill] sm:$0xff]  ;;  %v16155_v51 = vld [vmem:[#allocation95_spill] sm:$0xff]  ;;  %v16156_v29 = vld [vmem:[#allocation98_spill] sm:$0xff] }
 0x3fb   :  { %v5231_v25 = vrot.slane %v16152_v20, %v16137_v1  ;;  %v5235_v27 = vrot.slane %v16153_v3, %v16137_v1  ;;  %v5239_v21 = vrot.slane %v16154_v32, %v16137_v1  ;;  %v5243_v28 = vrot.slane %v16155_v51, %v16137_v1  ;;  %v16157_v48 = vld [vmem:[#allocation105_spill] sm:$0xff]  ;;  %v16159_v20 = vld [vmem:[#allocation62_spill] sm:$0xff]  ;;  %v16161_v32 = vld [vmem:[#allocation99_spill] sm:$0xff] }
 0x3fc   :  { %v5247_v23 = vrot.slane %v16156_v29, %v16137_v1  ;;  %v5251_v46 = vrot.slane %v16157_v48, %v16137_v1  ;;  %v16158_v19 = vld [vmem:[#allocation57_spill] sm:$0xff]  ;;  %v5259_v33 = vrot.slane %v16159_v20, %v16137_v1  ;;  %v16160_v3 = vld [vmem:[#allocation66_spill] sm:$0xff]  ;;  %v5267_v56 = vrot.slane %v16161_v32, %v16137_v1  ;;  %v16162_v51 = vld [vmem:[#allocation100_spill] sm:$0xff] }
 0x3fd   :  { %v5255_v59 = vrot.slane %v16158_v19, %v16137_v1  ;;  %v5263_v24 = vrot.slane %v16160_v3, %v16137_v1  ;;  %v5271_v0 = vrot.slane %v16162_v51, %v16137_v1  ;;  %v16163_v29 = vld [vmem:[#allocation86_spill] sm:$0xff]  ;;  %v16164_v48 = vld [vmem:[#allocation87_spill] sm:$0xff]  ;;  %v16165_v19 = vld [vmem:[#allocation88_spill] sm:$0xff]  ;;  %v5291_v3 = vrot.slane %v16072_v50, %v16137_v1 }
 0x3fe   :  { %v5275_v14 = vrot.slane %v16163_v29, %v16137_v1  ;;  %v5279_v31 = vrot.slane %v16164_v48, %v16137_v1  ;;  %v5283_v60 = vrot.slane %v16165_v19, %v16137_v1  ;;  %v16166_v20 = vld [vmem:[#allocation90_spill] sm:$0xff]  ;;  %v16167_v63 = vld [vmem:[#allocation164_spill] sm:$0xff] }
 0x3ff   :  { %v5287_v16 = vrot.slane %v16166_v20, %v16137_v1  ;;  %v5305_v32 = vmul.f32 %v16167_v63, %v5175_v36  ;;  %v5306_v18 = vmul.f32 %v16167_v63, %v5179_v38  ;;  %v5307_v51 = vmul.f32 %v16167_v63, %v5183_v4 }
 0x400   :  { %v5308_v29 = vmul.f32 %v16167_v63, %v5187_v17  ;;  %v5309_v54 = vmul.f32 %v16167_v63, %v5191_v5  ;;  %v5310_v48 = vmul.f32 %v16167_v63, %v5195_v58  ;;  %v5311_v19 = vmul.f32 %v16167_v63, %v5199_v34 }
 0x401   :  { %v5312_v43 = vmul.f32 %v16167_v63, %v5203_v7  ;;  %v5313_v20 = vmul.f32 %v16167_v63, %v5207_v40  ;;  %v5314_v1 = vmul.f32 %v16167_v63, %v5211_v6  ;;  %v5315_v36 = vmul.f32 %v16167_v63, %v5215_v8 }
 0x402   :  { %v5316_v38 = vmul.f32 %v16167_v63, %v5219_v10  ;;  %v5317_v4 = vmul.f32 %v16167_v63, %v5223_v41  ;;  %v5318_v17 = vmul.f32 %v16167_v63, %v5227_v49  ;;  %v5319_v5 = vmul.f32 %v16167_v63, %v5231_v25 }
 0x403   :  { %v5320_v58 = vmul.f32 %v16167_v63, %v5235_v27  ;;  %v5321_v34 = vmul.f32 %v16167_v63, %v5239_v21  ;;  %v5322_v7 = vmul.f32 %v16167_v63, %v5243_v28  ;;  %v5323_v40 = vmul.f32 %v16167_v63, %v5247_v23 }
 0x404   :  { %v5324_v6 = vmul.f32 %v16167_v63, %v5251_v46  ;;  %v5325_v8 = vmul.f32 %v16167_v63, %v5255_v59  ;;  %v5326_v10 = vmul.f32 %v16167_v63, %v5259_v33  ;;  %v5327_v41 = vmul.f32 %v16167_v63, %v5263_v24 }
 0x405   :  { %v5328_v49 = vmul.f32 %v16167_v63, %v5267_v56  ;;  %v5329_v25 = vmul.f32 %v16167_v63, %v5271_v0  ;;  %v5330_v27 = vmul.f32 %v16167_v63, %v5275_v14  ;;  %v5331_v21 = vmul.f32 %v16167_v63, %v5279_v31 }
 0x406   :  { %v5332_v28 = vmul.f32 %v16167_v63, %v5283_v60  ;;  %v5333_v23 = vmul.f32 %v16167_v63, %v5287_v16  ;;  %v5334_v46 = vmul.f32 %v16167_v63, %v5291_v3  ;;  %v12684_v59 = vadd.f32 %v5305_v32, %v12504_v12  ;;  %v16186_v3 = vld [vmem:[#allocation21_spill] sm:$0xff] }
 0x407   :  { %v12687_v33 = vadd.f32 %v5306_v18, %v12507_v62  ;;  %v12690_v56 = vadd.f32 %v5307_v51, %v12510_v35  ;;  %v12693_v0 = vadd.f32 %v5308_v29, %v12513_v15  ;;  %v12696_v31 = vadd.f32 %v5309_v54, %v12516_v30  ;;  %v16182_v51 = vld [vmem:[#allocation44_spill] sm:$0xff] }
 0x408   :  { %v12699_v60 = vadd.f32 %v5310_v48, %v12519_v61  ;;  %v12702_v63 = vadd.f32 %v5311_v19, %v12522_v2  ;;  %v12705_v12 = vadd.f32 %v5312_v43, %v12525_v22  ;;  %v12708_v62 = vadd.f32 %v5313_v20, %v12528_v37  ;;  %v16184_v48 = vld [vmem:[#allocation61_spill] sm:$0xff]  ;;  %v16185_v19 = vld [vmem:[#allocation20_spill] sm:$0xff] }
 0x409   :  { %v12711_v35 = vadd.f32 %v5314_v1, %v12531_v53  ;;  %v12714_v15 = vadd.f32 %v5315_v36, %v12534_v13  ;;  %v12717_v30 = vadd.f32 %v5316_v38, %v12537_v45  ;;  %v12720_v61 = vadd.f32 %v5317_v4, %v12540_v55  ;;  %v16187_v36 = vld [vmem:[#allocation26_spill] sm:$0xff]  ;;  %v16188_v4 = vld [vmem:[#allocation12_spill] sm:$0xff] }
 0x40a   :  { %v12723_v2 = vadd.f32 %v5318_v17, %v12543_v39  ;;  %v12726_v22 = vadd.f32 %v5319_v5, %v12546_v42  ;;  %v12729_v37 = vadd.f32 %v5320_v58, %v12549_v47  ;;  %v12732_v53 = vadd.f32 %v5321_v34, %v12552_v26  ;;  %v16168_v47 = vld [vmem:[#allocation138_spill] sm:$0xff]  ;;  %v16170_v26 = vld [vmem:[#allocation24_spill] sm:$0xff]  ;;  %v16190_v34 = vld [vmem:[#allocation15_spill] sm:$0xff] }
 0x40b   :  { %v12735_v13 = vadd.f32 %v5322_v7, %v12555_v11  ;;  %v12738_v45 = vadd.f32 %v5323_v40, %v12558_v52  ;;  %v12741_v55 = vadd.f32 %v5324_v6, %v12561_v44  ;;  %v12744_v39 = vadd.f32 %v5325_v8, %v12564_v57  ;;  %v16172_v11 = vld [vmem:[#allocation89_spill] sm:$0xff]  ;;  %v16174_v52 = vld [vmem:[#allocation102_spill] sm:$0xff]  ;;  %v16176_v44 = vld [vmem:[#allocation128_spill] sm:$0xff] }
 0x40c   :  { %v12747_v42 = vadd.f32 %v5326_v10, %v12567_v9  ;;  %v12750_v43 = vadd.f32 %v5327_v41, %v16168_v47  ;;  %v12753_v54 = vadd.f32 %v5328_v49, %v16170_v26  ;;  %v12756_v18 = vadd.f32 %v5329_v25, %v16172_v11  ;;  %v16178_v57 = vld [vmem:[#allocation30_spill] sm:$0xff]  ;;  %v16191_v40 = vld [vmem:[#allocation16_spill] sm:$0xff]  ;;  %v16194_v25 = vld [vmem:[#allocation55_spill] sm:$0xff] }
 0x40d   :  { %v12759_v16 = vadd.f32 %v5330_v27, %v16174_v52  ;;  %v12762_v14 = vadd.f32 %v5331_v21, %v16176_v44  ;;  %v12765_v24 = vadd.f32 %v5332_v28, %v16178_v57  ;;  %v16180_v9 = vld [vmem:[#allocation70_spill] sm:$0xff]  ;;  %v12771_v29 = vadd.f32 %v5334_v46, %v16182_v51  ;;  %v16195_v21 = vld [vmem:[#allocation7_spill] sm:$0xff]  ;;  %v16198_v11 = vld [vmem:[#allocation49_spill] sm:$0xff] }
 0x40e   :  { %16169 = vst [vmem:[#allocation148_spill] sm:$0xff] %v12750_v43  ;;  %16171 = vst [vmem:[#allocation31_spill] sm:$0xff] %v12753_v54  ;;  %v12768_v32 = vadd.f32 %v5333_v23, %v16180_v9  ;;  %v5372_v20 = vrot.slane %v16185_v19, %v16184_v48  ;;  %v5376_v1 = vrot.slane %v16186_v3, %v16184_v48  ;;  %v16189_v5 = vld [vmem:[#allocation14_spill] sm:$0xff]  ;;  %v16196_v23 = vld [vmem:[#allocation8_spill] sm:$0xff] }
 0x40f   :  { %16173 = vst [vmem:[#allocation73_spill] sm:$0xff] %v12756_v18  ;;  %16175 = vst [vmem:[#allocation68_spill] sm:$0xff] %v12759_v16  ;;  %v5380_v38 = vrot.slane %v16187_v36, %v16184_v48  ;;  %v5384_v17 = vrot.slane %v16188_v4, %v16184_v48  ;;  %v5388_v58 = vrot.slane %v16189_v5, %v16184_v48  ;;  %v16192_v8 = vld [vmem:[#allocation18_spill] sm:$0xff]  ;;  %v16197_v47 = vld [vmem:[#allocation11_spill] sm:$0xff] }
 0x410   :  { %16177 = vst [vmem:[#allocation149_spill] sm:$0xff] %v12762_v14  ;;  %16179 = vst [vmem:[#allocation32_spill] sm:$0xff] %v12765_v24  ;;  %v5392_v7 = vrot.slane %v16190_v34, %v16184_v48  ;;  %v5396_v6 = vrot.slane %v16191_v40, %v16184_v48  ;;  %v5400_v10 = vrot.slane %v16192_v8, %v16184_v48  ;;  %v16193_v41 = vld [vmem:[#allocation50_spill] sm:$0xff]  ;;  %v16199_v44 = vld [vmem:[#allocation29_spill] sm:$0xff] }
 0x411   :  { %16181 = vst [vmem:[#allocation78_spill] sm:$0xff] %v12768_v32  ;;  %16183 = vst [vmem:[#allocation60_spill] sm:$0xff] %v12771_v29  ;;  %v5404_v49 = vrot.slane %v16193_v41, %v16184_v48  ;;  %v5408_v27 = vrot.slane %v16194_v25, %v16184_v48  ;;  %v5412_v28 = vrot.slane %v16195_v21, %v16184_v48  ;;  %v16200_v9 = vld [vmem:[#allocation37_spill] sm:$0xff]  ;;  %v16202_v36 = vld [vmem:[#allocation95_spill] sm:$0xff] }
 0x412   :  { %v5416_v46 = vrot.slane %v16196_v23, %v16184_v48  ;;  %v5420_v26 = vrot.slane %v16197_v47, %v16184_v48  ;;  %v5424_v52 = vrot.slane %v16198_v11, %v16184_v48  ;;  %v5428_v57 = vrot.slane %v16199_v44, %v16184_v48  ;;  %v16201_v19 = vld [vmem:[#allocation45_spill] sm:$0xff]  ;;  %v16203_v5 = vld [vmem:[#allocation98_spill] sm:$0xff]  ;;  %v16208_v44 = vld [vmem:[#allocation99_spill] sm:$0xff] }
 0x413   :  { %v5432_v51 = vrot.slane %v16200_v9, %v16184_v48  ;;  %v5436_v3 = vrot.slane %v16201_v19, %v16184_v48  ;;  %v5440_v4 = vrot.slane %v16202_v36, %v16184_v48  ;;  %v5444_v34 = vrot.slane %v16203_v5, %v16184_v48  ;;  %v16204_v40 = vld [vmem:[#allocation105_spill] sm:$0xff]  ;;  %v16206_v21 = vld [vmem:[#allocation62_spill] sm:$0xff]  ;;  %v16209_v19 = vld [vmem:[#allocation100_spill] sm:$0xff] }
 0x414   :  { %v5448_v8 = vrot.slane %v16204_v40, %v16184_v48  ;;  %v16205_v41 = vld [vmem:[#allocation57_spill] sm:$0xff]  ;;  %v5456_v23 = vrot.slane %v16206_v21, %v16184_v48  ;;  %v16207_v47 = vld [vmem:[#allocation66_spill] sm:$0xff]  ;;  %v5464_v9 = vrot.slane %v16208_v44, %v16184_v48  ;;  %v5468_v36 = vrot.slane %v16209_v19, %v16184_v48  ;;  %v16211_v40 = vld [vmem:[#allocation87_spill] sm:$0xff] }
 0x415   :  { %v5452_v25 = vrot.slane %v16205_v41, %v16184_v48  ;;  %v5460_v11 = vrot.slane %v16207_v47, %v16184_v48  ;;  %v16210_v5 = vld [vmem:[#allocation86_spill] sm:$0xff]  ;;  %v5476_v32 = vrot.slane %v16211_v40, %v16184_v48  ;;  %v16212_v41 = vld [vmem:[#allocation88_spill] sm:$0xff]  ;;  %v5488_v47 = vrot.slane %v16072_v50, %v16184_v48  ;;  %v16214_v16 = vld [vmem:[#allocation53_spill] sm:$0xff] }
 0x416   :  { %v5472_v29 = vrot.slane %v16210_v5, %v16184_v48  ;;  %v5480_v24 = vrot.slane %v16212_v41, %v16184_v48  ;;  %v16213_v21 = vld [vmem:[#allocation90_spill] sm:$0xff]  ;;  %v5502_v44 = vmul.f32 %v16214_v16, %v5372_v20  ;;  %v5503_v18 = vmul.f32 %v16214_v16, %v5376_v1 }
 0x417   :  { %v5484_v14 = vrot.slane %v16213_v21, %v16184_v48  ;;  %v5504_v19 = vmul.f32 %v16214_v16, %v5380_v38  ;;  %v5505_v5 = vmul.f32 %v16214_v16, %v5384_v17  ;;  %v5506_v54 = vmul.f32 %v16214_v16, %v5388_v58 }
 0x418   :  { %v5507_v40 = vmul.f32 %v16214_v16, %v5392_v7  ;;  %v5508_v41 = vmul.f32 %v16214_v16, %v5396_v6  ;;  %v5509_v43 = vmul.f32 %v16214_v16, %v5400_v10  ;;  %v5510_v21 = vmul.f32 %v16214_v16, %v5404_v49 }
 0x419   :  { %v5511_v50 = vmul.f32 %v16214_v16, %v5408_v27  ;;  %v5512_v48 = vmul.f32 %v16214_v16, %v5412_v28  ;;  %v5513_v20 = vmul.f32 %v16214_v16, %v5416_v46  ;;  %v5514_v1 = vmul.f32 %v16214_v16, %v5420_v26 }
 0x41a   :  { %v5515_v38 = vmul.f32 %v16214_v16, %v5424_v52  ;;  %v5516_v17 = vmul.f32 %v16214_v16, %v5428_v57  ;;  %v5517_v58 = vmul.f32 %v16214_v16, %v5432_v51  ;;  %v5518_v7 = vmul.f32 %v16214_v16, %v5436_v3 }
 0x41b   :  { %v5519_v6 = vmul.f32 %v16214_v16, %v5440_v4  ;;  %v5520_v10 = vmul.f32 %v16214_v16, %v5444_v34  ;;  %v5521_v49 = vmul.f32 %v16214_v16, %v5448_v8  ;;  %v5522_v27 = vmul.f32 %v16214_v16, %v5452_v25 }
 0x41c   :  { %v5523_v28 = vmul.f32 %v16214_v16, %v5456_v23  ;;  %v5524_v46 = vmul.f32 %v16214_v16, %v5460_v11  ;;  %v5525_v26 = vmul.f32 %v16214_v16, %v5464_v9  ;;  %v5526_v52 = vmul.f32 %v16214_v16, %v5468_v36 }
 0x41d   :  { %v5527_v57 = vmul.f32 %v16214_v16, %v5472_v29  ;;  %v5528_v51 = vmul.f32 %v16214_v16, %v5476_v32  ;;  %v5529_v3 = vmul.f32 %v16214_v16, %v5480_v24  ;;  %v5530_v4 = vmul.f32 %v16214_v16, %v5484_v14 }
 0x41e   :  { %v5531_v34 = vmul.f32 %v16214_v16, %v5488_v47  ;;  %v12864_v8 = vadd.f32 %v5502_v44, %v12684_v59  ;;  %v12867_v25 = vadd.f32 %v5503_v18, %v12687_v33  ;;  %v12870_v23 = vadd.f32 %v5504_v19, %v12690_v56  ;;  %v16222_v47 = vld [vmem:[#allocation60_spill] sm:$0xff] }
 0x41f   :  { %v12873_v11 = vadd.f32 %v5505_v5, %v12693_v0  ;;  %v12876_v32 = vadd.f32 %v5506_v54, %v12696_v31  ;;  %v12879_v24 = vadd.f32 %v5507_v40, %v12699_v60  ;;  %v12882_v16 = vadd.f32 %v5508_v41, %v12702_v63  ;;  %v16223_v19 = vld [vmem:[#allocation132_spill] sm:$0xff] }
 0x420   :  { %v12885_v59 = vadd.f32 %v5509_v43, %v12705_v12  ;;  %v12888_v33 = vadd.f32 %v5510_v21, %v12708_v62  ;;  %v12891_v56 = vadd.f32 %v5511_v50, %v12711_v35  ;;  %v12894_v0 = vadd.f32 %v5512_v48, %v12714_v15 }
 0x421   :  { %v12897_v31 = vadd.f32 %v5513_v20, %v12717_v30  ;;  %v12900_v60 = vadd.f32 %v5514_v1, %v12720_v61  ;;  %v12903_v63 = vadd.f32 %v5515_v38, %v12723_v2  ;;  %v12906_v12 = vadd.f32 %v5516_v17, %v12726_v22 }
 0x422   :  { %v12909_v62 = vadd.f32 %v5517_v58, %v12729_v37  ;;  %v12912_v35 = vadd.f32 %v5518_v7, %v12732_v53  ;;  %v12915_v15 = vadd.f32 %v5519_v6, %v12735_v13  ;;  %v12918_v30 = vadd.f32 %v5520_v10, %v12738_v45  ;;  %v16215_v37 = vld [vmem:[#allocation148_spill] sm:$0xff]  ;;  %v16216_v53 = vld [vmem:[#allocation31_spill] sm:$0xff]  ;;  %v16217_v13 = vld [vmem:[#allocation73_spill] sm:$0xff] }
 0x423   :  { %v12921_v61 = vadd.f32 %v5521_v49, %v12741_v55  ;;  %v12924_v2 = vadd.f32 %v5522_v27, %v12744_v39  ;;  %v12927_v22 = vadd.f32 %v5523_v28, %v12747_v42  ;;  %v12930_v43 = vadd.f32 %v5524_v46, %v16215_v37  ;;  %v16218_v45 = vld [vmem:[#allocation68_spill] sm:$0xff]  ;;  %v16219_v55 = vld [vmem:[#allocation149_spill] sm:$0xff]  ;;  %v16221_v42 = vld [vmem:[#allocation78_spill] sm:$0xff] }
 0x424   :  { %v12933_v54 = vadd.f32 %v5525_v26, %v16216_v53  ;;  %v12936_v18 = vadd.f32 %v5526_v52, %v16217_v13  ;;  %v12939_v14 = vadd.f32 %v5527_v57, %v16218_v45  ;;  %v12942_v29 = vadd.f32 %v5528_v51, %v16219_v55  ;;  %v16220_v39 = vld [vmem:[#allocation32_spill] sm:$0xff] }
 0x425   :  { %v12945_v9 = vadd.f32 %v5529_v3, %v16220_v39  ;;  %v12948_v36 = vadd.f32 %v5530_v4, %v16221_v42  ;;  %v12951_v44 = vadd.f32 %v5531_v34, %v16222_v47  ;;  %v12955_v5 = vmul.f32 %v16223_v19, %v12864_v8  ;;  %v16234_v39 = vld [vmem:[#allocation82_spill] sm:$0xff] }
 0x426   :  { %v12959_v40 = vmul.f32 %v16223_v19, %v12867_v25  ;;  %v12963_v41 = vmul.f32 %v16223_v19, %v12870_v23  ;;  %v12967_v21 = vmul.f32 %v16223_v19, %v12873_v11  ;;  %v12971_v50 = vmul.f32 %v16223_v19, %v12876_v32 }
 0x427   :  { %v12975_v48 = vmul.f32 %v16223_v19, %v12879_v24  ;;  %v12979_v20 = vmul.f32 %v16223_v19, %v12882_v16  ;;  %v12983_v1 = vmul.f32 %v16223_v19, %v12885_v59  ;;  %v12987_v38 = vmul.f32 %v16223_v19, %v12888_v33 }
 0x428   :  { %v12991_v17 = vmul.f32 %v16223_v19, %v12891_v56  ;;  %v12995_v58 = vmul.f32 %v16223_v19, %v12894_v0  ;;  %v12999_v7 = vmul.f32 %v16223_v19, %v12897_v31  ;;  %v13003_v6 = vmul.f32 %v16223_v19, %v12900_v60 }
 0x429   :  { %v13007_v10 = vmul.f32 %v16223_v19, %v12903_v63  ;;  %v13011_v49 = vmul.f32 %v16223_v19, %v12906_v12  ;;  %v13015_v27 = vmul.f32 %v16223_v19, %v12909_v62  ;;  %v13019_v28 = vmul.f32 %v16223_v19, %v12912_v35 }
 0x42a   :  { %v13023_v46 = vmul.f32 %v16223_v19, %v12915_v15  ;;  %v13027_v26 = vmul.f32 %v16223_v19, %v12918_v30  ;;  %v13031_v52 = vmul.f32 %v16223_v19, %v12921_v61  ;;  %v13035_v57 = vmul.f32 %v16223_v19, %v12924_v2 }
 0x42b   :  { %v13039_v51 = vmul.f32 %v16223_v19, %v12927_v22  ;;  %v13043_v3 = vmul.f32 %v16223_v19, %v12930_v43  ;;  %v13047_v4 = vmul.f32 %v16223_v19, %v12933_v54  ;;  %v13051_v34 = vmul.f32 %v16223_v19, %v12936_v18 }
 0x42c   :  { %16224 = vst [vmem:[#allocation150_spill] sm:$0xff] %v13035_v57  ;;  %v13055_v37 = vmul.f32 %v16223_v19, %v12939_v14  ;;  %v13059_v53 = vmul.f32 %v16223_v19, %v12942_v29  ;;  %v13063_v13 = vmul.f32 %v16223_v19, %v12945_v9  ;;  %v13067_v45 = vmul.f32 %v16223_v19, %v12948_v36 }
 0x42d   :  { %16225 = vst [vmem:[#allocation38_spill] sm:$0xff] %v13039_v51  ;;  %16226 = vst [vmem:[#allocation80_spill] sm:$0xff] %v13043_v3  ;;  %v13071_v55 = vmul.f32 %v16223_v19, %v12951_v44  ;;  %v13074_v42 = vmul.f32 0.0, %v16234_v39  ;;  %v13078_v47 = vmul.f32 %v16234_v39, %v12864_v8 }
 0x42e   :  { %16227 = vst [vmem:[#allocation43_spill] sm:$0xff] %v13047_v4  ;;  %16228 = vst [vmem:[#allocation152_spill] sm:$0xff] %v13051_v34 }
 0x42f   :  { %16229 = vst [vmem:[#allocation39_spill] sm:$0xff] %v13055_v37  ;;  %16230 = vst [vmem:[#allocation81_spill] sm:$0xff] %v13059_v53  ;;  %v13082_v53 = vmul.f32 %v16234_v39, %v12867_v25  ;;  %v16267_v37 = vld [vmem:[#allocation165_spill] sm:$0xff] }
 0x430   :  { %16231 = vst [vmem:[#allocation69_spill] sm:$0xff] %v13063_v13  ;;  %16232 = vst [vmem:[#allocation153_spill] sm:$0xff] %v13067_v45  ;;  %v13086_v13 = vmul.f32 %v16234_v39, %v12870_v23  ;;  %v13090_v45 = vmul.f32 %v16234_v39, %v12873_v11 }
 0x431   :  { %16233 = vst [vmem:[#allocation40_spill] sm:$0xff] %v13071_v55  ;;  %16235 = vst [vmem:[#allocation83_spill] sm:$0xff] %v13074_v42  ;;  %v13094_v55 = vmul.f32 %v16234_v39, %v12876_v32  ;;  %v13098_v42 = vmul.f32 %v16234_v39, %v12879_v24 }
 0x432   :  { %16236 = vst [vmem:[#allocation74_spill] sm:$0xff] %v13078_v47  ;;  %16237 = vst [vmem:[#allocation154_spill] sm:$0xff] %v13082_v53  ;;  %v13102_v47 = vmul.f32 %v16234_v39, %v12882_v16  ;;  %v13106_v53 = vmul.f32 %v16234_v39, %v12885_v59 }
 0x433   :  { %16238 = vst [vmem:[#allocation75_spill] sm:$0xff] %v13086_v13  ;;  %16239 = vst [vmem:[#allocation35_spill] sm:$0xff] %v13090_v45  ;;  %v13110_v13 = vmul.f32 %v16234_v39, %v12888_v33  ;;  %v13114_v45 = vmul.f32 %v16234_v39, %v12891_v56 }
 0x434   :  { %16240 = vst [vmem:[#allocation77_spill] sm:$0xff] %v13094_v55  ;;  %16241 = vst [vmem:[#allocation46_spill] sm:$0xff] %v13098_v42  ;;  %v13118_v55 = vmul.f32 %v16234_v39, %v12894_v0  ;;  %v13122_v42 = vmul.f32 %v16234_v39, %v12897_v31 }
 0x435   :  { %16242 = vst [vmem:[#allocation111_spill] sm:$0xff] %v13102_v47  ;;  %16243 = vst [vmem:[#allocation17_spill] sm:$0xff] %v13106_v53  ;;  %v13126_v47 = vmul.f32 %v16234_v39, %v12900_v60  ;;  %v13130_v53 = vmul.f32 %v16234_v39, %v12903_v63 }
 0x436   :  { %16244 = vst [vmem:[#allocation103_spill] sm:$0xff] %v13110_v13  ;;  %16245 = vst [vmem:[#allocation47_spill] sm:$0xff] %v13114_v45  ;;  %v13134_v13 = vmul.f32 %v16234_v39, %v12906_v12  ;;  %v13138_v45 = vmul.f32 %v16234_v39, %v12909_v62 }
 0x437   :  { %16246 = vst [vmem:[#allocation140_spill] sm:$0xff] %v13118_v55  ;;  %16247 = vst [vmem:[#allocation19_spill] sm:$0xff] %v13122_v42  ;;  %v13142_v55 = vmul.f32 %v16234_v39, %v12912_v35  ;;  %v13146_v42 = vmul.f32 %v16234_v39, %v12915_v15 }
 0x438   :  { %16248 = vst [vmem:[#allocation104_spill] sm:$0xff] %v13126_v47  ;;  %16249 = vst [vmem:[#allocation48_spill] sm:$0xff] %v13130_v53  ;;  %v13150_v47 = vmul.f32 %v16234_v39, %v12918_v30  ;;  %v13154_v53 = vmul.f32 %v16234_v39, %v12921_v61 }
 0x439   :  { %16250 = vst [vmem:[#allocation106_spill] sm:$0xff] %v13134_v13  ;;  %16251 = vst [vmem:[#allocation9_spill] sm:$0xff] %v13138_v45  ;;  %v13158_v13 = vmul.f32 %v16234_v39, %v12924_v2  ;;  %v13162_v45 = vmul.f32 %v16234_v39, %v12927_v22 }
 0x43a   :  { %16252 = vst [vmem:[#allocation54_spill] sm:$0xff] %v13142_v55  ;;  %16253 = vst [vmem:[#allocation96_spill] sm:$0xff] %v13146_v42  ;;  %v13166_v55 = vmul.f32 %v16234_v39, %v12930_v43  ;;  %v13170_v42 = vmul.f32 %v16234_v39, %v12933_v54 }
 0x43b   :  { %16254 = vst [vmem:[#allocation56_spill] sm:$0xff] %v13150_v47  ;;  %16255 = vst [vmem:[#allocation25_spill] sm:$0xff] %v13154_v53  ;;  %v13174_v47 = vmul.f32 %v16234_v39, %v12936_v18  ;;  %v13178_v53 = vmul.f32 %v16234_v39, %v12939_v14 }
 0x43c   :  { %16256 = vst [vmem:[#allocation27_spill] sm:$0xff] %v13158_v13  ;;  %16257 = vst [vmem:[#allocation28_spill] sm:$0xff] %v13162_v45  ;;  %v13182_v13 = vmul.f32 %v16234_v39, %v12942_v29  ;;  %v13186_v45 = vmul.f32 %v16234_v39, %v12945_v9 }
 0x43d   :  { %16258 = vst [vmem:[#allocation33_spill] sm:$0xff] %v13166_v55  ;;  %16259 = vst [vmem:[#allocation63_spill] sm:$0xff] %v13170_v42  ;;  %v13190_v55 = vmul.f32 %v16234_v39, %v12948_v36  ;;  %v13194_v42 = vmul.f32 %v16234_v39, %v12951_v44 }
 0x43e   :  { %16260 = vst [vmem:[#allocation157_spill] sm:$0xff] %v13174_v47  ;;  %16261 = vst [vmem:[#allocation158_spill] sm:$0xff] %v13178_v53  ;;  %v16266_v47 = vld [vmem:[#allocation112_spill] sm:$0xff]  ;;  %v16268_v53 = vld [vmem:[#allocation114_spill] sm:$0xff] }
 0x43f   :  { %16262 = vst [vmem:[#allocation160_spill] sm:$0xff] %v13182_v13  ;;  %16263 = vst [vmem:[#allocation161_spill] sm:$0xff] %v13186_v45  ;;  %v5367_v34 = vadd.f32 %v16267_v37, %v16266_v47  ;;  %v13200_v4 = vmul.f32 %v16223_v19, %v16268_v53  ;;  %v16270_v13 = vld [vmem:[#allocation94_spill] sm:$0xff]  ;;  %v16271_v47 = vld [vmem:[#allocation51_spill] sm:$0xff] }
 0x440   :  { %16264 = vst [vmem:[#allocation162_spill] sm:$0xff] %v13190_v55  ;;  %16265 = vst [vmem:[#allocation10_spill] sm:$0xff] %v13194_v42  ;;  %v5611_v3 = vmul.f32 0.0, %v16270_v13  ;;  %v5612_v45 = vmul.f32 %v16270_v13, %v12864_v8  ;;  %v5613_v51 = vmul.f32 %v16270_v13, %v12867_v25  ;;  %v5614_v55 = vmul.f32 %v16270_v13, %v12870_v23 }
 0x441   :  { %16269 = vst [vmem:[#allocation139_spill] sm:$0xff] %v13200_v4  ;;  %v5615_v39 = vmul.f32 %v16270_v13, %v12873_v11  ;;  %v5616_v37 = vmul.f32 %v16270_v13, %v12876_v32  ;;  %v5564_v53 = vadd.f32 %v16271_v47, %v5367_v34  ;;  %v5617_v42 = vmul.f32 %v16270_v13, %v12879_v24 }
 0x442   :  { %v5618_v8 = vmul.f32 %v16270_v13, %v12882_v16  ;;  %v5619_v25 = vmul.f32 %v16270_v13, %v12885_v59  ;;  %v5620_v23 = vmul.f32 %v16270_v13, %v12888_v33  ;;  %v5621_v11 = vmul.f32 %v16270_v13, %v12891_v56 }
 0x443   :  { %v5622_v32 = vmul.f32 %v16270_v13, %v12894_v0  ;;  %v5623_v34 = vmul.f32 %v16270_v13, %v12897_v31  ;;  %v5604_v24 = vmul.f32 %v16223_v19, %v5564_v53  ;;  %v5624_v16 = vmul.f32 %v16270_v13, %v12900_v60 }
 0x444   :  { %v5625_v59 = vmul.f32 %v16270_v13, %v12903_v63  ;;  %v5626_v33 = vmul.f32 %v16270_v13, %v12906_v12  ;;  %v5627_v56 = vmul.f32 %v16270_v13, %v12909_v62  ;;  %v5628_v0 = vmul.f32 %v16270_v13, %v12912_v35 }
 0x445   :  { %v5629_v31 = vmul.f32 %v16270_v13, %v12915_v15  ;;  %v5630_v19 = vmul.f32 %v16270_v13, %v12918_v30  ;;  %v5631_v60 = vmul.f32 %v16270_v13, %v12921_v61  ;;  %v5632_v63 = vmul.f32 %v16270_v13, %v12924_v2 }
 0x446   :  { %v5633_v12 = vmul.f32 %v16270_v13, %v12927_v22  ;;  %v5634_v62 = vmul.f32 %v16270_v13, %v12930_v43  ;;  %v5635_v35 = vmul.f32 %v16270_v13, %v12933_v54  ;;  %v5636_v15 = vmul.f32 %v16270_v13, %v12936_v18 }
 0x447   :  { %v5637_v30 = vmul.f32 %v16270_v13, %v12939_v14  ;;  %v5638_v61 = vmul.f32 %v16270_v13, %v12942_v29  ;;  %v5639_v2 = vmul.f32 %v16270_v13, %v12945_v9  ;;  %v5640_v22 = vmul.f32 %v16270_v13, %v12948_v36 }
 0x448   :  { %v5641_v43 = vmul.f32 %v16270_v13, %v12951_v44  ;;  %v5642_v54 = vmul.f32 %v16270_v13, %v5564_v53  ;;  %v5643_v47 = vadd.f32 %v5611_v3, %v12955_v5  ;;  %v5644_v18 = vadd.f32 %v5612_v45, %v12959_v40  ;;  %v16273_v3 = vld [vmem:[#allocation38_spill] sm:$0xff]  ;;  %v16274_v45 = vld [vmem:[#allocation80_spill] sm:$0xff]  ;;  %v16279_v53 = vld [vmem:[#allocation69_spill] sm:$0xff] }
 0x449   :  { %v5645_v14 = vadd.f32 %v5613_v51, %v12963_v41  ;;  %v5646_v4 = vadd.f32 %v5614_v55, %v12967_v21  ;;  %v5647_v29 = vadd.f32 %v5615_v39, %v12971_v50  ;;  %v5648_v9 = vadd.f32 %v5616_v37, %v12975_v48  ;;  %v16272_v51 = vld [vmem:[#allocation150_spill] sm:$0xff]  ;;  %v16275_v55 = vld [vmem:[#allocation43_spill] sm:$0xff]  ;;  %v16278_v37 = vld [vmem:[#allocation81_spill] sm:$0xff] }
 0x44a   :  { %v5649_v57 = vadd.f32 %v5617_v42, %v12979_v20  ;;  %v5650_v36 = vadd.f32 %v5618_v8, %v12983_v1  ;;  %v5651_v44 = vadd.f32 %v5619_v25, %v12987_v38  ;;  %v5652_v13 = vadd.f32 %v5620_v23, %v12991_v17  ;;  %v16276_v42 = vld [vmem:[#allocation152_spill] sm:$0xff]  ;;  %v16277_v39 = vld [vmem:[#allocation39_spill] sm:$0xff]  ;;  %v16280_v8 = vld [vmem:[#allocation153_spill] sm:$0xff] }
 0x44b   :  { %v5653_v5 = vadd.f32 %v5621_v11, %v12995_v58  ;;  %v5654_v40 = vadd.f32 %v5622_v32, %v12999_v7  ;;  %v5655_v41 = vadd.f32 %v5623_v34, %v13003_v6  ;;  %v5656_v21 = vadd.f32 %v5624_v16, %v13007_v10  ;;  %v16281_v25 = vld [vmem:[#allocation40_spill] sm:$0xff]  ;;  %v16282_v11 = vld [vmem:[#allocation139_spill] sm:$0xff] }
 0x44c   :  { %v5657_v50 = vadd.f32 %v5625_v59, %v13011_v49  ;;  %v5658_v48 = vadd.f32 %v5626_v33, %v13015_v27  ;;  %v5659_v20 = vadd.f32 %v5627_v56, %v13019_v28  ;;  %v5660_v1 = vadd.f32 %v5628_v0, %v13023_v46  ;;  %v16283_v34 = vld [vmem:[#allocation83_spill] sm:$0xff]  ;;  %v16284_v33 = vld [vmem:[#allocation74_spill] sm:$0xff] }
 0x44d   :  { %v5661_v38 = vadd.f32 %v5629_v31, %v13027_v26  ;;  %v5662_v17 = vadd.f32 %v5630_v19, %v13031_v52  ;;  %v5663_v58 = vadd.f32 %v5631_v60, %v16272_v51  ;;  %v5664_v7 = vadd.f32 %v5632_v63, %v16273_v3  ;;  %v16285_v0 = vld [vmem:[#allocation154_spill] sm:$0xff]  ;;  %v16286_v19 = vld [vmem:[#allocation75_spill] sm:$0xff]  ;;  %v16296_v51 = vld [vmem:[#allocation104_spill] sm:$0xff] }
 0x44e   :  { %v5665_v6 = vadd.f32 %v5633_v12, %v16274_v45  ;;  %v5666_v10 = vadd.f32 %v5634_v62, %v16275_v55  ;;  %v5667_v49 = vadd.f32 %v5635_v35, %v16276_v42  ;;  %v5668_v27 = vadd.f32 %v5636_v15, %v16277_v39  ;;  %v16287_v63 = vld [vmem:[#allocation35_spill] sm:$0xff]  ;;  %v16288_v62 = vld [vmem:[#allocation77_spill] sm:$0xff]  ;;  %v16289_v15 = vld [vmem:[#allocation46_spill] sm:$0xff] }
 0x44f   :  { %v5669_v28 = vadd.f32 %v5637_v30, %v16278_v37  ;;  %v5670_v46 = vadd.f32 %v5638_v61, %v16279_v53  ;;  %v5671_v26 = vadd.f32 %v5639_v2, %v16280_v8  ;;  %v5672_v52 = vadd.f32 %v5640_v22, %v16281_v25  ;;  %v16290_v61 = vld [vmem:[#allocation111_spill] sm:$0xff]  ;;  %v16291_v2 = vld [vmem:[#allocation17_spill] sm:$0xff]  ;;  %v16297_v3 = vld [vmem:[#allocation48_spill] sm:$0xff] }
 0x450   :  { %v5673_v23 = vadd.f32 %v5641_v43, %v5604_v24  ;;  %v5674_v32 = vadd.f32 %v5642_v54, %v16282_v11  ;;  %v5711_v16 = vadd.f32 %v16283_v34, %v5643_v47  ;;  %v5712_v59 = vadd.f32 %v16283_v34, %v5644_v18  ;;  %v16292_v43 = vld [vmem:[#allocation103_spill] sm:$0xff]  ;;  %v16300_v45 = vld [vmem:[#allocation54_spill] sm:$0xff]  ;;  %v16301_v42 = vld [vmem:[#allocation96_spill] sm:$0xff] }
 0x451   :  { %v5713_v56 = vadd.f32 %v16284_v33, %v5645_v14  ;;  %v5714_v31 = vadd.f32 %v16285_v0, %v5646_v4  ;;  %v5715_v60 = vadd.f32 %v16286_v19, %v5647_v29  ;;  %v5716_v12 = vadd.f32 %v16287_v63, %v5648_v9  ;;  %v16293_v47 = vld [vmem:[#allocation47_spill] sm:$0xff]  ;;  %v16294_v4 = vld [vmem:[#allocation140_spill] sm:$0xff]  ;;  %v16308_v11 = vld [vmem:[#allocation157_spill] sm:$0xff] }
 0x452   :  { %v5717_v35 = vadd.f32 %v16288_v62, %v5649_v57  ;;  %v5718_v30 = vadd.f32 %v16289_v15, %v5650_v36  ;;  %v5719_v24 = vadd.f32 %v16290_v61, %v5651_v44  ;;  %v5720_v22 = vadd.f32 %v16291_v2, %v5652_v13  ;;  %5745 = vst [vmem:[#allocation2] sm:$0x7] %v5711_v16  ;;  %v16295_v29 = vld [vmem:[#allocation19_spill] sm:$0xff]  ;;  %v16298_v44 = vld [vmem:[#allocation106_spill] sm:$0xff]  ;;  %v16305_v8 = vld [vmem:[#allocation28_spill] sm:$0xff] }
 0x453   :  { %v5721_v54 = vadd.f32 %v16292_v43, %v5653_v5  ;;  %v5722_v18 = vadd.f32 %v16293_v47, %v5654_v40  ;;  %5746 = vst [vmem:[#allocation2 + $0x10] sm:$0x7] %v5712_v59  ;;  %5747 = vst [vmem:[#allocation2 + $0x20] sm:$0x7] %v5713_v56  ;;  %v5723_v14 = vadd.f32 %v16294_v4, %v5655_v41  ;;  %v16299_v5 = vld [vmem:[#allocation9_spill] sm:$0xff]  ;;  %v16302_v41 = vld [vmem:[#allocation56_spill] sm:$0xff] }
 0x454   :  { %5748 = vst [vmem:[#allocation2 + $0x30] sm:$0x7] %v5714_v31  ;;  %v5724_v9 = vadd.f32 %v16295_v29, %v5656_v21  ;;  %v5725_v57 = vadd.f32 %v16296_v51, %v5657_v50  ;;  %v5726_v36 = vadd.f32 %v16297_v3, %v5658_v48  ;;  %5749 = vst [vmem:[#allocation2 + $0x40] sm:$0x7] %v5715_v60  ;;  %v16303_v50 = vld [vmem:[#allocation25_spill] sm:$0xff]  ;;  %v16304_v37 = vld [vmem:[#allocation27_spill] sm:$0xff] }
 0x455   :  { %5750 = vst [vmem:[#allocation2 + $0x50] sm:$0x7] %v5716_v12  ;;  %5751 = vst [vmem:[#allocation2 + $0x60] sm:$0x7] %v5717_v35  ;;  %v5727_v13 = vadd.f32 %v16298_v44, %v5659_v20  ;;  %v5728_v40 = vadd.f32 %v16299_v5, %v5660_v1  ;;  %v5729_v55 = vadd.f32 %v16300_v45, %v5661_v38  ;;  %v16306_v20 = vld [vmem:[#allocation33_spill] sm:$0xff]  ;;  %v16307_v38 = vld [vmem:[#allocation63_spill] sm:$0xff] }
 0x456   :  { %5752 = vst [vmem:[#allocation2 + $0x70] sm:$0x7] %v5718_v30  ;;  %v5730_v39 = vadd.f32 %v16301_v42, %v5662_v17  ;;  %5753 = vst [vmem:[#allocation2 + $0x80] sm:$0x7] %v5719_v24  ;;  %v5731_v21 = vadd.f32 %v16302_v41, %v5663_v58  ;;  %v5732_v48 = vadd.f32 %v16303_v50, %v5664_v7  ;;  %v16309_v16 = vld [vmem:[#allocation158_spill] sm:$0xff]  ;;  %v16310_v58 = vld [vmem:[#allocation160_spill] sm:$0xff] }
 0x457   :  { %5754 = vst [vmem:[#allocation2 + $0x90] sm:$0x7] %v5720_v22  ;;  %5755 = vst [vmem:[#allocation2 + $0xa0] sm:$0x7] %v5721_v54  ;;  %v5733_v53 = vadd.f32 %v16304_v37, %v5665_v6  ;;  %v5734_v25 = vadd.f32 %v16305_v8, %v5666_v10  ;;  %v5735_v1 = vadd.f32 %v16306_v20, %v5667_v49  ;;  %v16311_v6 = vld [vmem:[#allocation161_spill] sm:$0xff]  ;;  %v16312_v33 = vld [vmem:[#allocation162_spill] sm:$0xff] }
 0x458   :  { %5756 = vst [vmem:[#allocation2 + $0xb0] sm:$0x7] %v5722_v18  ;;  %5757 = vst [vmem:[#allocation2 + $0xc0] sm:$0x7] %v5723_v14  ;;  %v5736_v17 = vadd.f32 %v16307_v38, %v5668_v27  ;;  %v5737_v34 = vadd.f32 %v16308_v11, %v5669_v28  ;;  %v5738_v59 = vadd.f32 %v16309_v16, %v5670_v46  ;;  %v16313_v0 = vld [vmem:[#allocation10_spill] sm:$0xff]  ;;  %v13329_v49 = vmov 0.0  }
 0x459   :  { %5758 = vst [vmem:[#allocation2 + $0xd0] sm:$0x7] %v5724_v9  ;;  %5759 = vst [vmem:[#allocation2 + $0xe0] sm:$0x7] %v5725_v57  ;;  %v5739_v7 = vadd.f32 %v16310_v58, %v5671_v26  ;;  %v5740_v10 = vadd.f32 %v16311_v6, %v5672_v52  ;;  %v5741_v56 = vadd.f32 %v16312_v33, %v5673_v23  ;;  %v13331_v27 = vmov 0.0  }
 0x45a   :  { %5760 = vst [vmem:[#allocation2 + $0xf0] sm:$0x7] %v5726_v36  ;;  %5761 = vst [vmem:[#allocation2 + $0x100] sm:$0x7] %v5727_v13  ;;  %v5742_v31 = vadd.f32 %v16313_v0, %v5674_v32 }
 0x45b   :  { %5762 = vst [vmem:[#allocation2 + $0x110] sm:$0x7] %v5728_v40  ;;  %5763 = vst [vmem:[#allocation2 + $0x120] sm:$0x7] %v5729_v55 }
 0x45c   :  { %5764 = vst [vmem:[#allocation2 + $0x130] sm:$0x7] %v5730_v39  ;;  %5765 = vst [vmem:[#allocation2 + $0x140] sm:$0x7] %v5731_v21 }
 0x45d   :  { %5766 = vst [vmem:[#allocation2 + $0x150] sm:$0x7] %v5732_v48  ;;  %5767 = vst [vmem:[#allocation2 + $0x160] sm:$0x7] %v5733_v53 }
 0x45e   :  { %5768 = vst [vmem:[#allocation2 + $0x170] sm:$0x7] %v5734_v25  ;;  %5769 = vst [vmem:[#allocation2 + $0x180] sm:$0x7] %v5735_v1 }
 0x45f   :  { %5770 = vst [vmem:[#allocation2 + $0x190] sm:$0x7] %v5736_v17  ;;  %5771 = vst [vmem:[#allocation2 + $0x1a0] sm:$0x7] %v5737_v34 }
 0x460   :  { %5772 = vst [vmem:[#allocation2 + $0x1b0] sm:$0x7] %v5738_v59  ;;  %5773 = vst [vmem:[#allocation2 + $0x1c0] sm:$0x7] %v5739_v7 }
 0x461   :  { %5774 = vst [vmem:[#allocation2 + $0x1d0] sm:$0x7] %v5740_v10  ;;  %5775 = vst [vmem:[#allocation2 + $0x1e0] sm:$0x7] %v5741_v56 }
 0x462   :  { %5776 = vst [vmem:[#allocation2 + $0x1f0] sm:$0x7] %v5742_v31 }
 0x463 LB: > { %s6066_s7 = sshll.u32 %s6353_s5, 8  ;;  %v16314_v28 = vld [vmem:[#allocation59_spill] sm:$0xff]  ;;  %v16315_v26 = vld [vmem:[#allocation58_spill] sm:$0xff]  ;;  %s6062_s10 = sshll.u32 %s6353_s5, 4  ;;  %s6353_s5 = sphi %s13333_s5, %s5792_s5   ;;  %v6349_v27 = vphi %v13331_v27, %v5877_v27   ;;  %v6345_v49 = vphi %v13329_v49, %v5873_v49  }
 0x464   : > { %v5814_v46 = vmul.f32 %v6349_v27, %v16314_v28  ;;  %v5816_v52 = vmul.f32 %v6345_v49, %v16315_v26  ;;  %s13343_s8 = scalar_lea.vmem [#allocation2], %s6066_s7  ;;  %v5820_v35 = vmul.f32 %v6349_v27, %v16315_v26  ;;  %s13351_s11 = scalar_lea.vmem [#allocation4], %s6062_s10 }
 0x465   : > { %s5792_s5 = sadd.s32 1, %s6353_s5  }
 0x466   : > { %p5789_p1 = scmp.ge.s32.totalorder %s5792_s5, 2  }
 0x467   :  { %s6356_s12 = smov (%p5789_p1), [#allocation4]  }
 0x468   :  { %s6012_s13 = sshll.u32 (%p5789_p1), %s6356_s12, 4  ;;  %s6013_s13 = int_to_ptr.vmem [resolvable:$true] %s6012_s13 }
 0x469   : > { %v5798_v23 = vld [vmem:[%s13343_s8] sm:$0xff]  ;;  %v5799_v60 = vld [vmem:[%s13343_s8 + $0x10] sm:$0xff]  ;;  %s6267_s14 = scalar_lea.vmem (%p5789_p1), %s6013_s13, 512  ;;  %p6272_p3 = scmp.lt.s32.totalorder (%p5789_p1), %s6013_s13, %s6013_s13 }
 0x46a   : > { %v5815_v32 = vsub.f32 %v5798_v23, %v5814_v46  ;;  %v5800_v2 = vld [vmem:[%s13343_s8 + $0x20] sm:$0xff]  ;;  %v5801_v9 = vld [vmem:[%s13343_s8 + $0x30] sm:$0xff]  ;;  %p6268_p2 = scmp.ne.s32.totalorder (%p5789_p1), %s6013_s13, %s6267_s14  ;;  %p6273_p4 = scmp.lt.s32.totalorder (%p5789_p1), %s6267_s14, %s6267_s14 }
 0x46b   : > { %v5802_v45 = vld [vmem:[%s13343_s8 + $0x40] sm:$0xff]  ;;  %v5803_v53 = vld [vmem:[%s13343_s8 + $0x50] sm:$0xff] }
 0x46c   : > { %v5817_v19 = vsub.f32 %v5815_v32, %v5816_v52  ;;  %v5804_v16 = vld [vmem:[%s13343_s8 + $0x60] sm:$0xff]  ;;  %v5805_v31 = vld [vmem:[%s13343_s8 + $0x70] sm:$0xff]  ;;  %p6274_p5 = por (%p5789_p1), %p6273_p4, %p6272_p3 }
 0x46e   : > { %v5894_v63 = vrot.slane %v5817_v19, 1  ;;  %v5942_v12 = vrot.slane %v5817_v19, 2  ;;  %v5818_v62 = vmul.f32 %v5817_v19, %v16314_v28  ;;  %v5824_v47 = vmul.f32 %v5817_v19, %v16315_v26  ;;  %p6275_p6 = pnand (%p5789_p1), %p6274_p5, %p6268_p2 }
 0x470   : > { %v5926_v15 = vadd.f32 %v5894_v63, %v5817_v19  ;;  %v5819_v30 = vsub.f32 %v5799_v60, %v5818_v62  ;;  %v5806_v63 = vld [vmem:[%s13343_s8 + $0x80] sm:$0xff] }
 0x472   : > { %v5974_v61 = vadd.f32 %v5942_v12, %v5926_v15  ;;  %v5821_v24 = vsub.f32 %v5819_v30, %v5820_v35 }
 0x474   : > { %5991 = vst [vmem:[%s13351_s11] sm:$0x1] %v5974_v61  ;;  %v5895_v22 = vrot.slane %v5821_v24, 1  ;;  %v5943_v43 = vrot.slane %v5821_v24, 2  ;;  %v5822_v54 = vmul.f32 %v5821_v24, %v16314_v28  ;;  %v5828_v36 = vmul.f32 %v5821_v24, %v16315_v26 }
 0x476   : > { %v5927_v18 = vadd.f32 %v5895_v22, %v5821_v24  ;;  %v5823_v4 = vsub.f32 %v5800_v2, %v5822_v54  ;;  %v5807_v22 = vld [vmem:[%s13343_s8 + $0x90] sm:$0xff] }
 0x478   : > { %v5975_v14 = vadd.f32 %v5943_v43, %v5927_v18  ;;  %v5825_v29 = vsub.f32 %v5823_v4, %v5824_v47 }
 0x47a   : > { %5992 = vst [vmem:[%s13351_s11 + $0x1] sm:$0x1] %v5975_v14  ;;  %v5896_v51 = vrot.slane %v5825_v29, 1  ;;  %v5944_v57 = vrot.slane %v5825_v29, 2  ;;  %v5826_v3 = vmul.f32 %v5825_v29, %v16314_v28  ;;  %v5832_v41 = vmul.f32 %v5825_v29, %v16315_v26 }
 0x47c   : > { %v5928_v44 = vadd.f32 %v5896_v51, %v5825_v29  ;;  %v5827_v13 = vsub.f32 %v5801_v9, %v5826_v3  ;;  %v5808_v51 = vld [vmem:[%s13343_s8 + $0xa0] sm:$0xff] }
 0x47e   : > { %v5976_v5 = vadd.f32 %v5944_v57, %v5928_v44  ;;  %v5829_v40 = vsub.f32 %v5827_v13, %v5828_v36 }
 0x480   : > { %5993 = vst [vmem:[%s13351_s11 + $0x2] sm:$0x1] %v5976_v5  ;;  %v5897_v55 = vrot.slane %v5829_v40, 1  ;;  %v5945_v42 = vrot.slane %v5829_v40, 2  ;;  %v5830_v39 = vmul.f32 %v5829_v40, %v16314_v28  ;;  %v5836_v1 = vmul.f32 %v5829_v40, %v16315_v26 }
 0x482   : > { %v5929_v21 = vadd.f32 %v5897_v55, %v5829_v40  ;;  %v5831_v50 = vsub.f32 %v5802_v45, %v5830_v39  ;;  %v5809_v55 = vld [vmem:[%s13343_s8 + $0xb0] sm:$0xff] }
 0x484   : > { %v5977_v48 = vadd.f32 %v5945_v42, %v5929_v21  ;;  %v5833_v37 = vsub.f32 %v5831_v50, %v5832_v41 }
 0x486   : > { %5994 = vst [vmem:[%s13351_s11 + $0x3] sm:$0x1] %v5977_v48  ;;  %v5898_v8 = vrot.slane %v5833_v37, 1  ;;  %v5946_v25 = vrot.slane %v5833_v37, 2  ;;  %v5834_v20 = vmul.f32 %v5833_v37, %v16314_v28  ;;  %v5840_v6 = vmul.f32 %v5833_v37, %v16315_v26 }
 0x488   : > { %v5930_v38 = vadd.f32 %v5898_v8, %v5833_v37  ;;  %v5835_v17 = vsub.f32 %v5803_v53, %v5834_v20  ;;  %v5810_v8 = vld [vmem:[%s13343_s8 + $0xc0] sm:$0xff] }
 0x48a   : > { %v5978_v11 = vadd.f32 %v5946_v25, %v5930_v38  ;;  %v5837_v34 = vsub.f32 %v5835_v17, %v5836_v1 }
 0x48c   : > { %5995 = vst [vmem:[%s13351_s11 + $0x4] sm:$0x1] %v5978_v11  ;;  %v5899_v59 = vrot.slane %v5837_v34, 1  ;;  %v5947_v58 = vrot.slane %v5837_v34, 2  ;;  %v5838_v7 = vmul.f32 %v5837_v34, %v16314_v28  ;;  %v5844_v52 = vmul.f32 %v5837_v34, %v16315_v26 }
 0x48e   : > { %v5931_v10 = vadd.f32 %v5899_v59, %v5837_v34  ;;  %v5839_v33 = vsub.f32 %v5804_v16, %v5838_v7  ;;  %v5811_v59 = vld [vmem:[%s13343_s8 + $0xd0] sm:$0xff] }
 0x490   : > { %v5979_v56 = vadd.f32 %v5947_v58, %v5931_v10  ;;  %v5841_v0 = vsub.f32 %v5839_v33, %v5840_v6 }
 0x492   : > { %5996 = vst [vmem:[%s13351_s11 + $0x5] sm:$0x1] %v5979_v56  ;;  %v5900_v49 = vrot.slane %v5841_v0, 1  ;;  %v5948_v27 = vrot.slane %v5841_v0, 2  ;;  %v5842_v46 = vmul.f32 %v5841_v0, %v16314_v28  ;;  %v5848_v15 = vmul.f32 %v5841_v0, %v16315_v26 }
 0x494   : > { %v5932_v23 = vadd.f32 %v5900_v49, %v5841_v0  ;;  %v5843_v32 = vsub.f32 %v5805_v31, %v5842_v46  ;;  %v5812_v49 = vld [vmem:[%s13343_s8 + $0xe0] sm:$0xff] }
 0x496   : > { %v5980_v19 = vadd.f32 %v5948_v27, %v5932_v23  ;;  %v5845_v60 = vsub.f32 %v5843_v32, %v5844_v52 }
 0x498   : > { %5997 = vst [vmem:[%s13351_s11 + $0x6] sm:$0x1] %v5980_v19  ;;  %v5901_v12 = vrot.slane %v5845_v60, 1  ;;  %v5949_v62 = vrot.slane %v5845_v60, 2  ;;  %v5846_v35 = vmul.f32 %v5845_v60, %v16314_v28  ;;  %v5852_v18 = vmul.f32 %v5845_v60, %v16315_v26 }
 0x49a   : > { %v5933_v30 = vadd.f32 %v5901_v12, %v5845_v60  ;;  %v5847_v61 = vsub.f32 %v5806_v63, %v5846_v35  ;;  %v5813_v63 = vld [vmem:[%s13343_s8 + $0xf0] sm:$0xff] }
 0x49c   : > { %v5981_v24 = vadd.f32 %v5949_v62, %v5933_v30  ;;  %v5849_v2 = vsub.f32 %v5847_v61, %v5848_v15 }
 0x49e   : > { %5998 = vst [vmem:[%s13351_s11 + $0x7] sm:$0x1] %v5981_v24  ;;  %v5902_v43 = vrot.slane %v5849_v2, 1  ;;  %v5950_v54 = vrot.slane %v5849_v2, 2  ;;  %v5850_v47 = vmul.f32 %v5849_v2, %v16314_v28  ;;  %v5856_v44 = vmul.f32 %v5849_v2, %v16315_v26 }
 0x4a0   : > { %v5934_v4 = vadd.f32 %v5902_v43, %v5849_v2  ;;  %v5851_v14 = vsub.f32 %v5807_v22, %v5850_v47 }
 0x4a2   : > { %v5982_v29 = vadd.f32 %v5950_v54, %v5934_v4  ;;  %v5853_v9 = vsub.f32 %v5851_v14, %v5852_v18 }
 0x4a4   : > { %5999 = vst [vmem:[%s13351_s11 + $0x8] sm:$0x1] %v5982_v29  ;;  %v5903_v57 = vrot.slane %v5853_v9, 1  ;;  %v5951_v3 = vrot.slane %v5853_v9, 2  ;;  %v5854_v36 = vmul.f32 %v5853_v9, %v16314_v28  ;;  %v5860_v21 = vmul.f32 %v5853_v9, %v16315_v26 }
 0x4a6   : > { %v5935_v13 = vadd.f32 %v5903_v57, %v5853_v9  ;;  %v5855_v5 = vsub.f32 %v5808_v51, %v5854_v36 }
 0x4a8   : > { %v5983_v40 = vadd.f32 %v5951_v3, %v5935_v13  ;;  %v5857_v45 = vsub.f32 %v5855_v5, %v5856_v44 }
 0x4aa   : > { %6000 = vst [vmem:[%s13351_s11 + $0x9] sm:$0x1] %v5983_v40  ;;  %v5904_v42 = vrot.slane %v5857_v45, 1  ;;  %v5952_v39 = vrot.slane %v5857_v45, 2  ;;  %v5858_v41 = vmul.f32 %v5857_v45, %v16314_v28  ;;  %v5864_v38 = vmul.f32 %v5857_v45, %v16315_v26 }
 0x4ac   : > { %v5936_v50 = vadd.f32 %v5904_v42, %v5857_v45  ;;  %v5859_v48 = vsub.f32 %v5809_v55, %v5858_v41 }
 0x4ae   : > { %v5984_v37 = vadd.f32 %v5952_v39, %v5936_v50  ;;  %v5861_v53 = vsub.f32 %v5859_v48, %v5860_v21 }
 0x4b0   : > { %6001 = vst [vmem:[%s13351_s11 + $0xa] sm:$0x1] %v5984_v37  ;;  %v5905_v25 = vrot.slane %v5861_v53, 1  ;;  %v5953_v20 = vrot.slane %v5861_v53, 2  ;;  %v5862_v1 = vmul.f32 %v5861_v53, %v16314_v28  ;;  %v5868_v10 = vmul.f32 %v5861_v53, %v16315_v26 }
 0x4b2   : > { %v5937_v17 = vadd.f32 %v5905_v25, %v5861_v53  ;;  %v5863_v11 = vsub.f32 %v5810_v8, %v5862_v1 }
 0x4b4   : > { %v5985_v34 = vadd.f32 %v5953_v20, %v5937_v17  ;;  %v5865_v16 = vsub.f32 %v5863_v11, %v5864_v38 }
 0x4b6   : > { %6002 = vst [vmem:[%s13351_s11 + $0xb] sm:$0x1] %v5985_v34  ;;  %v5906_v58 = vrot.slane %v5865_v16, 1  ;;  %v5954_v7 = vrot.slane %v5865_v16, 2  ;;  %v5866_v6 = vmul.f32 %v5865_v16, %v16314_v28  ;;  %v5872_v23 = vmul.f32 %v5865_v16, %v16315_v26 }
 0x4b8   : > { %v5938_v33 = vadd.f32 %v5906_v58, %v5865_v16  ;;  %v5867_v56 = vsub.f32 %v5811_v59, %v5866_v6 }
 0x4ba   : > { %v5986_v0 = vadd.f32 %v5954_v7, %v5938_v33  ;;  %v5869_v31 = vsub.f32 %v5867_v56, %v5868_v10 }
 0x4bc   : > { %6003 = vst [vmem:[%s13351_s11 + $0xc] sm:$0x1] %v5986_v0  ;;  %v5907_v27 = vrot.slane %v5869_v31, 1  ;;  %v5955_v46 = vrot.slane %v5869_v31, 2  ;;  %v5870_v52 = vmul.f32 %v5869_v31, %v16314_v28  ;;  %v5876_v15 = vmul.f32 %v5869_v31, %v16315_v26 }
 0x4be   : > { %v5939_v32 = vadd.f32 %v5907_v27, %v5869_v31  ;;  %v5871_v19 = vsub.f32 %v5812_v49, %v5870_v52 }
 0x4c0   : > { %v5987_v60 = vadd.f32 %v5955_v46, %v5939_v32  ;;  %v5873_v49 = vsub.f32 %v5871_v19, %v5872_v23  }
 0x4c2   : > { %6004 = vst [vmem:[%s13351_s11 + $0xd] sm:$0x1] %v5987_v60  ;;  %v5908_v12 = vrot.slane %v5873_v49, 1  ;;  %v5956_v62 = vrot.slane %v5873_v49, 2  ;;  %v5874_v35 = vmul.f32 %v5873_v49, %v16314_v28 }
 0x4c4   : > { %v5940_v30 = vadd.f32 %v5908_v12, %v5873_v49  ;;  %v5875_v61 = vsub.f32 %v5813_v63, %v5874_v35 }
 0x4c6   : > { %v5988_v24 = vadd.f32 %v5956_v62, %v5940_v30  ;;  %v5877_v27 = vsub.f32 %v5875_v61, %v5876_v15  }
 0x4c8   : > { %6005 = vst [vmem:[%s13351_s11 + $0xe] sm:$0x1] %v5988_v24  ;;  %v5909_v2 = vrot.slane %v5877_v27, 1  ;;  %v5957_v22 = vrot.slane %v5877_v27, 2  ;;  %5791 = sbr.rel (!%p5789_p1) target bundleno = 1123 (0x463), region = 85 }
 0x4ca   : > { %v5941_v43 = vadd.f32 %v5909_v2, %v5877_v27 }
 0x4cc   : > { %v5989_v54 = vadd.f32 %v5957_v22, %v5941_v43 }
 0x4ce   : > { %6006 = vst [vmem:[%s13351_s11 + $0xf] sm:$0x1] %v5989_v54 }
 0x4cf   :  { %6278 = shalt.err (!%p6275_p6)
}
 0x4d0   :  { %s6279_s16 = scalar_lea.hbm %s13438_s9, 512 }
 0x4d1   :  { %p6280_p7 = scmp.ne.s32.totalorder %s13438_s9, %s6279_s16  ;;  %p6283_p8 = scmp.lt.u32.totalorder %s6279_s16, %s13438_s9 }
 0x4d3   :  { %p6285_p9 = pnand %p6283_p8, %p6280_p7 }
 0x4d5   :  { %6288 = shalt.err (!%p6285_p9)
}
 0x4d6   :  { %s6357_s4 = smov 16   ;;  %s6358_s21 = smov 1  }
 0x4d7   :  { %6018 = dma.vmem_to_hbm [thread:$0]  %s6013_s13, 512, %s13438_s9, [#allocation5], %s6357_s4, %s6357_s4, %s6358_s21  }
 0x4d8   :  { %6321 = dma.done.wait [#allocation5], 512  }
 0x4d9   :  { %6322 = vsyncadd [#allocation5], 4294966784 }
 0x4da   :  { %6022 = vsyncpa [#allocation5], 1 }

</bundles_post_ra>
